<compile_context>
chip_gen: v6e
topology: v6e:2x2x1
jax: 0.10.0
libtpu: 0.0.40
codegen_flags: <defaults>
</compile_context>

<pallas_src>
import functools

import jax
import jax.numpy as jnp
from jax import lax
from jax.experimental import pallas as pl
from jax.experimental.pallas import tpu as pltpu

RELU_SLOPE = 0.2
LANE = 128


def _round_up(v, m):
    return (v + m - 1) // m * m


def _pad_axis(a, axis, size):
    if a.shape[axis] == size:
        return a
    widths = [(0, 0)] * a.ndim
    widths[axis] = (0, size - a.shape[axis])
    return jnp.pad(a, widths)


# ----------------------------------------------------------------------------
# Fused kernel: one (batch, row-tile) block per grid step.
# ----------------------------------------------------------------------------
def _fused_up_block_kernel(x_cur_ref, x_prev_ref, x_nxt_ref,
                           br_cur_ref, br_prev_ref, br_nxt_ref,
                           wup_ref, bup_ref, w1_ref, b1_ref,
                           w2_ref, b2_ref, wi_ref, bi_ref, o_ref, *, Ho):
    f32 = jnp.float32
    bf16 = jnp.bfloat16
    _, Rx, W, Cin = x_cur_ref.shape
    _, R, Wo, Cbr = br_cur_ref.shape
    Cp = o_ref.shape[-1]                     # lane-padded channel width
    C2 = 2 * Cp                              # concat width (up | bridge)
    Wp = Wo + 2                              # 1-px zero column border
    Rc = R + 4                               # cat rows incl. 2-row halo each side
    R1 = R + 2                               # conv_1 output rows (1-row halo)
    nx = (Rx + 2) * W                        # x pixels incl. 1-row halo
    n1 = R1 * Wp
    n2 = R * Wp

    t = pl.program_id(1)
    r0 = t * R                               # first output row of this tile

    def leaky(z):
        return jnp.where(z >= 0, z, RELU_SLOPE * z)

    # ---- up = ConvTranspose2d(k=2,s=2): one matmul over x rows incl. halo.
    x_ext = jnp.concatenate([x_prev_ref[0], x_cur_ref[0], x_nxt_ref[0]], axis=0)
    x2d = x_ext.reshape(nx, Cin)                                  # bf16
    up4 = jnp.dot(x2d, wup_ref[...], preferred_element_type=f32) + bup_ref[...]
    up4 = up4.astype(bf16)                   # (nx, 4*Cp), columns = (a, b, oc)

    def riffle_b(block):                     # (nx, 2*Cp) -> (Rx+2, Wo, Cp)
        even = block[:, :Cp].reshape(nx, 1, Cp)
        odd = block[:, Cp:].reshape(nx, 1, Cp)
        return jnp.concatenate([even, odd], axis=1).reshape(Rx + 2, Wo, Cp)

    rows_a = riffle_b(up4[:, :C2])           # output rows 2i
    rows_b = riffle_b(up4[:, C2:])           # output rows 2i+1
    up_ext = jnp.concatenate(
        [rows_a.reshape(Rx + 2, 1, Wo, Cp), rows_b.reshape(Rx + 2, 1, Wo, Cp)],
        axis=1).reshape(Rc, Wo, Cp)          # rows r0-2 .. r0+R+1

    # ---- channel concat [up | bridge], bf16, never hits HBM.
    br_ext = jnp.concatenate([br_prev_ref[0], br_cur_ref[0], br_nxt_ref[0]],
                             axis=0)                               # (Rc, Wo, Cbr)
    if Cbr < Cp:
        br_ext = jnp.concatenate(
            [br_ext, jnp.zeros((Rc, Wo, Cp - Cbr), bf16)], axis=-1)
    cat = jnp.concatenate([up_ext, br_ext], axis=-1)               # (Rc, Wo, 2Cp)

    # zero halo rows that fall outside the image (top/bottom tiles): this is the
    # 3x3 conv's implicit zero padding AND neutralizes the clamped halo blocks
    # plus the transposed-conv bias on those rows.  Load-bearing.
    g = lax.broadcasted_iota(jnp.int32, (Rc, 1, 1), 0) + (r0 - 2)
    cat = jnp.where((g >= 0) & (g < Ho), cat, jnp.zeros((), bf16))

    # 1-px zero column border + flatten; one extra guard row at each end covers
    # the +-1 column taps of the first/last pixel.
    zc = jnp.zeros((Rc, 1, C2), bf16)
    cat_flat = jnp.concatenate([zc, cat, zc], axis=1).reshape(Rc * Wp, C2)
    zrow = jnp.zeros((1, C2), bf16)
    ext1 = jnp.concatenate([zrow, cat_flat, zrow], axis=0)

    # ---- conv_1 (3x3 on the concat): 9 tap-accumulated matmuls, K = 2*Cp.
    acc1 = jnp.zeros((n1, Cp), f32) + b1_ref[...]
    for tap in range(9):
        dr, dc = tap // 3 - 1, tap % 3 - 1
        start = 1 + (1 + dr) * Wp + dc                 # static slice start
        acc1 = acc1 + jnp.dot(ext1[start:start + n1, :], w1_ref[tap],
                              preferred_element_type=f32)
    out1 = leaky(acc1).reshape(R1, Wp, Cp)

    # re-zero the border of out1: columns 0 / Wp-1 and rows outside the image.
    # This provides conv_2's implicit zero padding (load-bearing).
    col = lax.broadcasted_iota(jnp.int32, (1, Wp, 1), 1)
    g1 = lax.broadcasted_iota(jnp.int32, (R1, 1, 1), 0) + (r0 - 1)
    keep1 = (col >= 1) & (col <= Wo) & (g1 >= 0) & (g1 < Ho)
    out1 = jnp.where(keep1, out1, 0.0).astype(bf16)

    ext2 = jnp.concatenate([jnp.zeros((1, Cp), bf16),
                            out1.reshape(n1, Cp),
                            jnp.zeros((1, Cp), bf16)], axis=0)

    # ---- conv_2 (3x3): 9 tap-accumulated matmuls, K = Cp.
    acc2 = jnp.zeros((n2, Cp), f32) + b2_ref[...]
    for tap in range(9):
        dr, dc = tap // 3 - 1, tap % 3 - 1
        start = 1 + (1 + dr) * Wp + dc
        acc2 = acc2 + jnp.dot(ext2[start:start + n2, :], w2_ref[tap],
                              preferred_element_type=f32)
    out2 = leaky(acc2)

    # ---- identity 1x1 conv on the concat + residual add.
    ident = jnp.dot(cat_flat[2 * Wp:2 * Wp + n2, :], wi_ref[...],
                    preferred_element_type=f32) + bi_ref[...]

    res = (out2 + ident).reshape(R, Wp, Cp)
    o_ref[0] = res[:, 1:1 + Wo, :].astype(o_ref.dtype)


# ----------------------------------------------------------------------------
# Host-side weight packing (lane-padded, tap-major, bf16).
# ----------------------------------------------------------------------------
def _pack_params(params):
    up_w = params["up_w"]                      # (Cin, Cout, 2, 2)  PyTorch layout
    Cin, Cout = up_w.shape[0], up_w.shape[1]
    Cp = _round_up(Cout, LANE)
    bf16 = jnp.bfloat16

    # tconv weight -> (Cin, 4*Cp); column = (a*2 + b)*Cp + oc
    w_up = jnp.transpose(up_w, (0, 2, 3, 1))                 # (Cin, a, b, Cout)
    w_up = _pad_axis(w_up, 3, Cp).reshape(Cin, 4 * Cp).astype(bf16)
    b_up = jnp.tile(_pad_axis(params["up_b"], 0, Cp), 4)
    b_up = b_up.reshape(1, 4 * Cp).astype(jnp.float32)

    def pack3x3(w_pt, chunks):
        # (Cout, Cin_total, 3, 3) -> (9, len(chunks)*Cp, Cp): one (K, Cp) tap each,
        # with every input chunk lane-padded to Cp (tap = 3*kh + kw).
        w = jnp.transpose(w_pt, (2, 3, 1, 0))                # (kh, kw, ic, oc)
        w = _pad_axis(w, 3, Cp)
        parts = [_pad_axis(w[:, :, s:s + n, :], 2, Cp) for s, n in chunks]
        w = jnp.concatenate(parts, axis=2) if len(parts) > 1 else parts[0]
        return w.reshape(9, len(chunks) * Cp, Cp).astype(bf16)

    # conv_1 / identity see the concat as [up (Cp) | bridge (Cp)]
    w1 = pack3x3(params["w1"], [(0, Cout), (Cout, Cout)])
    w2 = pack3x3(params["w2"], [(0, Cout)])

    wi_t = _pad_axis(jnp.transpose(params["wi"][:, :, 0, 0], (1, 0)), 1, Cp)
    wi = jnp.concatenate([_pad_axis(wi_t[:Cout], 0, Cp),
                          _pad_axis(wi_t[Cout:], 0, Cp)], axis=0).astype(bf16)

    b1 = _pad_axis(params["b1"], 0, Cp).reshape(1, Cp).astype(jnp.float32)
    b2 = _pad_axis(params["b2"], 0, Cp).reshape(1, Cp).astype(jnp.float32)
    bi = _pad_axis(params["bi"], 0, Cp).reshape(1, Cp).astype(jnp.float32)
    return (w_up, b_up, w1, b1, w2, b2, wi, bi), Cout, Cp


# ----------------------------------------------------------------------------
# VMEM budget + row-tile selection (device-aware: v7x 64 MiB vs v5e/v6e 128 MiB).
# ----------------------------------------------------------------------------
def _vmem_budget_bytes():
    cap = None
    try:
        info = pltpu.get_tpu_info()
        cap = getattr(info, "vmem_capacity_bytes", None)
    except Exception:
        cap = None
    if not cap:
        cap = 64 * 1024 * 1024          # conservative (v7x-sized) fallback
    return min(int(cap) * 3 // 4, 100 * 1024 * 1024)


def _pick_row_tile(Ho, Wo, H, W, Cin, Cbr, Cp, budget_bytes, requested=None):
    candidates = [r for r in range(2, Ho + 1, 2) if Ho % r == 0]
    if not candidates:
        raise ValueError("output height must be even (it is 2*H)")
    if requested is not None:
        if requested not in candidates:
            raise ValueError(f"row_tile must be an even divisor of {Ho}, got {requested}")
        return requested
    Wp = Wo + 2

    def est(R):
        Rx = R // 2
        b = 0
        b += 2 * (Rx + 2) * W * Cin * 2            # x blocks (double-buffered), bf16
        b += 2 * (R + 4) * Wo * Cbr * 2            # bridge blocks, bf16
        b += 2 * R * Wo * Cp * 4                   # output block, f32
        b += (27 * Cp * Cp + Cin * 4 * Cp + 2 * Cp * Cp + 8 * Cp) * 2   # weights
        b += (Rx + 2) * W * 4 * Cp * 4             # up4 (f32)
        b += (R + 4) * Wo * Cp * 2                 # up_ext (bf16)
        b += 2 * (R + 4) * Wp * 2 * Cp * 2         # cat_flat + ext1 (bf16)
        b += (R + 2) * Wp * Cp * 4                 # conv_1 accumulator (f32)
        b += 2 * (R + 2) * Wp * Cp * 2             # out1 + ext2 (bf16)
        b += (R + 2) * Wp * 2 * Cp * 2             # shifted-tap LHS temp (bf16)
        b += 2 * R * Wp * Cp * 4                   # conv_2 acc + identity (f32)
        return int(b * 1.25)                       # relayout / pipeline slack

    best = candidates[0]
    for r in candidates:
        if est(r) <= budget_bytes:
            best = r
    return best


# ----------------------------------------------------------------------------
# Module wrappers.
# ----------------------------------------------------------------------------
def init_params(key, in_size, out_size):
    ks = jax.random.split(key, 8)
    s = 0.1
    return {
        # up: ConvTranspose2d(in_size, out_size, k=2, s=2, bias=True)
        "up_w": s * jax.random.normal(ks[0], (in_size, out_size, 2, 2), jnp.float32),
        "up_b": s * jax.random.normal(ks[1], (out_size,), jnp.float32),
        # conv_block: UNetConvBlock(2*out_size, out_size, downsample=False)
        "w1": s * jax.random.normal(ks[2], (out_size, 2 * out_size, 3, 3), jnp.float32),
        "b1": s * jax.random.normal(ks[3], (out_size,), jnp.float32),
        "w2": s * jax.random.normal(ks[4], (out_size, out_size, 3, 3), jnp.float32),
        "b2": s * jax.random.normal(ks[5], (out_size,), jnp.float32),
        "wi": s * jax.random.normal(ks[6], (out_size, 2 * out_size, 1, 1), jnp.float32),
        "bi": s * jax.random.normal(ks[7], (out_size,), jnp.float32),
    }


def unet_up_block_forward_nhwc(params, x_nhwc, bridge_nhwc, *, row_tile=None,
                               out_dtype=jnp.float32):
    """Native NHWC entry point.  Returns (N, 2H, 2W, Cp) with Cp = round_up(Cout,
    128); channels >= Cout are zero padding (keep the surrounding model in this
    padded-NHWC layout to avoid per-block transposes/slices)."""
    N, H, W, Cin = x_nhwc.shape
    Nb, Ho, Wo, Cbr = bridge_nhwc.shape
    (w_up, b_up, w1, b1, w2, b2, wi, bi), Cout, Cp = _pack_params(params)
    assert Nb == N and Ho == 2 * H and Wo == 2 * W and Cbr == Cout

    budget = _vmem_budget_bytes()
    R = _pick_row_tile(Ho, Wo, H, W, Cin, Cbr, Cp, budget, requested=row_tile)
    Rx, T = R // 2, Ho // R
    nbx = H - 1            # last 1-row block index of x
    nbb = Ho // 2 - 1      # last 2-row block index of bridge

    x = x_nhwc.astype(jnp.bfloat16)
    bridge = bridge_nhwc.astype(jnp.bfloat16)
    kernel = functools.partial(_fused_up_block_kernel, Ho=Ho)

    out = pl.pallas_call(
        kernel,
        out_shape=jax.ShapeDtypeStruct((N, Ho, Wo, Cp), out_dtype),
        grid=(N, T),
        in_specs=[
            # x: current rows + 1-row halo above / below (clamped at the edge,
            # re-zeroed inside the kernel when outside the image)
            pl.BlockSpec((1, Rx, W, Cin), lambda n, t: (n, t, 0, 0)),
            pl.BlockSpec((1, 1, W, Cin),
                         lambda n, t: (n, jnp.maximum(t * Rx - 1, 0), 0, 0)),
            pl.BlockSpec((1, 1, W, Cin),
                         lambda n, t: (n, jnp.minimum((t + 1) * Rx, nbx), 0, 0)),
            # bridge: current rows + 2-row halo above / below
            pl.BlockSpec((1, R, Wo, Cbr), lambda n, t: (n, t, 0, 0)),
            pl.BlockSpec((1, 2, Wo, Cbr),
                         lambda n, t: (n, jnp.maximum(t * Rx - 1, 0), 0, 0)),
            pl.BlockSpec((1, 2, Wo, Cbr),
                         lambda n, t: (n, jnp.minimum((t + 1) * Rx, nbb), 0, 0)),
            # weights / biases: constant block index -> fetched once, resident
            pl.BlockSpec((Cin, 4 * Cp), lambda n, t: (0, 0)),
            pl.BlockSpec((1, 4 * Cp), lambda n, t: (0, 0)),
            pl.BlockSpec((9, 2 * Cp, Cp), lambda n, t: (0, 0, 0)),
            pl.BlockSpec((1, Cp), lambda n, t: (0, 0)),
            pl.BlockSpec((9, Cp, Cp), lambda n, t: (0, 0, 0)),
            pl.BlockSpec((1, Cp), lambda n, t: (0, 0)),
            pl.BlockSpec((2 * Cp, Cp), lambda n, t: (0, 0)),
            pl.BlockSpec((1, Cp), lambda n, t: (0, 0)),
        ],
        out_specs=pl.BlockSpec((1, R, Wo, Cp), lambda n, t: (n, t, 0, 0)),
        compiler_params=pltpu.CompilerParams(
            dimension_semantics=("parallel", "parallel"),   # megacore on v7x
            vmem_limit_bytes=budget,
        ),
    )(x, x, x, bridge, bridge, bridge, w_up, b_up, w1, b1, w2, b2, wi, bi)
    return out


def unet_up_block_forward(params, x_nchw, bridge_nchw, tran_x=None, mode="normal",
                          row_tile=None):
    # TODO(synk): conditional modulation (TConv/tran_x) not available -> plain convs.
    del tran_x, mode
    x = jnp.transpose(x_nchw, (0, 2, 3, 1))
    bridge = jnp.transpose(bridge_nchw, (0, 2, 3, 1))
    out_p = unet_up_block_forward_nhwc(params, x, bridge, row_tile=row_tile)
    Cout = params["up_b"].shape[0]
    # drop channel padding; return NCHW to match the PyTorch convention
    return jnp.transpose(out_p[..., :Cout], (0, 3, 1, 2))


# ----------------------------------------------------------------------------
# Pure-JAX reference (lax convs) for correctness checking.
# ----------------------------------------------------------------------------
def _ref_forward(params, x_nchw, bridge_nchw):
    dn = ("NHWC", "HWIO", "NHWC")
    x = jnp.transpose(x_nchw, (0, 2, 3, 1))
    bridge = jnp.transpose(bridge_nchw, (0, 2, 3, 1))

    # transposed conv (k=2,s=2,p=0) == conv over 2x-dilated input, pad 1, flipped kernel
    w_up = jnp.transpose(params["up_w"], (2, 3, 0, 1))[::-1, ::-1]  # HWIO, flipped
    up = lax.conv_general_dilated(x, w_up, window_strides=(1, 1),
                                  padding=[(1, 1), (1, 1)], lhs_dilation=(2, 2),
                                  dimension_numbers=dn) + params["up_b"]
    cat = jnp.concatenate([up, bridge], axis=-1)

    def conv3(z, w, b):
        return lax.conv_general_dilated(z, jnp.transpose(w, (2, 3, 1, 0)),
                                        (1, 1), [(1, 1), (1, 1)],
                                        dimension_numbers=dn) + b

    def leaky(z):
        return jnp.where(z >= 0, z, RELU_SLOPE * z)

    o = leaky(conv3(cat, params["w1"], params["b1"]))
    o = leaky(conv3(o, params["w2"], params["b2"]))
    ident = lax.conv_general_dilated(cat, jnp.transpose(params["wi"], (2, 3, 1, 0)),
                                     (1, 1), [(0, 0), (0, 0)],
                                     dimension_numbers=dn) + params["bi"]
    o = o + ident
    return jnp.transpose(o, (0, 3, 1, 2))


if __name__ == "__main__":
    key = jax.random.PRNGKey(0)
    k_p, k_x, k_b, k_t = jax.random.split(key, 4)

    N, in_size, out_size, H, W = 2, 8, 4, 8, 8
    x = jax.random.normal(k_x, (N, in_size, H, W), jnp.float32)            # NCHW
    bridge = jax.random.normal(k_b, (N, out_size, 2 * H, 2 * W), jnp.float32)
    tran_x = jax.random.normal(k_t, (N, 128), jnp.float32)                 # dim_in=128

    params = init_params(k_p, in_size, out_size)

    fwd = jax.jit(unet_up_block_forward, static_argnames=("mode", "row_tile"))
    ref = jax.block_until_ready(_ref_forward(params, x, bridge))

    # (1) spatially tiled path: grid = (N, Ho // 4) -> exercises interior halos.
    out_tiled = jax.block_until_ready(
        fwd(params, x, bridge, tran_x, mode="normal", row_tile=4))
    # (2) auto-sized row tile (whole image fits one tile at this size).
    out_auto = jax.block_until_ready(
        fwd(params, x, bridge, tran_x, mode="normal"))

    assert out_tiled.shape == (N, out_size, 2 * H, 2 * W), out_tiled.shape
    assert out_auto.shape == (N, out_size, 2 * H, 2 * W), out_auto.shape
    err_t = float(jnp.max(jnp.abs(out_tiled - ref)))
    err_a = float(jnp.max(jnp.abs(out_auto - ref)))
    # bf16 MXU operands / bf16-resident intermediates vs f32 reference
    assert err_t < 5e-2, err_t
    assert err_a < 5e-2, err_a

    print("KERNEL_OK")
</pallas_src>

<mosaic_0001>
module attributes {stable_mosaic.version = 11 : i64} {
  func.func @_fused_up_block_kernel(%arg0: i32, %arg1: i32, %arg2: memref<1x2x8x8xbf16, #tpu.memory_space<vmem>>, %arg3: memref<1x1x8x8xbf16, #tpu.memory_space<vmem>>, %arg4: memref<1x1x8x8xbf16, #tpu.memory_space<vmem>>, %arg5: memref<1x4x16x4xbf16, #tpu.memory_space<vmem>>, %arg6: memref<1x2x16x4xbf16, #tpu.memory_space<vmem>>, %arg7: memref<1x2x16x4xbf16, #tpu.memory_space<vmem>>, %arg8: memref<8x512xbf16, #tpu.memory_space<vmem>>, %arg9: memref<1x512xf32, #tpu.memory_space<vmem>>, %arg10: memref<9x256x128xbf16, #tpu.memory_space<vmem>>, %arg11: memref<1x128xf32, #tpu.memory_space<vmem>>, %arg12: memref<9x128x128xbf16, #tpu.memory_space<vmem>>, %arg13: memref<1x128xf32, #tpu.memory_space<vmem>>, %arg14: memref<256x128xbf16, #tpu.memory_space<vmem>>, %arg15: memref<1x128xf32, #tpu.memory_space<vmem>>, %arg16: memref<1x4x16x128xf32, #tpu.memory_space<vmem>>) attributes {dimension_semantics = [#tpu.dimension_semantics<parallel>, #tpu.dimension_semantics<parallel>], iteration_bounds = array<i64: 2, 4>, scalar_prefetch = 0 : i64, scratch_operands = 0 : i64, tpu.core_type = #tpu.core_type<tc>, window_params = [{transform_indices = @transform_0, window_bounds = array<i64: 1, 2, 8, 8>}, {transform_indices = @transform_1, window_bounds = array<i64: 1, 1, 8, 8>}, {transform_indices = @transform_2, window_bounds = array<i64: 1, 1, 8, 8>}, {transform_indices = @transform_3, window_bounds = array<i64: 1, 4, 16, 4>}, {transform_indices = @transform_4, window_bounds = array<i64: 1, 2, 16, 4>}, {transform_indices = @transform_5, window_bounds = array<i64: 1, 2, 16, 4>}, {pipeline_mode = #tpu.pipeline_mode<synchronous>, transform_indices = @transform_6, window_bounds = array<i64: 8, 512>}, {pipeline_mode = #tpu.pipeline_mode<synchronous>, transform_indices = @transform_7, window_bounds = array<i64: 1, 512>}, {pipeline_mode = #tpu.pipeline_mode<synchronous>, transform_indices = @transform_8, window_bounds = array<i64: 9, 256, 128>}, {pipeline_mode = #tpu.pipeline_mode<synchronous>, transform_indices = @transform_9, window_bounds = array<i64: 1, 128>}, {pipeline_mode = #tpu.pipeline_mode<synchronous>, transform_indices = @transform_10, window_bounds = array<i64: 9, 128, 128>}, {pipeline_mode = #tpu.pipeline_mode<synchronous>, transform_indices = @transform_11, window_bounds = array<i64: 1, 128>}, {pipeline_mode = #tpu.pipeline_mode<synchronous>, transform_indices = @transform_12, window_bounds = array<i64: 256, 128>}, {pipeline_mode = #tpu.pipeline_mode<synchronous>, transform_indices = @transform_13, window_bounds = array<i64: 1, 128>}, {transform_indices = @transform_14, window_bounds = array<i64: 1, 4, 16, 128>}]} {
    %c4_i32 = arith.constant 4 : i32
    %0 = arith.muli %arg1, %c4_i32 : i32
    %c0 = arith.constant 0 : index
    %c0_0 = arith.constant 0 : index
    %c0_1 = arith.constant 0 : index
    %c0_2 = arith.constant 0 : index
    %1 = vector.load %arg3[%c0, %c0_0, %c0_1, %c0_2] : memref<1x1x8x8xbf16, #tpu.memory_space<vmem>>, vector<1x1x8x8xbf16>
    %2 = vector.shape_cast %1 : vector<1x1x8x8xbf16> to vector<1x8x8xbf16>
    %c0_3 = arith.constant 0 : index
    %c0_4 = arith.constant 0 : index
    %c0_5 = arith.constant 0 : index
    %c0_6 = arith.constant 0 : index
    %3 = vector.load %arg2[%c0_3, %c0_4, %c0_5, %c0_6] : memref<1x2x8x8xbf16, #tpu.memory_space<vmem>>, vector<1x2x8x8xbf16>
    %4 = vector.shape_cast %3 : vector<1x2x8x8xbf16> to vector<2x8x8xbf16>
    %c0_7 = arith.constant 0 : index
    %c0_8 = arith.constant 0 : index
    %c0_9 = arith.constant 0 : index
    %c0_10 = arith.constant 0 : index
    %5 = vector.load %arg4[%c0_7, %c0_8, %c0_9, %c0_10] : memref<1x1x8x8xbf16, #tpu.memory_space<vmem>>, vector<1x1x8x8xbf16>
    %6 = vector.shape_cast %5 : vector<1x1x8x8xbf16> to vector<1x8x8xbf16>
    %7 = tpu.concatenate %2, %4, %6 in 0 : vector<1x8x8xbf16>, vector<2x8x8xbf16>, vector<1x8x8xbf16> -> vector<4x8x8xbf16>
    %8 = vector.shape_cast %7 : vector<4x8x8xbf16> to vector<32x8xbf16>
    %c0_11 = arith.constant 0 : index
    %c0_12 = arith.constant 0 : index
    %9 = vector.load %arg8[%c0_11, %c0_12] : memref<8x512xbf16, #tpu.memory_space<vmem>>, vector<8x512xbf16>
    %cst = arith.constant dense<0.000000e+00> : vector<32x512xf32>
    %10 = tpu.matmul %8, %9, %cst {dimension_numbers = #tpu.dot_dimension_numbers<[1], [0], [0], [1], [0, 0, 1, 1], [], []>} : vector<32x8xbf16>, vector<8x512xbf16>, vector<32x512xf32> -> vector<32x512xf32>
    %c0_13 = arith.constant 0 : index
    %c0_14 = arith.constant 0 : index
    %11 = vector.load %arg9[%c0_13, %c0_14] : memref<1x512xf32, #tpu.memory_space<vmem>>, vector<1x512xf32>
    %12 = vector.broadcast %11 : vector<1x512xf32> to vector<32x512xf32>
    %13 = arith.addf %10, %12 : vector<32x512xf32>
    %14 = arith.truncf %13 : vector<32x512xf32> to vector<32x512xbf16>
    %15 = vector.extract_strided_slice %14 {offsets = [0, 0], sizes = [32, 256], strides = [1, 1]} : vector<32x512xbf16> to vector<32x256xbf16>
    %16 = vector.extract_strided_slice %15 {offsets = [0, 0], sizes = [32, 128], strides = [1, 1]} : vector<32x256xbf16> to vector<32x128xbf16>
    %17 = vector.shape_cast %16 : vector<32x128xbf16> to vector<32x1x128xbf16>
    %18 = vector.extract_strided_slice %15 {offsets = [0, 128], sizes = [32, 128], strides = [1, 1]} : vector<32x256xbf16> to vector<32x128xbf16>
    %19 = vector.shape_cast %18 : vector<32x128xbf16> to vector<32x1x128xbf16>
    %20 = tpu.concatenate %17, %19 in 1 : vector<32x1x128xbf16>, vector<32x1x128xbf16> -> vector<32x2x128xbf16>
    %21 = vector.shape_cast %20 : vector<32x2x128xbf16> to vector<4x16x128xbf16>
    %22 = vector.extract_strided_slice %14 {offsets = [0, 256], sizes = [32, 256], strides = [1, 1]} : vector<32x512xbf16> to vector<32x256xbf16>
    %23 = vector.extract_strided_slice %22 {offsets = [0, 0], sizes = [32, 128], strides = [1, 1]} : vector<32x256xbf16> to vector<32x128xbf16>
    %24 = vector.shape_cast %23 : vector<32x128xbf16> to vector<32x1x128xbf16>
    %25 = vector.extract_strided_slice %22 {offsets = [0, 128], sizes = [32, 128], strides = [1, 1]} : vector<32x256xbf16> to vector<32x128xbf16>
    %26 = vector.shape_cast %25 : vector<32x128xbf16> to vector<32x1x128xbf16>
    %27 = tpu.concatenate %24, %26 in 1 : vector<32x1x128xbf16>, vector<32x1x128xbf16> -> vector<32x2x128xbf16>
    %28 = vector.shape_cast %27 : vector<32x2x128xbf16> to vector<4x16x128xbf16>
    %29 = vector.shape_cast %21 : vector<4x16x128xbf16> to vector<4x1x16x128xbf16>
    %30 = vector.shape_cast %28 : vector<4x16x128xbf16> to vector<4x1x16x128xbf16>
    %31 = tpu.concatenate %29, %30 in 1 : vector<4x1x16x128xbf16>, vector<4x1x16x128xbf16> -> vector<4x2x16x128xbf16>
    %32 = vector.shape_cast %31 : vector<4x2x16x128xbf16> to vector<8x16x128xbf16>
    %c0_15 = arith.constant 0 : index
    %c0_16 = arith.constant 0 : index
    %c0_17 = arith.constant 0 : index
    %c0_18 = arith.constant 0 : index
    %33 = vector.load %arg6[%c0_15, %c0_16, %c0_17, %c0_18] : memref<1x2x16x4xbf16, #tpu.memory_space<vmem>>, vector<1x2x16x4xbf16>
    %34 = vector.shape_cast %33 : vector<1x2x16x4xbf16> to vector<2x16x4xbf16>
    %c0_19 = arith.constant 0 : index
    %c0_20 = arith.constant 0 : index
    %c0_21 = arith.constant 0 : index
    %c0_22 = arith.constant 0 : index
    %35 = vector.load %arg5[%c0_19, %c0_20, %c0_21, %c0_22] : memref<1x4x16x4xbf16, #tpu.memory_space<vmem>>, vector<1x4x16x4xbf16>
    %36 = vector.shape_cast %35 : vector<1x4x16x4xbf16> to vector<4x16x4xbf16>
    %c0_23 = arith.constant 0 : index
    %c0_24 = arith.constant 0 : index
    %c0_25 = arith.constant 0 : index
    %c0_26 = arith.constant 0 : index
    %37 = vector.load %arg7[%c0_23, %c0_24, %c0_25, %c0_26] : memref<1x2x16x4xbf16, #tpu.memory_space<vmem>>, vector<1x2x16x4xbf16>
    %38 = vector.shape_cast %37 : vector<1x2x16x4xbf16> to vector<2x16x4xbf16>
    %39 = tpu.concatenate %34, %36, %38 in 0 : vector<2x16x4xbf16>, vector<4x16x4xbf16>, vector<2x16x4xbf16> -> vector<8x16x4xbf16>
    %cst_27 = arith.constant 0.000000e+00 : bf16
    %40 = vector.broadcast %cst_27 : bf16 to vector<8x16x124xbf16>
    %41 = tpu.concatenate %39, %40 in 2 : vector<8x16x4xbf16>, vector<8x16x124xbf16> -> vector<8x16x128xbf16>
    %42 = tpu.concatenate %32, %41 in 2 : vector<8x16x128xbf16>, vector<8x16x128xbf16> -> vector<8x16x256xbf16>
    %43 = tpu.iota {dimensions = array<i32: 0>} : vector<8x1x1xi32>
    %c2_i32 = arith.constant 2 : i32
    %44 = arith.subi %0, %c2_i32 : i32
    %45 = vector.broadcast %44 : i32 to vector<8x1x1xi32>
    %46 = arith.addi %43, %45 : vector<8x1x1xi32>
    %c0_i32 = arith.constant 0 : i32
    %47 = vector.broadcast %c0_i32 : i32 to vector<8x1x1xi32>
    %48 = arith.cmpi sge, %46, %47 : vector<8x1x1xi32>
    %c16_i32 = arith.constant 16 : i32
    %49 = vector.broadcast %c16_i32 : i32 to vector<8x1x1xi32>
    %50 = arith.cmpi slt, %46, %49 : vector<8x1x1xi32>
    %51 = arith.andi %48, %50 : vector<8x1x1xi1>
    %cst_28 = arith.constant 0.000000e+00 : bf16
    %52 = vector.shape_cast %51 : vector<8x1x1xi1> to vector<8x1x1xi1>
    %53 = vector.broadcast %52 : vector<8x1x1xi1> to vector<8x16x256xi1>
    %54 = vector.broadcast %cst_28 : bf16 to vector<8x16x256xbf16>
    %55 = arith.select %53, %42, %54 : vector<8x16x256xi1>, vector<8x16x256xbf16>
    %cst_29 = arith.constant 0.000000e+00 : bf16
    %56 = vector.broadcast %cst_29 : bf16 to vector<8x1x256xbf16>
    %57 = tpu.concatenate %56, %55, %56 in 1 : vector<8x1x256xbf16>, vector<8x16x256xbf16>, vector<8x1x256xbf16> -> vector<8x18x256xbf16>
    %58 = vector.shape_cast %57 : vector<8x18x256xbf16> to vector<144x256xbf16>
    %cst_30 = arith.constant 0.000000e+00 : bf16
    %59 = vector.broadcast %cst_30 : bf16 to vector<1x256xbf16>
    %60 = tpu.concatenate %59, %58, %59 in 0 : vector<1x256xbf16>, vector<144x256xbf16>, vector<1x256xbf16> -> vector<146x256xbf16>
    %cst_31 = arith.constant 0.000000e+00 : f32
    %61 = vector.broadcast %cst_31 : f32 to vector<108x128xf32>
    %c0_32 = arith.constant 0 : index
    %c0_33 = arith.constant 0 : index
    %62 = vector.load %arg11[%c0_32, %c0_33] : memref<1x128xf32, #tpu.memory_space<vmem>>, vector<1x128xf32>
    %63 = vector.broadcast %62 : vector<1x128xf32> to vector<108x128xf32>
    %64 = arith.addf %61, %63 : vector<108x128xf32>
    %65 = vector.extract_strided_slice %60 {offsets = [0, 0], sizes = [108, 256], strides = [1, 1]} : vector<146x256xbf16> to vector<108x256xbf16>
    %c0_34 = arith.constant 0 : index
    %c0_35 = arith.constant 0 : index
    %c0_36 = arith.constant 0 : index
    %66 = vector.load %arg10[%c0_34, %c0_35, %c0_36] : memref<9x256x128xbf16, #tpu.memory_space<vmem>>, vector<1x256x128xbf16>
    %67 = vector.shape_cast %66 : vector<1x256x128xbf16> to vector<256x128xbf16>
    %cst_37 = arith.constant dense<0.000000e+00> : vector<108x128xf32>
    %68 = tpu.matmul %65, %67, %cst_37 {dimension_numbers = #tpu.dot_dimension_numbers<[1], [0], [0], [1], [0, 0, 1, 1], [], []>} : vector<108x256xbf16>, vector<256x128xbf16>, vector<108x128xf32> -> vector<108x128xf32>
    %69 = arith.addf %64, %68 : vector<108x128xf32>
    %70 = vector.extract_strided_slice %60 {offsets = [1, 0], sizes = [108, 256], strides = [1, 1]} : vector<146x256xbf16> to vector<108x256xbf16>
    %c1 = arith.constant 1 : index
    %c0_38 = arith.constant 0 : index
    %c0_39 = arith.constant 0 : index
    %71 = vector.load %arg10[%c1, %c0_38, %c0_39] : memref<9x256x128xbf16, #tpu.memory_space<vmem>>, vector<1x256x128xbf16>
    %72 = vector.shape_cast %71 : vector<1x256x128xbf16> to vector<256x128xbf16>
    %cst_40 = arith.constant dense<0.000000e+00> : vector<108x128xf32>
    %73 = tpu.matmul %70, %72, %cst_40 {dimension_numbers = #tpu.dot_dimension_numbers<[1], [0], [0], [1], [0, 0, 1, 1], [], []>} : vector<108x256xbf16>, vector<256x128xbf16>, vector<108x128xf32> -> vector<108x128xf32>
    %74 = arith.addf %69, %73 : vector<108x128xf32>
    %75 = vector.extract_strided_slice %60 {offsets = [2, 0], sizes = [108, 256], strides = [1, 1]} : vector<146x256xbf16> to vector<108x256xbf16>
    %c2 = arith.constant 2 : index
    %c0_41 = arith.constant 0 : index
    %c0_42 = arith.constant 0 : index
    %76 = vector.load %arg10[%c2, %c0_41, %c0_42] : memref<9x256x128xbf16, #tpu.memory_space<vmem>>, vector<1x256x128xbf16>
    %77 = vector.shape_cast %76 : vector<1x256x128xbf16> to vector<256x128xbf16>
    %cst_43 = arith.constant dense<0.000000e+00> : vector<108x128xf32>
    %78 = tpu.matmul %75, %77, %cst_43 {dimension_numbers = #tpu.dot_dimension_numbers<[1], [0], [0], [1], [0, 0, 1, 1], [], []>} : vector<108x256xbf16>, vector<256x128xbf16>, vector<108x128xf32> -> vector<108x128xf32>
    %79 = arith.addf %74, %78 : vector<108x128xf32>
    %80 = vector.extract_strided_slice %60 {offsets = [18, 0], sizes = [108, 256], strides = [1, 1]} : vector<146x256xbf16> to vector<108x256xbf16>
    %c3 = arith.constant 3 : index
    %c0_44 = arith.constant 0 : index
    %c0_45 = arith.constant 0 : index
    %81 = vector.load %arg10[%c3, %c0_44, %c0_45] : memref<9x256x128xbf16, #tpu.memory_space<vmem>>, vector<1x256x128xbf16>
    %82 = vector.shape_cast %81 : vector<1x256x128xbf16> to vector<256x128xbf16>
    %cst_46 = arith.constant dense<0.000000e+00> : vector<108x128xf32>
    %83 = tpu.matmul %80, %82, %cst_46 {dimension_numbers = #tpu.dot_dimension_numbers<[1], [0], [0], [1], [0, 0, 1, 1], [], []>} : vector<108x256xbf16>, vector<256x128xbf16>, vector<108x128xf32> -> vector<108x128xf32>
    %84 = arith.addf %79, %83 : vector<108x128xf32>
    %85 = vector.extract_strided_slice %60 {offsets = [19, 0], sizes = [108, 256], strides = [1, 1]} : vector<146x256xbf16> to vector<108x256xbf16>
    %c4 = arith.constant 4 : index
    %c0_47 = arith.constant 0 : index
    %c0_48 = arith.constant 0 : index
    %86 = vector.load %arg10[%c4, %c0_47, %c0_48] : memref<9x256x128xbf16, #tpu.memory_space<vmem>>, vector<1x256x128xbf16>
    %87 = vector.shape_cast %86 : vector<1x256x128xbf16> to vector<256x128xbf16>
    %cst_49 = arith.constant dense<0.000000e+00> : vector<108x128xf32>
    %88 = tpu.matmul %85, %87, %cst_49 {dimension_numbers = #tpu.dot_dimension_numbers<[1], [0], [0], [1], [0, 0, 1, 1], [], []>} : vector<108x256xbf16>, vector<256x128xbf16>, vector<108x128xf32> -> vector<108x128xf32>
    %89 = arith.addf %84, %88 : vector<108x128xf32>
    %90 = vector.extract_strided_slice %60 {offsets = [20, 0], sizes = [108, 256], strides = [1, 1]} : vector<146x256xbf16> to vector<108x256xbf16>
    %c5 = arith.constant 5 : index
    %c0_50 = arith.constant 0 : index
    %c0_51 = arith.constant 0 : index
    %91 = vector.load %arg10[%c5, %c0_50, %c0_51] : memref<9x256x128xbf16, #tpu.memory_space<vmem>>, vector<1x256x128xbf16>
    %92 = vector.shape_cast %91 : vector<1x256x128xbf16> to vector<256x128xbf16>
    %cst_52 = arith.constant dense<0.000000e+00> : vector<108x128xf32>
    %93 = tpu.matmul %90, %92, %cst_52 {dimension_numbers = #tpu.dot_dimension_numbers<[1], [0], [0], [1], [0, 0, 1, 1], [], []>} : vector<108x256xbf16>, vector<256x128xbf16>, vector<108x128xf32> -> vector<108x128xf32>
    %94 = arith.addf %89, %93 : vector<108x128xf32>
    %95 = vector.extract_strided_slice %60 {offsets = [36, 0], sizes = [108, 256], strides = [1, 1]} : vector<146x256xbf16> to vector<108x256xbf16>
    %c6 = arith.constant 6 : index
    %c0_53 = arith.constant 0 : index
    %c0_54 = arith.constant 0 : index
    %96 = vector.load %arg10[%c6, %c0_53, %c0_54] : memref<9x256x128xbf16, #tpu.memory_space<vmem>>, vector<1x256x128xbf16>
    %97 = vector.shape_cast %96 : vector<1x256x128xbf16> to vector<256x128xbf16>
    %cst_55 = arith.constant dense<0.000000e+00> : vector<108x128xf32>
    %98 = tpu.matmul %95, %97, %cst_55 {dimension_numbers = #tpu.dot_dimension_numbers<[1], [0], [0], [1], [0, 0, 1, 1], [], []>} : vector<108x256xbf16>, vector<256x128xbf16>, vector<108x128xf32> -> vector<108x128xf32>
    %99 = arith.addf %94, %98 : vector<108x128xf32>
    %100 = vector.extract_strided_slice %60 {offsets = [37, 0], sizes = [108, 256], strides = [1, 1]} : vector<146x256xbf16> to vector<108x256xbf16>
    %c7 = arith.constant 7 : index
    %c0_56 = arith.constant 0 : index
    %c0_57 = arith.constant 0 : index
    %101 = vector.load %arg10[%c7, %c0_56, %c0_57] : memref<9x256x128xbf16, #tpu.memory_space<vmem>>, vector<1x256x128xbf16>
    %102 = vector.shape_cast %101 : vector<1x256x128xbf16> to vector<256x128xbf16>
    %cst_58 = arith.constant dense<0.000000e+00> : vector<108x128xf32>
    %103 = tpu.matmul %100, %102, %cst_58 {dimension_numbers = #tpu.dot_dimension_numbers<[1], [0], [0], [1], [0, 0, 1, 1], [], []>} : vector<108x256xbf16>, vector<256x128xbf16>, vector<108x128xf32> -> vector<108x128xf32>
    %104 = arith.addf %99, %103 : vector<108x128xf32>
    %105 = vector.extract_strided_slice %60 {offsets = [38, 0], sizes = [108, 256], strides = [1, 1]} : vector<146x256xbf16> to vector<108x256xbf16>
    %c8 = arith.constant 8 : index
    %c0_59 = arith.constant 0 : index
    %c0_60 = arith.constant 0 : index
    %106 = vector.load %arg10[%c8, %c0_59, %c0_60] : memref<9x256x128xbf16, #tpu.memory_space<vmem>>, vector<1x256x128xbf16>
    %107 = vector.shape_cast %106 : vector<1x256x128xbf16> to vector<256x128xbf16>
    %cst_61 = arith.constant dense<0.000000e+00> : vector<108x128xf32>
    %108 = tpu.matmul %105, %107, %cst_61 {dimension_numbers = #tpu.dot_dimension_numbers<[1], [0], [0], [1], [0, 0, 1, 1], [], []>} : vector<108x256xbf16>, vector<256x128xbf16>, vector<108x128xf32> -> vector<108x128xf32>
    %109 = arith.addf %104, %108 : vector<108x128xf32>
    %cst_62 = arith.constant 0.000000e+00 : f32
    %110 = vector.broadcast %cst_62 : f32 to vector<108x128xf32>
    %111 = arith.cmpf oge, %109, %110 : vector<108x128xf32>
    %cst_63 = arith.constant 2.000000e-01 : f32
    %112 = vector.broadcast %cst_63 : f32 to vector<108x128xf32>
    %113 = arith.mulf %112, %109 : vector<108x128xf32>
    %114 = arith.select %111, %109, %113 : vector<108x128xi1>, vector<108x128xf32>
    %115 = vector.shape_cast %114 : vector<108x128xf32> to vector<6x18x128xf32>
    %116 = tpu.iota {dimensions = array<i32: 1>} : vector<1x18x1xi32>
    %117 = tpu.iota {dimensions = array<i32: 0>} : vector<6x1x1xi32>
    %c1_i32 = arith.constant 1 : i32
    %118 = arith.subi %0, %c1_i32 : i32
    %119 = vector.broadcast %118 : i32 to vector<6x1x1xi32>
    %120 = arith.addi %117, %119 : vector<6x1x1xi32>
    %c1_i32_64 = arith.constant 1 : i32
    %121 = vector.broadcast %c1_i32_64 : i32 to vector<1x18x1xi32>
    %122 = arith.cmpi sge, %116, %121 : vector<1x18x1xi32>
    %c16_i32_65 = arith.constant 16 : i32
    %123 = vector.broadcast %c16_i32_65 : i32 to vector<1x18x1xi32>
    %124 = arith.cmpi sle, %116, %123 : vector<1x18x1xi32>
    %125 = arith.andi %122, %124 : vector<1x18x1xi1>
    %c0_i32_66 = arith.constant 0 : i32
    %126 = vector.broadcast %c0_i32_66 : i32 to vector<6x1x1xi32>
    %127 = arith.cmpi sge, %120, %126 : vector<6x1x1xi32>
    %128 = vector.broadcast %125 : vector<1x18x1xi1> to vector<6x18x1xi1>
    %129 = vector.broadcast %127 : vector<6x1x1xi1> to vector<6x18x1xi1>
    %130 = arith.andi %128, %129 : vector<6x18x1xi1>
    %c16_i32_67 = arith.constant 16 : i32
    %131 = vector.broadcast %c16_i32_67 : i32 to vector<6x1x1xi32>
    %132 = arith.cmpi slt, %120, %131 : vector<6x1x1xi32>
    %133 = vector.broadcast %132 : vector<6x1x1xi1> to vector<6x18x1xi1>
    %134 = arith.andi %130, %133 : vector<6x18x1xi1>
    %cst_68 = arith.constant 0.000000e+00 : f32
    %135 = vector.shape_cast %134 : vector<6x18x1xi1> to vector<6x18x1xi1>
    %136 = vector.broadcast %135 : vector<6x18x1xi1> to vector<6x18x128xi1>
    %137 = vector.broadcast %cst_68 : f32 to vector<6x18x128xf32>
    %138 = arith.select %136, %115, %137 : vector<6x18x128xi1>, vector<6x18x128xf32>
    %139 = arith.truncf %138 : vector<6x18x128xf32> to vector<6x18x128xbf16>
    %cst_69 = arith.constant 0.000000e+00 : bf16
    %140 = vector.broadcast %cst_69 : bf16 to vector<1x128xbf16>
    %141 = vector.shape_cast %139 : vector<6x18x128xbf16> to vector<108x128xbf16>
    %cst_70 = arith.constant 0.000000e+00 : bf16
    %142 = vector.broadcast %cst_70 : bf16 to vector<1x128xbf16>
    %143 = tpu.concatenate %140, %141, %142 in 0 : vector<1x128xbf16>, vector<108x128xbf16>, vector<1x128xbf16> -> vector<110x128xbf16>
    %cst_71 = arith.constant 0.000000e+00 : f32
    %144 = vector.broadcast %cst_71 : f32 to vector<72x128xf32>
    %c0_72 = arith.constant 0 : index
    %c0_73 = arith.constant 0 : index
    %145 = vector.load %arg13[%c0_72, %c0_73] : memref<1x128xf32, #tpu.memory_space<vmem>>, vector<1x128xf32>
    %146 = vector.broadcast %145 : vector<1x128xf32> to vector<72x128xf32>
    %147 = arith.addf %144, %146 : vector<72x128xf32>
    %148 = vector.extract_strided_slice %143 {offsets = [0, 0], sizes = [72, 128], strides = [1, 1]} : vector<110x128xbf16> to vector<72x128xbf16>
    %c0_74 = arith.constant 0 : index
    %c0_75 = arith.constant 0 : index
    %c0_76 = arith.constant 0 : index
    %149 = vector.load %arg12[%c0_74, %c0_75, %c0_76] : memref<9x128x128xbf16, #tpu.memory_space<vmem>>, vector<1x128x128xbf16>
    %150 = vector.shape_cast %149 : vector<1x128x128xbf16> to vector<128x128xbf16>
    %cst_77 = arith.constant dense<0.000000e+00> : vector<72x128xf32>
    %151 = tpu.matmul %148, %150, %cst_77 {dimension_numbers = #tpu.dot_dimension_numbers<[1], [0], [0], [1], [0, 0, 1, 1], [], []>} : vector<72x128xbf16>, vector<128x128xbf16>, vector<72x128xf32> -> vector<72x128xf32>
    %152 = arith.addf %147, %151 : vector<72x128xf32>
    %153 = vector.extract_strided_slice %143 {offsets = [1, 0], sizes = [72, 128], strides = [1, 1]} : vector<110x128xbf16> to vector<72x128xbf16>
    %c1_78 = arith.constant 1 : index
    %c0_79 = arith.constant 0 : index
    %c0_80 = arith.constant 0 : index
    %154 = vector.load %arg12[%c1_78, %c0_79, %c0_80] : memref<9x128x128xbf16, #tpu.memory_space<vmem>>, vector<1x128x128xbf16>
    %155 = vector.shape_cast %154 : vector<1x128x128xbf16> to vector<128x128xbf16>
    %cst_81 = arith.constant dense<0.000000e+00> : vector<72x128xf32>
    %156 = tpu.matmul %153, %155, %cst_81 {dimension_numbers = #tpu.dot_dimension_numbers<[1], [0], [0], [1], [0, 0, 1, 1], [], []>} : vector<72x128xbf16>, vector<128x128xbf16>, vector<72x128xf32> -> vector<72x128xf32>
    %157 = arith.addf %152, %156 : vector<72x128xf32>
    %158 = vector.extract_strided_slice %143 {offsets = [2, 0], sizes = [72, 128], strides = [1, 1]} : vector<110x128xbf16> to vector<72x128xbf16>
    %c2_82 = arith.constant 2 : index
    %c0_83 = arith.constant 0 : index
    %c0_84 = arith.constant 0 : index
    %159 = vector.load %arg12[%c2_82, %c0_83, %c0_84] : memref<9x128x128xbf16, #tpu.memory_space<vmem>>, vector<1x128x128xbf16>
    %160 = vector.shape_cast %159 : vector<1x128x128xbf16> to vector<128x128xbf16>
    %cst_85 = arith.constant dense<0.000000e+00> : vector<72x128xf32>
    %161 = tpu.matmul %158, %160, %cst_85 {dimension_numbers = #tpu.dot_dimension_numbers<[1], [0], [0], [1], [0, 0, 1, 1], [], []>} : vector<72x128xbf16>, vector<128x128xbf16>, vector<72x128xf32> -> vector<72x128xf32>
    %162 = arith.addf %157, %161 : vector<72x128xf32>
    %163 = vector.extract_strided_slice %143 {offsets = [18, 0], sizes = [72, 128], strides = [1, 1]} : vector<110x128xbf16> to vector<72x128xbf16>
    %c3_86 = arith.constant 3 : index
    %c0_87 = arith.constant 0 : index
    %c0_88 = arith.constant 0 : index
    %164 = vector.load %arg12[%c3_86, %c0_87, %c0_88] : memref<9x128x128xbf16, #tpu.memory_space<vmem>>, vector<1x128x128xbf16>
    %165 = vector.shape_cast %164 : vector<1x128x128xbf16> to vector<128x128xbf16>
    %cst_89 = arith.constant dense<0.000000e+00> : vector<72x128xf32>
    %166 = tpu.matmul %163, %165, %cst_89 {dimension_numbers = #tpu.dot_dimension_numbers<[1], [0], [0], [1], [0, 0, 1, 1], [], []>} : vector<72x128xbf16>, vector<128x128xbf16>, vector<72x128xf32> -> vector<72x128xf32>
    %167 = arith.addf %162, %166 : vector<72x128xf32>
    %168 = vector.extract_strided_slice %143 {offsets = [19, 0], sizes = [72, 128], strides = [1, 1]} : vector<110x128xbf16> to vector<72x128xbf16>
    %c4_90 = arith.constant 4 : index
    %c0_91 = arith.constant 0 : index
    %c0_92 = arith.constant 0 : index
    %169 = vector.load %arg12[%c4_90, %c0_91, %c0_92] : memref<9x128x128xbf16, #tpu.memory_space<vmem>>, vector<1x128x128xbf16>
    %170 = vector.shape_cast %169 : vector<1x128x128xbf16> to vector<128x128xbf16>
    %cst_93 = arith.constant dense<0.000000e+00> : vector<72x128xf32>
    %171 = tpu.matmul %168, %170, %cst_93 {dimension_numbers = #tpu.dot_dimension_numbers<[1], [0], [0], [1], [0, 0, 1, 1], [], []>} : vector<72x128xbf16>, vector<128x128xbf16>, vector<72x128xf32> -> vector<72x128xf32>
    %172 = arith.addf %167, %171 : vector<72x128xf32>
    %173 = vector.extract_strided_slice %143 {offsets = [20, 0], sizes = [72, 128], strides = [1, 1]} : vector<110x128xbf16> to vector<72x128xbf16>
    %c5_94 = arith.constant 5 : index
    %c0_95 = arith.constant 0 : index
    %c0_96 = arith.constant 0 : index
    %174 = vector.load %arg12[%c5_94, %c0_95, %c0_96] : memref<9x128x128xbf16, #tpu.memory_space<vmem>>, vector<1x128x128xbf16>
    %175 = vector.shape_cast %174 : vector<1x128x128xbf16> to vector<128x128xbf16>
    %cst_97 = arith.constant dense<0.000000e+00> : vector<72x128xf32>
    %176 = tpu.matmul %173, %175, %cst_97 {dimension_numbers = #tpu.dot_dimension_numbers<[1], [0], [0], [1], [0, 0, 1, 1], [], []>} : vector<72x128xbf16>, vector<128x128xbf16>, vector<72x128xf32> -> vector<72x128xf32>
    %177 = arith.addf %172, %176 : vector<72x128xf32>
    %178 = vector.extract_strided_slice %143 {offsets = [36, 0], sizes = [72, 128], strides = [1, 1]} : vector<110x128xbf16> to vector<72x128xbf16>
    %c6_98 = arith.constant 6 : index
    %c0_99 = arith.constant 0 : index
    %c0_100 = arith.constant 0 : index
    %179 = vector.load %arg12[%c6_98, %c0_99, %c0_100] : memref<9x128x128xbf16, #tpu.memory_space<vmem>>, vector<1x128x128xbf16>
    %180 = vector.shape_cast %179 : vector<1x128x128xbf16> to vector<128x128xbf16>
    %cst_101 = arith.constant dense<0.000000e+00> : vector<72x128xf32>
    %181 = tpu.matmul %178, %180, %cst_101 {dimension_numbers = #tpu.dot_dimension_numbers<[1], [0], [0], [1], [0, 0, 1, 1], [], []>} : vector<72x128xbf16>, vector<128x128xbf16>, vector<72x128xf32> -> vector<72x128xf32>
    %182 = arith.addf %177, %181 : vector<72x128xf32>
    %183 = vector.extract_strided_slice %143 {offsets = [37, 0], sizes = [72, 128], strides = [1, 1]} : vector<110x128xbf16> to vector<72x128xbf16>
    %c7_102 = arith.constant 7 : index
    %c0_103 = arith.constant 0 : index
    %c0_104 = arith.constant 0 : index
    %184 = vector.load %arg12[%c7_102, %c0_103, %c0_104] : memref<9x128x128xbf16, #tpu.memory_space<vmem>>, vector<1x128x128xbf16>
    %185 = vector.shape_cast %184 : vector<1x128x128xbf16> to vector<128x128xbf16>
    %cst_105 = arith.constant dense<0.000000e+00> : vector<72x128xf32>
    %186 = tpu.matmul %183, %185, %cst_105 {dimension_numbers = #tpu.dot_dimension_numbers<[1], [0], [0], [1], [0, 0, 1, 1], [], []>} : vector<72x128xbf16>, vector<128x128xbf16>, vector<72x128xf32> -> vector<72x128xf32>
    %187 = arith.addf %182, %186 : vector<72x128xf32>
    %188 = vector.extract_strided_slice %143 {offsets = [38, 0], sizes = [72, 128], strides = [1, 1]} : vector<110x128xbf16> to vector<72x128xbf16>
    %c8_106 = arith.constant 8 : index
    %c0_107 = arith.constant 0 : index
    %c0_108 = arith.constant 0 : index
    %189 = vector.load %arg12[%c8_106, %c0_107, %c0_108] : memref<9x128x128xbf16, #tpu.memory_space<vmem>>, vector<1x128x128xbf16>
    %190 = vector.shape_cast %189 : vector<1x128x128xbf16> to vector<128x128xbf16>
    %cst_109 = arith.constant dense<0.000000e+00> : vector<72x128xf32>
    %191 = tpu.matmul %188, %190, %cst_109 {dimension_numbers = #tpu.dot_dimension_numbers<[1], [0], [0], [1], [0, 0, 1, 1], [], []>} : vector<72x128xbf16>, vector<128x128xbf16>, vector<72x128xf32> -> vector<72x128xf32>
    %192 = arith.addf %187, %191 : vector<72x128xf32>
    %cst_110 = arith.constant 0.000000e+00 : f32
    %193 = vector.broadcast %cst_110 : f32 to vector<72x128xf32>
    %194 = arith.cmpf oge, %192, %193 : vector<72x128xf32>
    %cst_111 = arith.constant 2.000000e-01 : f32
    %195 = vector.broadcast %cst_111 : f32 to vector<72x128xf32>
    %196 = arith.mulf %195, %192 : vector<72x128xf32>
    %197 = arith.select %194, %192, %196 : vector<72x128xi1>, vector<72x128xf32>
    %198 = vector.extract_strided_slice %58 {offsets = [36, 0], sizes = [72, 256], strides = [1, 1]} : vector<144x256xbf16> to vector<72x256xbf16>
    %c0_112 = arith.constant 0 : index
    %c0_113 = arith.constant 0 : index
    %199 = vector.load %arg14[%c0_112, %c0_113] : memref<256x128xbf16, #tpu.memory_space<vmem>>, vector<256x128xbf16>
    %cst_114 = arith.constant dense<0.000000e+00> : vector<72x128xf32>
    %200 = tpu.matmul %198, %199, %cst_114 {dimension_numbers = #tpu.dot_dimension_numbers<[1], [0], [0], [1], [0, 0, 1, 1], [], []>} : vector<72x256xbf16>, vector<256x128xbf16>, vector<72x128xf32> -> vector<72x128xf32>
    %c0_115 = arith.constant 0 : index
    %c0_116 = arith.constant 0 : index
    %201 = vector.load %arg15[%c0_115, %c0_116] : memref<1x128xf32, #tpu.memory_space<vmem>>, vector<1x128xf32>
    %202 = vector.broadcast %201 : vector<1x128xf32> to vector<72x128xf32>
    %203 = arith.addf %200, %202 : vector<72x128xf32>
    %204 = arith.addf %197, %203 : vector<72x128xf32>
    %205 = vector.shape_cast %204 : vector<72x128xf32> to vector<4x18x128xf32>
    %206 = vector.extract_strided_slice %205 {offsets = [0, 1, 0], sizes = [4, 16, 128], strides = [1, 1, 1]} : vector<4x18x128xf32> to vector<4x16x128xf32>
    %c0_117 = arith.constant 0 : index
    %c0_118 = arith.constant 0 : index
    %c0_119 = arith.constant 0 : index
    %c0_120 = arith.constant 0 : index
    %207 = vector.load %arg16[%c0_117, %c0_118, %c0_119, %c0_120] : memref<1x4x16x128xf32, #tpu.memory_space<vmem>>, vector<1x4x16x128xf32>
    %208 = vector.shape_cast %207 : vector<1x4x16x128xf32> to vector<4x16x128xf32>
    %209 = vector.shape_cast %206 : vector<4x16x128xf32> to vector<1x4x16x128xf32>
    tpu.vector_store %arg16[%c0_117, %c0_118, %c0_119, %c0_120], %209 {strides = array<i32>} : memref<1x4x16x128xf32, #tpu.memory_space<vmem>>, vector<1x4x16x128xf32>,
    return
  }
  func.func @transform_0(%arg0: i32, %arg1: i32) -> (i32, i32, i32, i32) {
    %c0_i32 = arith.constant 0 : i32
    %c0_i32_0 = arith.constant 0 : i32
    %c0_i32_1 = arith.constant 0 : i32
    return %arg0, %arg1, %c0_i32, %c0_i32_0 : i32, i32, i32, i32
  }
  func.func @transform_1(%arg0: i32, %arg1: i32) -> (i32, i32, i32, i32) {
    %c2_i32 = arith.constant 2 : i32
    %0 = arith.muli %arg1, %c2_i32 : i32
    %c1_i32 = arith.constant 1 : i32
    %1 = arith.subi %0, %c1_i32 : i32
    %c0_i32 = arith.constant 0 : i32
    %2 = arith.maxsi %1, %c0_i32 : i32
    %c0_i32_0 = arith.constant 0 : i32
    %c0_i32_1 = arith.constant 0 : i32
    %c0_i32_2 = arith.constant 0 : i32
    return %arg0, %2, %c0_i32_0, %c0_i32_1 : i32, i32, i32, i32
  }
  func.func @transform_2(%arg0: i32, %arg1: i32) -> (i32, i32, i32, i32) {
    %c1_i32 = arith.constant 1 : i32
    %0 = arith.addi %arg1, %c1_i32 : i32
    %c2_i32 = arith.constant 2 : i32
    %1 = arith.muli %0, %c2_i32 : i32
    %c7_i32 = arith.constant 7 : i32
    %2 = arith.minsi %1, %c7_i32 : i32
    %c0_i32 = arith.constant 0 : i32
    %c0_i32_0 = arith.constant 0 : i32
    %c0_i32_1 = arith.constant 0 : i32
    return %arg0, %2, %c0_i32, %c0_i32_0 : i32, i32, i32, i32
  }
  func.func @transform_3(%arg0: i32, %arg1: i32) -> (i32, i32, i32, i32) {
    %c0_i32 = arith.constant 0 : i32
    %c0_i32_0 = arith.constant 0 : i32
    %c0_i32_1 = arith.constant 0 : i32
    return %arg0, %arg1, %c0_i32, %c0_i32_0 : i32, i32, i32, i32
  }
  func.func @transform_4(%arg0: i32, %arg1: i32) -> (i32, i32, i32, i32) {
    %c2_i32 = arith.constant 2 : i32
    %0 = arith.muli %arg1, %c2_i32 : i32
    %c1_i32 = arith.constant 1 : i32
    %1 = arith.subi %0, %c1_i32 : i32
    %c0_i32 = arith.constant 0 : i32
    %2 = arith.maxsi %1, %c0_i32 : i32
    %c0_i32_0 = arith.constant 0 : i32
    %c0_i32_1 = arith.constant 0 : i32
    %c0_i32_2 = arith.constant 0 : i32
    return %arg0, %2, %c0_i32_0, %c0_i32_1 : i32, i32, i32, i32
  }
  func.func @transform_5(%arg0: i32, %arg1: i32) -> (i32, i32, i32, i32) {
    %c1_i32 = arith.constant 1 : i32
    %0 = arith.addi %arg1, %c1_i32 : i32
    %c2_i32 = arith.constant 2 : i32
    %1 = arith.muli %0, %c2_i32 : i32
    %c7_i32 = arith.constant 7 : i32
    %2 = arith.minsi %1, %c7_i32 : i32
    %c0_i32 = arith.constant 0 : i32
    %c0_i32_0 = arith.constant 0 : i32
    %c0_i32_1 = arith.constant 0 : i32
    return %arg0, %2, %c0_i32, %c0_i32_0 : i32, i32, i32, i32
  }
  func.func @transform_6(%arg0: i32, %arg1: i32) -> (i32, i32) {
    %c0_i32 = arith.constant 0 : i32
    %c0_i32_0 = arith.constant 0 : i32
    %c0_i32_1 = arith.constant 0 : i32
    return %c0_i32, %c0_i32_0 : i32, i32
  }
  func.func @transform_7(%arg0: i32, %arg1: i32) -> (i32, i32) {
    %c0_i32 = arith.constant 0 : i32
    %c0_i32_0 = arith.constant 0 : i32
    %c0_i32_1 = arith.constant 0 : i32
    return %c0_i32, %c0_i32_0 : i32, i32
  }
  func.func @transform_8(%arg0: i32, %arg1: i32) -> (i32, i32, i32) {
    %c0_i32 = arith.constant 0 : i32
    %c0_i32_0 = arith.constant 0 : i32
    %c0_i32_1 = arith.constant 0 : i32
    %c0_i32_2 = arith.constant 0 : i32
    return %c0_i32, %c0_i32_0, %c0_i32_1 : i32, i32, i32
  }
  func.func @transform_9(%arg0: i32, %arg1: i32) -> (i32, i32) {
    %c0_i32 = arith.constant 0 : i32
    %c0_i32_0 = arith.constant 0 : i32
    %c0_i32_1 = arith.constant 0 : i32
    return %c0_i32, %c0_i32_0 : i32, i32
  }
  func.func @transform_10(%arg0: i32, %arg1: i32) -> (i32, i32, i32) {
    %c0_i32 = arith.constant 0 : i32
    %c0_i32_0 = arith.constant 0 : i32
    %c0_i32_1 = arith.constant 0 : i32
    %c0_i32_2 = arith.constant 0 : i32
    return %c0_i32, %c0_i32_0, %c0_i32_1 : i32, i32, i32
  }
  func.func @transform_11(%arg0: i32, %arg1: i32) -> (i32, i32) {
    %c0_i32 = arith.constant 0 : i32
    %c0_i32_0 = arith.constant 0 : i32
    %c0_i32_1 = arith.constant 0 : i32
    return %c0_i32, %c0_i32_0 : i32, i32
  }
  func.func @transform_12(%arg0: i32, %arg1: i32) -> (i32, i32) {
    %c0_i32 = arith.constant 0 : i32
    %c0_i32_0 = arith.constant 0 : i32
    %c0_i32_1 = arith.constant 0 : i32
    return %c0_i32, %c0_i32_0 : i32, i32
  }
  func.func @transform_13(%arg0: i32, %arg1: i32) -> (i32, i32) {
    %c0_i32 = arith.constant 0 : i32
    %c0_i32_0 = arith.constant 0 : i32
    %c0_i32_1 = arith.constant 0 : i32
    return %c0_i32, %c0_i32_0 : i32, i32
  }
  func.func @transform_14(%arg0: i32, %arg1: i32) -> (i32, i32, i32, i32) {
    %c0_i32 = arith.constant 0 : i32
    %c0_i32_0 = arith.constant 0 : i32
    %c0_i32_1 = arith.constant 0 : i32
    return %arg0, %arg1, %c0_i32, %c0_i32_0 : i32, i32, i32, i32
  }
}

</mosaic_0001>

<bundles_post_ra>
// kernel: tile.8
= control target key start
LH: loop header
LB: loop body
LE: loop exit
PB: predicated region body
PF: predicated region fallthrough
CT: control target
= control target key end

     0   :  { %s22_s0 = inlined_call_operand.vmem [shape: f32[128], index: 0, kind: input, shape index: {}]   ;;  %s23_s1 = inlined_call_operand.vmem [shape: f32[4,128], index: 1, kind: output, shape index: {}]  }
   0x1   :  { %v4_v0 = vld [vmem:[%s22_s0] ss:$0 sm:$0xff] }
   0x2   :  { %5 = vst [vmem:[%s23_s1] sm:$0xf] %v4_v0 }

// kernel: unet_up_block_forward.1
= control target key start
LH: loop header
LB: loop body
LE: loop exit
PB: predicated region body
PF: predicated region fallthrough
CT: control target
= control target key end

     0   :  { %s13145_s29 = smov 0   ;;  %s13147_s30 = smov 0   ;;  %s17890_s0 = inlined_call_operand.vmem [shape: bf16[2,8,8,8], index: 0, kind: input, shape index: {}, may-alias: {0,1,2}]   ;;  %s17891_s1 = inlined_call_operand.vmem [shape: bf16[2,8,8,8], index: 1, kind: input, shape index: {}, may-alias: {0,1,2}]   ;;  %s17892_s2 = inlined_call_operand.vmem [shape: bf16[2,8,8,8], index: 2, kind: input, shape index: {}, may-alias: {0,1,2}]   ;;  %s17893_s3 = inlined_call_operand.vmem [shape: bf16[2,16,16,4], index: 3, kind: input, shape index: {}, may-alias: {3,4,5}]   ;;  %s17894_s4 = inlined_call_operand.vmem [shape: bf16[2,16,16,4], index: 4, kind: input, shape index: {}, may-alias: {3,4,5}]   ;;  %s17895_s5 = inlined_call_operand.vmem [shape: bf16[2,16,16,4], index: 5, kind: input, shape index: {}, may-alias: {3,4,5}]   ;;  %s17896_s6 = inlined_call_operand.vmem [shape: bf16[8,512], index: 6, kind: input, shape index: {}]   ;;  %s17897_s7 = inlined_call_operand.vmem [shape: f32[1,512], index: 7, kind: input, shape index: {}]   ;;  %s17898_s8 = inlined_call_operand.vmem [shape: bf16[9,256,128], index: 8, kind: input, shape index: {}]   ;;  %s17899_s9 = inlined_call_operand.vmem [shape: f32[1,128], index: 9, kind: input, shape index: {}]   ;;  %s17900_s10 = inlined_call_operand.vmem [shape: bf16[9,128,128], index: 10, kind: input, shape index: {}]   ;;  %s17901_s11 = inlined_call_operand.vmem [shape: f32[1,128], index: 11, kind: input, shape index: {}]   ;;  %s17902_s12 = inlined_call_operand.vmem [shape: bf16[256,128], index: 12, kind: input, shape index: {}]   ;;  %s17903_s13 = inlined_call_operand.vmem [shape: f32[1,128], index: 13, kind: input, shape index: {}]   ;;  %s17904_s14 = inlined_call_operand.vmem [shape: f32[2,16,16,128], index: 14, kind: output, shape index: {}]  }
   0x1   :  { %18048 = sst [smem:[#allocation51_spill]] %s17890_s0  ;;  %s13149_s15 = smov 0  }
   0x2   :  { %18049 = sst [smem:[#allocation52_spill]] %s17891_s1  ;;  %s13151_s16 = smov 0  }
   0x3   :  { %18050 = sst [smem:[#allocation53_spill]] %s17893_s3  ;;  %s13153_s17 = smov 0  }
   0x4   :  { %18051 = sst [smem:[#allocation54_spill]] %s17896_s6 }
   0x5   :  { %18052 = sst [smem:[#allocation55_spill]] %s17904_s14 }
   0x6 LB: > { %18053 = sst [smem:[#allocation2_spill]] %s13055_s15  ;;  %s33_s18 = sadd.s32 1, %s13055_s15  ;;  %s13063_s17 = sphi %s13153_s17, %s24_s17   ;;  %s13059_s16 = sphi %s13151_s16, %s18464_s16   ;;  %s13055_s15 = sphi %s13149_s15, %s18463_s15   ;;  %s13051_s30 = sphi %s13147_s30, %s18462_s30   ;;  %s13047_s29 = sphi %s13145_s29, %s18461_s29  }
   0x7   : > { %18054 = sst [smem:[#allocation3_spill]] %s13059_s16  ;;  %s36_s19 = sadd.s32 1, %s13059_s16 }
   0x8   : > { %18055 = sst [smem:[#allocation4_spill]] %s13063_s17  ;;  %p34_p0 = scmp.ge.s32.totalorder %s33_s18, 4 }
   0x9   : > { %p10919_p1 = scmp.ge.s32.totalorder %s13063_s17, 1  ;;  %p581_p2 = scmp.lt.s32.totalorder %s13063_s17, 9 }
   0xa   : > { %s18466_s18 = smov (%p34_p0, %s33_s18), 0  ;;  %s18468_s19 = smov (!%p34_p0, %s36_s19), %s13059_s16 }
   0xb   : > { %18056 = sst [smem:[#allocation5_spill]] %s18466_s18  ;;  %p582_p3 = pnand %p10919_p1, %p581_p2 }
   0xc   : > { %p38_p4 = scmp.ge.s32.totalorder %s18468_s19, 2 }
   0xd   : > { %585 = sbr.rel (%p582_p3) target bundleno = 1415 (0x587), region = 76 }
   0xe   : > { %s18470_s19 = smov (%p38_p4, %s18468_s19), 0 }
   0xf   : > { %18057 = sst [smem:[#allocation6_spill]] %s18470_s19 }
  0x12   : > { %s18058_s6 = sld [smem:[#allocation54_spill]]  ;;  %vm857_vm0 = vcmask 1043456   ;;  %s13184_s24 = sshll.u32 %s13047_s29, 1  ;;  %v13065_v6 = vmov 0   ;;  %vm850_vm1 = vcmask 64512   ;;  %vm2403_vm2 = vcmask 31744  }
  0x13   : > { %p699_p5 = scmp.lt.s32.totalorder %s13051_s30, 1  ;;  %902 = vmatprep.mubr.bf16.mxu0 %v13065_v6  ;;  %p701_p6 = scmp.lt.s32.totalorder %s13184_s24, 7  ;;  %955 = vmatprep.mubr.bf16.mxu1 %v13065_v6  ;;  %v810_v20 = vlaneseq  ;;  %v18063_v24 = vmov 0  ;;  %v18066_v27 = vmov 0  ;;  %v18073_v38 = vmov 0 }
  0x14   : > { %s10924_s25 = sadd.s32 4294967295, %s13184_s24  ;;  %s13197_s21 = sshll.u32 %s13047_s29, 2  ;;  %v13066_v41 = vmov 1966171168   ;;  %v18076_v45 = vmov 0  ;;  %v18080_v55 = vmov 0 }
  0x15   : > { %s18472_s30 = smov (!%p699_p5, %s13051_s30), 1  ;;  %p710_p7 = scmp.gt.s32.totalorder %s10924_s25, 0  ;;  %v13263_v29 = vshrl.u32 %v810_v20, 7  ;;  %v988_v42 = vunpack.c.l.s4 %v13066_v41  ;;  %v808_v49 = vld [vmem:[%s17897_s7] sm:$0xf] }
  0x16   : > { %s702_s26 = scalar_select %p701_p6, %s13184_s24, 7 }
  0x17   : > { %s13193_s27 = sshll.u32 %s18472_s30, 3  ;;  %p10925_p8 = scmp.lt.s32.totalorder %s10924_s25, 7  ;;  %18069 = vst [vmem:[#allocation10_spill] sm:$0xff] %v13263_v29  ;;  %v13292_v46 = vsub.s32 0, %v13263_v29  ;;  %v820_v47 = vsub.s32 2, %v13263_v29  ;;  %v989_v60 = vunpack.c.0.s8 %v988_v42 }
  0x18   : > { %v806_v0 = vld [vmem:[%s18058_s6] sm:$0xff]  ;;  %v807_v1 = vld [vmem:[%s18058_s6 + $0x8] sm:$0xff]  ;;  %s704_s28 = sadd.s32 %s13193_s27, %s702_s26  ;;  %s18059_s0 = sld [smem:[#allocation51_spill]] }
  0x19   : > { %v10961_v2 = vcombine.high %v806_v0, %v806_v0  ;;  %v10963_v3 = vcombine.high %v807_v1, %v807_v1  ;;  %v10960_v4 = vcombine.low %v806_v0, %v806_v0  ;;  %v10962_v5 = vcombine.low %v807_v1, %v807_v1  ;;  %s10922_s20 = sshll.u32 %s704_s28, 2  ;;  %p743_p9 = scmp.lt.s32.totalorder %s13197_s21, 15 }
  0x1a   : > { %s18474_s25 = smov (!%p710_p7, %s10924_s25), 0  ;;  %s13206_s15 = sshll.u32 %s18472_s30, 5  ;;  %v13313_v61 = vrot.slane %v808_v49, %v13292_v46  ;;  %v13315_v62 = vrot.slane %v808_v49, %v820_v47 }
  0x1b   : > { %10964 = vmatprep.subr.msk.bf16.mxu0 %vm857_vm0, %v10961_v2  ;;  %10967 = vmatprep.subr.msk.bf16.mxu1 %vm857_vm0, %v10963_v3  ;;  %v859_v7 = vsel %vm857_vm0, %v10960_v4, 0  ;;  %v865_v8 = vsel %vm857_vm0, %v10962_v5, 0  ;;  %s744_s19 = scalar_select %p743_p9, %s13197_s21, 15 }
  0x1c   : > { %885 = vmatpush1.bf16.msra.mxu0 %v859_v7  ;;  %938 = vmatpush1.bf16.msra.mxu1 %v865_v8  ;;  %s11706_s18 = scalar_select %p10925_p8, %s18474_s25, 7  ;;  %18084 = vst [vmem:[#allocation17_spill] sm:$0xff] %v13315_v62  ;;  %v13327_v8 = vsub.s32 %v989_v60, %v13263_v29 }
  0x1d   : > { %s10939_s16 = sshll.u32 %s744_s19, 1  ;;  %s18060_s1 = sld [smem:[#allocation52_spill]] }
  0x1e   : > { %s13202_s6 = scalar_lea.vmem %s18059_s0, %s10922_s20  ;;  %s717_s26 = sadd.s32 %s11706_s18, %s13193_s27  ;;  %18087 = vst [vmem:[#allocation20_spill] sm:$0xff] %v13327_v8 }
  0x1f   : > { %v803_v9 = vld [vmem:[%s13202_s6] sm:$0xf]  ;;  %s13211_s29 = sadd.s32 %s13206_s15, %s10939_s16  ;;  %s10931_s28 = sshll.u32 %s717_s26, 2  ;;  %v804_v12 = vld [vmem:[%s13202_s6 + $0x4] sm:$0xf] }
  0x20   : > { %s10941_s22 = sshll.u32 %s13211_s29, 2  ;;  %s18061_s3 = sld [smem:[#allocation53_spill]] }
  0x21   : > { %s10944_s30 = sshll.u32 %s18474_s25, 1  ;;  %s11708_s18 = sadd.s32 2, %s13184_s24 }
  0x22   : > { %p758_p10 = scmp.lt.s32.totalorder %s10944_s30, 15  ;;  %p726_p11 = scmp.lt.s32.totalorder %s11708_s18, 7 }
  0x23   : > { %s719_s0 = scalar_lea.vmem %s18060_s1, %s10931_s28  ;;  %s11050_s6 = sadd.s32 4294967294, %s13197_s21 }
  0x24   : > { %v802_v10 = vld [vmem:[%s719_s0] sm:$0xf]  ;;  %s18476_s30 = smov (!%p758_p10, %s10944_s30), 15  ;;  %s18478_s18 = smov (!%p726_p11, %s11708_s18), 7  ;;  %v13243_v15 = vstv %s11050_s6 }
  0x25   : > { %v10958_v11 = vcombine.low %v802_v10, %v803_v9  ;;  %s10945_s16 = sshll.u32 %s18476_s30, 1  ;;  %18062 = vst [vmem:[#allocation7_spill] sm:$0xff] %v13243_v15  ;;  %v2895_v16 = vadd.s32 1, %v13243_v15  ;;  %v2900_v17 = vadd.s32 6, %v13243_v15  ;;  %v2896_v22 = vadd.s32 2, %v13243_v15 }
  0x26   : > { %s13220_s19 = scalar_lea.vmem %s18061_s3, %s10941_s22  ;;  %s762_s26 = sadd.s32 %s10945_s16, %s13206_s15  ;;  %vm2902_vm7 = vcmp.ge.s32.totalorder %v13243_v15, 0  ;;  %vm2910_vm8 = vcmp.lt.s32.totalorder %v13243_v15, 16  ;;  %v2897_v25 = vadd.s32 3, %v13243_v15  ;;  %v2901_v28 = vadd.s32 7, %v13243_v15 }
  0x27   : > { %10965 = vmatmul.mubr.msk.bf16.vlgmr.msra.gmra.mxu0 %vm850_vm1, %v10958_v11  ;;  %10968 = vmatmul.mubr.msk.bf16.vlgmr.msra.gmra.mxu1 %vm850_vm1, %v10958_v11  ;;  %s10947_s14 = sshll.u32 %s762_s26, 2  ;;  %s10949_s22 = sshll.u32 %s18478_s18, 1  ;;  %vm2903_vm3 = vcmp.ge.s32.totalorder %v2895_v16, 0  ;;  %vm2911_vm4 = vcmp.lt.s32.totalorder %v2895_v16, 16  ;;  %vm2908_vm5 = vcmp.ge.s32.totalorder %v2900_v17, 0  ;;  %vm2916_vm6 = vcmp.lt.s32.totalorder %v2900_v17, 16  ;;  %vm13266_vm11 = vmand %vm2902_vm7, %vm2910_vm8 }
  0x28   : > { %912 = vmatprep.mubr.bf16.mxu0 %v13065_v6  ;;  %965 = vmatprep.mubr.bf16.mxu1 %v13065_v6  ;;  %s764_s25 = scalar_lea.vmem %s17894_s4, %s10947_s14  ;;  %p777_p12 = scmp.lt.s32.totalorder %s10949_s22, 15  ;;  %vm13252_vm9 = vmand %vm2903_vm3, %vm2911_vm4  ;;  %v12789_v33 = vld [vmem:[%s13220_s19] sm:$0xff]   ;;  %vm2904_vm12 = vcmp.ge.s32.totalorder %v2896_v22, 0  ;;  %vm2912_vm13 = vcmp.lt.s32.totalorder %v2896_v22, 16  ;;  %v12790_v34 = vld [vmem:[%s13220_s19 + $0x8] sm:$0xff]   ;;  %vm2905_vm14 = vcmp.ge.s32.totalorder %v2897_v25, 0 }
  0x29   : > { %s731_s28 = scalar_select %p726_p11, %s18478_s18, 7  ;;  %v12786_v18 = vld [vmem:[%s764_s25 + $0x8] sm:$0xff]   ;;  %v12785_v21 = vld [vmem:[%s764_s25] sm:$0xff]   ;;  %v18064_v24 = vsel %vm13252_vm9, 4294967295, %v18063_v24  ;;  %vm13258_vm10 = vmand %vm2908_vm5, %vm2916_vm6  ;;  %vm2913_vm15 = vcmp.lt.s32.totalorder %v2897_v25, 16  ;;  %v2412_v43 = vsel %vm2403_vm2, %v12789_v33, 0 }
  0x2a   : > { %s18480_s22 = smov (!%p777_p12, %s10949_s22), 15  ;;  %v2409_v23 = vsel %vm2403_vm2, %v12786_v18, 0  ;;  %18065 = vst [vmem:[#allocation8_spill] sm:$0xff] %v18064_v24  ;;  %v18067_v27 = vsel %vm13258_vm10, 4294967295, %v18066_v27  ;;  %v2406_v30 = vsel %vm2403_vm2, %v12785_v21, 0  ;;  %vm13280_vm0 = vmand %vm2904_vm12, %vm2912_vm13  ;;  %v2415_v44 = vsel %vm2403_vm2, %v12790_v34, 0 }
  0x2b   : > { %s733_s20 = sadd.s32 %s13193_s27, %s731_s28  ;;  %s10950_s30 = sshll.u32 %s18480_s22, 1  ;;  %18068 = vst [vmem:[#allocation9_spill] sm:$0xff] %v18067_v27  ;;  %v2945_v32 = vsel %vm13252_vm9, %v2409_v23, 0  ;;  %v13278_v36 = vsel %vm13266_vm11, %v2406_v30, 0  ;;  %v18074_v38 = vsel %vm13280_vm0, 4294967295, %v18073_v38  ;;  %vm2909_vm3 = vcmp.ge.s32.totalorder %v2901_v28, 0 }
  0x2c   : > { %s10937_s23 = sshll.u32 %s733_s20, 2  ;;  %s781_s16 = sadd.s32 %s10950_s30, %s13206_s15  ;;  %18072 = vst [vmem:[#allocation11_spill] sm:$0xff] %v13278_v36  ;;  %v2980_v37 = vshrl.u32 %v2945_v32, 16  ;;  %18075 = vst [vmem:[#allocation12_spill] sm:$0xff] %v18074_v38  ;;  %vm2917_vm4 = vcmp.lt.s32.totalorder %v2901_v28, 16  ;;  %v2966_v48 = vshrl.u32 %v13278_v36, 16 }
  0x2d   : > { %s735_s24 = scalar_lea.vmem %s17892_s2, %s10937_s23  ;;  %s10952_s26 = sshll.u32 %s781_s16, 2  ;;  %v2983_v51 = vshll.u32 %v2945_v32, 16  ;;  %v2947_v52 = vsel %vm13280_vm0, %v2412_v43, 0  ;;  %vm13306_vm5 = vmand %vm2909_vm3, %vm2917_vm4  ;;  %vm1632_vm6 = vcmask 1040384   ;;  %vm1633_vm7 = vsmask.f32 256 }
  0x2e   : > { %v805_v13 = vld [vmem:[%s735_s24] sm:$0xf]  ;;  %s13240_s27 = scalar_lea.vmem %s17895_s5, %s10952_s26  ;;  %v13299_v50 = vrot.slane %v2980_v37, 7  ;;  %v18081_v55 = vsel %vm13306_vm5, 4294967295, %v18080_v55  ;;  %v2994_v1 = vshrl.u32 %v2947_v52, 16  ;;  %v13317_v3 = vrot.slane %v2966_v48, 7  ;;  %vm13337_vm8 = vmand %vm1632_vm6, %vm1633_vm7 }
  0x2f   : > { %v10959_v14 = vcombine.low %v804_v12, %v805_v13  ;;  %v12787_v19 = vld [vmem:[%s13240_s27] sm:$0xff]   ;;  %v12788_v39 = vld [vmem:[%s13240_s27 + $0x8] sm:$0xff]   ;;  %18082 = vst [vmem:[#allocation15_spill] sm:$0xff] %v18081_v55  ;;  %v816_v9 = vsub.s32 1, %v13263_v29  ;;  %v824_v10 = vsub.s32 3, %v13263_v29  ;;  %v18088_v18 = vmov 0 }
  0x30   : > { %v2424_v26 = vsel %vm2403_vm2, %v12787_v19, 0  ;;  %18079 = vst [vmem:[#allocation14_spill] sm:$0xff] %v13299_v50  ;;  %v2427_v54 = vsel %vm2403_vm2, %v12788_v39, 0  ;;  %18085 = vst [vmem:[#allocation18_spill] sm:$0xff] %v13317_v3  ;;  %v2985_v5 = vor.u32 %v2983_v51, %v13299_v50  ;;  %v18089_v18 = vsel %vm13337_vm8, 4294967295, %v18088_v18  ;;  %s11460_s15 = sadd.s32 4294967295, %s13197_s21 }
  0x31   : > { %10966 = vmatmul.mubr.msk.bf16.gmra.mxu0 %vm850_vm1, %v10959_v14  ;;  %10969 = vmatmul.mubr.msk.bf16.gmra.mxu1 %vm850_vm1, %v10959_v14  ;;  %v2955_v35 = vsel %vm13258_vm10, %v2424_v26, 0  ;;  %vm13287_vm1 = vmand %vm2905_vm14, %vm2913_vm15  ;;  %v13323_v6 = vsel %vm13306_vm5, %v2427_v54, 0  ;;  %18090 = vst [vmem:[#allocation21_spill] sm:$0xff] %v18089_v18  ;;  %v13341_v19 = vrot.slane %v2994_v1, 7  ;;  %v2997_v20 = vshll.u32 %v2947_v52, 16  ;;  %s10956_s16 = sshll.u32 %s13211_s29, 3 }
  0x32   : > { %v3050_v40 = vshrl.u32 %v2955_v35, 16  ;;  %v18077_v45 = vsel %vm13287_vm1, 4294967295, %v18076_v45  ;;  %v2949_v53 = vsel %vm13287_vm1, %v2415_v44, 0  ;;  %v3053_v57 = vshll.u32 %v2955_v35, 16  ;;  %18086 = vst [vmem:[#allocation19_spill] sm:$0xff] %v13323_v6  ;;  %s18459_s18 = sld [smem:[#allocation55_spill]] }
  0x33   : > { %18078 = vst [vmem:[#allocation13_spill] sm:$0xff] %v18077_v45  ;;  %v3008_v2 = vshrl.u32 %v2949_v53, 16  ;;  %18091 = vst [vmem:[#allocation22_spill] sm:$0xff] %v13341_v19  ;;  %v3011_v22 = vshll.u32 %v2949_v53, 16  ;;  %v13353_v32 = vsel %vm13337_vm8, 0, %v2985_v5  ;;  %v13356_v34 = vrot.slane %v808_v49, %v816_v9 }
  0x34   : > { %v13310_v56 = vrot.slane %v3050_v40, 7  ;;  %18093 = vst [vmem:[#allocation24_spill] sm:$0xff] %v13353_v32  ;;  %v13358_v35 = vrot.slane %v808_v49, %v824_v10  ;;  %v2999_v47 = vor.u32 %v2997_v20, %v13341_v19  ;;  %vm4714_vm14 = vsmask.f32 7424 }
  0x35   : > { %v13343_v21 = vrot.slane %v3008_v2, 7  ;;  %18094 = vst [vmem:[#allocation25_spill] sm:$0xff] %v13356_v34  ;;  %vm5073_vm15 = vcmask 1046528   ;;  %vm18044_vm3 = vsmask.f32 5376  ;;  %vm18045_vm4 = vcmask 1044480  }
  0x36   : > { %18083 = vst [vmem:[#allocation16_spill] sm:$0xff] %v13310_v56  ;;  %v3055_v7 = vor.u32 %v3053_v57, %v13310_v56  ;;  %18095 = vst [vmem:[#allocation26_spill] sm:$0xff] %v13358_v35 }
  0x37   : > { %18092 = vst [vmem:[#allocation23_spill] sm:$0xff] %v13343_v21  ;;  %v3013_v48 = vor.u32 %v3011_v22, %v13343_v21 }
  0x38   : > { %v13362_v37 = vsel %vm13337_vm8, 0, %v3055_v7 }
  0x39   : > { %18096 = vst [vmem:[#allocation27_spill] sm:$0xff] %v13362_v37  ;;  %v13395_v7 = vsel %vm13337_vm8, 0, %v3013_v48 }
  0x3a   : > { %18098 = vst [vmem:[#allocation29_spill] sm:$0xff] %v13395_v7 }
  0xe7   : > { %v904_v58 = vpop.f32.mrf.mxu0  ;;  %v957_v59 = vpop.f32.mrf.mxu1 }
  0xe8   : > { %v905_v13 = vadd.f32 %v904_v58, %v13313_v61  ;;  %v958_v14 = vadd.f32 %v957_v59, %v13315_v62 }
  0xe9   : > { %v906_v63 = vpop.f32.mrf.mxu0  ;;  %v959_v0 = vpop.f32.mrf.mxu1 }
  0xea   : > { %v13374_v54 = vadd.f32 %v906_v63, %v13356_v34  ;;  %v13377_v57 = vadd.f32 %v959_v0, %v13358_v35  ;;  %v13391_v0 = vsel %vm13337_vm8, 0, %v2999_v47 }
  0xeb   : > { %v908_v11 = vpop.f32.mrf.mxu0  ;;  %v961_v12 = vpop.f32.mrf.mxu1  ;;  %18097 = vst [vmem:[#allocation28_spill] sm:$0xff] %v13391_v0 }
  0xec   : > { %v909_v16 = vadd.f32 %v908_v11, %v13313_v61  ;;  %v962_v17 = vadd.f32 %v961_v12, %v13315_v62 }
  0xed   : > { %v910_v30 = vpop.f32.mrf.mxu0  ;;  %v963_v42 = vpop.f32.mrf.mxu1 }
  0xee   : > { %v976_v26 = vpack.c.bf16 %v909_v16, %v905_v13  ;;  %v10970_v28 = vpack.c.bf16 %v909_v16, %v909_v16  ;;  %v978_v41 = vpack.c.bf16 %v962_v17, %v958_v14  ;;  %v11006_v43 = vpack.c.bf16 %v962_v17, %v962_v17 }
  0xef   : > { %v13367_v44 = vadd.f32 %v910_v30, %v13356_v34  ;;  %v13383_v59 = vadd.f32 %v963_v42, %v13358_v35 }
  0xf0   : > { %v993_v39 = vrot.slane %v976_v26, %v13327_v8  ;;  %v1000_v40 = vrot.slane %v10970_v28, %v13327_v8  ;;  %v1676_v5 = vrot.slane %v978_v41, %v13327_v8  ;;  %v1683_v63 = vrot.slane %v11006_v43, %v13327_v8 }
  0xf2   : > { %v1001_v49 = vcombine.high %v993_v39, %v993_v39  ;;  %v1002_v51 = vcombine.high %v1000_v40, %v1000_v40  ;;  %v1009_v52 = vrot.slane %v993_v39, %v13327_v8  ;;  %v1016_v53 = vrot.slane %v1000_v40, %v13327_v8 }
  0xf3   : > { %v1684_v28 = vcombine.high %v1676_v5, %v1676_v5  ;;  %v1685_v41 = vcombine.high %v1683_v63, %v1683_v63  ;;  %v13409_v42 = vrot.slane %v1676_v5, %v13327_v8 }
  0xf4   : > { %v1023_v60 = vrot.slane %v1001_v49, %v13327_v8  ;;  %v1030_v1 = vrot.slane %v1002_v51, %v13327_v8  ;;  %v1031_v2 = vcombine.high %v1009_v52, %v1009_v52  ;;  %v1032_v10 = vcombine.high %v1016_v53, %v1016_v53 }
  0xf5   : > { %v1085_v14 = vunpack.i.h.s16 %v1009_v52  ;;  %v1093_v26 = vunpack.i.h.s16 %v1016_v53  ;;  %v10974_v48 = vpack.i.b16 %v1009_v52, %v1009_v52  ;;  %v13412_v49 = vrot.slane %v1683_v63, %v13327_v8 }
  0xf6   : > { %v1033_v11 = vcombine.high %v1023_v60, %v1023_v60  ;;  %v1034_v12 = vcombine.high %v1030_v1, %v1030_v1  ;;  %v1087_v16 = vunpack.i.h.s16 %v1023_v60  ;;  %v1089_v22 = vunpack.i.h.s16 %v1031_v2 }
  0xf7   : > { %v1095_v40 = vunpack.i.h.s16 %v1030_v1  ;;  %v1097_v43 = vunpack.i.h.s16 %v1032_v10  ;;  %v13414_v51 = vpack.i.b16 %v1085_v14, %v1085_v14  ;;  %v10975_v33 = vpack.i.b16 %v1023_v60, %v1023_v60 }
  0xf8   : > { %v1091_v39 = vunpack.i.h.s16 %v1033_v11  ;;  %v1099_v47 = vunpack.i.h.s16 %v1034_v12  ;;  %v13416_v4 = vpack.i.b16 %v1087_v16, %v1087_v16  ;;  %v10978_v25 = vpack.i.b16 %v1016_v53, %v1016_v53 }
  0xf9   : > { %v10976_v9 = vpack.i.b16 %v1031_v2, %v1031_v2  ;;  %v13418_v23 = vpack.i.b16 %v1089_v22, %v1089_v22  ;;  %v10977_v58 = vpack.i.b16 %v1033_v11, %v1033_v11  ;;  %v13420_v30 = vpack.i.b16 %v1093_v26, %v1093_v26 }
  0xfa   : > { %v13422_v5 = vpack.i.b16 %v1091_v39, %v1091_v39  ;;  %v10979_v20 = vpack.i.b16 %v1030_v1, %v1030_v1  ;;  %v13424_v17 = vpack.i.b16 %v1095_v40, %v1095_v40  ;;  %v10980_v52 = vpack.i.b16 %v1032_v10, %v1032_v10 }
  0xfb   : > { %v13426_v63 = vpack.i.b16 %v1097_v43, %v1097_v43  ;;  %v10981_v14 = vpack.i.b16 %v1034_v12, %v1034_v12  ;;  %v13428_v13 = vpack.i.b16 %v1099_v47, %v1099_v47  ;;  %v13431_v60 = vrot.slane %v10974_v48, %v13292_v46 }
  0xfc   : > { %v13436_v2 = vrot.slane %v10975_v33, %v13292_v46  ;;  %v1706_v11 = vrot.slane %v1684_v28, %v13327_v8  ;;  %v13440_v1 = vrot.slane %v1685_v41, %v13327_v8  ;;  %v13445_v12 = vrot.slane %v10976_v9, %v13292_v46 }
  0xfd   : > { %v1714_v22 = vcombine.high %v13409_v42, %v13409_v42  ;;  %v13452_v33 = vrot.slane %v10977_v58, %v13292_v46  ;;  %v13458_v28 = vcombine.high %v13412_v49, %v13412_v49  ;;  %v13461_v9 = vrot.slane %v10978_v25, %v13292_v46 }
  0xfe   : > { %v1716_v39 = vcombine.high %v1706_v11, %v1706_v11  ;;  %v13467_v41 = vcombine.high %v13440_v1, %v13440_v1  ;;  %v1768_v58 = vunpack.i.h.s16 %v13409_v42  ;;  %v13471_v43 = vrot.slane %v10979_v20, %v13292_v46 }
  0xff   : > { %v1770_v48 = vunpack.i.h.s16 %v1706_v11  ;;  %v1772_v26 = vunpack.i.h.s16 %v1714_v22  ;;  %v13476_v25 = vrot.slane %v10980_v52, %v13292_v46  ;;  %v1776_v10 = vunpack.i.h.s16 %v13412_v49 }
 0x100   : > { %v1774_v16 = vunpack.i.h.s16 %v1716_v39  ;;  %v13482_v53 = vrot.slane %v10981_v14, %v13292_v46  ;;  %v1778_v29 = vunpack.i.h.s16 %v13440_v1  ;;  %v1780_v47 = vunpack.i.h.s16 %v13458_v28 }
 0x101   : > { %v1782_v56 = vunpack.i.h.s16 %v13467_v41  ;;  %v11010_v52 = vpack.i.b16 %v13409_v42, %v13409_v42  ;;  %v13491_v6 = vpack.i.b16 %v1768_v58, %v1768_v58  ;;  %v11011_v40 = vpack.i.b16 %v1706_v11, %v1706_v11 }
 0x102   : > { %v13493_v55 = vpack.i.b16 %v1770_v48, %v1770_v48  ;;  %v11012_v36 = vpack.i.b16 %v1714_v22, %v1714_v22  ;;  %v13495_v14 = vpack.i.b16 %v1772_v26, %v1772_v26  ;;  %v11013_v37 = vpack.i.b16 %v1716_v39, %v1716_v39 }
 0x103   : > { %18099 = vst [vmem:[#allocation30_spill] sm:$0xff] %v13491_v6  ;;  %v13497_v27 = vpack.i.b16 %v1774_v16, %v1774_v16  ;;  %v13501_v15 = vpack.i.b16 %v1776_v10, %v1776_v10  ;;  %v13505_v42 = vpack.i.b16 %v1778_v29, %v1778_v29  ;;  %v13509_v58 = vpack.i.b16 %v1780_v47, %v1780_v47 }
 0x104   : > { %18100 = vst [vmem:[#allocation31_spill] sm:$0xff] %v13493_v55  ;;  %18101 = vst [vmem:[#allocation32_spill] sm:$0xff] %v13495_v14  ;;  %v13513_v16 = vpack.i.b16 %v1782_v56, %v1782_v56  ;;  %v13516_v26 = vrot.slane %v11010_v52, %v13292_v46  ;;  %v13521_v39 = vrot.slane %v11011_v40, %v13292_v46 }
 0x105   : > { %18102 = vst [vmem:[#allocation33_spill] sm:$0xff] %v13497_v27  ;;  %v18105_v29 = vpack.c.bf16 %v13367_v44, %v13374_v54  ;;  %v18106_v48 = vpack.c.bf16 %v13367_v44, %v13367_v44  ;;  %v18107_v52 = vpack.c.bf16 %v13383_v59, %v13377_v57  ;;  %v18108_v40 = vpack.c.bf16 %v13383_v59, %v13383_v59 }
 0x106   : > { %18103 = vst [vmem:[#allocation34_spill] sm:$0xff] %v13516_v26  ;;  %18104 = vst [vmem:[#allocation35_spill] sm:$0xff] %v13521_v39 }
 0x107   : > { %v1125_v47 = vrot.slane %v18105_v29, %v13327_v8  ;;  %v1132_v56 = vrot.slane %v18106_v48, %v13327_v8  ;;  %v13535_v22 = vrot.slane %v18107_v52, %v13327_v8  ;;  %v13541_v10 = vrot.slane %v18108_v40, %v13327_v8 }
 0x108   : > { %v13546_v29 = vrot.slane %v11012_v36, %v13292_v46  ;;  %v13551_v48 = vrot.slane %v11013_v37, %v13292_v46 }
 0x109   : > { %v1133_v57 = vcombine.high %v1125_v47, %v1125_v47  ;;  %v1134_v52 = vcombine.high %v1132_v56, %v1132_v56  ;;  %v1141_v11 = vrot.slane %v1125_v47, %v13327_v8  ;;  %v1148_v59 = vrot.slane %v1132_v56, %v13327_v8 }
 0x10a   : > { %18109 = vst [vmem:[#allocation36_spill] sm:$0xff] %v13546_v29  ;;  %18110 = vst [vmem:[#allocation37_spill] sm:$0xff] %v13551_v48  ;;  %v13563_v44 = vrot.slane %v13535_v22, %v13327_v8 }
 0x10b   : > { %v1155_v37 = vrot.slane %v1133_v57, %v13327_v8  ;;  %v1162_v32 = vrot.slane %v1134_v52, %v13327_v8  ;;  %v1163_v47 = vcombine.high %v1141_v11, %v1141_v11  ;;  %v1164_v20 = vcombine.high %v1148_v59, %v1148_v59 }
 0x10c   : > { %v1217_v56 = vunpack.i.h.s16 %v1141_v11  ;;  %v1225_v7 = vunpack.i.h.s16 %v1148_v59  ;;  %v10990_v50 = vpack.i.b16 %v1141_v11, %v1141_v11  ;;  %v10994_v40 = vpack.i.b16 %v1148_v59, %v1148_v59 }
 0x10d   : > { %v1165_v21 = vcombine.high %v1155_v37, %v1155_v37  ;;  %v1166_v45 = vcombine.high %v1162_v32, %v1162_v32  ;;  %v1219_v54 = vunpack.i.h.s16 %v1155_v37  ;;  %v1221_v24 = vunpack.i.h.s16 %v1163_v47 }
 0x10e   : > { %v1227_v35 = vunpack.i.h.s16 %v1162_v32  ;;  %v1229_v36 = vunpack.i.h.s16 %v1164_v20  ;;  %v1441_v34 = vpack.i.b16 %v1217_v56, %v1217_v56  ;;  %v10991_v3 = vpack.i.b16 %v1155_v37, %v1155_v37 }
 0x10f   : > { %v1223_v27 = vunpack.i.h.s16 %v1165_v21  ;;  %v1231_v48 = vunpack.i.h.s16 %v1166_v45  ;;  %v1443_v14 = vpack.i.b16 %v1219_v54, %v1219_v54  ;;  %v10992_v57 = vpack.i.b16 %v1163_v47, %v1163_v47 }
 0x110   : > { %v1445_v29 = vpack.i.b16 %v1221_v24, %v1221_v24  ;;  %v10993_v52 = vpack.i.b16 %v1165_v21, %v1165_v21  ;;  %v1449_v55 = vpack.i.b16 %v1225_v7, %v1225_v7  ;;  %v10995_v39 = vpack.i.b16 %v1162_v32, %v1162_v32 }
 0x111   : > { %v1447_v6 = vpack.i.b16 %v1223_v27, %v1223_v27  ;;  %v1451_v26 = vpack.i.b16 %v1227_v35, %v1227_v35  ;;  %v10996_v11 = vpack.i.b16 %v1164_v20, %v1164_v20  ;;  %v1453_v59 = vpack.i.b16 %v1229_v36, %v1229_v36 }
 0x112   : > { %v10997_v0 = vpack.i.b16 %v1166_v45, %v1166_v45  ;;  %v1455_v19 = vpack.i.b16 %v1231_v48, %v1231_v48  ;;  %v1475_v38 = vrot.slane %v10990_v50, %v13292_v46  ;;  %v1479_v62 = vrot.slane %v1441_v34, %v13292_v46 }
 0x113   : > { %v1483_v37 = vrot.slane %v10991_v3, %v13292_v46  ;;  %v1487_v56 = vrot.slane %v1443_v14, %v13292_v46  ;;  %v1491_v54 = vrot.slane %v10992_v57, %v13292_v46  ;;  %v1495_v24 = vrot.slane %v1445_v29, %v13292_v46 }
 0x114   : > { %v1499_v21 = vrot.slane %v10993_v52, %v13292_v46  ;;  %v1503_v27 = vrot.slane %v1447_v6, %v13292_v46  ;;  %v1507_v32 = vrot.slane %v10994_v40, %v13292_v46  ;;  %v1511_v45 = vrot.slane %v1449_v55, %v13292_v46 }
 0x115   : > { %v1515_v50 = vrot.slane %v10995_v39, %v13292_v46  ;;  %v1519_v34 = vrot.slane %v1451_v26, %v13292_v46  ;;  %v1523_v3 = vrot.slane %v10996_v11, %v13292_v46  ;;  %v1527_v35 = vrot.slane %v1453_v59, %v13292_v46 }
 0x116   : > { %v1531_v7 = vrot.slane %v10997_v0, %v13292_v46  ;;  %v1535_v20 = vrot.slane %v1455_v19, %v13292_v46  ;;  %v1635_v6 = vsel %vm13337_vm8, %v13431_v60, %v1475_v38  ;;  %v18111_v14 = vrot.slane %v13414_v51, %v13292_v46 }
 0x117   : > { %v1637_v26 = vsel %vm13337_vm8, %v13436_v2, %v1483_v37  ;;  %v18112_v39 = vrot.slane %v13416_v4, %v13292_v46  ;;  %v1639_v38 = vsel %vm13337_vm8, %v13445_v12, %v1491_v54  ;;  %v18113_v0 = vrot.slane %v13418_v23, %v13292_v46 }
 0x118   : > { %v1636_v55 = vsel %vm13337_vm8, %v18111_v14, %v1479_v62  ;;  %v1641_v51 = vsel %vm13337_vm8, %v13452_v33, %v1499_v21  ;;  %v18114_v4 = vrot.slane %v13422_v5, %v13292_v46  ;;  %v1643_v2 = vsel %vm13337_vm8, %v13461_v9, %v1507_v32 }
 0x119   : > { %v1638_v19 = vsel %vm13337_vm8, %v18112_v39, %v1487_v56  ;;  %v1640_v62 = vsel %vm13337_vm8, %v18113_v0, %v1495_v24  ;;  %v18115_v23 = vrot.slane %v13420_v30, %v13292_v46  ;;  %v1645_v33 = vsel %vm13337_vm8, %v13471_v43, %v1515_v50 }
 0x11a   : > { %v1642_v60 = vsel %vm13337_vm8, %v18114_v4, %v1503_v27  ;;  %v18116_v5 = vrot.slane %v13424_v17, %v13292_v46  ;;  %v1647_v9 = vsel %vm13337_vm8, %v13476_v25, %v1523_v3  ;;  %v18117_v30 = vrot.slane %v13426_v63, %v13292_v46  ;;  %v12793_v25 = vld [vmem:[%s17898_s8 + $0x78] sm:$0xff]  }
 0x11b   : > { %v1644_v12 = vsel %vm13337_vm8, %v18115_v23, %v1511_v45  ;;  %v1649_v43 = vsel %vm13337_vm8, %v13482_v53, %v1531_v7  ;;  %v18118_v17 = vrot.slane %v13428_v13, %v13292_v46  ;;  %v2493_v36 = vcombine.low %v1635_v6, %v1636_v55  ;;  %v12794_v53 = vld [vmem:[%s17898_s8 + $0x38] sm:$0xff]   ;;  %11711 = vmatprep.subr.bf16.mxu0 %v12793_v25  ;;  %v914_v25 = vpop.f32.mrf.mxu0 }
 0x11c   : > { %v1646_v29 = vsel %vm13337_vm8, %v18116_v5, %v1519_v34  ;;  %v1648_v48 = vsel %vm13337_vm8, %v18117_v30, %v1527_v35  ;;  %v2494_v47 = vcombine.low %v1637_v26, %v1638_v19  ;;  %v2495_v63 = vcombine.low %v1639_v38, %v1640_v62  ;;  %11712 = vmatpush3.bf16.msra.mxu0 %v12794_v53  ;;  %v12795_v35 = vld [vmem:[%s17898_s8 + $0x70] sm:$0xff]   ;;  %v12800_v5 = vld [vmem:[%s17898_s8 + $0xb8] sm:$0xff]  }
 0x11d   : > { %v1650_v40 = vsel %vm13337_vm8, %v18118_v17, %v1535_v20  ;;  %v2496_v57 = vcombine.low %v1641_v51, %v1642_v60  ;;  %v2591_v52 = vcombine.low %v1643_v2, %v1644_v12  ;;  %v2592_v11 = vcombine.low %v1645_v33, %v1646_v29  ;;  %11713 = vmatprep.subr.bf16.mxu0 %v12795_v35  ;;  %v12797_v33 = vld [vmem:[%s17898_s8 + $0x68] sm:$0xff]   ;;  %v18126_v53 = vld [vmem:[#allocation17_spill] sm:$0xff]  ;;  %v12803_v35 = vld [vmem:[%s17898_s8 + $0x20] sm:$0xff]  }
 0x11e   : > { %v2503_v59 = vrot.slane %v2493_v36, %v13327_v8  ;;  %v2510_v13 = vrot.slane %v2494_v47, %v13327_v8  ;;  %v2593_v37 = vcombine.low %v1647_v9, %v1648_v48  ;;  %v2594_v56 = vcombine.low %v1649_v43, %v1650_v40  ;;  %v12799_v17 = vld [vmem:[%s17898_s8 + $0x28] sm:$0xff]  }
 0x11f   : > { %v2517_v54 = vrot.slane %v2495_v63, %v13327_v8  ;;  %v2524_v24 = vrot.slane %v2496_v57, %v13327_v8  ;;  %v2601_v21 = vrot.slane %v2591_v52, %v13327_v8  ;;  %v2608_v27 = vrot.slane %v2592_v11, %v13327_v8  ;;  %v967_v63 = vpop.f32.mrf.mxu1 }
 0x120   : > { %v2525_v32 = vcombine.low %v2503_v59, %v2510_v13  ;;  %v2615_v45 = vrot.slane %v2593_v37, %v13327_v8  ;;  %v2622_v50 = vrot.slane %v2594_v56, %v13327_v8  ;;  %v18119_v34 = vcombine.high %v13535_v22, %v13535_v22  ;;  %v12796_v22 = vld [vmem:[%s17898_s8 + $0x30] sm:$0xff]  }
 0x121   : > { %v18120_v7 = vpack.i.b16 %v13412_v49, %v13412_v49  ;;  %v2526_v6 = vcombine.low %v2517_v54, %v2524_v24  ;;  %v2623_v14 = vcombine.low %v2601_v21, %v2608_v27  ;;  %v13678_v55 = vrot.slane %v13541_v10, %v13327_v8  ;;  %11714 = vmatpush3.bf16.msra.mxu0 %v12796_v22  ;;  %v12802_v13 = vld [vmem:[%s17898_s8 + $0xf0] sm:$0xff]   ;;  %v12801_v21 = vld [vmem:[%s17898_s8 + $0x60] sm:$0xff]  }
 0x122   : > { %v13665_v3 = vrot.slane %v18119_v34, %v13327_v8  ;;  %v2002_v26 = vrot.slane %v13501_v15, %v13292_v46  ;;  %v18121_v39 = vpack.i.b16 %v13440_v1, %v13440_v1  ;;  %v2624_v19 = vcombine.low %v2615_v45, %v2622_v50  ;;  %11715 = vmatprep.subr.bf16.mxu0 %v12797_v33  ;;  %v12804_v27 = vld [vmem:[%s17898_s8 + $0xb0] sm:$0xff]  }
 0x123   : > { %v13674_v20 = vrot.slane %v18120_v7, %v13292_v46  ;;  %v18122_v38 = vcombine.high %v13541_v10, %v13541_v10  ;;  %v2010_v62 = vrot.slane %v13505_v42, %v13292_v46  ;;  %v18123_v51 = vpack.i.b16 %v13458_v28, %v13458_v28  ;;  %v12798_v10 = vld [vmem:[%s17898_s8 + $0xf8] sm:$0xff]   ;;  %v12819_v42 = vld [vmem:[%s17898_s8] sm:$0xff]  }
 0x124   : > { %v13689_v49 = vrot.slane %v18121_v39, %v13292_v46  ;;  %v2533_v1 = vrot.slane %v2525_v32, %v13327_v8  ;;  %v2540_v60 = vrot.slane %v2526_v6, %v13327_v8  ;;  %v2631_v2 = vrot.slane %v2623_v14, %v13327_v8  ;;  %11769 = vmatprep.subr.bf16.mxu1 %v12798_v10 }
 0x125   : > { %v13695_v0 = vrot.slane %v18122_v38, %v13327_v8  ;;  %v13703_v4 = vrot.slane %v18123_v51, %v13292_v46  ;;  %v2638_v23 = vrot.slane %v2624_v19, %v13327_v8  ;;  %v13714_v12 = vcombine.high %v13563_v44, %v13563_v44  ;;  %11770 = vmatpush3.bf16.msra.mxu1 %v12800_v5 }
 0x126   : > { %v13718_v28 = vcombine.high %v13665_v3, %v13665_v3  ;;  %v2018_v29 = vrot.slane %v13509_v58, %v13292_v46  ;;  %v18124_v9 = vpack.i.b16 %v13467_v41, %v13467_v41  ;;  %v2541_v48 = vcombine.low %v2533_v1, %v2540_v60  ;;  %11716 = vmatpush3.bf16.msra.mxu0 %v12799_v17  ;;  %v12806_v1 = vld [vmem:[%s17898_s8 + $0xe8] sm:$0xff]  }
 0x127   : > { %v13736_v43 = vcombine.high %v13678_v55, %v13678_v55  ;;  %v2026_v40 = vrot.slane %v13513_v16, %v13292_v46  ;;  %v2639_v36 = vcombine.low %v2631_v2, %v2638_v23  ;;  %v13745_v47 = vcombine.high %v13695_v0, %v13695_v0  ;;  %11771 = vmatprep.subr.bf16.mxu1 %v12802_v13  ;;  %v12805_v2 = vld [vmem:[%s17898_s8 + $0x58] sm:$0xff]   ;;  %v12808_v23 = vld [vmem:[%s17898_s8 + $0xa8] sm:$0xff]  }
 0x128   : > { %v13732_v30 = vrot.slane %v18124_v9, %v13292_v46  ;;  %v1900_v41 = vunpack.i.h.s16 %v13563_v44  ;;  %v13750_v57 = vsel %vm13266_vm11, %v2541_v48, 0  ;;  %v1902_v52 = vunpack.i.h.s16 %v13665_v3  ;;  %11717 = vmatprep.subr.bf16.mxu0 %v12801_v21 }
 0x129   : > { %18125 = vst [vmem:[#allocation38_spill] sm:$0xff] %v13750_v57  ;;  %v13754_v11 = vadd.f32 %v914_v25, %v13313_v61  ;;  %v13757_v59 = vadd.f32 %v967_v63, %v18126_v53  ;;  %v2946_v56 = vsel %vm13280_vm0, %v2639_v36, 0  ;;  %v1904_v31 = vunpack.i.h.s16 %v13714_v12  ;;  %11772 = vmatpush3.bf16.msra.mxu1 %v12804_v27 }
 0x12a   : > { %v1906_v54 = vunpack.i.h.s16 %v13718_v28  ;;  %v1908_v24 = vunpack.i.h.s16 %v13678_v55  ;;  %v2959_v32 = vshrl.u32 %v13750_v57, 16  ;;  %v2987_v45 = vshrl.u32 %v2946_v56, 16  ;;  %11718 = vmatpush3.bf16.msra.mxu0 %v12803_v35  ;;  %11773 = vmatprep.subr.bf16.mxu1 %v12806_v1 }
 0x12b   : > { %v1910_v50 = vunpack.i.h.s16 %v13695_v0  ;;  %v1912_v34 = vunpack.i.h.s16 %v13736_v43  ;;  %v1914_v7 = vunpack.i.h.s16 %v13745_v47  ;;  %v11026_v6 = vpack.i.b16 %v13563_v44, %v13563_v44  ;;  %11719 = vmatprep.subr.bf16.mxu0 %v12805_v2 }
 0x12c   : > { %v2124_v14 = vpack.i.b16 %v1900_v41, %v1900_v41  ;;  %v11027_v22 = vpack.i.b16 %v13665_v3, %v13665_v3  ;;  %v2989_v39 = vrot.slane %v2987_v45, 7  ;;  %v2990_v19 = vshll.u32 %v2946_v56, 16 }
 0x12d   : > { %v2126_v38 = vpack.i.b16 %v1902_v52, %v1902_v52  ;;  %v11028_v51 = vpack.i.b16 %v13714_v12, %v13714_v12  ;;  %v2128_v60 = vpack.i.b16 %v1904_v31, %v1904_v31  ;;  %v11029_v44 = vpack.i.b16 %v13718_v28, %v13718_v28  ;;  %11774 = vmatpush3.bf16.msra.mxu1 %v12808_v23  ;;  %v18135_v23 = vld [vmem:[#allocation35_spill] sm:$0xff] }
 0x12e   : > { %v2130_v10 = vpack.i.b16 %v1906_v54, %v1906_v54  ;;  %v11030_v3 = vpack.i.b16 %v13678_v55, %v13678_v55  ;;  %v13799_v12 = vrot.slane %v2959_v32, 7  ;;  %v2992_v33 = vor.u32 %v2990_v19, %v2989_v39  ;;  %v12807_v55 = vld [vmem:[%s17898_s8 + $0x18] sm:$0xff]   ;;  %v12809_v54 = vld [vmem:[%s17898_s8 + $0x50] sm:$0xff]  }
 0x12f   : > { %v3122_v5 = vsel %vm13337_vm8, %v2989_v39, 0  ;;  %v2132_v9 = vpack.i.b16 %v1908_v24, %v1908_v24  ;;  %v11031_v28 = vpack.i.b16 %v13695_v0, %v13695_v0  ;;  %v2134_v48 = vpack.i.b16 %v1910_v50, %v1910_v50  ;;  %11720 = vmatpush3.bf16.msra.mxu0 %v12807_v55  ;;  %v12810_v0 = vld [vmem:[%s17898_s8 + $0xe0] sm:$0xff]   ;;  %v12811_v50 = vld [vmem:[%s17898_s8 + $0x10] sm:$0xff]  }
 0x130   : > { %18128 = vst [vmem:[#allocation17_spill] sm:$0xff] %v13799_v12  ;;  %v11032_v17 = vpack.i.b16 %v13736_v43, %v13736_v43  ;;  %v2136_v36 = vpack.i.b16 %v1912_v34, %v1912_v34  ;;  %v13812_v41 = vsel %vm13337_vm8, 0, %v2992_v33  ;;  %v11033_v25 = vpack.i.b16 %v13745_v47, %v13745_v47  ;;  %v18129_v43 = vld [vmem:[#allocation22_spill] sm:$0xff]  ;;  %v12812_v24 = vld [vmem:[%s17898_s8 + $0xa0] sm:$0xff]   ;;  %11775 = vmatprep.subr.bf16.mxu1 %v12810_v0  ;;  %v18131_v34 = vld [vmem:[#allocation28_spill] sm:$0xff] }
 0x131   : > { %v2138_v63 = vpack.i.b16 %v1914_v7, %v1914_v7  ;;  %v2158_v52 = vrot.slane %v11026_v6, %v13292_v46  ;;  %v18130_v13 = vsel %vm13337_vm8, %v18129_v43, 0  ;;  %v2162_v56 = vrot.slane %v2124_v14, %v13292_v46  ;;  %11721 = vmatprep.subr.bf16.mxu0 %v12809_v54  ;;  %11776 = vmatpush3.bf16.msra.mxu1 %v12812_v24  ;;  %v18136_v55 = vld [vmem:[#allocation31_spill] sm:$0xff]  ;;  %v18141_v0 = vld [vmem:[#allocation37_spill] sm:$0xff] }
 0x132   : > { %v13824_v37 = vcombine.low %v3122_v5, %v18130_v13  ;;  %v2166_v31 = vrot.slane %v11027_v22, %v13292_v46  ;;  %v2170_v47 = vrot.slane %v2126_v38, %v13292_v46  ;;  %v2174_v21 = vrot.slane %v11028_v51, %v13292_v46  ;;  %v12814_v51 = vld [vmem:[%s17898_s8 + $0xd8] sm:$0xff]   ;;  %v12813_v5 = vld [vmem:[%s17898_s8 + $0x48] sm:$0xff]  }
 0x133   : > { %v2178_v27 = vrot.slane %v2128_v60, %v13292_v46  ;;  %v2182_v32 = vrot.slane %v11029_v44, %v13292_v46  ;;  %v2186_v45 = vrot.slane %v2130_v10, %v13292_v46  ;;  %v3296_v35 = vcombine.low %v13812_v41, %v18131_v34  ;;  %11722 = vmatpush3.bf16.msra.mxu0 %v12811_v50  ;;  %v18132_v60 = vld [vmem:[#allocation34_spill] sm:$0xff]  ;;  %v12815_v13 = vld [vmem:[%s17898_s8 + $0x8] sm:$0xff]  }
 0x134   : > { %v2190_v7 = vrot.slane %v11030_v3, %v13292_v46  ;;  %v2194_v6 = vrot.slane %v2132_v9, %v13292_v46  ;;  %v2198_v14 = vrot.slane %v11031_v28, %v13292_v46  ;;  %v2202_v22 = vrot.slane %v2134_v48, %v13292_v46  ;;  %v18133_v10 = vld [vmem:[#allocation30_spill] sm:$0xff]  ;;  %11777 = vmatprep.subr.bf16.mxu1 %v12814_v51 }
 0x135   : > { %v2206_v39 = vrot.slane %v11032_v17, %v13292_v46  ;;  %v2210_v19 = vrot.slane %v2136_v36, %v13292_v46  ;;  %v2214_v38 = vrot.slane %v11033_v25, %v13292_v46  ;;  %v2218_v1 = vrot.slane %v2138_v63, %v13292_v46  ;;  %v12816_v9 = vld [vmem:[%s17898_s8 + $0x98] sm:$0xff]   ;;  %v18138_v17 = vld [vmem:[#allocation36_spill] sm:$0xff]  ;;  %11723 = vmatprep.subr.bf16.mxu0 %v12813_v5 }
 0x136   : > { %v2315_v44 = vsel %vm13337_vm8, %v18132_v60, %v2158_v52  ;;  %v18134_v3 = vrot.slane %v18133_v10, %v13292_v46  ;;  %v2317_v33 = vsel %vm13337_vm8, %v18135_v23, %v2166_v31  ;;  %v18137_v28 = vrot.slane %v18136_v55, %v13292_v46  ;;  %v18139_v25 = vld [vmem:[#allocation32_spill] sm:$0xff]  ;;  %11778 = vmatpush3.bf16.msra.mxu1 %v12816_v9 }
 0x137   : > { %v2319_v36 = vsel %vm13337_vm8, %v18138_v17, %v2174_v21  ;;  %v18140_v63 = vrot.slane %v18139_v25, %v13292_v46  ;;  %v2321_v43 = vsel %vm13337_vm8, %v18141_v0, %v2182_v32  ;;  %v2323_v54 = vsel %vm13337_vm8, %v13674_v20, %v2190_v7  ;;  %v12818_v32 = vld [vmem:[%s17898_s8 + $0xd0] sm:$0xff]   ;;  %11724 = vmatpush3.bf16.msra.mxu0 %v12815_v13 }
 0x138   : > { %v2316_v2 = vsel %vm13337_vm8, %v18134_v3, %v2162_v56  ;;  %v2318_v48 = vsel %vm13337_vm8, %v18137_v28, %v2170_v47  ;;  %v18142_v56 = vld [vmem:[#allocation33_spill] sm:$0xff]  ;;  %v2324_v24 = vsel %vm13337_vm8, %v2002_v26, %v2194_v6  ;;  %v2325_v21 = vsel %vm13337_vm8, %v13689_v49, %v2198_v14  ;;  %11779 = vmatprep.subr.bf16.mxu1 %v12818_v32 }
 0x139   : > { %v2320_v52 = vsel %vm13337_vm8, %v18140_v63, %v2178_v27  ;;  %v18143_v31 = vrot.slane %v18142_v56, %v13292_v46  ;;  %v12817_v27 = vld [vmem:[%s17898_s8 + $0x40] sm:$0xff]   ;;  %v2326_v15 = vsel %vm13337_vm8, %v2010_v62, %v2202_v22  ;;  %v2327_v20 = vsel %vm13337_vm8, %v13703_v4, %v2206_v39  ;;  %v969_v22 = vpop.f32.mrf.mxu1 }
 0x13a   : > { %v2328_v26 = vsel %vm13337_vm8, %v2018_v29, %v2210_v19  ;;  %v2329_v49 = vsel %vm13337_vm8, %v13732_v30, %v2214_v38  ;;  %v2330_v62 = vsel %vm13337_vm8, %v2026_v40, %v2218_v1  ;;  %v2542_v58 = vcombine.low %v2315_v44, %v2316_v2  ;;  %v12820_v29 = vld [vmem:[%s17898_s8 + $0x90] sm:$0xff]   ;;  %11725 = vmatprep.subr.bf16.mxu0 %v12817_v27 }
 0x13b   : > { %v2322_v47 = vsel %vm13337_vm8, %v18143_v31, %v2186_v45  ;;  %v916_v45 = vpop.f32.mrf.mxu0  ;;  %v2543_v4 = vcombine.low %v2317_v33, %v2318_v48  ;;  %v2544_v50 = vcombine.low %v2319_v36, %v2320_v52  ;;  %v2640_v7 = vcombine.low %v2323_v54, %v2324_v24  ;;  %11726 = vmatpush3.bf16.msra.mxu0 %v12819_v42  ;;  %v12821_v33 = vld [vmem:[%s17898_s8 + $0xc8] sm:$0xff]   ;;  %v971_v48 = vpop.f32.mrf.mxu1  ;;  %v18150_v24 = vld [vmem:[#allocation26_spill] sm:$0xff] }
 0x13c   : > { %v2545_v30 = vcombine.low %v2321_v43, %v2322_v47  ;;  %v2641_v6 = vcombine.low %v2325_v21, %v2326_v15  ;;  %v2642_v14 = vcombine.low %v2327_v20, %v2328_v26  ;;  %v3297_v16 = vcombine.high %v13812_v41, %v18131_v34  ;;  %11780 = vmatpush3.bf16.msra.mxu1 %v12820_v29  ;;  %v12822_v41 = vld [vmem:[%s17898_s8 + $0x178] sm:$0xff]   ;;  %v18149_v47 = vld [vmem:[#allocation25_spill] sm:$0xff] }
 0x13d   : > { %v2552_v39 = vrot.slane %v2542_v58, %v13327_v8  ;;  %v2559_v40 = vrot.slane %v2543_v4, %v13327_v8  ;;  %v2643_v19 = vcombine.low %v2329_v49, %v2330_v62  ;;  %v2566_v38 = vrot.slane %v2544_v50, %v13327_v8  ;;  %v918_v44 = vpop.f32.mrf.mxu0  ;;  %11781 = vmatprep.subr.bf16.mxu1 %v12821_v33  ;;  %v18146_v34 = vld [vmem:[#allocation18_spill] sm:$0xff]  ;;  %v12823_v33 = vld [vmem:[%s17898_s8 + $0x88] sm:$0xff]  }
 0x13e   : > { %v2573_v51 = vrot.slane %v2545_v30, %v13327_v8  ;;  %v2650_v1 = vrot.slane %v2640_v7, %v13327_v8  ;;  %v2657_v60 = vrot.slane %v2641_v6, %v13327_v8  ;;  %v2664_v3 = vrot.slane %v2642_v14, %v13327_v8  ;;  %11827 = vmatprep.subr.bf16.mxu0 %v12822_v41  ;;  %v12791_v7 = vld [vmem:[%s13220_s19 + $0x10] sm:$0xff]   ;;  %v18159_v41 = vld [vmem:[#allocation14_spill] sm:$0xff] }
 0x13f   : > { %v2574_v10 = vcombine.low %v2552_v39, %v2559_v40  ;;  %v2671_v2 = vrot.slane %v2643_v19, %v13327_v8  ;;  %v919_v23 = vadd.f32 %v918_v44, %v13313_v61  ;;  %v3118_v5 = vsel %vm13337_vm8, %v13799_v12, 0  ;;  %v920_v26 = vpop.f32.mrf.mxu0 }
 0x140   : > { %v3353_v9 = vrot.slane %v13824_v37, %v13327_v8  ;;  %v2575_v55 = vcombine.low %v2566_v38, %v2573_v51  ;;  %v2672_v28 = vcombine.low %v2650_v1, %v2657_v60  ;;  %v972_v61 = vadd.f32 %v971_v48, %v18126_v53  ;;  %11782 = vmatpush3.bf16.msra.mxu1 %v12823_v33 }
 0x141   : > { %v2673_v17 = vcombine.low %v2664_v3, %v2671_v2  ;;  %v980_v36 = vpack.c.bf16 %v919_v23, %v13754_v11  ;;  %v10971_v25 = vpack.c.bf16 %v919_v23, %v919_v23  ;;  %v13965_v63 = vrot.slane %v3296_v35, %v13327_v8 }
 0x142   : > { %v13968_v52 = vrot.slane %v3297_v16, %v13327_v8  ;;  %v2582_v37 = vrot.slane %v2574_v10, %v13327_v8  ;;  %v2589_v0 = vrot.slane %v2575_v55, %v13327_v8  ;;  %v2680_v43 = vrot.slane %v2672_v28, %v13327_v8 }
 0x143   : > { %18144 = vst [vmem:[#allocation12_spill] sm:$0xff] %v13965_v63  ;;  %v2687_v11 = vrot.slane %v2673_v17, %v13327_v8  ;;  %v1042_v53 = vrot.slane %v980_v36, %v13327_v8  ;;  %v1049_v13 = vrot.slane %v10971_v25, %v13327_v8  ;;  %v18147_v35 = vsel %vm13337_vm8, %v18146_v34, 0 }
 0x144   : > { %18145 = vst [vmem:[#allocation22_spill] sm:$0xff] %v13968_v52  ;;  %v13983_v56 = vcombine.low %v3118_v5, %v18147_v35  ;;  %v2590_v31 = vcombine.low %v2582_v37, %v2589_v0  ;;  %v13986_v54 = vadd.f32 %v916_v45, %v18149_v47  ;;  %v13989_v21 = vadd.f32 %v969_v22, %v18150_v24  ;;  %v18156_v37 = vld [vmem:[#allocation23_spill] sm:$0xff] }
 0x145   : > { %v2688_v27 = vcombine.low %v2680_v43, %v2687_v11  ;;  %v1050_v32 = vcombine.high %v1042_v53, %v1042_v53  ;;  %v982_v15 = vpack.c.bf16 %v972_v61, %v13757_v59  ;;  %v11007_v20 = vpack.c.bf16 %v972_v61, %v972_v61 }
 0x146   : > { %18148 = vst [vmem:[#allocation28_spill] sm:$0xff] %v13983_v56  ;;  %v13995_v42 = vrot.slane %v3353_v9, %v13327_v8  ;;  %v2944_v45 = vsel %vm13252_vm9, %v2590_v31, 0  ;;  %v1051_v58 = vcombine.high %v1049_v13, %v1049_v13  ;;  %v14004_v30 = vrot.slane %v1042_v53, %v13327_v8  ;;  %v12835_v56 = vld [vmem:[%s17898_s8 + $0x1f8] sm:$0xff]  }
 0x147   : > { %v2948_v29 = vsel %vm13287_vm1, %v2688_v27, 0  ;;  %v2973_v59 = vshrl.u32 %v2944_v45, 16  ;;  %v14009_v6 = vrot.slane %v13965_v63, %v13327_v8  ;;  %v14012_v22 = vrot.slane %v1050_v32, %v13327_v8 }
 0x148   : > { %18151 = vst [vmem:[#allocation34_spill] sm:$0xff] %v13995_v42  ;;  %v3001_v14 = vshrl.u32 %v2948_v29, 16  ;;  %v14015_v16 = vadd.f32 %v920_v26, %v18149_v47  ;;  %v2976_v40 = vshll.u32 %v2944_v45, 16  ;;  %v14018_v19 = vrot.slane %v982_v15, %v13327_v8  ;;  %v18162_v47 = vld [vmem:[#allocation29_spill] sm:$0xff] }
 0x149   : > { %18154 = vst [vmem:[#allocation30_spill] sm:$0xff] %v14009_v6  ;;  %v2975_v39 = vrot.slane %v2973_v59, 7  ;;  %v14021_v38 = vrot.slane %v11007_v20, %v13327_v8  ;;  %v3004_v1 = vshll.u32 %v2948_v29, 16  ;;  %v14024_v60 = vrot.slane %v1049_v13, %v13327_v8 }
 0x14a   : > { %v3003_v51 = vrot.slane %v3001_v14, 7  ;;  %v14027_v44 = vrot.slane %v1051_v58, %v13327_v8  ;;  %v14031_v10 = vrot.slane %v13968_v52, %v13327_v8  ;;  %v14035_v2 = vcombine.high %v14004_v30, %v14004_v30 }
 0x14b   : > { %v2978_v3 = vor.u32 %v2976_v40, %v2975_v39  ;;  %v14038_v23 = vsel %vm2403_vm2, %v12791_v7, 0  ;;  %v3120_v9 = vsel %vm13337_vm8, %v2975_v39, 0  ;;  %v14049_v28 = vcombine.high %v14012_v22, %v14012_v22 }
 0x14c   : > { %18155 = vst [vmem:[#allocation35_spill] sm:$0xff] %v14031_v10  ;;  %v3006_v5 = vor.u32 %v3004_v1, %v3003_v51  ;;  %v3124_v55 = vsel %vm13337_vm8, %v3003_v51, 0  ;;  %v1733_v48 = vcombine.high %v14018_v19, %v14018_v19  ;;  %v1734_v17 = vcombine.high %v14021_v38, %v14021_v38  ;;  %v12825_v51 = vld [vmem:[%s17898_s8 + $0xc0] sm:$0xff]  }
 0x14d   : > { %v981_v36 = vpack.c.bf16 %v14015_v16, %v13986_v54  ;;  %v10973_v25 = vpack.c.bf16 %v14015_v16, %v14015_v16  ;;  %v18157_v0 = vsel %vm13337_vm8, %v18156_v37, 0  ;;  %v14067_v11 = vcombine.high %v14024_v60, %v14024_v60  ;;  %v12826_v1 = vld [vmem:[%s17898_s8 + $0x80] sm:$0xff]   ;;  %11783 = vmatprep.subr.bf16.mxu1 %v12825_v51 }
 0x14e   : > { %v3108_v61 = vsel %vm13337_vm8, 0, %v3006_v5  ;;  %v3411_v43 = vcombine.low %v3124_v55, %v18157_v0  ;;  %v14071_v53 = vcombine.high %v14027_v44, %v14027_v44  ;;  %v14075_v13 = vsel %vm13337_vm8, 0, %v2978_v3  ;;  %11784 = vmatpush3.bf16.msra.mxu1 %v12826_v1 }
 0x14f   : > { %18158 = vst [vmem:[#allocation31_spill] sm:$0xff] %v14075_v13  ;;  %v18160_v35 = vsel %vm13337_vm8, %v18159_v41, 0  ;;  %v3361_v27 = vcombine.low %v3108_v61, %v18162_v47  ;;  %v3362_v32 = vcombine.high %v3108_v61, %v18162_v47  ;;  %v1101_v15 = vunpack.i.h.s16 %v14004_v30  ;;  %11885 = vmatprep.subr.bf16.mxu1 %v12835_v56 }
 0x150   : > { %v14081_v31 = vcombine.low %v3120_v9, %v18160_v35  ;;  %v1103_v20 = vunpack.i.h.s16 %v14012_v22  ;;  %v1105_v26 = vunpack.i.h.s16 %v14035_v2  ;;  %v1107_v62 = vunpack.i.h.s16 %v14049_v28 }
 0x151   : > { %v3369_v45 = vrot.slane %v3361_v27, %v13327_v8  ;;  %v3376_v58 = vrot.slane %v3362_v32, %v13327_v8  ;;  %v1109_v50 = vunpack.i.h.s16 %v14024_v60  ;;  %v1111_v29 = vunpack.i.h.s16 %v14027_v44 }
 0x152   : > { %18161 = vst [vmem:[#allocation36_spill] sm:$0xff] %v14081_v31  ;;  %v3418_v14 = vrot.slane %v3411_v43, %v13327_v8  ;;  %v1113_v39 = vunpack.i.h.s16 %v14067_v11  ;;  %v1115_v40 = vunpack.i.h.s16 %v14071_v53  ;;  %v10982_v61 = vpack.i.b16 %v14004_v30, %v14004_v30 }
 0x153   : > { %v3377_v5 = vcombine.high %v3369_v45, %v3369_v45  ;;  %v3378_v9 = vcombine.high %v3376_v58, %v3376_v58  ;;  %v14109_v55 = vrot.slane %v3369_v45, %v13327_v8  ;;  %v14113_v37 = vpack.i.b16 %v1101_v15, %v1101_v15 }
 0x154   : > { %v10983_v0 = vpack.i.b16 %v14012_v22, %v14012_v22  ;;  %v14118_v43 = vrot.slane %v3376_v58, %v13327_v8  ;;  %v14126_v47 = vpack.i.b16 %v1103_v20, %v1103_v20  ;;  %v3425_v30 = vrot.slane %v3418_v14, %v13327_v8 }
 0x155   : > { %18164 = vst [vmem:[#allocation32_spill] sm:$0xff] %v14109_v55  ;;  %v14121_v41 = vrot.slane %v3377_v5, %v13327_v8  ;;  %v14124_v35 = vrot.slane %v3378_v9, %v13327_v8  ;;  %v10984_v27 = vpack.i.b16 %v14035_v2, %v14035_v2  ;;  %v14131_v32 = vpack.i.b16 %v1105_v26, %v1105_v26 }
 0x156   : > { %18165 = vst [vmem:[#allocation37_spill] sm:$0xff] %v14118_v43  ;;  %v10985_v22 = vpack.i.b16 %v14049_v28, %v14049_v28  ;;  %v14135_v15 = vpack.i.b16 %v1107_v62, %v1107_v62  ;;  %v10986_v45 = vpack.i.b16 %v14024_v60, %v14024_v60  ;;  %v14139_v58 = vpack.i.b16 %v1109_v50, %v1109_v50 }
 0x157   : > { %18166 = vst [vmem:[#allocation33_spill] sm:$0xff] %v14121_v41  ;;  %18167 = vst [vmem:[#allocation25_spill] sm:$0xff] %v14124_v35  ;;  %v10987_v20 = vpack.i.b16 %v14027_v44, %v14027_v44  ;;  %v14145_v51 = vpack.i.b16 %v1111_v29, %v1111_v29  ;;  %v10988_v2 = vpack.i.b16 %v14067_v11, %v14067_v11  ;;  %vm18046_vm0 = vsmask.f32 6400 }
 0x158   : > { %v14149_v26 = vpack.i.b16 %v1113_v39, %v1113_v39  ;;  %v3409_v60 = vcombine.high %v14121_v41, %v14121_v41  ;;  %v3410_v62 = vcombine.high %v14124_v35, %v14124_v35  ;;  %v10989_v50 = vpack.i.b16 %v14071_v53, %v14071_v53 }
 0x159   : > { %v14161_v29 = vpack.i.b16 %v1115_v40, %v1115_v40  ;;  %v14164_v11 = vrot.slane %v10982_v61, %v13292_v46  ;;  %v14169_v1 = vrot.slane %v10983_v0, %v13292_v46  ;;  %v14174_v9 = vrot.slane %v10984_v27, %v13292_v46 }
 0x15a   : > { %v1741_v53 = vrot.slane %v14018_v19, %v13327_v8  ;;  %v14182_v61 = vrot.slane %v14021_v38, %v13327_v8  ;;  %v1755_v0 = vrot.slane %v1733_v48, %v13327_v8  ;;  %v14192_v27 = vrot.slane %v1734_v17, %v13327_v8 }
 0x15b   : > { %v14195_v28 = vcombine.low %v3409_v60, %v14118_v43  ;;  %v14197_v44 = vcombine.low %v3410_v62, %v3425_v30  ;;  %v14200_v14 = vrot.slane %v10985_v22, %v13292_v46  ;;  %v14207_v48 = vrot.slane %v10986_v45, %v13292_v46 }
 0x15c   : > { %v14202_v4 = vcombine.high %v1741_v53, %v1741_v53  ;;  %v14211_v38 = vcombine.high %v14182_v61, %v14182_v61  ;;  %v14213_v17 = vcombine.high %v1755_v0, %v1755_v0  ;;  %v14218_v22 = vrot.slane %v10987_v20, %v13292_v46 }
 0x15d   : > { %18168 = vst [vmem:[#allocation26_spill] sm:$0xff] %v14195_v28  ;;  %18169 = vst [vmem:[#allocation8_spill] sm:$0xff] %v14197_v44  ;;  %v14222_v60 = vcombine.high %v14192_v27, %v14192_v27  ;;  %v1784_v62 = vunpack.i.h.s16 %v1741_v53  ;;  %v14227_v49 = vrot.slane %v10988_v2, %v13292_v46  ;;  %v1786_v33 = vunpack.i.h.s16 %v1755_v0 }
 0x15e   : > { %v1788_v3 = vunpack.i.h.s16 %v14202_v4  ;;  %v14233_v20 = vrot.slane %v10989_v50, %v13292_v46  ;;  %v1790_v30 = vunpack.i.h.s16 %v14213_v17  ;;  %v1792_v19 = vunpack.i.h.s16 %v14182_v61 }
 0x15f   : > { %18170 = vst [vmem:[#allocation13_spill] sm:$0xff] %v14222_v60  ;;  %v1794_v45 = vunpack.i.h.s16 %v14192_v27  ;;  %v1796_v2 = vunpack.i.h.s16 %v14211_v38  ;;  %v1174_v5 = vrot.slane %v981_v36, %v13327_v8  ;;  %v1798_v7 = vunpack.i.h.s16 %v14222_v60 }
 0x160   : > { %v11018_v50 = vpack.i.b16 %v1741_v53, %v1741_v53  ;;  %v14246_v39 = vpack.i.b16 %v1784_v62, %v1784_v62  ;;  %v1181_v44 = vrot.slane %v10973_v25, %v13327_v8  ;;  %v11019_v40 = vpack.i.b16 %v1755_v0, %v1755_v0  ;;  %v973_v0 = vpop.f32.mrf.mxu1 }
 0x161   : > { %v14252_v35 = vpack.i.b16 %v1786_v33, %v1786_v33  ;;  %v14256_v28 = vpack.i.b16 %v1788_v3, %v1788_v3  ;;  %v14260_v36 = vpack.i.b16 %v1790_v30, %v1790_v30  ;;  %v14264_v62 = vpack.i.b16 %v1792_v19, %v1792_v19 }
 0x162   : > { %18171 = vst [vmem:[#allocation23_spill] sm:$0xff] %v14246_v39  ;;  %v14268_v25 = vpack.i.b16 %v1794_v45, %v1794_v45  ;;  %v14272_v3 = vpack.i.b16 %v1796_v2, %v1796_v2  ;;  %v14276_v54 = vpack.i.b16 %v1798_v7, %v1798_v7  ;;  %v14279_v53 = vrot.slane %v11018_v50, %v13292_v46  ;;  %v18177_v7 = vld [vmem:[#allocation7_spill] sm:$0xff] }
 0x163   : > { %18172 = vst [vmem:[#allocation14_spill] sm:$0xff] %v14252_v35  ;;  %v14284_v45 = vrot.slane %v11019_v40, %v13292_v46  ;;  %v1182_v16 = vcombine.high %v1174_v5, %v1174_v5  ;;  %v1183_v43 = vcombine.high %v1181_v44, %v1181_v44  ;;  %v1190_v2 = vrot.slane %v1174_v5, %v13327_v8 }
 0x164   : > { %18173 = vst [vmem:[#allocation29_spill] sm:$0xff] %v14272_v3  ;;  %18174 = vst [vmem:[#allocation39_spill] sm:$0xff] %v14276_v54  ;;  %v1197_v30 = vrot.slane %v1181_v44, %v13327_v8  ;;  %v14291_v42 = vadd.s32 4, %v18177_v7  ;;  %v14294_v50 = vadd.f32 %v973_v0, %v18150_v24  ;;  %vm18047_vm1 = vcmask 1045504  }
 0x165   : > { %18175 = vst [vmem:[#allocation40_spill] sm:$0xff] %v14279_v53  ;;  %18176 = vst [vmem:[#allocation41_spill] sm:$0xff] %v14284_v45  ;;  %v1204_v19 = vrot.slane %v1182_v16, %v13327_v8  ;;  %v1211_v40 = vrot.slane %v1183_v43, %v13327_v8  ;;  %v1212_v41 = vcombine.high %v1190_v2, %v1190_v2  ;;  %v1233_v55 = vunpack.i.h.s16 %v1190_v2 }
 0x166   : > { %v1213_v10 = vcombine.high %v1197_v30, %v1197_v30  ;;  %v1241_v6 = vunpack.i.h.s16 %v1197_v30  ;;  %v10998_v5 = vpack.i.b16 %v1190_v2, %v1190_v2  ;;  %v11002_v52 = vpack.i.b16 %v1197_v30, %v1197_v30 }
 0x167   : > { %v1214_v63 = vcombine.high %v1204_v19, %v1204_v19  ;;  %v1215_v33 = vcombine.high %v1211_v40, %v1211_v40  ;;  %v1235_v31 = vunpack.i.h.s16 %v1204_v19  ;;  %v1237_v44 = vunpack.i.h.s16 %v1212_v41 }
 0x168   : > { %v1243_v24 = vunpack.i.h.s16 %v1211_v40  ;;  %v1245_v0 = vunpack.i.h.s16 %v1213_v10  ;;  %v1457_v59 = vpack.i.b16 %v1233_v55, %v1233_v55  ;;  %v10999_v16 = vpack.i.b16 %v1204_v19, %v1204_v19 }
 0x169   : > { %v1239_v13 = vunpack.i.h.s16 %v1214_v63  ;;  %v1247_v43 = vunpack.i.h.s16 %v1215_v33  ;;  %v1459_v12 = vpack.i.b16 %v1235_v31, %v1235_v31  ;;  %v11000_v34 = vpack.i.b16 %v1212_v41, %v1212_v41 }
 0x16a   : > { %v1461_v57 = vpack.i.b16 %v1237_v44, %v1237_v44  ;;  %v11001_v2 = vpack.i.b16 %v1214_v63, %v1214_v63  ;;  %v1465_v30 = vpack.i.b16 %v1241_v6, %v1241_v6  ;;  %v11003_v35 = vpack.i.b16 %v1211_v40, %v1211_v40 }
 0x16b   : > { %v1463_v45 = vpack.i.b16 %v1239_v13, %v1239_v13  ;;  %v1467_v39 = vpack.i.b16 %v1243_v24, %v1243_v24  ;;  %v11004_v53 = vpack.i.b16 %v1213_v10, %v1213_v10  ;;  %v1469_v7 = vpack.i.b16 %v1245_v0, %v1245_v0 }
 0x16c   : > { %v11005_v54 = vpack.i.b16 %v1215_v33, %v1215_v33  ;;  %v1471_v60 = vpack.i.b16 %v1247_v43, %v1247_v43  ;;  %v1539_v3 = vrot.slane %v10998_v5, %v13292_v46  ;;  %v1543_v55 = vrot.slane %v1457_v59, %v13292_v46 }
 0x16d   : > { %v1547_v19 = vrot.slane %v10999_v16, %v13292_v46  ;;  %v1551_v31 = vrot.slane %v1459_v12, %v13292_v46  ;;  %v1555_v56 = vrot.slane %v11000_v34, %v13292_v46  ;;  %v1559_v63 = vrot.slane %v1461_v57, %v13292_v46 }
 0x16e   : > { %v1563_v6 = vrot.slane %v11001_v2, %v13292_v46  ;;  %v1567_v13 = vrot.slane %v1463_v45, %v13292_v46  ;;  %v1571_v10 = vrot.slane %v11002_v52, %v13292_v46  ;;  %v1575_v41 = vrot.slane %v1465_v30, %v13292_v46 }
 0x16f   : > { %v1579_v33 = vrot.slane %v11003_v35, %v13292_v46  ;;  %v1583_v59 = vrot.slane %v1467_v39, %v13292_v46  ;;  %v1587_v40 = vrot.slane %v11004_v53, %v13292_v46  ;;  %v1591_v12 = vrot.slane %v1469_v7, %v13292_v46 }
 0x170   : > { %v1595_v34 = vrot.slane %v11005_v54, %v13292_v46  ;;  %v1599_v57 = vrot.slane %v1471_v60, %v13292_v46  ;;  %v1651_v45 = vsel %vm13337_vm8, %v14164_v11, %v1539_v3  ;;  %v18178_v52 = vrot.slane %v14113_v37, %v13292_v46 }
 0x171   : > { %v1653_v39 = vsel %vm13337_vm8, %v14169_v1, %v1547_v19  ;;  %v18179_v53 = vrot.slane %v14126_v47, %v13292_v46  ;;  %v1655_v11 = vsel %vm13337_vm8, %v14174_v9, %v1555_v56  ;;  %v18180_v37 = vrot.slane %v14131_v32, %v13292_v46 }
 0x172   : > { %v1652_v35 = vsel %vm13337_vm8, %v18178_v52, %v1543_v55  ;;  %v1657_v1 = vsel %vm13337_vm8, %v14200_v14, %v1563_v6  ;;  %v18181_v47 = vrot.slane %v14135_v15, %v13292_v46  ;;  %v1659_v9 = vsel %vm13337_vm8, %v14207_v48, %v1571_v10 }
 0x173   : > { %v1654_v60 = vsel %vm13337_vm8, %v18179_v53, %v1551_v31  ;;  %v1656_v54 = vsel %vm13337_vm8, %v18180_v37, %v1559_v63  ;;  %v18182_v32 = vrot.slane %v14139_v58, %v13292_v46  ;;  %v1661_v14 = vsel %vm13337_vm8, %v14218_v22, %v1579_v33 }
 0x174   : > { %v1658_v3 = vsel %vm13337_vm8, %v18181_v47, %v1567_v13  ;;  %v18183_v15 = vrot.slane %v14145_v51, %v13292_v46  ;;  %v1663_v48 = vsel %vm13337_vm8, %v14227_v49, %v1587_v40  ;;  %v18184_v58 = vrot.slane %v14149_v26, %v13292_v46 }
 0x175   : > { %v1660_v7 = vsel %vm13337_vm8, %v18182_v32, %v1575_v41  ;;  %v1665_v22 = vsel %vm13337_vm8, %v14233_v20, %v1595_v34  ;;  %v18185_v51 = vrot.slane %v14161_v29, %v13292_v46  ;;  %v2689_v0 = vcombine.low %v1651_v45, %v1652_v35 }
 0x176   : > { %v1662_v5 = vsel %vm13337_vm8, %v18183_v15, %v1583_v59  ;;  %v1664_v44 = vsel %vm13337_vm8, %v18184_v58, %v1591_v12  ;;  %v2690_v16 = vcombine.low %v1653_v39, %v1654_v60  ;;  %v2691_v43 = vcombine.low %v1655_v11, %v1656_v54 }
 0x177   : > { %v1666_v24 = vsel %vm13337_vm8, %v18185_v51, %v1599_v57  ;;  %v2692_v49 = vcombine.low %v1657_v1, %v1658_v3  ;;  %v2787_v2 = vcombine.low %v1659_v9, %v1660_v7  ;;  %v2788_v30 = vcombine.low %v1661_v14, %v1662_v5 }
 0x178   : > { %v2699_v26 = vrot.slane %v2689_v0, %v13327_v8  ;;  %v2706_v55 = vrot.slane %v2690_v16, %v13327_v8  ;;  %v2789_v19 = vcombine.low %v1663_v48, %v1664_v44  ;;  %v2790_v31 = vcombine.low %v1665_v22, %v1666_v24 }
 0x179   : > { %v2713_v20 = vrot.slane %v2691_v43, %v13327_v8  ;;  %v2720_v56 = vrot.slane %v2692_v49, %v13327_v8  ;;  %v2797_v29 = vrot.slane %v2787_v2, %v13327_v8  ;;  %v2804_v63 = vrot.slane %v2788_v30, %v13327_v8 }
 0x17a   : > { %v2721_v6 = vcombine.low %v2699_v26, %v2706_v55  ;;  %v2811_v13 = vrot.slane %v2789_v19, %v13327_v8  ;;  %v2818_v10 = vrot.slane %v2790_v31, %v13327_v8  ;;  %vm2906_vm9 = vcmp.ge.s32.totalorder %v14291_v42, 0  ;;  %v18194_v19 = vld [vmem:[#allocation29_spill] sm:$0xff] }
 0x17b   : > { %v2722_v41 = vcombine.low %v2713_v20, %v2720_v56  ;;  %v2819_v33 = vcombine.low %v2797_v29, %v2804_v63  ;;  %vm2914_vm11 = vcmp.lt.s32.totalorder %v14291_v42, 16  ;;  %v983_v59 = vpack.c.bf16 %v14294_v50, %v13989_v21 }
 0x17c   : > { %v18186_v40 = vpack.i.b16 %v14202_v4, %v14202_v4  ;;  %v2729_v34 = vrot.slane %v2721_v6, %v13327_v8  ;;  %v2820_v57 = vcombine.low %v2811_v13, %v2818_v10  ;;  %vm14400_vm12 = vmand %vm2906_vm9, %vm2914_vm11  ;;  %v11009_v52 = vpack.c.bf16 %v14294_v50, %v14294_v50  ;;  %v12792_v13 = vld [vmem:[%s13220_s19 + $0x18] sm:$0xff]   ;;  %v18195_v10 = vld [vmem:[#allocation13_spill] sm:$0xff]  ;;  %s17808_s19 = scalar_lea.vmem %s18459_s18, %s10956_s16 }
 0x17d   : > { %v2736_v42 = vrot.slane %v2722_v41, %v13327_v8  ;;  %v2827_v21 = vrot.slane %v2819_v33, %v13327_v8  ;;  %v2951_v4 = vsel %vm14400_vm12, %v14038_v23, 0  ;;  %v1857_v35 = vrot.slane %v983_v59, %v13327_v8  ;;  %v18197_v59 = vld [vmem:[#allocation39_spill] sm:$0xff] }
 0x17e   : > { %v14397_v12 = vrot.slane %v18186_v40, %v13292_v46  ;;  %v2834_v39 = vrot.slane %v2820_v57, %v13327_v8  ;;  %v3022_v53 = vshrl.u32 %v2951_v4, 16  ;;  %v3025_v60 = vshll.u32 %v2951_v4, 16 }
 0x17f   : > { %v1864_v11 = vrot.slane %v11009_v52, %v13327_v8  ;;  %v2050_v37 = vrot.slane %v14256_v28, %v13292_v46  ;;  %v18189_v50 = vpack.i.b16 %v14213_v17, %v14213_v17  ;;  %v2737_v1 = vcombine.low %v2729_v34, %v2736_v42 }
 0x180   : > { %v1865_v47 = vcombine.high %v1857_v35, %v1857_v35  ;;  %v2058_v23 = vrot.slane %v14260_v36, %v13292_v46  ;;  %v2835_v3 = vcombine.low %v2827_v21, %v2834_v39  ;;  %v3024_v9 = vrot.slane %v3022_v53, 7 }
 0x181   : > { %v14420_v54 = vrot.slane %v18189_v50, %v13292_v46  ;;  %v1866_v32 = vcombine.high %v1864_v11, %v1864_v11  ;;  %v18190_v7 = vpack.i.b16 %v14182_v61, %v14182_v61  ;;  %v2066_v15 = vrot.slane %v14264_v62, %v13292_v46 }
 0x182   : > { %v2950_v17 = vsel %vm14400_vm12, %v2737_v1, 0  ;;  %v14435_v5 = vrot.slane %v1857_v35, %v13327_v8  ;;  %v2954_v58 = vsel %vm13258_vm10, %v2835_v3, 0  ;;  %v3027_v51 = vor.u32 %v3025_v60, %v3024_v9  ;;  %v18198_v60 = vld [vmem:[#allocation27_spill] sm:$0xff] }
 0x183   : > { %v14428_v14 = vrot.slane %v18190_v7, %v13292_v46  ;;  %v3015_v44 = vshrl.u32 %v2950_v17, 16  ;;  %v3018_v22 = vshll.u32 %v2950_v17, 16  ;;  %v18192_v61 = vpack.i.b16 %v14192_v27, %v14192_v27  ;;  %v18199_v7 = vld [vmem:[#allocation7_spill] sm:$0xff] }
 0x184   : > { %v3043_v0 = vshrl.u32 %v2954_v58, 16  ;;  %v3046_v16 = vshll.u32 %v2954_v58, 16  ;;  %v1887_v43 = vrot.slane %v1865_v47, %v13327_v8  ;;  %v2074_v49 = vrot.slane %v14268_v25, %v13292_v46 }
 0x185   : > { %v14443_v24 = vrot.slane %v18192_v61, %v13292_v46  ;;  %v3017_v2 = vrot.slane %v3015_v44, 7  ;;  %v14449_v30 = vrot.slane %v1864_v11, %v13327_v8  ;;  %v14452_v26 = vrot.slane %v1866_v32, %v13327_v8 }
 0x186   : > { %v18193_v27 = vpack.i.b16 %v14211_v38, %v14211_v38  ;;  %v2082_v31 = vrot.slane %v18194_v19, %v13292_v46  ;;  %v14462_v20 = vrot.slane %v3043_v0, 7  ;;  %v1895_v56 = vcombine.high %v14435_v5, %v14435_v5 }
 0x187   : > { %v3020_v29 = vor.u32 %v3018_v22, %v3017_v2  ;;  %v3111_v63 = vsel %vm13337_vm8, 0, %v3027_v51  ;;  %v3126_v6 = vsel %vm13337_vm8, %v3017_v2, 0  ;;  %v3127_v38 = vsel %vm13337_vm8, %v3024_v9, 0 }
 0x188   : > { %v14458_v55 = vrot.slane %v18193_v27, %v13292_v46  ;;  %v18196_v41 = vpack.i.b16 %v18195_v10, %v18195_v10  ;;  %v2090_v40 = vrot.slane %v18197_v59, %v13292_v46  ;;  %v3048_v34 = vor.u32 %v3046_v16, %v14462_v20 }
 0x189   : > { %v1897_v57 = vcombine.high %v1887_v43, %v1887_v43  ;;  %v3110_v45 = vsel %vm13337_vm8, 0, %v3020_v29  ;;  %v1896_v52 = vcombine.high %v14449_v30, %v14449_v30  ;;  %v1898_v42 = vcombine.high %v14452_v26, %v14452_v26 }
 0x18a   : > { %v14477_v33 = vrot.slane %v18196_v41, %v13292_v46  ;;  %v1916_v21 = vunpack.i.h.s16 %v14435_v5  ;;  %v14491_v4 = vsel %vm13337_vm8, 0, %v3048_v34  ;;  %v3426_v35 = vcombine.low %v3110_v45, %v3111_v63 }
 0x18b   : > { %v3427_v39 = vcombine.high %v3110_v45, %v3111_v63  ;;  %v14493_v53 = vcombine.low %v3126_v6, %v3127_v38  ;;  %v3556_v11 = vcombine.low %v14491_v4, %v18198_v60  ;;  %v1918_v50 = vunpack.i.h.s16 %v1887_v43 }
 0x18c   : > { %v1920_v1 = vunpack.i.h.s16 %v1895_v56  ;;  %v14498_v47 = vsel %vm2403_vm2, %v12792_v13, 0  ;;  %v14501_v3 = vrot.slane %v3426_v35, %v13327_v8  ;;  %v1922_v32 = vunpack.i.h.s16 %v1897_v57 }
 0x18d   : > { %v14504_v9 = vrot.slane %v3427_v39, %v13327_v8  ;;  %v14507_v17 = vadd.s32 5, %v18199_v7  ;;  %v1924_v48 = vunpack.i.h.s16 %v14449_v30  ;;  %v1926_v58 = vunpack.i.h.s16 %v14452_v26 }
 0x18e   : > { %v1928_v44 = vunpack.i.h.s16 %v1896_v52  ;;  %v1930_v22 = vunpack.i.h.s16 %v1898_v42  ;;  %v3483_v51 = vrot.slane %v14493_v53, %v13327_v8  ;;  %v11034_v61 = vpack.i.b16 %v14435_v5, %v14435_v5  ;;  %v18213_v53 = vld [vmem:[#allocation31_spill] sm:$0xff] }
 0x18f   : > { %v2140_v0 = vpack.i.b16 %v1916_v21, %v1916_v21  ;;  %v11035_v16 = vpack.i.b16 %v1887_v43, %v1887_v43  ;;  %v14516_v2 = vrot.slane %v3556_v11, %v13327_v8  ;;  %v2142_v27 = vpack.i.b16 %v1918_v50, %v1918_v50 }
 0x190   : > { %v11036_v29 = vpack.i.b16 %v1895_v56, %v1895_v56  ;;  %v2144_v63 = vpack.i.b16 %v1920_v1, %v1920_v1  ;;  %v3442_v6 = vcombine.high %v14501_v3, %v14501_v3  ;;  %v3443_v38 = vcombine.high %v14504_v9, %v14504_v9 }
 0x191   : > { %v11037_v13 = vpack.i.b16 %v1897_v57, %v1897_v57  ;;  %v2146_v10 = vpack.i.b16 %v1922_v32, %v1922_v32  ;;  %v11038_v41 = vpack.i.b16 %v14449_v30, %v14449_v30  ;;  %v2148_v5 = vpack.i.b16 %v1924_v48, %v1924_v48 }
 0x192   : > { %v11039_v43 = vpack.i.b16 %v14452_v26, %v14452_v26  ;;  %v2150_v34 = vpack.i.b16 %v1926_v58, %v1926_v58  ;;  %v11040_v45 = vpack.i.b16 %v1896_v52, %v1896_v52  ;;  %v2152_v21 = vpack.i.b16 %v1928_v44, %v1928_v44 }
 0x193   : > { %v11041_v56 = vpack.i.b16 %v1898_v42, %v1898_v42  ;;  %v2154_v35 = vpack.i.b16 %v1930_v22, %v1930_v22  ;;  %v2222_v39 = vrot.slane %v11034_v61, %v13292_v46  ;;  %v2226_v11 = vrot.slane %v2140_v0, %v13292_v46  ;;  %v18200_v0 = vld [vmem:[#allocation40_spill] sm:$0xff] }
 0x194   : > { %v2230_v50 = vrot.slane %v11035_v16, %v13292_v46  ;;  %v2234_v57 = vrot.slane %v2142_v27, %v13292_v46  ;;  %v2238_v1 = vrot.slane %v11036_v29, %v13292_v46  ;;  %v2242_v30 = vrot.slane %v2144_v63, %v13292_v46  ;;  %v18201_v27 = vld [vmem:[#allocation23_spill] sm:$0xff] }
 0x195   : > { %v2246_v32 = vrot.slane %v11037_v13, %v13292_v46  ;;  %v2250_v26 = vrot.slane %v2146_v10, %v13292_v46  ;;  %v2254_v52 = vrot.slane %v11038_v41, %v13292_v46  ;;  %v2258_v42 = vrot.slane %v2148_v5, %v13292_v46  ;;  %v18203_v13 = vld [vmem:[#allocation41_spill] sm:$0xff]  ;;  %v18204_v41 = vld [vmem:[#allocation14_spill] sm:$0xff] }
 0x196   : > { %v2262_v7 = vrot.slane %v11039_v43, %v13292_v46  ;;  %v2266_v48 = vrot.slane %v2150_v34, %v13292_v46  ;;  %vm2907_vm2 = vcmp.ge.s32.totalorder %v14507_v17, 0  ;;  %v2270_v58 = vrot.slane %v11040_v45, %v13292_v46 }
 0x197   : > { %v2274_v44 = vrot.slane %v2152_v21, %v13292_v46  ;;  %v2278_v22 = vrot.slane %v11041_v56, %v13292_v46  ;;  %v2282_v61 = vrot.slane %v2154_v35, %v13292_v46  ;;  %v2331_v16 = vsel %vm13337_vm8, %v18200_v0, %v2222_v39 }
 0x198   : > { %v18202_v29 = vrot.slane %v18201_v27, %v13292_v46  ;;  %v2333_v10 = vsel %vm13337_vm8, %v18203_v13, %v2230_v50  ;;  %v18205_v5 = vrot.slane %v18204_v41, %v13292_v46  ;;  %v2335_v34 = vsel %vm13337_vm8, %v14397_v12, %v2238_v1 }
 0x199   : > { %v2336_v45 = vsel %vm13337_vm8, %v2050_v37, %v2242_v30  ;;  %v2337_v21 = vsel %vm13337_vm8, %v14420_v54, %v2246_v32  ;;  %v2338_v56 = vsel %vm13337_vm8, %v2058_v23, %v2250_v26  ;;  %v2339_v12 = vsel %vm13337_vm8, %v14428_v14, %v2254_v52  ;;  %v18206_v32 = vld [vmem:[#allocation38_spill] sm:$0xff] }
 0x19a   : > { %v2332_v63 = vsel %vm13337_vm8, %v18202_v29, %v2226_v11  ;;  %v2334_v43 = vsel %vm13337_vm8, %v18205_v5, %v2234_v57  ;;  %v2340_v28 = vsel %vm13337_vm8, %v2066_v15, %v2258_v42  ;;  %v2341_v37 = vsel %vm13337_vm8, %v14443_v24, %v2262_v7  ;;  %v18212_v29 = vld [vmem:[#allocation17_spill] sm:$0xff] }
 0x19b   : > { %v2342_v36 = vsel %vm13337_vm8, %v2074_v49, %v2266_v48  ;;  %v2343_v54 = vsel %vm13337_vm8, %v14458_v55, %v2270_v58  ;;  %v2344_v62 = vsel %vm13337_vm8, %v2082_v31, %v2274_v44  ;;  %v2345_v23 = vsel %vm13337_vm8, %v14477_v33, %v2278_v22  ;;  %v18209_v58 = vld [vmem:[#allocation18_spill] sm:$0xff]  ;;  %v18210_v44 = vld [vmem:[#allocation11_spill] sm:$0xff] }
 0x19c   : > { %v2346_v25 = vsel %vm13337_vm8, %v2090_v40, %v2282_v61  ;;  %v2738_v14 = vcombine.low %v2331_v16, %v2332_v63  ;;  %v2739_v15 = vcombine.low %v2333_v10, %v2334_v43  ;;  %v2740_v24 = vcombine.low %v2335_v34, %v2336_v45 }
 0x19d   : > { %v2741_v49 = vcombine.low %v2337_v21, %v2338_v56  ;;  %v2836_v55 = vcombine.low %v2339_v12, %v2340_v28  ;;  %v2837_v35 = vcombine.low %v2341_v37, %v2342_v36  ;;  %v2838_v19 = vcombine.low %v2343_v54, %v2344_v62 }
 0x19e   : > { %v2839_v39 = vcombine.low %v2345_v23, %v2346_v25  ;;  %v2748_v31 = vrot.slane %v2738_v14, %v13327_v8  ;;  %v2755_v11 = vrot.slane %v2739_v15, %v13327_v8  ;;  %v2762_v33 = vrot.slane %v2740_v24, %v13327_v8 }
 0x19f   : > { %v2769_v50 = vrot.slane %v2741_v49, %v13327_v8  ;;  %v2846_v46 = vrot.slane %v2836_v55, %v13327_v8  ;;  %v2853_v59 = vrot.slane %v2837_v35, %v13327_v8  ;;  %v2860_v40 = vrot.slane %v2838_v19, %v13327_v8 }
 0x1a0   : > { %v2867_v57 = vrot.slane %v2839_v39, %v13327_v8  ;;  %v2770_v1 = vcombine.low %v2748_v31, %v2755_v11  ;;  %vm2915_vm10 = vcmp.lt.s32.totalorder %v14507_v17, 16  ;;  %v2962_v26 = vshll.u32 %v18206_v32, 16 }
 0x1a1   : > { %v2771_v30 = vcombine.low %v2762_v33, %v2769_v50  ;;  %v14619_v52 = vrot.slane %v14501_v3, %v13327_v8  ;;  %v2868_v42 = vcombine.low %v2846_v46, %v2853_v59  ;;  %vm14623_vm13 = vmand %vm2907_vm2, %vm2915_vm10  ;;  %v18211_v22 = vshll.u32 %v18210_v44, 16  ;;  %v18217_v33 = vld [vmem:[#allocation28_spill] sm:$0xff] }
 0x1a2   : > { %v2869_v7 = vcombine.low %v2860_v40, %v2867_v57  ;;  %v2778_v0 = vrot.slane %v2770_v1, %v13327_v8  ;;  %v2953_v27 = vsel %vm14623_vm13, %v14498_v47, 0  ;;  %v2964_v63 = vor.u32 %v2962_v26, %v18212_v29 }
 0x1a3   : > { %v2971_v61 = vor.u32 %v18211_v22, %v18209_v58  ;;  %v2785_v16 = vrot.slane %v2771_v30, %v13327_v8  ;;  %v2876_v17 = vrot.slane %v2868_v42, %v13327_v8  ;;  %v3036_v10 = vshrl.u32 %v2953_v27, 16 }
 0x1a4   : > { %v2883_v13 = vrot.slane %v2869_v7, %v13327_v8  ;;  %v3039_v41 = vshll.u32 %v2953_v27, 16  ;;  %v14642_v5 = vrot.slane %v3442_v6, %v13327_v8  ;;  %v3102_v34 = vsel %vm13337_vm8, 0, %v2964_v63 }
 0x1a5   : > { %v2786_v43 = vcombine.low %v2778_v0, %v2785_v16  ;;  %v3103_v47 = vsel %vm13337_vm8, 0, %v2971_v61  ;;  %v3038_v21 = vrot.slane %v3036_v10, 7  ;;  %v14652_v28 = vrot.slane %v14504_v9, %v13327_v8 }
 0x1a6   : > { %v14648_v45 = vcombine.low %v2876_v17, %v2883_v13  ;;  %v3166_v56 = vcombine.low %v3102_v34, %v3103_v47  ;;  %v3167_v12 = vcombine.high %v3102_v34, %v3103_v47  ;;  %v14658_v3 = vrot.slane %v3443_v38, %v13327_v8 }
 0x1a7   : > { %v14664_v6 = vrot.slane %v3483_v51, %v13327_v8  ;;  %v2952_v37 = vsel %vm14623_vm13, %v2786_v43, 0  ;;  %v3041_v23 = vor.u32 %v3039_v41, %v3038_v21  ;;  %v3952_v9 = vcombine.low %v14619_v52, %v14642_v5  ;;  %v18214_v51 = vld [vmem:[#allocation24_spill] sm:$0xff] }
 0x1a8   : > { %v3029_v54 = vshrl.u32 %v2952_v37, 16  ;;  %v3032_v62 = vshll.u32 %v2952_v37, 16  ;;  %v11055_v38 = vcombine.high %v14619_v52, %v14642_v5  ;;  %v3174_v25 = vrot.slane %v3166_v56, %v13327_v8 }
 0x1a9   : > { %v18215_v14 = vcombine.low %v18213_v53, %v18214_v51  ;;  %v3129_v49 = vsel %vm13337_vm8, %v3038_v21, 0  ;;  %v3181_v55 = vrot.slane %v3167_v12, %v13327_v8  ;;  %v18216_v35 = vcombine.high %v18213_v53, %v18214_v51  ;;  %v18218_v53 = vld [vmem:[#allocation36_spill] sm:$0xff] }
 0x1aa   : > { %v3031_v24 = vrot.slane %v3029_v54, 7  ;;  %v4016_v39 = vcombine.low %v14652_v28, %v14658_v3  ;;  %v11056_v31 = vcombine.high %v14652_v28, %v14658_v3  ;;  %v3182_v11 = vcombine.high %v3174_v25, %v3174_v25  ;;  %v12846_v3 = vld [vmem:[%s17898_s8 + $0x1a0] sm:$0xff]  }
 0x1ab   : > { %v3239_v15 = vrot.slane %v18215_v14, %v13327_v8  ;;  %v3246_v19 = vrot.slane %v18216_v35, %v13327_v8  ;;  %v3223_v50 = vrot.slane %v18217_v33, %v13327_v8  ;;  %v3113_v59 = vsel %vm13337_vm8, 0, %v3041_v23 }
 0x1ac   : > { %v3034_v46 = vor.u32 %v3032_v62, %v3031_v24  ;;  %v3128_v40 = vsel %vm13337_vm8, %v3031_v24, 0  ;;  %v3183_v57 = vcombine.high %v3181_v55, %v3181_v55  ;;  %v3190_v30 = vrot.slane %v3174_v25, %v13327_v8 }
 0x1ad   : > { %v3541_v1 = vcombine.low %v3128_v40, %v3129_v49  ;;  %v3204_v32 = vrot.slane %v3182_v11, %v13327_v8  ;;  %v3247_v26 = vcombine.high %v3239_v15, %v3239_v15  ;;  %v3197_v7 = vrot.slane %v3181_v55, %v13327_v8 }
 0x1ae   : > { %v3112_v42 = vsel %vm13337_vm8, 0, %v3034_v46  ;;  %v3211_v48 = vrot.slane %v3183_v57, %v13327_v8  ;;  %v3248_v58 = vcombine.high %v3246_v19, %v3246_v19  ;;  %v3255_v61 = vrot.slane %v3239_v15, %v13327_v8 }
 0x1af   : > { %v3491_v44 = vcombine.low %v3112_v42, %v3113_v59  ;;  %v3492_v22 = vcombine.high %v3112_v42, %v3113_v59  ;;  %v3262_v0 = vrot.slane %v3246_v19, %v13327_v8  ;;  %v3686_v16 = vcombine.low %v3190_v30, %v3204_v32 }
 0x1b0   : > { %v11051_v27 = vcombine.high %v3190_v30, %v3204_v32  ;;  %v3688_v29 = vcombine.low %v3197_v7, %v3211_v48  ;;  %v11052_v63 = vcombine.high %v3197_v7, %v3211_v48  ;;  %v3548_v10 = vrot.slane %v3541_v1, %v13327_v8 }
 0x1b1   : > { %v3499_v17 = vrot.slane %v3491_v44, %v13327_v8  ;;  %v3506_v13 = vrot.slane %v3492_v22, %v13327_v8  ;;  %v3269_v41 = vrot.slane %v3247_v26, %v13327_v8  ;;  %v3696_v43 = vrot.slane %v3686_v16, %v13327_v8 }
 0x1b2   : > { %v3703_v34 = vrot.slane %v11051_v27, %v13327_v8  ;;  %v3710_v47 = vrot.slane %v3688_v29, %v13327_v8  ;;  %v3717_v21 = vrot.slane %v11052_v63, %v13327_v8  ;;  %v3230_v25 = vrot.slane %v3223_v50, %v13327_v8  ;;  %v12842_v50 = vld [vmem:[%s17898_s8 + $0x1a8] sm:$0xff]  }
 0x1b3   : > { %v3507_v56 = vcombine.high %v3499_v17, %v3499_v17  ;;  %v3508_v12 = vcombine.high %v3506_v13, %v3506_v13  ;;  %v14713_v37 = vrot.slane %v3499_v17, %v13327_v8  ;;  %v14716_v54 = vrot.slane %v3506_v13, %v13327_v8 }
 0x1b4   : > { %v3719_v62 = vcombine.high %v3696_v43, %v3703_v34  ;;  %v3721_v23 = vcombine.high %v3710_v47, %v3717_v21  ;;  %v18219_v51 = vrot.slane %v18218_v53, %v13327_v8  ;;  %v14727_v24 = vrot.slane %v3548_v10, %v13327_v8  ;;  %v18220_v10 = vld [vmem:[#allocation12_spill] sm:$0xff] }
 0x1b5   : > { %v14724_v15 = vrot.slane %v3507_v56, %v13327_v8  ;;  %v3276_v49 = vrot.slane %v3248_v58, %v13327_v8  ;;  %v3277_v55 = vcombine.high %v3255_v61, %v3255_v61  ;;  %v14731_v35 = vrot.slane %v3508_v12, %v13327_v8 }
 0x1b6   : > { %v3295_v14 = vrot.slane %v18219_v51, %v13327_v8  ;;  %v3537_v19 = vcombine.high %v14713_v37, %v14713_v37  ;;  %v3735_v11 = vrot.slane %v3719_v62, %v13327_v8  ;;  %v3749_v33 = vrot.slane %v3721_v23, %v13327_v8  ;;  %v18224_v51 = vld [vmem:[#allocation30_spill] sm:$0xff] }
 0x1b7   : > { %v3278_v59 = vcombine.high %v3262_v0, %v3262_v0  ;;  %v3279_v40 = vcombine.high %v3269_v41, %v3269_v41  ;;  %v3718_v1 = vcombine.low %v3696_v43, %v3703_v34  ;;  %v3720_v30 = vcombine.low %v3710_v47, %v3717_v21  ;;  %v18222_v43 = vld [vmem:[#allocation22_spill] sm:$0xff] }
 0x1b8   : > { %v3751_v57 = vcombine.low %v3735_v11, %v3749_v33  ;;  %v3752_v32 = vcombine.low %v3230_v25, %v3255_v61  ;;  %v3539_v26 = vcombine.high %v14724_v15, %v14724_v15  ;;  %v3280_v42 = vcombine.high %v3276_v49, %v3276_v49 }
 0x1b9   : > { %v3753_v7 = vcombine.low %v3269_v41, %v3277_v55  ;;  %v3754_v48 = vcombine.low %v3279_v40, %v3262_v0  ;;  %v3728_v22 = vrot.slane %v3718_v1, %v13327_v8  ;;  %v3742_v16 = vrot.slane %v3720_v30, %v13327_v8  ;;  %v18225_v30 = vld [vmem:[#allocation35_spill] sm:$0xff] }
 0x1ba   : > { %v4288_v58 = vshrl.u32 %v3751_v57, 16  ;;  %v4291_v44 = vshll.u32 %v3751_v57, 16  ;;  %v3755_v27 = vcombine.low %v3276_v49, %v3278_v59  ;;  %v3762_v29 = vrot.slane %v3752_v32, %v13327_v8 }
 0x1bb   : > { %v3769_v63 = vrot.slane %v3753_v7, %v13327_v8  ;;  %v3776_v17 = vrot.slane %v3754_v48, %v13327_v8  ;;  %v3750_v13 = vcombine.low %v3728_v22, %v3742_v16  ;;  %v18221_v0 = vcombine.high %v18220_v10, %v18220_v10  ;;  %v12827_v10 = vld [vmem:[%s17898_s8 + $0x170] sm:$0xff]  }
 0x1bc   : > { %v14748_v61 = vrot.slane %v4288_v58, 7  ;;  %v18223_v34 = vcombine.high %v18222_v43, %v18222_v43  ;;  %v3540_v21 = vcombine.high %v14731_v35, %v14731_v35  ;;  %v3783_v56 = vrot.slane %v3755_v27, %v13327_v8 }
 0x1bd   : > { %v3334_v41 = vrot.slane %v18221_v0, %v13327_v8  ;;  %v3784_v12 = vcombine.low %v3762_v29, %v3769_v63  ;;  %v3785_v62 = vcombine.high %v3762_v29, %v3769_v63  ;;  %v4281_v25 = vshrl.u32 %v3750_v13, 16 }
 0x1be   : > { %v14758_v47 = vrot.slane %v18223_v34, %v13327_v8  ;;  %v4293_v23 = vor.u32 %v4291_v44, %v14748_v61  ;;  %v3818_v53 = vcombine.low %v3280_v42, %v3295_v14  ;;  %v3786_v55 = vcombine.low %v3776_v17, %v3783_v56  ;;  %v12824_v44 = vld [vmem:[%s17898_s8 + $0x138] sm:$0xff]  }
 0x1bf   : > { %v3819_v49 = vcombine.low %v18224_v51, %v3334_v41  ;;  %v3794_v11 = vrot.slane %v3784_v12, %v13327_v8  ;;  %v4284_v33 = vshll.u32 %v3750_v13, 16  ;;  %v3787_v59 = vcombine.high %v3776_v17, %v3783_v56 }
 0x1c0   : > { %v14768_v40 = vsel %vm13337_vm8, 0, %v4293_v23  ;;  %v4283_v57 = vrot.slane %v4281_v25, 7  ;;  %v11053_v1 = vcombine.high %v18224_v51, %v3334_v41  ;;  %v3821_v32 = vcombine.low %v18225_v30, %v14758_v47  ;;  %v12828_v51 = vld [vmem:[%s17898_s8 + $0x130] sm:$0xff]  }
 0x1c1   : > { %4610 = vmatprep.mubr.bf16.mxu0 %v14768_v40  ;;  %v4730_v14 = vshll.u32 %v14768_v40, 16  ;;  %v3808_v42 = vrot.slane %v3786_v55, %v13327_v8  ;;  %v3801_v7 = vrot.slane %v3785_v62, %v13327_v8  ;;  %v3815_v48 = vrot.slane %v3787_v59, %v13327_v8  ;;  %v12829_v59 = vld [vmem:[%s17898_s8 + $0x168] sm:$0xff]  }
 0x1c2   : > { %v4286_v58 = vor.u32 %v4284_v33, %v4283_v57  ;;  %v3828_v22 = vrot.slane %v3818_v53, %v13327_v8  ;;  %v14783_v16 = vrot.slane %v3819_v49, %v13327_v8  ;;  %v14786_v27 = vrot.slane %v11053_v1, %v13327_v8 }
 0x1c3   : > { %v14789_v29 = vcombine.low %v3539_v26, %v14716_v54  ;;  %v3816_v63 = vcombine.low %v3794_v11, %v3808_v42  ;;  %v3817_v17 = vcombine.low %v3801_v7, %v3815_v48  ;;  %v14792_v13 = vrot.slane %v3821_v32, %v13327_v8 }
 0x1c4   : > { %18226 = vst [vmem:[#allocation9_spill] sm:$0xff] %v14783_v16  ;;  %18227 = vst [vmem:[#allocation29_spill] sm:$0xff] %v14786_v27  ;;  %v4728_v0 = vshrl.u32 %v14768_v40, 16  ;;  %v4732_v41 = vrot.slane %v4730_v14, 1  ;;  %v14800_v43 = vsel %vm13337_vm8, 0, %v4286_v58  ;;  %v3851_v34 = vcombine.high %v3828_v22, %v14783_v16 }
 0x1c5   : > { %18228 = vst [vmem:[#allocation13_spill] sm:$0xff] %v14792_v13  ;;  %v4295_v26 = vshrl.u32 %v3816_v63, 16  ;;  %4611 = vmatmul.mubr.bf16.vlgmr.msra.gmra.mxu0 %v14800_v43  ;;  %v4718_v56 = vshll.u32 %v14800_v43, 16  ;;  %v3850_v12 = vcombine.low %v3828_v22, %v14783_v16  ;;  %v4298_v62 = vshll.u32 %v3816_v63, 16  ;;  %v18231_v63 = vld [vmem:[#allocation33_spill] sm:$0xff] }
 0x1c6   : > { %11828 = vmatpush3.bf16.msra.mxu0 %v12824_v44  ;;  %v3853_v23 = vcombine.high %v14786_v27, %v14792_v13  ;;  %v3867_v25 = vrot.slane %v3851_v34, %v13327_v8  ;;  %v4303_v53 = vshrl.u32 %v3817_v17, 16  ;;  %v4716_v55 = vshrl.u32 %v14800_v43, 16  ;;  %v18229_v44 = vld [vmem:[#allocation32_spill] sm:$0xff] }
 0x1c7   : > { %v14812_v49 = vrot.slane %v4295_v26, 7  ;;  %v4720_v11 = vrot.slane %v4718_v56, 1  ;;  %v4306_v33 = vshll.u32 %v3817_v17, 16  ;;  %11829 = vmatprep.subr.bf16.mxu0 %v12827_v10  ;;  %v4733_v14 = vor.u32 %v4732_v41, %v4728_v0  ;;  %v12830_v56 = vld [vmem:[%s17898_s8 + $0x128] sm:$0xff]  }
 0x1c8   : > { %v3881_v1 = vrot.slane %v3853_v23, %v13327_v8  ;;  %v4305_v32 = vrot.slane %v4303_v53, 7  ;;  %v3852_v42 = vcombine.low %v14786_v27, %v14792_v13  ;;  %v3860_v48 = vrot.slane %v3850_v12, %v13327_v8  ;;  %v18237_v23 = vld [vmem:[#allocation26_spill] sm:$0xff] }
 0x1c9   : > { %v4300_v7 = vor.u32 %v4298_v62, %v14812_v49  ;;  %v11054_v58 = vcombine.high %v18225_v30, %v14758_v47  ;;  %v18230_v22 = vcombine.high %v18229_v44, %v18229_v44  ;;  %v4721_v26 = vor.u32 %v4720_v11, %v4716_v55  ;;  %v18234_v30 = vld [vmem:[#allocation34_spill] sm:$0xff]  ;;  %v12831_v11 = vld [vmem:[%s17898_s8 + $0x160] sm:$0xff]  }
 0x1ca   : > { %v3883_v10 = vcombine.low %v3867_v25, %v3881_v1  ;;  %v4308_v34 = vor.u32 %v4306_v33, %v4305_v32  ;;  %11830 = vmatpush3.bf16.msra.mxu0 %v12828_v51  ;;  %v3874_v0 = vrot.slane %v3852_v42, %v13327_v8  ;;  %v18235_v12 = vcombine.low %v18234_v30, %v18229_v44 }
 0x1cb   : > { %v3886_v17 = vcombine.low %v18231_v63, %v18230_v22  ;;  %v14831_v41 = vsel %vm1633_vm7, %v4283_v57, %v4300_v7  ;;  %11831 = vmatprep.subr.bf16.mxu0 %v12829_v59  ;;  %v14837_v47 = vrot.slane %v11054_v58, %v13327_v8  ;;  %v14847_v25 = vrot.slane %v18237_v23, %v13327_v8 }
 0x1cc   : > { %18232 = vst [vmem:[#allocation39_spill] sm:$0xff] %v14831_v41  ;;  %v14843_v62 = vrot.slane %v18235_v12, %v13327_v8  ;;  %v14851_v57 = vsel %vm1633_vm7, %v14748_v61, %v4308_v34  ;;  %v4319_v53 = vshrl.u32 %v3883_v10, 16  ;;  %v17965_v51 = vshll.u32 %v14831_v41, 16 }
 0x1cd   : > { %18233 = vst [vmem:[#allocation27_spill] sm:$0xff] %v14837_v47  ;;  %18238 = vst [vmem:[#allocation40_spill] sm:$0xff] %v14847_v25  ;;  %v14855_v55 = vrot.slane %v3886_v17, %v13327_v8  ;;  %v4322_v33 = vshll.u32 %v3883_v10, 16  ;;  %4618 = vmatprep.mubr.bf16.mxu0 %v14851_v57  ;;  %v17966_v59 = vshll.u32 %v14851_v57, 16  ;;  %v3882_v1 = vcombine.low %v3860_v48, %v3874_v0 }
 0x1ce   : > { %18236 = vst [vmem:[#allocation7_spill] sm:$0xff] %v14843_v62  ;;  %18239 = vst [vmem:[#allocation23_spill] sm:$0xff] %v14851_v57  ;;  %v17968_v42 = vshrl.u32 %v14831_v41, 16  ;;  %v14863_v61 = vrot.slane %v4319_v53, 7  ;;  %v4725_v7 = vrot.slane %v17965_v51, 1  ;;  %4619 = vmatmul.mubr.bf16.gmra.mxu0 %v14831_v41  ;;  %v3917_v58 = vcombine.high %v14837_v47, %v14843_v62  ;;  %v12836_v53 = vld [vmem:[%s17898_s8 + $0x1b8] sm:$0xff]  }
 0x1cf   : > { %18240 = vst [vmem:[#allocation41_spill] sm:$0xff] %v14855_v55  ;;  %v3919_v44 = vcombine.high %v14855_v55, %v14847_v25  ;;  %v14876_v48 = vcombine.low %v3540_v21, %v14727_v24  ;;  %v4737_v22 = vrot.slane %v17966_v59, 1  ;;  %v17967_v63 = vshrl.u32 %v14851_v57, 16  ;;  %11832 = vmatpush3.bf16.msra.mxu0 %v12830_v56  ;;  %v12832_v24 = vld [vmem:[%s17898_s8 + $0x120] sm:$0xff]  }
 0x1d0   : > { %v4311_v17 = vshrl.u32 %v3882_v1, 16  ;;  %v4324_v10 = vor.u32 %v4322_v33, %v14863_v61  ;;  %v4726_v34 = vsel %vm4714_vm14, %v4721_v26, %v4725_v7  ;;  %v4314_v0 = vshll.u32 %v3882_v1, 16  ;;  %11833 = vmatprep.subr.bf16.mxu0 %v12831_v11  ;;  %v12833_v26 = vld [vmem:[%s17898_s8 + $0x158] sm:$0xff]   ;;  %v18242_v1 = vld [vmem:[#allocation37_spill] sm:$0xff] }
 0x1d1   : > { %v4741_v30 = vor.u32 %v17968_v42, %v4725_v7  ;;  %v4738_v21 = vsel %vm4714_vm14, %v4733_v14, %v4737_v22  ;;  %v3933_v56 = vrot.slane %v3917_v58, %v13327_v8  ;;  %v3947_v23 = vrot.slane %v3919_v44, %v13327_v8  ;;  %v18244_v58 = vld [vmem:[#allocation25_spill] sm:$0xff] }
 0x1d2   : > { %v14889_v12 = vrot.slane %v4311_v17, 7  ;;  %v14900_v11 = vsel %vm1633_vm7, %v4305_v32, %v4324_v10  ;;  %4967 = vmatprep.mubr.bf16.mxu1 %v4738_v21  ;;  %v3916_v14 = vcombine.low %v14837_v47, %v14843_v62  ;;  %v3918_v33 = vcombine.low %v14855_v55, %v14847_v25  ;;  %v12839_v17 = vld [vmem:[%s17898_s8 + $0x1f0] sm:$0xff]  }
 0x1d3   : > { %18241 = vst [vmem:[#allocation14_spill] sm:$0xff] %v14900_v11  ;;  %v18243_v7 = vcombine.high %v18242_v1, %v18242_v1  ;;  %4968 = vmatmul.mubr.bf16.vlgmr.msra.gmra.mxu1 %v4726_v34  ;;  %v4749_v32 = vor.u32 %v17967_v63, %v4737_v22  ;;  %v14916_v10 = vshll.u32 %v14900_v11, 16  ;;  %4626 = vmatprep.mubr.bf16.mxu0 %v14900_v11  ;;  %v14921_v1 = vshrl.u32 %v14900_v11, 16  ;;  %v18245_v34 = vld [vmem:[#allocation8_spill] sm:$0xff]  ;;  %v12834_v22 = vld [vmem:[%s17898_s8 + $0x118] sm:$0xff]  }
 0x1d4   : > { %v4316_v21 = vor.u32 %v4314_v0, %v14889_v12  ;;  %v3949_v51 = vcombine.low %v3933_v56, %v3947_v23  ;;  %11834 = vmatpush3.bf16.msra.mxu0 %v12832_v24  ;;  %v14927_v59 = vrot.slane %v18245_v34, %v13327_v8  ;;  %11886 = vmatpush3.bf16.msra.mxu1 %v12836_v53  ;;  %v12837_v23 = vld [vmem:[%s17898_s8 + $0x150] sm:$0xff]   ;;  %v18267_v13 = vshrl.u32 %v14831_v41, 16 }
 0x1d5   : > { %v3950_v44 = vcombine.low %v18244_v58, %v18243_v7  ;;  %v3926_v7 = vrot.slane %v3916_v14, %v13327_v8  ;;  %v3940_v58 = vrot.slane %v3918_v33, %v13327_v8  ;;  %v4753_v63 = vrot.slane %v14916_v10, 1  ;;  %11835 = vmatprep.subr.bf16.mxu0 %v12833_v26  ;;  %11887 = vmatprep.subr.bf16.mxu1 %v12839_v17  ;;  %v12840_v26 = vld [vmem:[%s17898_s8 + $0x1b0] sm:$0xff]  }
 0x1d6   : > { %18246 = vst [vmem:[#allocation38_spill] sm:$0xff] %v14927_v59  ;;  %v14935_v0 = vsel %vm1633_vm7, %v14812_v49, %v4316_v21  ;;  %v4335_v56 = vshrl.u32 %v3949_v51, 16  ;;  %v4338_v33 = vshll.u32 %v3949_v51, 16  ;;  %v14951_v49 = vrot.slane %v3952_v9, %v13327_v8 }
 0x1d7   : > { %18247 = vst [vmem:[#allocation18_spill] sm:$0xff] %v14935_v0  ;;  %v14938_v24 = vrot.slane %v3950_v44, %v13327_v8  ;;  %v14944_v14 = vshll.u32 %v14935_v0, 16  ;;  %4627 = vmatmul.mubr.bf16.gmra.mxu0 %v14935_v0  ;;  %v3948_v34 = vcombine.low %v3926_v7, %v3940_v58  ;;  %v4754_v53 = vsel %vm4714_vm14, %v4749_v32, %v4753_v63  ;;  %v12838_v58 = vld [vmem:[%s17898_s8 + $0x110] sm:$0xff]  }
 0x1d8   : > { %18250 = vst [vmem:[#allocation31_spill] sm:$0xff] %v14951_v49  ;;  %v14957_v44 = vrot.slane %v4335_v56, 7  ;;  %v14960_v21 = vshrl.u32 %v14935_v0, 16  ;;  %v14966_v51 = vrot.slane %v11055_v38, %v13327_v8  ;;  %4975 = vmatprep.mubr.bf16.mxu1 %v4754_v53  ;;  %v4765_v17 = vor.u32 %v14921_v1, %v4753_v63  ;;  %11836 = vmatpush3.bf16.msra.mxu0 %v12834_v22  ;;  %v12841_v63 = vld [vmem:[%s17898_s8 + $0x1e8] sm:$0xff]  }
 0x1d9   : > { %18248 = vst [vmem:[#allocation11_spill] sm:$0xff] %v14938_v24  ;;  %18249 = vst [vmem:[#allocation17_spill] sm:$0xff] %v14944_v14  ;;  %v4745_v9 = vrot.slane %v14944_v14, 1  ;;  %v4327_v7 = vshrl.u32 %v3948_v34, 16  ;;  %v3983_v32 = vcombine.high %v14938_v24, %v14927_v59  ;;  %v3982_v5 = vcombine.low %v14938_v24, %v14927_v59  ;;  %11837 = vmatprep.subr.bf16.mxu0 %v12837_v23  ;;  %v12843_v23 = vld [vmem:[%s17898_s8 + $0x148] sm:$0xff]  }
 0x1da   : > { %18251 = vst [vmem:[#allocation24_spill] sm:$0xff] %v14966_v51  ;;  %v4340_v56 = vor.u32 %v4338_v33, %v14957_v44  ;;  %v3985_v52 = vcombine.high %v14951_v49, %v14966_v51  ;;  %v3984_v38 = vcombine.low %v14951_v49, %v14966_v51  ;;  %v4330_v42 = vshll.u32 %v3948_v34, 16  ;;  %11888 = vmatpush3.bf16.msra.mxu1 %v12840_v26  ;;  %v12845_v26 = vld [vmem:[%s17898_s8 + $0x1e0] sm:$0xff]  }
 0x1db   : > { %v4746_v22 = vsel %vm4714_vm14, %v4741_v30, %v4745_v9  ;;  %v14986_v53 = vrot.slane %v4327_v7, 7  ;;  %v3999_v33 = vrot.slane %v3983_v32, %v13327_v8  ;;  %v3992_v34 = vrot.slane %v3982_v5, %v13327_v8  ;;  %11889 = vmatprep.subr.bf16.mxu1 %v12841_v63 }
 0x1dc   : > { %4976 = vmatmul.mubr.bf16.gmra.mxu1 %v4746_v22  ;;  %v14997_v36 = vsel %vm1633_vm7, %v14863_v61, %v4340_v56  ;;  %v4013_v30 = vrot.slane %v3985_v52, %v13327_v8  ;;  %v4006_v7 = vrot.slane %v3984_v38, %v13327_v8  ;;  %v4019_v56 = vcombine.low %v14724_v15, %v3537_v19  ;;  %v12844_v52 = vld [vmem:[%s17898_s8 + $0x108] sm:$0xff]   ;;  %v12848_v15 = vld [vmem:[%s17898_s8 + $0x140] sm:$0xff]  }
 0x1dd   : > { %18252 = vst [vmem:[#allocation28_spill] sm:$0xff] %v14997_v36  ;;  %v15006_v32 = vshll.u32 %v14997_v36, 16  ;;  %4634 = vmatprep.mubr.bf16.mxu0 %v14997_v36  ;;  %v4332_v22 = vor.u32 %v4330_v42, %v14986_v53  ;;  %v15011_v61 = vshrl.u32 %v14997_v36, 16  ;;  %11838 = vmatpush3.bf16.msra.mxu0 %v12838_v58  ;;  %v15024_v42 = vrot.slane %v4016_v39, %v13327_v8 }
 0x1de   : > { %v4015_v5 = vcombine.low %v3999_v33, %v4013_v30  ;;  %v4014_v38 = vcombine.low %v3992_v34, %v4006_v7  ;;  %v15030_v46 = vrot.slane %v11056_v31, %v13327_v8  ;;  %v18255_v39 = vcombine.low %v14664_v6, %v14713_v37  ;;  %11890 = vmatpush3.bf16.msra.mxu1 %v12842_v50  ;;  %v12847_v37 = vld [vmem:[%s17898_s8 + $0x1d8] sm:$0xff]  }
 0x1df   : > { %18253 = vst [vmem:[#allocation36_spill] sm:$0xff] %v15024_v42  ;;  %v4769_v19 = vrot.slane %v15006_v32, 1  ;;  %v15038_v58 = vsel %vm1633_vm7, %v14889_v12, %v4332_v22  ;;  %v15047_v28 = vrot.slane %v4019_v56, %v13327_v8  ;;  %11839 = vmatprep.subr.bf16.mxu0 %v12843_v23  ;;  %v4757_v31 = vor.u32 %v14960_v21, %v4745_v9 }
 0x1e0   : > { %18254 = vst [vmem:[#allocation12_spill] sm:$0xff] %v15030_v46  ;;  %v15044_v33 = vrot.slane %v18255_v39, %v13327_v8  ;;  %v15054_v12 = vshll.u32 %v15038_v58, 16  ;;  %4635 = vmatmul.mubr.bf16.gmra.mxu0 %v15038_v58  ;;  %v4351_v63 = vshrl.u32 %v4015_v5, 16  ;;  %v4343_v6 = vshrl.u32 %v4014_v38, 16  ;;  %11891 = vmatprep.subr.bf16.mxu1 %v12845_v26 }
 0x1e1   : > { %18257 = vst [vmem:[#allocation30_spill] sm:$0xff] %v15047_v28  ;;  %v4770_v50 = vsel %vm4714_vm14, %v4765_v17, %v4769_v19  ;;  %v4354_v23 = vshll.u32 %v4015_v5, 16  ;;  %v4781_v30 = vor.u32 %v15011_v61, %v4769_v19  ;;  %v4346_v34 = vshll.u32 %v4014_v38, 16  ;;  %11840 = vmatpush3.bf16.msra.mxu0 %v12844_v52  ;;  %v12850_v17 = vld [vmem:[%s17898_s8 + $0x100] sm:$0xff]  }
 0x1e2   : > { %18256 = vst [vmem:[#allocation22_spill] sm:$0xff] %v15044_v33  ;;  %4983 = vmatprep.mubr.bf16.mxu1 %v4770_v50  ;;  %v4761_v9 = vrot.slane %v15054_v12, 1  ;;  %v15063_v7 = vrot.slane %v4351_v63, 7  ;;  %v15065_v22 = vrot.slane %v4343_v6, 7  ;;  %v4049_v26 = vcombine.high %v15024_v42, %v15030_v46  ;;  %11841 = vmatprep.subr.bf16.mxu0 %v12848_v15  ;;  %v12849_v15 = vld [vmem:[%s17898_s8 + $0x198] sm:$0xff]   ;;  %v12851_v50 = vld [vmem:[%s17898_s8 + $0x1d0] sm:$0xff]  }
 0x1e3   : > { %v15073_v56 = vshrl.u32 %v15038_v58, 16  ;;  %v4051_v52 = vcombine.high %v15044_v33, %v15047_v28  ;;  %v4048_v5 = vcombine.low %v15024_v42, %v15030_v46  ;;  %v4050_v38 = vcombine.low %v15044_v33, %v15047_v28  ;;  %11892 = vmatpush3.bf16.msra.mxu1 %v12846_v3 }
 0x1e4   : > { %v4762_v19 = vsel %vm4714_vm14, %v4757_v31, %v4761_v9  ;;  %v4356_v39 = vor.u32 %v4354_v23, %v15063_v7  ;;  %v4348_v63 = vor.u32 %v4346_v34, %v15065_v22  ;;  %v15089_v6 = vrot.slane %v14516_v2, %v13327_v8  ;;  %11893 = vmatprep.subr.bf16.mxu1 %v12847_v37  ;;  %v12854_v34 = vld [vmem:[%s17898_s8 + $0x278] sm:$0xff]  }
 0x1e5   : > { %4984 = vmatmul.mubr.bf16.gmra.mxu1 %v4762_v19  ;;  %v4065_v3 = vrot.slane %v4049_v26, %v13327_v8  ;;  %v4079_v28 = vrot.slane %v4051_v52, %v13327_v8  ;;  %v4058_v31 = vrot.slane %v4048_v5, %v13327_v8  ;;  %v4072_v23 = vrot.slane %v4050_v38, %v13327_v8 }
 0x1e6   : > { %v15103_v37 = vsel %vm1633_vm7, %v14957_v44, %v4356_v39  ;;  %v15107_v46 = vsel %vm1633_vm7, %v14986_v53, %v4348_v63  ;;  %v18258_v26 = vcombine.high %v14516_v2, %v14516_v2  ;;  %v18259_v5 = vcombine.high %v14716_v54, %v14716_v54  ;;  %11842 = vmatpush3.bf16.msra.mxu0 %v12850_v17  ;;  %v12852_v2 = vld [vmem:[%s17898_s8 + $0x190] sm:$0xff]  }
 0x1e7   : > { %v15120_v19 = vshll.u32 %v15103_v37, 16  ;;  %4642 = vmatprep.mubr.bf16.mxu0 %v15103_v37  ;;  %v4773_v44 = vor.u32 %v15073_v56, %v4761_v9  ;;  %v15125_v53 = vshll.u32 %v15107_v46, 16  ;;  %v4081_v39 = vcombine.low %v4065_v3, %v4079_v28  ;;  %11894 = vmatpush3.bf16.msra.mxu1 %v12849_v15  ;;  %v12853_v28 = vld [vmem:[%s17898_s8 + $0x1c8] sm:$0xff]  }
 0x1e8   : > { %v15113_v52 = vrot.slane %v18258_v26, %v13327_v8  ;;  %v4083_v38 = vcombine.low %v14731_v35, %v18259_v5  ;;  %v15133_v35 = vsel %vm13306_vm5, %v14648_v45, 0  ;;  %4643 = vmatmul.mubr.bf16.gmra.mxu0 %v15107_v46  ;;  %v4080_v17 = vcombine.low %v4058_v31, %v4072_v23  ;;  %11895 = vmatprep.subr.bf16.mxu1 %v12851_v50  ;;  %v18264_v50 = vld [vmem:[#allocation19_spill] sm:$0xff] }
 0x1e9   : > { %v15140_v63 = vrot.slane %v14789_v29, %v13327_v8  ;;  %v4785_v15 = vrot.slane %v15120_v19, 1  ;;  %v4777_v45 = vrot.slane %v15125_v53, 1  ;;  %v4367_v3 = vshrl.u32 %v4081_v39, 16  ;;  %11943 = vmatprep.subr.bf16.mxu0 %v12854_v34  ;;  %v12855_v34 = vld [vmem:[%s17898_s8 + $0x188] sm:$0xff]  }
 0x1ea   : > { %v4085_v9 = vcombine.low %v15089_v6, %v15113_v52  ;;  %v4370_v26 = vshll.u32 %v4081_v39, 16  ;;  %v4359_v31 = vshrl.u32 %v4080_v17, 16  ;;  %v4362_v23 = vshll.u32 %v4080_v17, 16 }
 0x1eb   : > { %18261 = vst [vmem:[#allocation35_spill] sm:$0xff] %v15140_v63  ;;  %v15148_v5 = vrot.slane %v4083_v38, %v13327_v8  ;;  %v15152_v29 = vrot.slane %v14876_v48, %v13327_v8  ;;  %v18265_v54 = vshrl.u32 %v18264_v50, 16  ;;  %v3067_v51 = vshll.u32 %v18264_v50, 16  ;;  %11896 = vmatpush3.bf16.msra.mxu1 %v12852_v2 }
 0x1ec   : > { %v4786_v42 = vsel %vm4714_vm14, %v4781_v30, %v4785_v15  ;;  %v15160_v59 = vrot.slane %v4367_v3, 7  ;;  %v4778_v38 = vsel %vm4714_vm14, %v4773_v44, %v4777_v45  ;;  %v15166_v48 = vrot.slane %v4359_v31, 7  ;;  %11897 = vmatprep.subr.bf16.mxu1 %v12853_v28  ;;  %v12857_v30 = vld [vmem:[%s17898_s8 + $0x1c0] sm:$0xff]  }
 0x1ed   : > { %18262 = vst [vmem:[#allocation32_spill] sm:$0xff] %v15148_v5  ;;  %18263 = vst [vmem:[#allocation33_spill] sm:$0xff] %v15152_v29  ;;  %v15156_v33 = vrot.slane %v18265_v54, 7  ;;  %4991 = vmatprep.mubr.bf16.mxu1 %v4786_v42  ;;  %v4113_v39 = vrot.slane %v4085_v9, %v13327_v8  ;;  %v4115_v17 = vcombine.high %v15140_v63, %v15148_v5  ;;  %v3057_v2 = vshrl.u32 %v15133_v35, 16 }
 0x1ee   : > { %4992 = vmatmul.mubr.bf16.gmra.mxu1 %v4778_v38  ;;  %v4372_v3 = vor.u32 %v4370_v26, %v15160_v59  ;;  %v15177_v42 = vshrl.u32 %v15103_v37, 16  ;;  %v4114_v44 = vcombine.low %v15140_v63, %v15148_v5  ;;  %v4364_v9 = vor.u32 %v4362_v23, %v15166_v48  ;;  %v12858_v23 = vld [vmem:[%s17898_s8 + $0x180] sm:$0xff]  }
 0x1ef   : > { %v4117_v31 = vcombine.high %v15152_v29, %v4113_v39  ;;  %v4131_v28 = vrot.slane %v4115_v17, %v13327_v8  ;;  %v4116_v50 = vcombine.low %v15152_v29, %v4113_v39  ;;  %v3060_v54 = vshll.u32 %v15133_v35, 16  ;;  %11898 = vmatpush3.bf16.msra.mxu1 %v12855_v34  ;;  %v12867_v34 = vld [vmem:[%s17898_s8 + $0x2f8] sm:$0xff]  }
 0x1f0   : > { %v15188_v38 = vsel %vm1633_vm7, %v15063_v7, %v4372_v3  ;;  %v15191_v26 = vshrl.u32 %v15107_v46, 16  ;;  %v4124_v49 = vrot.slane %v4114_v44, %v13327_v8  ;;  %v4797_v17 = vor.u32 %v15177_v42, %v4785_v15  ;;  %11899 = vmatprep.subr.bf16.mxu1 %v12857_v30 }
 0x1f1   : > { %v15199_v39 = vshll.u32 %v15188_v38, 16  ;;  %4650 = vmatprep.mubr.bf16.mxu0 %v15188_v38  ;;  %v15204_v7 = vsel %vm1633_vm7, %v15065_v22, %v4364_v9  ;;  %v4145_v35 = vrot.slane %v4117_v31, %v13327_v8  ;;  %v15210_v3 = vrot.slane %v3057_v2, 7  ;;  %v18266_v31 = vld [vmem:[#allocation16_spill] sm:$0xff] }
 0x1f2   : > { %v4789_v15 = vor.u32 %v15191_v26, %v4777_v45  ;;  %v15214_v44 = vshll.u32 %v15204_v7, 16  ;;  %4651 = vmatmul.mubr.bf16.gmra.mxu0 %v15204_v7  ;;  %v4138_v5 = vrot.slane %v4116_v50, %v13327_v8  ;;  %v3069_v30 = vor.u32 %v3067_v51, %v15156_v33 }
 0x1f3   : > { %v4801_v22 = vrot.slane %v15199_v39, 1  ;;  %v4147_v9 = vcombine.low %v4131_v28, %v4145_v35  ;;  %v3131_v29 = vsel %vm13337_vm8, %v18266_v31, 0  ;;  %11900 = vmatpush3.bf16.msra.mxu1 %v12858_v23  ;;  %v3130_v45 = vsel %vm13337_vm8, %v14462_v20, 0 }
 0x1f4   : > { %v4793_v2 = vrot.slane %v15214_v44, 1  ;;  %v4146_v63 = vcombine.low %v4124_v49, %v4138_v5  ;;  %12001 = vmatprep.subr.bf16.mxu1 %v12867_v34  ;;  %v3062_v28 = vor.u32 %v3060_v54, %v15210_v3  ;;  %v15234_v49 = vsel %vm13337_vm8, 0, %v3069_v30 }
 0x1f5   : > { %v4802_v62 = vsel %vm4714_vm14, %v4797_v17, %v4801_v22  ;;  %v4383_v50 = vshrl.u32 %v4147_v9, 16  ;;  %v4386_v55 = vshll.u32 %v4147_v9, 16  ;;  %v3606_v5 = vcombine.low %v3130_v45, %v3131_v29 }
 0x1f6   : > { %4999 = vmatprep.mubr.bf16.mxu1 %v4802_v62  ;;  %v4794_v51 = vsel %vm4714_vm14, %v4789_v15, %v4793_v2  ;;  %v4375_v35 = vshrl.u32 %v4146_v63, 16  ;;  %v4378_v31 = vshll.u32 %v4146_v63, 16  ;;  %v5078_v17 = vrot.slane %v14851_v57, 1 }
 0x1f7   : > { %5000 = vmatmul.mubr.bf16.gmra.mxu1 %v4794_v51  ;;  %v15230_v25 = vrot.slane %v4383_v50, 7  ;;  %v3557_v62 = vcombine.high %v14491_v4, %v18198_v60  ;;  %v15244_v63 = vsel %vm13337_vm8, 0, %v3062_v28  ;;  %v15247_v54 = vshrl.u32 %v15188_v38, 16 }
 0x1f8   : > { %v15236_v20 = vrot.slane %v4375_v35, 7  ;;  %v5077_v15 = vrot.slane %v14768_v40, 1  ;;  %v5074_v60 = vrot.slane %v14800_v43, 1  ;;  %v5075_v35 = vrot.slane %v14831_v41, 1 }
 0x1f9   : > { %v4388_v23 = vor.u32 %v4386_v55, %v15230_v25  ;;  %v15255_v55 = vshrl.u32 %v15204_v7, 16  ;;  %v3571_v4 = vrot.slane %v3557_v62, %v13327_v8  ;;  %v4813_v9 = vor.u32 %v15247_v54, %v4801_v22 }
 0x1fa   : > { %v4380_v34 = vor.u32 %v4378_v31, %v15236_v20  ;;  %v5079_v40 = vsel %vm5073_vm15, %v5077_v15, %v5078_v17  ;;  %v5082_v15 = vrot.slane %v14900_v11, 1  ;;  %v15298_v47 = vrot.slane %v18267_v13, 1 }
 0x1fb   : > { %v15252_v29 = vsel %vm1633_vm7, %v15160_v59, %v4388_v23  ;;  %v4805_v45 = vor.u32 %v15255_v55, %v4793_v2  ;;  %v3573_v43 = vcombine.high %v3571_v4, %v3571_v4  ;;  %v3587_v51 = vrot.slane %v3571_v4, %v13327_v8 }
 0x1fc   : > { %v15262_v30 = vshll.u32 %v15252_v29, 16  ;;  %4658 = vmatprep.mubr.bf16.mxu0 %v15252_v29  ;;  %v15267_v59 = vsel %vm1633_vm7, %v15166_v48, %v4380_v34  ;;  %v15277_v28 = vshrl.u32 %v15252_v29, 16  ;;  %v3613_v48 = vrot.slane %v3606_v5, %v13327_v8  ;;  %18268 = vst [vmem:[#allocation34_spill] sm:$0xff] %v15298_v47 }
 0x1fd   : > { %v15271_v50 = vshll.u32 %v15267_v59, 16  ;;  %4659 = vmatmul.mubr.bf16.gmra.mxu0 %v15267_v59  ;;  %v3601_v31 = vrot.slane %v3573_v43, %v13327_v8  ;;  %v3621_v23 = vcombine.low %v15244_v63, %v15234_v49  ;;  %v11057_v4 = vcombine.high %v15089_v6, %v15113_v52 }
 0x1fe   : > { %v4817_v22 = vrot.slane %v15262_v30, 1  ;;  %5242 = vmatprep.mubr.bf16.mxu0 %v5079_v40  ;;  %v3620_v40 = vrot.slane %v3613_v48, %v13327_v8  ;;  %v18269_v52 = vshrl.u32 %v14851_v57, 16  ;;  %v12859_v48 = vld [vmem:[%s17898_s8 + $0x270] sm:$0xff]   ;;  %v15417_v14 = vrot.slane %v15252_v29, 1 }
 0x1ff   : > { %v4809_v2 = vrot.slane %v15271_v50, 1  ;;  %v15294_v24 = vrot.slane %v3621_v23, %v13327_v8  ;;  %v4149_v43 = vcombine.low %v3587_v51, %v3601_v31  ;;  %v4158_v6 = vrot.slane %v11057_v4, %v13327_v8 }
 0x200   : > { %v4818_v62 = vsel %vm4714_vm14, %v4813_v9, %v4817_v22  ;;  %v4824_v34 = vor.u32 %v15277_v28, %v4817_v22  ;;  %v12856_v9 = vld [vmem:[%s17898_s8 + $0x238] sm:$0xff]   ;;  %v11058_v22 = vcombine.high %v3587_v51, %v3601_v31  ;;  %v5076_v31 = vsel %vm5073_vm15, %v5074_v60, %v5075_v35 }
 0x201   : > { %5007 = vmatprep.mubr.bf16.mxu1 %v4818_v62  ;;  %v4810_v5 = vsel %vm4714_vm14, %v4805_v45, %v4809_v2  ;;  %v15306_v45 = vrot.slane %v18269_v52, 1  ;;  %v15313_v13 = vrot.slane %v15294_v24, %v13327_v8  ;;  %v4165_v23 = vrot.slane %v4149_v43, %v13327_v8 }
 0x202   : > { %5008 = vmatmul.mubr.bf16.gmra.mxu1 %v4810_v5  ;;  %v18270_v62 = vshll.u32 %v14851_v57, 16  ;;  %v5083_v4 = vsel %vm5073_vm15, %v5078_v17, %v5082_v15  ;;  %v18271_v5 = vshll.u32 %v14831_v41, 16  ;;  %v12860_v17 = vld [vmem:[%s17898_s8 + $0x230] sm:$0xff]   ;;  %v5606_v60 = vrot.slane %v15006_v32, 2 }
 0x203   : > { %5015 = vmatprep.mubr.bf16.mxu1 %v4824_v34  ;;  %v4172_v34 = vrot.slane %v11058_v22, %v13327_v8  ;;  %v4151_v16 = vcombine.low %v3620_v40, %v15313_v13  ;;  %v4181_v27 = vcombine.high %v4158_v6, %v4165_v23  ;;  %v4180_v11 = vcombine.low %v4158_v6, %v4165_v23  ;;  %v12861_v22 = vld [vmem:[%s17898_s8 + $0x268] sm:$0xff]  }
 0x204   : > { %v15318_v51 = vrot.slane %v18270_v62, 2  ;;  %v15325_v52 = vrot.slane %v18271_v5, 2  ;;  %v15331_v62 = vshrl.u32 %v15267_v59, 16  ;;  %v5080_v40 = vrot.slane %v14935_v0, 1 }
 0x205   : > { %5243 = vmatmul.mubr.bf16.vlgmr.msra.gmra.mxu0 %v5076_v31  ;;  %v4179_v6 = vrot.slane %v4151_v16, %v13327_v8  ;;  %v4197_v31 = vrot.slane %v4181_v27, %v13327_v8  ;;  %v5605_v5 = vrot.slane %v15011_v61, 1  ;;  %v12862_v16 = vld [vmem:[%s17898_s8 + $0x228] sm:$0xff]   ;;  %v12863_v27 = vld [vmem:[%s17898_s8 + $0x260] sm:$0xff]   ;;  %v5614_v0 = vrot.slane %v15120_v19, 2 }
 0x206   : > { %18272 = vst [vmem:[#allocation26_spill] sm:$0xff] %v15325_v52  ;;  %11944 = vmatpush3.bf16.msra.mxu0 %v12856_v9  ;;  %5250 = vmatprep.mubr.bf16.mxu0 %v5083_v4  ;;  %v4821_v23 = vor.u32 %v15331_v62, %v4809_v2  ;;  %v5601_v2 = vrot.slane %v15073_v56, 1  ;;  %v5613_v9 = vrot.slane %v15177_v42, 1  ;;  %vm13068_vm5 = vmmov 0  }
 0x207   : > { %11945 = vmatprep.subr.bf16.mxu0 %v12859_v48  ;;  %v4183_v43 = vcombine.high %v4172_v34, %v4179_v6  ;;  %v4182_v41 = vcombine.low %v4172_v34, %v4179_v6  ;;  %v4190_v48 = vrot.slane %v4180_v11, %v13327_v8  ;;  %v15358_v6 = vor.u32 %v5606_v60, %v5605_v5 }
 0x208   : > { %v5615_v60 = vor.u32 %v5614_v0, %v5613_v9  ;;  %v5609_v5 = vrot.slane %v15191_v26, 1  ;;  %v5610_v9 = vrot.slane %v15125_v53, 2 }
 0x209   : > { %v4211_v34 = vrot.slane %v4183_v43, %v13327_v8  ;;  %v4204_v11 = vrot.slane %v4182_v41, %v13327_v8  ;;  %18273 = vst [vmem:[#allocation37_spill] sm:$0xff] %v15358_v6  ;;  %v18281_v41 = vrot.slane %v14997_v36, 1 }
 0x20a   : > { %5016 = vmatmul.mubr.bf16.gmra.mxu1 %v4821_v23  ;;  %11946 = vmatpush3.bf16.msra.mxu0 %v12860_v17  ;;  %v5602_v17 = vrot.slane %v15054_v12, 2  ;;  %v5081_v23 = vsel %vm5073_vm15, %v5075_v35, %v5080_v40  ;;  %v12864_v35 = vld [vmem:[%s17898_s8 + $0x220] sm:$0xff]   ;;  %v15384_v0 = vsel %vm18046_vm0, %v15358_v6, %v5615_v60  ;;  %v5617_v6 = vrot.slane %v15255_v55, 1 }
 0x20b   : > { %5482 = vmatprep.mubr.bf16.mxu1 %v5083_v4  ;;  %11947 = vmatprep.subr.bf16.mxu0 %v12861_v22  ;;  %v18274_v4 = vrot.slane %v14997_v36, 1  ;;  %v4213_v57 = vcombine.low %v4197_v31, %v4211_v34  ;;  %v4212_v47 = vcombine.low %v4190_v48, %v4204_v11  ;;  %18276 = vst [vmem:[#allocation8_spill] sm:$0xff] %v15384_v0  ;;  %v5621_v11 = vrot.slane %v15247_v54, 1 }
 0x20c   : > { %v15367_v43 = vor.u32 %v5602_v17, %v5601_v2  ;;  %v12868_v17 = vld [vmem:[%s17898_s8 + $0x2b8] sm:$0xff]   ;;  %v5611_v0 = vor.u32 %v5610_v9, %v5609_v5  ;;  %v5618_v5 = vrot.slane %v15214_v44, 2  ;;  %v18280_v9 = vrot.slane %v15103_v37, 1 }
 0x20d   : > { %5251 = vmatmul.mubr.bf16.gmra.mxu0 %v5081_v23  ;;  %v5087_v22 = vsel %vm5073_vm15, %v5082_v15, %v18274_v4  ;;  %v12865_v15 = vld [vmem:[%s17898_s8 + $0x258] sm:$0xff]   ;;  %v4399_v31 = vshrl.u32 %v4213_v57, 16  ;;  %v4402_v48 = vshll.u32 %v4213_v57, 16  ;;  %v4391_v2 = vshrl.u32 %v4212_v47, 16 }
 0x20e   : > { %18275 = vst [vmem:[#allocation25_spill] sm:$0xff] %v15367_v43  ;;  %5258 = vmatprep.mubr.bf16.mxu0 %v5087_v22  ;;  %11948 = vmatpush3.bf16.msra.mxu0 %v12862_v16  ;;  %v4394_v34 = vshll.u32 %v4212_v47, 16  ;;  %v12871_v47 = vld [vmem:[%s17898_s8 + $0x2f0] sm:$0xff]   ;;  %v12866_v16 = vld [vmem:[%s17898_s8 + $0x218] sm:$0xff]  }
 0x20f   : > { %11949 = vmatprep.subr.bf16.mxu0 %v12863_v27  ;;  %v15391_v57 = vrot.slane %v4399_v31, 7  ;;  %v15393_v4 = vrot.slane %v4391_v2, 7  ;;  %v5622_v27 = vrot.slane %v15199_v39, 2  ;;  %v18279_v31 = vrot.slane %v15038_v58, 1 }
 0x211   : > { %18277 = vst [vmem:[#allocation15_spill] sm:$0xff] %v15391_v57  ;;  %18278 = vst [vmem:[#allocation19_spill] sm:$0xff] %v15393_v4  ;;  %v5085_v2 = vsel %vm5073_vm15, %v5080_v40, %v18279_v31  ;;  %v4396_v52 = vor.u32 %v4394_v34, %v15393_v4  ;;  %v12872_v40 = vld [vmem:[%s17898_s8 + $0x2b0] sm:$0xff]   ;;  %v12873_v34 = vld [vmem:[%s17898_s8 + $0x2e8] sm:$0xff]   ;;  %v5619_v31 = vor.u32 %v5618_v5, %v5617_v6  ;;  %v5625_v5 = vrot.slane %v15331_v62, 1 }
 0x212   : > { %5483 = vmatmul.mubr.bf16.vlgmr.msra.gmra.mxu1 %v5081_v23  ;;  %11950 = vmatpush3.bf16.msra.mxu0 %v12864_v35  ;;  %v12869_v23 = vld [vmem:[%s17898_s8 + $0x250] sm:$0xff]   ;;  %v4404_v35 = vor.u32 %v4402_v48, %v15391_v57  ;;  %v5623_v48 = vor.u32 %v5622_v27, %v5621_v11  ;;  %v15442_v27 = vrot.slane %v15267_v59, 1  ;;  %v5626_v6 = vrot.slane %v15271_v50, 2 }
 0x213   : > { %5490 = vmatprep.mubr.bf16.mxu1 %v5087_v22  ;;  %11951 = vmatprep.subr.bf16.mxu0 %v12865_v15  ;;  %v5091_v22 = vsel %vm5073_vm15, %v18281_v41, %v18280_v9  ;;  %v15424_v15 = vsel %vm18046_vm0, %v15367_v43, %v5611_v0  ;;  %v5629_v9 = vrot.slane %v15277_v28, 1  ;;  %v12870_v11 = vld [vmem:[%s17898_s8 + $0x210] sm:$0xff]   ;;  %v18285_v4 = vrot.slane %v15107_v46, 1 }
 0x214   : > { %12002 = vmatpush3.bf16.msra.mxu1 %v12868_v17  ;;  %18282 = vst [vmem:[#allocation16_spill] sm:$0xff] %v15424_v15  ;;  %v15431_v41 = vsel %vm1633_vm7, %v15230_v25, %v4404_v35  ;;  %v15435_v17 = vsel %vm1633_vm7, %v15236_v20, %v4396_v52  ;;  %v15447_v35 = vsel %vm18046_vm0, %v5615_v60, %v5623_v48  ;;  %v12875_v20 = vld [vmem:[%s17898_s8 + $0x248] sm:$0xff]   ;;  %v18287_v43 = vrot.slane %v15188_v38, 2 }
 0x215   : > { %5259 = vmatmul.mubr.bf16.gmra.mxu0 %v5085_v2  ;;  %12003 = vmatprep.subr.bf16.mxu1 %v12871_v47  ;;  %v18016_v47 = vrot.slane %v15431_v41, 1  ;;  %v18018_v25 = vrot.slane %v15435_v17, 1  ;;  %18283 = vst [vmem:[#allocation42_spill] sm:$0xff] %v15447_v35  ;;  %v15453_v52 = vsel %vm18046_vm0, %v5611_v0, %v5619_v31  ;;  %v18023_v35 = vshrl.u32 %v15431_v41, 16 }
 0x216   : > { %5266 = vmatprep.mubr.bf16.mxu0 %v5091_v22  ;;  %11952 = vmatpush3.bf16.msra.mxu0 %v12866_v16  ;;  %18284 = vst [vmem:[#allocation43_spill] sm:$0xff] %v15453_v52  ;;  %v5630_v16 = vrot.slane %v15262_v30, 2  ;;  %v18024_v15 = vshll.u32 %v15431_v41, 16  ;;  %v5627_v36 = vor.u32 %v5626_v6, %v5625_v5  ;;  %v18289_v6 = vrot.slane %v15188_v38, 1 }
 0x217   : > { %11953 = vmatprep.subr.bf16.mxu0 %v12869_v23  ;;  %v15462_v60 = vsel %vm5073_vm15, %v15417_v14, %v18016_v47  ;;  %v12874_v23 = vld [vmem:[%s17898_s8 + $0x2a8] sm:$0xff]   ;;  %v15471_v0 = vsel %vm5073_vm15, %v15442_v27, %v18018_v25  ;;  %v12877_v47 = vld [vmem:[%s17898_s8 + $0x2e0] sm:$0xff]   ;;  %v18286_v25 = vrot.slane %v15038_v58, 1 }
 0x218   : > { %12004 = vmatpush3.bf16.msra.mxu1 %v12872_v40  ;;  %v5918_v40 = vrot.slane %v15252_v29, 2  ;;  %v5631_v52 = vor.u32 %v5630_v16, %v5629_v9  ;;  %v18026_v16 = vshrl.u32 %v15435_v17, 16  ;;  %v15514_v5 = vsel %vm18046_vm0, %v5619_v31, %v5627_v36 }
 0x219   : > { %12005 = vmatprep.subr.bf16.mxu1 %v12873_v34  ;;  %v5089_v57 = vsel %vm5073_vm15, %v18286_v25, %v18285_v4  ;;  %v12876_v34 = vld [vmem:[%s17898_s8 + $0x208] sm:$0xff]   ;;  %v5648_v25 = vrot.slane %v18024_v15, 2  ;;  %18291 = vst [vmem:[#allocation45_spill] sm:$0xff] %v15514_v5  ;;  %v15519_v15 = vrot.slane %v15431_v41, 2 }
 0x21a   : > { %5491 = vmatmul.mubr.bf16.gmra.mxu1 %v5085_v2  ;;  %11954 = vmatpush3.bf16.msra.mxu0 %v12870_v11  ;;  %v15491_v9 = vsel %vm18047_vm1, %v18287_v43, %v5918_v40  ;;  %v12880_v2 = vld [vmem:[%s17898_s8 + $0x240] sm:$0xff]   ;;  %v15498_v4 = vsel %vm18046_vm0, %v5623_v48, %v5631_v52  ;;  %v5645_v11 = vrot.slane %v18023_v35, 1  ;;  %v18027_v43 = vshll.u32 %v15435_v17, 16 }
 0x21b   : > { %18288 = vst [vmem:[#allocation44_spill] sm:$0xff] %v15491_v9  ;;  %5498 = vmatprep.mubr.bf16.mxu1 %v5091_v22  ;;  %11955 = vmatprep.subr.bf16.mxu0 %v12875_v20  ;;  %v18290_v22 = vrot.slane %v15103_v37, 1  ;;  %v12878_v48 = vld [vmem:[%s17898_s8 + $0x2a0] sm:$0xff]   ;;  %v5636_v35 = vrot.slane %v18026_v16, 1  ;;  %v15530_v9 = vrot.slane %v15435_v17, 2 }
 0x21c   : > { %12006 = vmatpush3.bf16.msra.mxu1 %v12874_v23  ;;  %v15524_v23 = vor.u32 %v5648_v25, %v5645_v11  ;;  %v5639_v31 = vrot.slane %v18027_v43, 2  ;;  %v15540_v11 = vsel %vm18047_vm1, %v5918_v40, %v15519_v15  ;;  %v6421_v25 = vrot.slane %v15011_v61, 2  ;;  %v12886_v43 = vld [vmem:[%s17898_s8 + $0x378] sm:$0xff]  }
 0x21d   : > { %v5095_v20 = vsel %vm5073_vm15, %v18290_v22, %v18289_v6  ;;  %5267 = vmatmul.mubr.bf16.gmra.mxu0 %v5089_v57  ;;  %12007 = vmatprep.subr.bf16.mxu1 %v12877_v47  ;;  %v12879_v6 = vld [vmem:[%s17898_s8 + $0x2d8] sm:$0xff]   ;;  %v18029_v22 = vrot.slane %v15267_v59, 2  ;;  %v12882_v47 = vld [vmem:[%s17898_s8 + $0x200] sm:$0xff]   ;;  %18293 = vst [vmem:[#allocation47_spill] sm:$0xff] %v15540_v11  ;;  %v6422_v40 = vrot.slane %v15006_v32, 3  ;;  %v3132_v61 = vsel %vm13337_vm8, %v15210_v3, 0 }
 0x21e   : > { %18292 = vst [vmem:[#allocation46_spill] sm:$0xff] %v15524_v23  ;;  %5274 = vmatprep.mubr.bf16.mxu0 %v5095_v20  ;;  %11956 = vmatpush3.bf16.msra.mxu0 %v12876_v34  ;;  %v15548_v16 = vsel %vm18046_vm0, %v5631_v52, %v15524_v23  ;;  %v15550_v34 = vor.u32 %v5639_v31, %v5636_v35  ;;  %v18296_v11 = vrot.slane %v15107_v46, 1  ;;  %v18297_v35 = vrot.slane %v15188_v38, 1  ;;  %v12881_v32 = vld [vmem:[%s17898_s8 + $0x298] sm:$0xff]   ;;  %v12883_v3 = vld [vmem:[%s17898_s8 + $0x2d0] sm:$0xff]  }
 0x21f   : > { %11957 = vmatprep.subr.bf16.mxu0 %v12880_v2  ;;  %v15556_v5 = vsel %vm18047_vm1, %v18029_v22, %v15530_v9  ;;  %v18295_v2 = vrot.slane %v15204_v7, 1  ;;  %v6414_v22 = vrot.slane %v15073_v56, 2  ;;  %v6425_v23 = vrot.slane %v15191_v26, 2 }
 0x220   : > { %18294 = vst [vmem:[#allocation48_spill] sm:$0xff] %v15556_v5  ;;  %v5099_v31 = vsel %vm5073_vm15, %v18297_v35, %v15417_v14  ;;  %12008 = vmatpush3.bf16.msra.mxu1 %v12878_v48  ;;  %v6415_v35 = vrot.slane %v15054_v12, 3  ;;  %v6429_v48 = vrot.slane %v15177_v42, 2  ;;  %v18298_v5 = vrot.slane %v15204_v7, 1 }
 0x221   : > { %v5093_v52 = vsel %vm5073_vm15, %v18296_v11, %v18295_v2  ;;  %12009 = vmatprep.subr.bf16.mxu1 %v12879_v6  ;;  %v15580_v11 = vsel %vm18046_vm0, %v5627_v36, %v15550_v34  ;;  %v15582_v2 = vor.u32 %v6422_v40, %v6421_v25  ;;  %v6430_v6 = vrot.slane %v15120_v19, 3 }
 0x222   : > { %5499 = vmatmul.mubr.bf16.gmra.mxu1 %v5089_v57  ;;  %v15590_v56 = vsel %vm5073_vm15, %v18298_v5, %v15442_v27  ;;  %11958 = vmatpush3.bf16.msra.mxu0 %v12882_v47  ;;  %v6426_v36 = vrot.slane %v15125_v53, 3  ;;  %v5597_v25 = vrot.slane %v14921_v1, 1  ;;  %v15596_v12 = vor.u32 %v6415_v35, %v6414_v22  ;;  %v12884_v5 = vld [vmem:[%s17898_s8 + $0x290] sm:$0xff]   ;;  %v12887_v35 = vld [vmem:[%s17898_s8 + $0x288] sm:$0xff]  }
 0x223   : > { %5506 = vmatprep.mubr.bf16.mxu1 %v5095_v20  ;;  %12059 = vmatprep.subr.bf16.mxu0 %v12886_v43  ;;  %v6437_v42 = vrot.slane %v15247_v54, 2  ;;  %v6438_v57 = vrot.slane %v15199_v39, 3  ;;  %v6431_v19 = vor.u32 %v6430_v6, %v6429_v48  ;;  %v6433_v26 = vrot.slane %v15255_v55, 2  ;;  %v12885_v43 = vld [vmem:[%s17898_s8 + $0x2c8] sm:$0xff]  }
 0x224   : > { %12010 = vmatpush3.bf16.msra.mxu1 %v12881_v32  ;;  %v6427_v47 = vor.u32 %v6426_v36, %v6425_v23  ;;  %v6434_v53 = vrot.slane %v15214_v44, 3  ;;  %v6445_v39 = vrot.slane %v15277_v28, 2  ;;  %v6446_v20 = vrot.slane %v15262_v30, 3 }
 0x225   : > { %5275 = vmatmul.mubr.bf16.gmra.mxu0 %v5093_v52  ;;  %12011 = vmatprep.subr.bf16.mxu1 %v12883_v3  ;;  %v6439_v54 = vor.u32 %v6438_v57, %v6437_v42  ;;  %v15612_v23 = vsel %vm18044_vm3, %v15582_v2, %v6431_v19  ;;  %v6441_v22 = vrot.slane %v15331_v62, 2  ;;  %v6442_v28 = vrot.slane %v15271_v50, 3  ;;  %v12889_v42 = vld [vmem:[%s17898_s8 + $0x2c0] sm:$0xff]  }
 0x226   : > { %5282 = vmatprep.mubr.bf16.mxu0 %v5099_v31  ;;  %v15616_v44 = vsel %vm18044_vm3, %v15596_v12, %v6427_v47  ;;  %v6435_v55 = vor.u32 %v6434_v53, %v6433_v26  ;;  %v6447_v32 = vor.u32 %v6446_v20, %v6445_v39  ;;  %v18299_v30 = vshrl.u32 %v15431_v41, 16 }
 0x227   : > { %v15620_v40 = vsel %vm18044_vm3, %v6431_v19, %v6439_v54  ;;  %v18300_v6 = vshll.u32 %v15431_v41, 16  ;;  %v3622_v36 = vcombine.high %v15244_v63, %v15234_v49  ;;  %v3637_v50 = vcombine.high %v15294_v24, %v15294_v24 }
 0x228   : > { %v6453_v3 = vrot.slane %v18299_v30, 2  ;;  %12012 = vmatpush3.bf16.msra.mxu1 %v12884_v5  ;;  %v15629_v48 = vsel %vm18044_vm3, %v6427_v47, %v6435_v55  ;;  %v15641_v57 = vsel %vm18044_vm3, %v6439_v54, %v6447_v32  ;;  %v6443_v5 = vor.u32 %v6442_v28, %v6441_v22 }
 0x229   : > { %v6454_v62 = vrot.slane %v18300_v6, 3  ;;  %12013 = vmatprep.subr.bf16.mxu1 %v12885_v43  ;;  %v3667_v19 = vcombine.high %v15313_v13, %v15313_v13  ;;  %v18301_v47 = vsel %vm13337_vm8, %v15156_v33, 0  ;;  %v3636_v24 = vrot.slane %v3622_v36, %v13327_v8 }
 0x22a   : > { %v3671_v49 = vcombine.low %v3132_v61, %v18301_v47  ;;  %5507 = vmatmul.mubr.bf16.gmra.mxu1 %v5093_v52  ;;  %v3659_v26 = vrot.slane %v3637_v50, %v13327_v8  ;;  %v18302_v53 = vshrl.u32 %v15435_v17, 16  ;;  %v5598_v54 = vrot.slane %v14916_v10, 2  ;;  %v12890_v52 = vld [vmem:[%s17898_s8 + $0x280] sm:$0xff]  }
 0x22b   : > { %v15649_v63 = vor.u32 %v6454_v62, %v6453_v3  ;;  %5514 = vmatprep.mubr.bf16.mxu1 %v5099_v31  ;;  %v15657_v13 = vsel %vm18044_vm3, %v6435_v55, %v6443_v5  ;;  %v18303_v33 = vshll.u32 %v15435_v17, 16  ;;  %v3638_v31 = vcombine.high %v3636_v24, %v3636_v24  ;;  %v12899_v55 = vld [vmem:[%s17898_s8 + $0x3f8] sm:$0xff]  }
 0x22c   : > { %v6449_v43 = vrot.slane %v18302_v53, 2  ;;  %v3678_v39 = vrot.slane %v3671_v49, %v13327_v8  ;;  %12014 = vmatpush3.bf16.msra.mxu1 %v12887_v35  ;;  %v3652_v22 = vrot.slane %v3636_v24, %v13327_v8  ;;  %v3669_v28 = vcombine.high %v3659_v26, %v3659_v26 }
 0x22d   : > { %v6450_v61 = vrot.slane %v18303_v33, 3  ;;  %v15667_v20 = vsel %vm18044_vm3, %v6447_v32, %v15649_v63  ;;  %5283 = vmatmul.mubr.bf16.gmra.mxu0 %v15590_v56  ;;  %12015 = vmatprep.subr.bf16.mxu1 %v12889_v42  ;;  %v4214_v30 = vcombine.low %v3659_v26, %v3667_v19  ;;  %v3666_v35 = vrot.slane %v3638_v31, %v13327_v8 }
 0x22e   : > { %5290 = vmatprep.mubr.bf16.mxu0 %v15417_v14  ;;  %v3668_v32 = vcombine.high %v3652_v22, %v3652_v22  ;;  %v3685_v6 = vrot.slane %v3678_v39, %v13327_v8  ;;  %v4215_v62 = vcombine.low %v3669_v28, %v3652_v22  ;;  %v5599_v36 = vor.u32 %v5598_v54, %v5597_v25  ;;  %v18305_v54 = vld [vmem:[#allocation17_spill] sm:$0xff] }
 0x22f   : > { %v15674_v3 = vor.u32 %v6450_v61, %v6449_v43  ;;  %v4224_v50 = vrot.slane %v4214_v30, %v13327_v8  ;;  %v3670_v19 = vcombine.high %v3666_v35, %v3666_v35  ;;  %v18304_v25 = vor.u32 %v15318_v51, %v15306_v45 }
 0x230   : > { %12016 = vmatpush3.bf16.msra.mxu1 %v12890_v52  ;;  %v4216_v47 = vcombine.low %v3666_v35, %v3668_v32  ;;  %v4231_v14 = vrot.slane %v4215_v62, %v13327_v8  ;;  %v5590_v43 = vrot.slane %v14960_v21, 1  ;;  %v5591_v39 = vrot.slane %v18305_v54, 2 }
 0x231   : > { %v15684_v42 = vsel %vm18044_vm3, %v6443_v5, %v15674_v3  ;;  %12117 = vmatprep.subr.bf16.mxu1 %v12899_v55  ;;  %v4217_v49 = vcombine.low %v3670_v19, %v3685_v6  ;;  %v5600_v5 = vsel %vm18046_vm0, %v18304_v25, %v5599_v36  ;;  %v6750_v61 = vrot.slane %v15252_v29, 3  ;;  %v12888_v6 = vld [vmem:[%s17898_s8 + $0x338] sm:$0xff]  }
 0x232   : > { %5515 = vmatmul.mubr.bf16.gmra.mxu1 %v15590_v56  ;;  %v4238_v24 = vrot.slane %v4216_v47, %v13327_v8  ;;  %v4247_v26 = vcombine.high %v4224_v50, %v4231_v14  ;;  %v4246_v53 = vcombine.low %v4224_v50, %v4231_v14  ;;  %v18033_v56 = vrot.slane %v15188_v38, 3  ;;  %v18307_v47 = vld [vmem:[#allocation26_spill] sm:$0xff] }
 0x233   : > { %5522 = vmatprep.mubr.bf16.mxu1 %v15462_v60  ;;  %v4245_v33 = vrot.slane %v4217_v49, %v13327_v8  ;;  %v18032_v52 = vrot.slane %v15267_v59, 3  ;;  %v6754_v45 = vrot.slane %v15431_v41, 3  ;;  %v6752_v51 = vrot.slane %v15435_v17, 3  ;;  %v18308_v14 = vld [vmem:[#allocation34_spill] sm:$0xff] }
 0x234   : > { %v4263_v60 = vrot.slane %v4247_v26, %v13327_v8  ;;  %v4256_v28 = vrot.slane %v4246_v53, %v13327_v8  ;;  %v15708_v55 = vsel %vm18045_vm4, %v18033_v56, %v6750_v61  ;;  %v5592_v29 = vor.u32 %v5591_v39, %v5590_v43  ;;  %v18310_v26 = vld [vmem:[#allocation23_spill] sm:$0xff]  ;;  %v18311_v25 = vld [vmem:[#allocation14_spill] sm:$0xff] }
 0x235   : > { %5291 = vmatmul.mubr.bf16.gmra.mxu0 %v15442_v27  ;;  %v4249_v31 = vcombine.high %v4238_v24, %v4245_v33  ;;  %v4248_v22 = vcombine.low %v4238_v24, %v4245_v33  ;;  %v15713_v27 = vsel %vm18045_vm4, %v6750_v61, %v6754_v45  ;;  %v15720_v30 = vsel %vm18045_vm4, %v18032_v52, %v6752_v51 }
 0x236   : > { %5793 = vmatprep.mubr.bf16.mxu0 %v5600_v5  ;;  %v18306_v19 = vrot.slane %v15431_v41, 1  ;;  %v18309_v49 = vor.u32 %v18307_v47, %v18308_v14  ;;  %v5901_v53 = vrot.slane %v18310_v26, 2  ;;  %v18034_v5 = vrot.slane %v18311_v25, 2  ;;  %v18315_v26 = vld [vmem:[#allocation25_spill] sm:$0xff] }
 0x237   : > { %v4277_v35 = vrot.slane %v4249_v31, %v13327_v8  ;;  %v4270_v32 = vrot.slane %v4248_v22, %v13327_v8  ;;  %v12892_v22 = vld [vmem:[%s17898_s8 + $0x330] sm:$0xff]  }
 0x238   : > { %v5593_v24 = vsel %vm18046_vm0, %v18309_v49, %v5592_v29 }
 0x239   : > { %v4279_v62 = vcombine.low %v4263_v60, %v4277_v35  ;;  %v4278_v50 = vcombine.low %v4256_v28, %v4270_v32  ;;  %v18312_v60 = vld [vmem:[#allocation37_spill] sm:$0xff]  ;;  %v5903_v32 = vsel %vm18047_vm1, %v5901_v53, %v18034_v5  ;;  %v5604_v53 = vsel %vm18046_vm0, %v5592_v29, %v18315_v26 }
 0x23a   : > { %5523 = vmatmul.mubr.bf16.gmra.mxu1 %v15471_v0  ;;  %v12891_v0 = vld [vmem:[%s17898_s8 + $0x370] sm:$0xff]   ;;  %v5608_v31 = vsel %vm18046_vm0, %v5599_v36, %v18312_v60  ;;  %v12893_v36 = vld [vmem:[%s17898_s8 + $0x368] sm:$0xff]  }
 0x23b   : > { %5530 = vmatprep.mubr.bf16.mxu1 %v18306_v19  ;;  %v4415_v43 = vshrl.u32 %v4279_v62, 16  ;;  %v4418_v39 = vshll.u32 %v4279_v62, 16  ;;  %v4407_v33 = vshrl.u32 %v4278_v50, 16  ;;  %v4410_v61 = vshll.u32 %v4278_v50, 16  ;;  %v18313_v62 = vld [vmem:[#allocation39_spill] sm:$0xff]  ;;  %v18314_v50 = vld [vmem:[#allocation18_spill] sm:$0xff] }
 0x23c   : > { %v5898_v19 = vrot.slane %v18313_v62, 2 }
 0x23d   : > { %5794 = vmatmul.mubr.bf16.vlgmr.msra.gmra.mxu0 %v5593_v24  ;;  %v4417_v28 = vrot.slane %v4415_v43, 7  ;;  %v4409_v35 = vrot.slane %v4407_v33, 7  ;;  %v18320_v43 = vld [vmem:[#allocation8_spill] sm:$0xff] }
 0x23e   : > { %12060 = vmatpush3.bf16.msra.mxu0 %v12888_v6  ;;  %5801 = vmatprep.mubr.bf16.mxu0 %v5608_v31  ;;  %v18317_v31 = vrot.slane %v15435_v17, 1 }
 0x23f   : > { %12061 = vmatprep.subr.bf16.mxu0 %v12891_v0  ;;  %v4420_v6 = vor.u32 %v4418_v39, %v4417_v28  ;;  %v4412_v14 = vor.u32 %v4410_v61, %v4409_v35  ;;  %v4441_v49 = vsel %vm13337_vm8, %v4417_v28, 0  ;;  %v4440_v24 = vsel %vm13337_vm8, %v4409_v35, 0  ;;  %v18316_v0 = vld [vmem:[#allocation28_spill] sm:$0xff]  ;;  %v18318_v61 = vld [vmem:[#allocation15_spill] sm:$0xff] }
 0x240   : > { %v6481_v33 = vshll.u32 %v4441_v49, 16  ;;  %v6476_v60 = vshll.u32 %v4440_v24, 16  ;;  %v12894_v39 = vld [vmem:[%s17898_s8 + $0x328] sm:$0xff]   ;;  %v18319_v35 = vld [vmem:[#allocation19_spill] sm:$0xff]  ;;  %v6762_v29 = vrot.slane %v4441_v49, 3  ;;  %v6760_v26 = vrot.slane %v4440_v24, 3 }
 0x241   : > { %v15766_v28 = vsel %vm1633_vm7, %v18318_v61, %v4420_v6  ;;  %v15770_v62 = vsel %vm1633_vm7, %v18319_v35, %v4412_v14 }
 0x242   : > { %5531 = vmatmul.mubr.bf16.gmra.mxu1 %v18317_v31  ;;  %12062 = vmatpush3.bf16.msra.mxu0 %v12892_v22  ;;  %v12895_v22 = vld [vmem:[%s17898_s8 + $0x360] sm:$0xff]   ;;  %v18035_v31 = vrot.slane %v15766_v28, 2  ;;  %v18036_v52 = vrot.slane %v15770_v62, 2  ;;  %v6467_v56 = vshrl.u32 %v15766_v28, 16  ;;  %v6470_v6 = vshll.u32 %v15766_v28, 16 }
 0x243   : > { %6066 = vmatprep.mubr.bf16.mxu1 %v5903_v32  ;;  %12063 = vmatprep.subr.bf16.mxu0 %v12893_v36  ;;  %v6458_v61 = vshrl.u32 %v15770_v62, 16  ;;  %v6461_v14 = vshll.u32 %v15770_v62, 16  ;;  %v6483_v49 = vrot.slane %v6481_v33, 3  ;;  %v6478_v24 = vrot.slane %v6476_v60, 3 }
 0x244   : > { %v15785_v32 = vsel %vm18047_vm1, %v15519_v15, %v18035_v31  ;;  %v15791_v36 = vsel %vm18047_vm1, %v15530_v9, %v18036_v52  ;;  %v6469_v35 = vrot.slane %v6467_v56, 2  ;;  %v6472_v5 = vrot.slane %v6470_v6, 3  ;;  %v12897_v52 = vld [vmem:[%s17898_s8 + $0x358] sm:$0xff]  }
 0x245   : > { %5802 = vmatmul.mubr.bf16.gmra.mxu0 %v5604_v53  ;;  %v12896_v53 = vld [vmem:[%s17898_s8 + $0x320] sm:$0xff]   ;;  %v6460_v33 = vrot.slane %v6458_v61, 2  ;;  %v6463_v60 = vrot.slane %v6461_v14, 3  ;;  %v6758_v31 = vrot.slane %v15766_v28, 3  ;;  %v6756_v47 = vrot.slane %v15770_v62, 3 }
 0x246   : > { %5809 = vmatprep.mubr.bf16.mxu0 %v18320_v43  ;;  %12064 = vmatpush3.bf16.msra.mxu0 %v12894_v39  ;;  %v6473_v56 = vor.u32 %v6472_v5, %v6469_v35  ;;  %v12900_v43 = vld [vmem:[%s17898_s8 + $0x3b8] sm:$0xff]   ;;  %v18321_v5 = vrot.slane %v18314_v50, 2  ;;  %v12903_v35 = vld [vmem:[%s17898_s8 + $0x3f0] sm:$0xff]  }
 0x247   : > { %12065 = vmatprep.subr.bf16.mxu0 %v12895_v22  ;;  %v6464_v39 = vor.u32 %v6463_v60, %v6460_v33  ;;  %v15808_v6 = vsel %vm18045_vm4, %v6754_v45, %v6758_v31  ;;  %v15813_v61 = vsel %vm18045_vm4, %v6752_v51, %v6756_v47  ;;  %v15816_v22 = vsel %vm18045_vm4, %v6758_v31, %v6762_v29  ;;  %v18324_v33 = vld [vmem:[#allocation16_spill] sm:$0xff]  ;;  %v12902_v60 = vld [vmem:[%s17898_s8 + $0x310] sm:$0xff]  }
 0x248   : > { %v5900_v14 = vsel %vm18047_vm1, %v5898_v19, %v18321_v5  ;;  %v15826_v41 = vsel %vm18044_vm3, %v15649_v63, %v6473_v56  ;;  %v15829_v17 = vsel %vm18044_vm3, %v6473_v56, %v6483_v49  ;;  %v15832_v45 = vsel %vm18045_vm4, %v6756_v47, %v6760_v26  ;;  %v12898_v63 = vld [vmem:[%s17898_s8 + $0x318] sm:$0xff]   ;;  %v12901_v26 = vld [vmem:[%s17898_s8 + $0x350] sm:$0xff]   ;;  %v12907_v56 = vld [vmem:[%s17898_s8 + $0x348] sm:$0xff]  }
 0x249   : > { %v18322_v51 = vrot.slane %v18316_v0, 2  ;;  %v18323_v29 = vrot.slane %v18311_v25, 2  ;;  %v15846_v31 = vsel %vm18044_vm3, %v15674_v3, %v6464_v39  ;;  %v15849_v47 = vsel %vm18044_vm3, %v6464_v39, %v6478_v24  ;;  %v12904_v49 = vld [vmem:[%s17898_s8 + $0x3b0] sm:$0xff]   ;;  %v12905_v3 = vld [vmem:[%s17898_s8 + $0x3e8] sm:$0xff]   ;;  %v18325_v24 = vld [vmem:[#allocation42_spill] sm:$0xff] }
 0x24a   : > { %6067 = vmatmul.mubr.bf16.vlgmr.msra.gmra.mxu1 %v5900_v14  ;;  %12066 = vmatpush3.bf16.msra.mxu0 %v12896_v53  ;;  %v5904_v53 = vrot.slane %v15038_v58, 2  ;;  %v18326_v39 = vmov %v18321_v5  ;;  %v12909_v14 = vld [vmem:[%s17898_s8 + $0x3e0] sm:$0xff]  }
 0x24b   : > { %v15839_v19 = vsel %vm18047_vm1, %v18323_v29, %v18322_v51  ;;  %12067 = vmatprep.subr.bf16.mxu0 %v12897_v52  ;;  %12118 = vmatpush3.bf16.msra.mxu1 %v12900_v43  ;;  %v5910_v52 = vrot.slane %v15103_v37, 2  ;;  %v12906_v43 = vld [vmem:[%s17898_s8 + $0x3a8] sm:$0xff]  }
 0x24c   : > { %6074 = vmatprep.mubr.bf16.mxu1 %v15839_v19  ;;  %12119 = vmatprep.subr.bf16.mxu1 %v12903_v35  ;;  %v5905_v5 = vsel %vm18047_vm1, %v18326_v39, %v5904_v53  ;;  %v18327_v35 = vmov %v18322_v51  ;;  %v12908_v29 = vld [vmem:[%s17898_s8 + $0x308] sm:$0xff]   ;;  %v18329_v39 = vrot.slane %v15188_v38, 2 }
 0x24d   : > { %5810 = vmatmul.mubr.bf16.gmra.mxu0 %v18324_v33  ;;  %v5911_v51 = vsel %vm18047_vm1, %v18327_v35, %v5910_v52  ;;  %v18328_v33 = vld [vmem:[#allocation43_spill] sm:$0xff]  ;;  %v12916_v35 = vld [vmem:[%s17898_s8 + $0x390] sm:$0xff]  }
 0x24e   : > { %5817 = vmatprep.mubr.bf16.mxu0 %v18325_v24  ;;  %12068 = vmatpush3.bf16.msra.mxu0 %v12898_v63  ;;  %v12912_v63 = vld [vmem:[%s17898_s8 + $0x340] sm:$0xff]  }
 0x24f   : > { %12069 = vmatprep.subr.bf16.mxu0 %v12901_v26  ;;  %12120 = vmatpush3.bf16.msra.mxu1 %v12904_v49  ;;  %v12910_v26 = vld [vmem:[%s17898_s8 + $0x3a0] sm:$0xff]   ;;  %v5908_v49 = vrot.slane %v15107_v46, 2 }
 0x250   : > { %12121 = vmatprep.subr.bf16.mxu1 %v12905_v3  ;;  %v12911_v3 = vld [vmem:[%s17898_s8 + $0x3d8] sm:$0xff]   ;;  %v12914_v24 = vld [vmem:[%s17898_s8 + $0x300] sm:$0xff]  }
 0x252   : > { %6075 = vmatmul.mubr.bf16.gmra.mxu1 %v5905_v5  ;;  %12070 = vmatpush3.bf16.msra.mxu0 %v12902_v60  ;;  %v12918_v60 = vld [vmem:[%s17898_s8 + $0x478] sm:$0xff]  }
 0x253   : > { %6082 = vmatprep.mubr.bf16.mxu1 %v5911_v51  ;;  %12071 = vmatprep.subr.bf16.mxu0 %v12907_v56  ;;  %v12913_v56 = vld [vmem:[%s17898_s8 + $0x398] sm:$0xff]  }
 0x254   : > { %12122 = vmatpush3.bf16.msra.mxu1 %v12906_v43  ;;  %v5909_v43 = vsel %vm18047_vm1, %v5904_v53, %v5908_v49  ;;  %v5912_v53 = vrot.slane %v15204_v7, 2 }
 0x255   : > { %5818 = vmatmul.mubr.bf16.gmra.mxu0 %v18328_v33  ;;  %12123 = vmatprep.subr.bf16.mxu1 %v12909_v14  ;;  %v5915_v14 = vsel %vm18047_vm1, %v5910_v52, %v18329_v39  ;;  %v12919_v52 = vld [vmem:[%s17898_s8 + $0x388] sm:$0xff]   ;;  %v12921_v33 = vld [vmem:[%s17898_s8 + $0x3c0] sm:$0xff]   ;;  %v6418_v39 = vrot.slane %v14921_v1, 2  ;;  %v12924_v1 = vld [vmem:[%s17898_s8 + $0x430] sm:$0xff]  }
 0x256   : > { %5825 = vmatprep.mubr.bf16.mxu0 %v15498_v4  ;;  %12072 = vmatpush3.bf16.msra.mxu0 %v12908_v29  ;;  %v12915_v4 = vld [vmem:[%s17898_s8 + $0x3d0] sm:$0xff]  }
 0x257   : > { %12073 = vmatprep.subr.bf16.mxu0 %v12912_v63  ;;  %v18330_v29 = vld [vmem:[#allocation45_spill] sm:$0xff]  ;;  %v12917_v63 = vld [vmem:[%s17898_s8 + $0x3c8] sm:$0xff]  }
 0x258   : > { %12124 = vmatpush3.bf16.msra.mxu1 %v12910_v26  ;;  %v5913_v26 = vsel %vm18047_vm1, %v5908_v49, %v5912_v53  ;;  %v18333_v49 = vrot.slane %v15267_v59, 2 }
 0x259   : > { %12125 = vmatprep.subr.bf16.mxu1 %v12911_v3  ;;  %v18331_v3 = vld [vmem:[#allocation44_spill] sm:$0xff] }
 0x25a   : > { %6083 = vmatmul.mubr.bf16.gmra.mxu1 %v5909_v43  ;;  %12074 = vmatpush3.bf16.msra.mxu0 %v12914_v24  ;;  %v18332_v24 = vld [vmem:[#allocation46_spill] sm:$0xff] }
 0x25b   : > { %6090 = vmatprep.mubr.bf16.mxu1 %v5915_v14  ;;  %12175 = vmatprep.subr.bf16.mxu0 %v12918_v60  ;;  %v5917_v60 = vsel %vm18047_vm1, %v5912_v53, %v18333_v49  ;;  %v12923_v53 = vld [vmem:[%s17898_s8 + $0x470] sm:$0xff]  }
 0x25c   : > { %12126 = vmatpush3.bf16.msra.mxu1 %v12913_v56  ;;  %v18334_v56 = vld [vmem:[#allocation47_spill] sm:$0xff] }
 0x25d   : > { %5826 = vmatmul.mubr.bf16.gmra.mxu0 %v18330_v29  ;;  %12127 = vmatprep.subr.bf16.mxu1 %v12915_v4  ;;  %v18335_v4 = vld [vmem:[#allocation48_spill] sm:$0xff]  ;;  %v12927_v29 = vld [vmem:[%s17898_s8 + $0x460] sm:$0xff]  }
 0x25e   : > { %5833 = vmatprep.mubr.bf16.mxu0 %v15548_v16  ;;  %v12922_v16 = vld [vmem:[%s17898_s8 + $0x380] sm:$0xff]  }
 0x260   : > { %12128 = vmatpush3.bf16.msra.mxu1 %v12916_v35  ;;  %v12920_v35 = vld [vmem:[%s17898_s8 + $0x438] sm:$0xff]  }
 0x261   : > { %12129 = vmatprep.subr.bf16.mxu1 %v12917_v63 }
 0x262   : > { %6091 = vmatmul.mubr.bf16.gmra.mxu1 %v5913_v26 }
 0x263   : > { %6098 = vmatprep.mubr.bf16.mxu1 %v18331_v3 }
 0x264   : > { %12130 = vmatpush3.bf16.msra.mxu1 %v12919_v52  ;;  %v12933_v52 = vld [vmem:[%s17898_s8 + $0x448] sm:$0xff]  }
 0x265   : > { %5834 = vmatmul.mubr.bf16.gmra.mxu0 %v15580_v11  ;;  %12131 = vmatprep.subr.bf16.mxu1 %v12921_v33  ;;  %v6419_v11 = vrot.slane %v14916_v10, 3  ;;  %v12925_v10 = vld [vmem:[%s17898_s8 + $0x468] sm:$0xff]  }
 0x266   : > { %5841 = vmatprep.mubr.bf16.mxu0 %v18332_v24 }
 0x268   : > { %12132 = vmatpush3.bf16.msra.mxu1 %v12922_v16  ;;  %v12935_v16 = vld [vmem:[%s17898_s8 + $0x440] sm:$0xff]  }
 0x26a   : > { %6099 = vmatmul.mubr.bf16.gmra.mxu1 %v5917_v60 }
 0x26b   : > { %6106 = vmatprep.mubr.bf16.mxu1 %v18334_v56 }
 0x26d   : > { %5842 = vmatmul.mubr.bf16.gmra.mxu0 %v15550_v34  ;;  %v6420_v34 = vor.u32 %v6419_v11, %v6418_v39 }
 0x26e   : > { %6306 = vmatprep.mubr.bf16.mxu0 %v15839_v19  ;;  %v6411_v19 = vrot.slane %v14960_v21, 2  ;;  %v12928_v21 = vld [vmem:[%s17898_s8 + $0x420] sm:$0xff]  }
 0x272   : > { %6107 = vmatmul.mubr.bf16.gmra.mxu1 %v18335_v4 }
 0x273   : > { %6114 = vmatprep.mubr.bf16.mxu1 %v15519_v15  ;;  %v6412_v15 = vrot.slane %v18305_v54, 3  ;;  %v12930_v54 = vld [vmem:[%s17898_s8 + $0x418] sm:$0xff]  }
 0x275   : > { %6307 = vmatmul.mubr.bf16.vlgmr.msra.gmra.mxu0 %v5905_v5  ;;  %v6424_v5 = vsel %vm18044_vm3, %v6420_v34, %v15582_v2  ;;  %v6413_v63 = vor.u32 %v6412_v15, %v6411_v19 }
 0x276   : > { %12176 = vmatpush3.bf16.msra.mxu0 %v12920_v35  ;;  %6314 = vmatprep.mubr.bf16.mxu0 %v5911_v51  ;;  %v12926_v51 = vld [vmem:[%s17898_s8 + $0x428] sm:$0xff]  }
 0x277   : > { %12177 = vmatprep.subr.bf16.mxu0 %v12923_v53  ;;  %v6417_v2 = vsel %vm18044_vm3, %v6413_v63, %v15596_v12  ;;  %v12932_v12 = vld [vmem:[%s17898_s8 + $0x410] sm:$0xff]  }
 0x27a   : > { %6115 = vmatmul.mubr.bf16.gmra.mxu1 %v15530_v9  ;;  %12178 = vmatpush3.bf16.msra.mxu0 %v12924_v1  ;;  %v12929_v9 = vld [vmem:[%s17898_s8 + $0x458] sm:$0xff]  }
 0x27b   : > { %6627 = vmatprep.mubr.bf16.mxu1 %v6424_v5  ;;  %12179 = vmatprep.subr.bf16.mxu0 %v12925_v10 }
 0x27d   : > { %6315 = vmatmul.mubr.bf16.gmra.mxu0 %v5909_v43  ;;  %v12931_v43 = vld [vmem:[%s17898_s8 + $0x450] sm:$0xff]  }
 0x27e   : > { %6322 = vmatprep.mubr.bf16.mxu0 %v5915_v14  ;;  %12180 = vmatpush3.bf16.msra.mxu0 %v12926_v51 }
 0x27f   : > { %12181 = vmatprep.subr.bf16.mxu0 %v12927_v29 }
 0x282   : > { %6628 = vmatmul.mubr.bf16.vlgmr.msra.gmra.mxu1 %v6417_v2  ;;  %12182 = vmatpush3.bf16.msra.mxu0 %v12928_v21  ;;  %v18336_v2 = vrot.slane %v15766_v28, 2 }
 0x283   : > { %6635 = vmatprep.mubr.bf16.mxu1 %v15612_v23  ;;  %12183 = vmatprep.subr.bf16.mxu0 %v12929_v9 }
 0x285   : > { %6323 = vmatmul.mubr.bf16.gmra.mxu0 %v5913_v26  ;;  %v11727_v14 = vpop.f32.mrf.mxu0  ;;  %v12934_v26 = vld [vmem:[%s17898_s8 + $0x408] sm:$0xff]  }
 0x286   : > { %6330 = vmatprep.mubr.bf16.mxu0 %v18331_v3  ;;  %12184 = vmatpush3.bf16.msra.mxu0 %v12930_v54 }
 0x287   : > { %12185 = vmatprep.subr.bf16.mxu0 %v12931_v43  ;;  %v11728_v23 = vpop.f32.mrf.mxu0 }
 0x288   : > { %v11729_v33 = vadd.f32 %v11728_v23, %v11727_v14  ;;  %v6737_v23 = vrot.slane %v18311_v25, 3 }
 0x289   : > { %v11730_v3 = vpop.f32.mrf.mxu0 }
 0x28a   : > { %6636 = vmatmul.mubr.bf16.gmra.mxu1 %v15616_v44  ;;  %12186 = vmatpush3.bf16.msra.mxu0 %v12932_v12  ;;  %v12936_v44 = vld [vmem:[%s17898_s8 + $0x400] sm:$0xff]  }
 0x28b   : > { %6643 = vmatprep.mubr.bf16.mxu1 %v15620_v40  ;;  %12187 = vmatprep.subr.bf16.mxu0 %v12933_v52  ;;  %v11731_v24 = vpop.f32.mrf.mxu0 }
 0x28c   : > { %v11732_v49 = vadd.f32 %v11731_v24, %v11730_v3 }
 0x28d   : > { %6331 = vmatmul.mubr.bf16.gmra.mxu0 %v5917_v60  ;;  %v16008_v60 = vld [vmem:[%s17899_s9] ss:$0 sm:$0xff] }
 0x28e   : > { %6338 = vmatprep.mubr.bf16.mxu0 %v18334_v56  ;;  %12188 = vmatpush3.bf16.msra.mxu0 %v12934_v26  ;;  %v11733_v39 = vpop.f32.mrf.mxu0 }
 0x28f   : > { %12189 = vmatprep.subr.bf16.mxu0 %v12935_v16 }
 0x290   : > { %v11734_v40 = vpop.f32.mrf.mxu0 }
 0x291   : > { %v11735_v11 = vadd.f32 %v11734_v40, %v11733_v39 }
 0x292   : > { %6644 = vmatmul.mubr.bf16.gmra.mxu1 %v15629_v48  ;;  %12190 = vmatpush3.bf16.msra.mxu0 %v12936_v44  ;;  %v11736_v35 = vpop.f32.mrf.mxu0  ;;  %v4667_v48 = vadd.f32 %v11729_v33, %v16008_v60  ;;  %v6738_v33 = vrot.slane %v18316_v0, 3 }
 0x293   : > { %6651 = vmatprep.mubr.bf16.mxu1 %v15641_v57  ;;  %v11785_v56 = vpop.f32.mrf.mxu1  ;;  %v4669_v12 = vadd.f32 %v11735_v11, %v16008_v60 }
 0x294   : > { %v11737_v53 = vpop.f32.mrf.mxu0  ;;  %v6739_v44 = vsel %vm18045_vm4, %v6737_v23, %v6738_v33 }
 0x295   : > { %6339 = vmatmul.mubr.bf16.gmra.mxu0 %v18335_v4  ;;  %v11786_v34 = vpop.f32.mrf.mxu1  ;;  %v11738_v1 = vadd.f32 %v11737_v53, %v11736_v35  ;;  %v4668_v4 = vadd.f32 %v11732_v49, %v16008_v60  ;;  %v18337_v49 = vrot.slane %v15770_v62, 2  ;;  %v6735_v35 = vrot.slane %v15038_v58, 3 }
 0x296   : > { %6346 = vmatprep.mubr.bf16.mxu0 %v15785_v32  ;;  %v11787_v10 = vadd.f32 %v11786_v34, %v11785_v56  ;;  %v6742_v62 = vrot.slane %v15103_v37, 3 }
 0x297   : > { %v11739_v19 = vpop.f32.mrf.mxu0  ;;  %v11788_v57 = vpop.f32.mrf.mxu1  ;;  %v4670_v3 = vadd.f32 %v11738_v1, %v16008_v60 }
 0x298   : > { %v16014_v15 = vadd.f32 %v11787_v10, %v4667_v48 }
 0x299   : > { %v11740_v5 = vpop.f32.mrf.mxu0  ;;  %v11789_v51 = vpop.f32.mrf.mxu1 }
 0x29a   : > { %6652 = vmatmul.mubr.bf16.gmra.mxu1 %v15657_v13  ;;  %v11741_v29 = vadd.f32 %v11740_v5, %v11739_v19  ;;  %v11790_v32 = vadd.f32 %v11789_v51, %v11788_v57  ;;  %v6743_v51 = vsel %vm18045_vm4, %v6738_v33, %v6742_v62  ;;  %v18338_v33 = vrot.slane %v15188_v38, 3 }
 0x29b   : > { %6659 = vmatprep.mubr.bf16.mxu1 %v15667_v20  ;;  %v11742_v63 = vpop.f32.mrf.mxu0 }
 0x29c   : > { %v11791_v21 = vpop.f32.mrf.mxu1  ;;  %v16019_v9 = vadd.f32 %v11790_v32, %v4668_v4  ;;  %v4671_v56 = vadd.f32 %v11741_v29, %v16008_v60 }
 0x29d   : > { %6347 = vmatmul.mubr.bf16.gmra.mxu0 %v15791_v36  ;;  %v11743_v13 = vpop.f32.mrf.mxu0 }
 0x29e   : > { %6354 = vmatprep.mubr.bf16.mxu0 %v18336_v2  ;;  %v11792_v54 = vpop.f32.mrf.mxu1  ;;  %v11744_v43 = vadd.f32 %v11743_v13, %v11742_v63  ;;  %v6740_v63 = vrot.slane %v15107_v46, 3  ;;  %v6747_v46 = vsel %vm18045_vm4, %v6742_v62, %v18338_v33 }
 0x29f   : > { %v11793_v20 = vadd.f32 %v11792_v54, %v11791_v21 }
 0x2a0   : > { %v11794_v14 = vpop.f32.mrf.mxu1  ;;  %v11745_v52 = vpop.f32.mrf.mxu0  ;;  %v4672_v58 = vadd.f32 %v11744_v43, %v16008_v60 }
 0x2a1   : > { %v16027_v36 = vadd.f32 %v11793_v20, %v4669_v12  ;;  %v6741_v20 = vsel %vm18045_vm4, %v6735_v35, %v6740_v63 }
 0x2a2   : > { %6660 = vmatmul.mubr.bf16.gmra.mxu1 %v15684_v42  ;;  %v11795_v28 = vpop.f32.mrf.mxu1  ;;  %v11746_v26 = vpop.f32.mrf.mxu0 }
 0x2a3   : > { %6667 = vmatprep.mubr.bf16.mxu1 %v15826_v41  ;;  %v11796_v16 = vadd.f32 %v11795_v28, %v11794_v14  ;;  %v11747_v24 = vadd.f32 %v11746_v26, %v11745_v52  ;;  %v6734_v41 = vrot.slane %v18314_v50, 3 }
 0x2a4   : > { %v11748_v25 = vpop.f32.mrf.mxu0 }
 0x2a5   : > { %6355 = vmatmul.mubr.bf16.gmra.mxu0 %v18337_v49  ;;  %v16034_v39 = vadd.f32 %v11796_v16, %v4670_v3  ;;  %v11797_v0 = vpop.f32.mrf.mxu1  ;;  %v6736_v57 = vsel %vm18045_vm4, %v6734_v41, %v6735_v35  ;;  %v4673_v21 = vadd.f32 %v11747_v24, %v16008_v60  ;;  %v6744_v24 = vrot.slane %v15204_v7, 3 }
 0x2a6   : > { %6906 = vmatprep.mubr.bf16.mxu0 %v6739_v44  ;;  %v11749_v42 = vpop.f32.mrf.mxu0 }
 0x2a7   : > { %v11798_v40 = vpop.f32.mrf.mxu1  ;;  %v11750_v11 = vadd.f32 %v11749_v42, %v11748_v25 }
 0x2a8   : > { %v11799_v53 = vadd.f32 %v11798_v40, %v11797_v0  ;;  %v11751_v34 = vpop.f32.mrf.mxu0 }
 0x2a9   : > { %v11800_v1 = vpop.f32.mrf.mxu1  ;;  %v4674_v52 = vadd.f32 %v11750_v11, %v16008_v60  ;;  %v6745_v11 = vsel %vm18045_vm4, %v6740_v63, %v6744_v24 }
 0x2aa   : > { %6668 = vmatmul.mubr.bf16.gmra.mxu1 %v15846_v31  ;;  %v16042_v48 = vadd.f32 %v11799_v53, %v4671_v56  ;;  %v11752_v10 = vpop.f32.mrf.mxu0 }
 0x2ab   : > { %6675 = vmatprep.mubr.bf16.mxu1 %v15829_v17  ;;  %v11801_v19 = vpop.f32.mrf.mxu1  ;;  %v11753_v50 = vadd.f32 %v11752_v10, %v11751_v34 }
 0x2ac   : > { %v11802_v5 = vadd.f32 %v11801_v19, %v11800_v1  ;;  %v11754_v29 = vpop.f32.mrf.mxu0 }
 0x2ad   : > { %6907 = vmatmul.mubr.bf16.vlgmr.msra.gmra.mxu0 %v6736_v57  ;;  %v4675_v25 = vadd.f32 %v11753_v50, %v16008_v60 }
 0x2ae   : > { %v11803_v37 = vpop.f32.mrf.mxu1  ;;  %6914 = vmatprep.mubr.bf16.mxu0 %v6743_v51  ;;  %v16047_v31 = vadd.f32 %v11802_v5, %v4672_v58  ;;  %v11755_v4 = vpop.f32.mrf.mxu0  ;;  %v18339_v5 = vrot.slane %v15267_v59, 3 }
 0x2af   : > { %v11756_v32 = vadd.f32 %v11755_v4, %v11754_v29 }
 0x2b0   : > { %v11804_v17 = vpop.f32.mrf.mxu1  ;;  %v6749_v51 = vsel %vm18045_vm4, %v6744_v24, %v18339_v5 }
 0x2b1   : > { %v11805_v2 = vadd.f32 %v11804_v17, %v11803_v37  ;;  %v4676_v56 = vadd.f32 %v11756_v32, %v16008_v60 }
 0x2b2   : > { %6676 = vmatmul.mubr.bf16.gmra.mxu1 %v15849_v47  ;;  %v11806_v13 = vpop.f32.mrf.mxu1  ;;  %v11757_v54 = vpop.f32.mrf.mxu0 }
 0x2b3   : > { %v16052_v43 = vadd.f32 %v11805_v2, %v4673_v21 }
 0x2b4   : > { %v11807_v12 = vpop.f32.mrf.mxu1  ;;  %v11758_v14 = vpop.f32.mrf.mxu0 }
 0x2b5   : > { %v11808_v23 = vadd.f32 %v11807_v12, %v11806_v13  ;;  %6915 = vmatmul.mubr.bf16.gmra.mxu0 %v6741_v20  ;;  %v11759_v28 = vadd.f32 %v11758_v14, %v11757_v54 }
 0x2b6   : > { %6922 = vmatprep.mubr.bf16.mxu0 %v6747_v46  ;;  %v11760_v26 = vpop.f32.mrf.mxu0 }
 0x2b7   : > { %v16059_v47 = vadd.f32 %v11808_v23, %v4674_v52  ;;  %v11809_v3 = vpop.f32.mrf.mxu1  ;;  %v4677_v29 = vadd.f32 %v11759_v28, %v16008_v60 }
 0x2b8   : > { %v11761_v16 = vpop.f32.mrf.mxu0 }
 0x2b9   : > { %v11810_v49 = vpop.f32.mrf.mxu1  ;;  %v11762_v44 = vadd.f32 %v11761_v16, %v11760_v26 }
 0x2ba   : > { %v11811_v0 = vadd.f32 %v11810_v49, %v11809_v3 }
 0x2bb   : > { %v11812_v42 = vpop.f32.mrf.mxu1  ;;  %v4678_v40 = vadd.f32 %v11762_v44, %v16008_v60 }
 0x2bc   : > { %v16064_v38 = vadd.f32 %v11811_v0, %v4675_v25 }
 0x2bd   : > { %v11813_v41 = vpop.f32.mrf.mxu1  ;;  %v11763_v35 = vpop.f32.mrf.mxu0  ;;  %6923 = vmatmul.mubr.bf16.gmra.mxu0 %v6745_v11 }
 0x2be   : > { %v11814_v53 = vadd.f32 %v11813_v41, %v11812_v42  ;;  %6930 = vmatprep.mubr.bf16.mxu0 %v15708_v55 }
 0x2bf   : > { %v11764_v7 = vpop.f32.mrf.mxu0 }
 0x2c0   : > { %v16069_v34 = vadd.f32 %v11814_v53, %v4676_v56  ;;  %v11765_v62 = vadd.f32 %v11764_v7, %v11763_v35 }
 0x2c1   : > { %v11766_v1 = vpop.f32.mrf.mxu0 }
 0x2c2   : > { %v11815_v10 = vpop.f32.mrf.mxu1  ;;  %v4679_v19 = vadd.f32 %v11765_v62, %v16008_v60 }
 0x2c3   : > { %v11767_v57 = vpop.f32.mrf.mxu0 }
 0x2c4   : > { %v11816_v50 = vpop.f32.mrf.mxu1  ;;  %v11768_v58 = vadd.f32 %v11767_v57, %v11766_v1 }
 0x2c5   : > { %v11817_v37 = vadd.f32 %v11816_v50, %v11815_v10  ;;  %v11843_v4 = vpop.f32.mrf.mxu0  ;;  %6931 = vmatmul.mubr.bf16.gmra.mxu0 %v6749_v51 }
 0x2c6   : > { %v11818_v55 = vpop.f32.mrf.mxu1  ;;  %v4680_v17 = vadd.f32 %v11768_v58, %v16008_v60  ;;  %6938 = vmatprep.mubr.bf16.mxu0 %v15713_v27 }
 0x2c7   : > { %v16078_v32 = vadd.f32 %v11817_v37, %v4677_v29  ;;  %v11844_v63 = vpop.f32.mrf.mxu0 }
 0x2c8   : > { %v11819_v21 = vpop.f32.mrf.mxu1  ;;  %v11845_v2 = vadd.f32 %v11844_v63, %v11843_v4 }
 0x2c9   : > { %v11820_v13 = vadd.f32 %v11819_v21, %v11818_v55  ;;  %v11846_v54 = vpop.f32.mrf.mxu0 }
 0x2ca   : > { %v11821_v59 = vpop.f32.mrf.mxu1  ;;  %v5299_v12 = vadd.f32 %v11845_v2, %v16014_v15 }
 0x2cb   : > { %v16081_v20 = vadd.f32 %v11820_v13, %v4678_v40  ;;  %v11847_v14 = vpop.f32.mrf.mxu0 }
 0x2cc   : > { %v11822_v52 = vpop.f32.mrf.mxu1  ;;  %v11848_v23 = vadd.f32 %v11847_v14, %v11846_v54 }
 0x2cd   : > { %v11823_v33 = vadd.f32 %v11822_v52, %v11821_v59  ;;  %v11849_v46 = vpop.f32.mrf.mxu0  ;;  %6939 = vmatmul.mubr.bf16.gmra.mxu0 %v15720_v30 }
 0x2ce   : > { %v11824_v27 = vpop.f32.mrf.mxu1  ;;  %v5300_v60 = vadd.f32 %v11848_v23, %v16019_v9  ;;  %6946 = vmatprep.mubr.bf16.mxu0 %v15808_v6 }
 0x2cf   : > { %v16086_v28 = vadd.f32 %v11823_v33, %v4679_v19  ;;  %v11850_v26 = vpop.f32.mrf.mxu0 }
 0x2d0   : > { %v11825_v3 = vpop.f32.mrf.mxu1  ;;  %v11851_v16 = vadd.f32 %v11850_v26, %v11849_v46 }
 0x2d1   : > { %v11826_v15 = vadd.f32 %v11825_v3, %v11824_v27  ;;  %v11852_v24 = vpop.f32.mrf.mxu0 }
 0x2d2   : > { %v11901_v49 = vpop.f32.mrf.mxu1  ;;  %v5301_v44 = vadd.f32 %v11851_v16, %v16027_v36 }
 0x2d3   : > { %v16089_v25 = vadd.f32 %v11826_v15, %v4680_v17  ;;  %v11853_v0 = vpop.f32.mrf.mxu0 }
 0x2d4   : > { %v11902_v42 = vpop.f32.mrf.mxu1  ;;  %v11854_v30 = vadd.f32 %v11853_v0, %v11852_v24 }
 0x2d5   : > { %v11903_v40 = vadd.f32 %v11902_v42, %v11901_v49  ;;  %v11855_v11 = vpop.f32.mrf.mxu0  ;;  %6947 = vmatmul.mubr.bf16.gmra.mxu0 %v15813_v61 }
 0x2d6   : > { %v11904_v6 = vpop.f32.mrf.mxu1  ;;  %v5302_v9 = vadd.f32 %v11854_v30, %v16034_v39  ;;  %6954 = vmatprep.mubr.bf16.mxu0 %v15816_v22 }
 0x2d7   : > { %v16094_v41 = vadd.f32 %v11903_v40, %v5299_v12  ;;  %v11856_v35 = vpop.f32.mrf.mxu0 }
 0x2d8   : > { %v11905_v56 = vpop.f32.mrf.mxu1  ;;  %v11857_v53 = vadd.f32 %v11856_v35, %v11855_v11 }
 0x2d9   : > { %v11906_v36 = vadd.f32 %v11905_v56, %v11904_v6  ;;  %v11858_v7 = vpop.f32.mrf.mxu0  ;;  %v12937_v56 = vld [vmem:[%s17900_s10 + $0x38] sm:$0xff]  }
 0x2da   : > { %v11907_v62 = vpop.f32.mrf.mxu1  ;;  %v5303_v1 = vadd.f32 %v11857_v53, %v16042_v48 }
 0x2db   : > { %v16097_v10 = vadd.f32 %v11906_v36, %v5300_v60  ;;  %v11859_v19 = vpop.f32.mrf.mxu0 }
 0x2dc   : > { %v11908_v57 = vpop.f32.mrf.mxu1  ;;  %v11860_v61 = vadd.f32 %v11859_v19, %v11858_v7 }
 0x2dd   : > { %v11909_v50 = vadd.f32 %v11908_v57, %v11907_v62  ;;  %v11861_v58 = vpop.f32.mrf.mxu0  ;;  %6955 = vmatmul.mubr.bf16.gmra.mxu0 %v15832_v45 }
 0x2de   : > { %v11910_v22 = vpop.f32.mrf.mxu1  ;;  %v5304_v39 = vadd.f32 %v11860_v61, %v16047_v31 }
 0x2df   : > { %v16101_v5 = vadd.f32 %v11909_v50, %v5301_v44  ;;  %v11862_v51 = vpop.f32.mrf.mxu0 }
 0x2e0   : > { %v11911_v29 = vpop.f32.mrf.mxu1  ;;  %v11863_v37 = vadd.f32 %v11862_v51, %v11861_v58 }
 0x2e1   : > { %v11912_v4 = vadd.f32 %v11911_v29, %v11910_v22  ;;  %v11864_v55 = vpop.f32.mrf.mxu0 }
 0x2e2   : > { %v11913_v48 = vpop.f32.mrf.mxu1  ;;  %v5305_v17 = vadd.f32 %v11863_v37, %v16052_v43 }
 0x2e3   : > { %v16104_v63 = vadd.f32 %v11912_v4, %v5302_v9  ;;  %v11865_v21 = vpop.f32.mrf.mxu0 }
 0x2e4   : > { %v11914_v2 = vpop.f32.mrf.mxu1  ;;  %v11866_v13 = vadd.f32 %v11865_v21, %v11864_v55 }
 0x2e5   : > { %v11915_v54 = vadd.f32 %v11914_v2, %v11913_v48  ;;  %v11867_v45 = vpop.f32.mrf.mxu0 }
 0x2e6   : > { %v11916_v59 = vpop.f32.mrf.mxu1  ;;  %v5306_v31 = vadd.f32 %v11866_v13, %v16059_v47 }
 0x2e7   : > { %v16107_v12 = vadd.f32 %v11915_v54, %v5303_v1  ;;  %v11868_v14 = vpop.f32.mrf.mxu0 }
 0x2e8   : > { %v11917_v52 = vpop.f32.mrf.mxu1  ;;  %v11869_v23 = vadd.f32 %v11868_v14, %v11867_v45 }
 0x2e9   : > { %v11918_v33 = vadd.f32 %v11917_v52, %v11916_v59  ;;  %v11870_v46 = vpop.f32.mrf.mxu0 }
 0x2ea   : > { %v11919_v27 = vpop.f32.mrf.mxu1  ;;  %v5307_v43 = vadd.f32 %v11869_v23, %v16064_v38 }
 0x2eb   : > { %v16110_v60 = vadd.f32 %v11918_v33, %v5304_v39  ;;  %v11871_v26 = vpop.f32.mrf.mxu0 }
 0x2ec   : > { %v11920_v3 = vpop.f32.mrf.mxu1  ;;  %v11872_v16 = vadd.f32 %v11871_v26, %v11870_v46 }
 0x2ed   : > { %v11921_v15 = vadd.f32 %v11920_v3, %v11919_v27  ;;  %v11873_v24 = vpop.f32.mrf.mxu0 }
 0x2ee   : > { %v11922_v49 = vpop.f32.mrf.mxu1  ;;  %v5308_v47 = vadd.f32 %v11872_v16, %v16069_v34  ;;  %v18040_v34 = vmov 0.0  }
 0x2ef   : > { %v16113_v44 = vadd.f32 %v11921_v15, %v5305_v17  ;;  %v11874_v0 = vpop.f32.mrf.mxu0  ;;  %12396 = vmatprep.subr.bf16.mxu1 %v18040_v34  ;;  %12468 = vmatprep.subr.bf16.mxu0 %v18040_v34 }
 0x2f0   : > { %v11923_v42 = vpop.f32.mrf.mxu1  ;;  %v11875_v30 = vadd.f32 %v11874_v0, %v11873_v24  ;;  %12397 = vmatpush3.bf16.msra.mxu1 %v12937_v56  ;;  %12412 = vmatprep.mubr.msk.bf16.mxu1 %vm13068_vm5, %v18040_v34 }
 0x2f1   : > { %v11924_v40 = vadd.f32 %v11923_v42, %v11922_v49  ;;  %v11876_v11 = vpop.f32.mrf.mxu0  ;;  %12398 = vmatprep.subr.bf16.mxu1 %v18040_v34  ;;  %12484 = vmatprep.mubr.msk.bf16.mxu0 %vm13068_vm5, %v18040_v34 }
 0x2f2   : > { %v11925_v6 = vpop.f32.mrf.mxu1  ;;  %v5309_v38 = vadd.f32 %v11875_v30, %v16078_v32 }
 0x2f3   : > { %v16116_v9 = vadd.f32 %v11924_v40, %v5306_v31  ;;  %v11877_v35 = vpop.f32.mrf.mxu0 }
 0x2f4   : > { %v11926_v53 = vpop.f32.mrf.mxu1  ;;  %v11878_v36 = vadd.f32 %v11877_v35, %v11876_v11 }
 0x2f5   : > { %v11927_v7 = vadd.f32 %v11926_v53, %v11925_v6  ;;  %v11879_v62 = vpop.f32.mrf.mxu0 }
 0x2f6   : > { %v11928_v1 = vpop.f32.mrf.mxu1  ;;  %v5310_v32 = vadd.f32 %v11878_v36, %v16081_v20 }
 0x2f7   : > { %v16125_v19 = vadd.f32 %v11927_v7, %v5307_v43  ;;  %v11880_v57 = vpop.f32.mrf.mxu0 }
 0x2f8   : > { %v11929_v61 = vpop.f32.mrf.mxu1  ;;  %v11881_v50 = vadd.f32 %v11880_v57, %v11879_v62 }
 0x2f9   : > { %v11930_v58 = vadd.f32 %v11929_v61, %v11928_v1  ;;  %v11882_v22 = vpop.f32.mrf.mxu0 }
 0x2fa   : > { %v11931_v39 = vpop.f32.mrf.mxu1  ;;  %v5311_v51 = vadd.f32 %v11881_v50, %v16086_v28 }
 0x2fb   : > { %v16128_v29 = vadd.f32 %v11930_v58, %v5308_v47  ;;  %v11883_v37 = vpop.f32.mrf.mxu0 }
 0x2fc   : > { %v11932_v4 = vpop.f32.mrf.mxu1  ;;  %v11884_v55 = vadd.f32 %v11883_v37, %v11882_v22 }
 0x2fd   : > { %v11933_v48 = vadd.f32 %v11932_v4, %v11931_v39  ;;  %v11959_v17 = vpop.f32.mrf.mxu0 }
 0x2fe   : > { %v11934_v20 = vpop.f32.mrf.mxu1  ;;  %v5312_v21 = vadd.f32 %v11884_v55, %v16089_v25  ;;  %v12938_v25 = vld [vmem:[%s17900_s10 + $0x30] sm:$0xff]  }
 0x2ff   : > { %v16131_v2 = vadd.f32 %v11933_v48, %v5309_v38  ;;  %v11960_v13 = vpop.f32.mrf.mxu0  ;;  %12399 = vmatpush3.bf16.msra.mxu1 %v12938_v25  ;;  %v12939_v38 = vld [vmem:[%s17900_s10 + $0x28] sm:$0xff]  }
 0x300   : > { %v11935_v54 = vpop.f32.mrf.mxu1  ;;  %v11961_v45 = vadd.f32 %v11960_v13, %v11959_v17  ;;  %12400 = vmatprep.subr.bf16.mxu1 %v18040_v34  ;;  %v12940_v13 = vld [vmem:[%s17900_s10 + $0x20] sm:$0xff]  }
 0x301   : > { %v11936_v59 = vadd.f32 %v11935_v54, %v11934_v20  ;;  %v11962_v31 = vpop.f32.mrf.mxu0 }
 0x302   : > { %v11937_v14 = vpop.f32.mrf.mxu1  ;;  %v16134_v28 = vadd.f32 %v11961_v45, %v16094_v41 }
 0x303   : > { %v16136_v52 = vadd.f32 %v11936_v59, %v5310_v32  ;;  %v11963_v23 = vpop.f32.mrf.mxu0  ;;  %12401 = vmatpush3.bf16.msra.mxu1 %v12939_v38 }
 0x304   : > { %v11938_v33 = vpop.f32.mrf.mxu1  ;;  %v11964_v46 = vadd.f32 %v11963_v23, %v11962_v31  ;;  %12402 = vmatprep.subr.bf16.mxu1 %v18040_v34 }
 0x305   : > { %v11939_v27 = vadd.f32 %v11938_v33, %v11937_v14  ;;  %v11965_v43 = vpop.f32.mrf.mxu0 }
 0x306   : > { %v11940_v26 = vpop.f32.mrf.mxu1  ;;  %v16142_v3 = vadd.f32 %v11964_v46, %v16097_v10 }
 0x307   : > { %v16144_v16 = vadd.f32 %v11939_v27, %v5311_v51  ;;  %v11966_v15 = vpop.f32.mrf.mxu0  ;;  %12403 = vmatpush3.bf16.msra.mxu1 %v12940_v13 }
 0x308   : > { %v11941_v41 = vpop.f32.mrf.mxu1  ;;  %v11967_v24 = vadd.f32 %v11966_v15, %v11965_v43  ;;  %12404 = vmatprep.subr.bf16.mxu1 %v18040_v34 }
 0x309   : > { %v11942_v49 = vadd.f32 %v11941_v41, %v11940_v26  ;;  %v11968_v47 = vpop.f32.mrf.mxu0 }
 0x30a   : > { %v16147_v0 = vpop.f32.mrf.mxu1  ;;  %v16150_v42 = vadd.f32 %v11967_v24, %v16101_v5 }
 0x30b   : > { %v16152_v30 = vadd.f32 %v11942_v49, %v5312_v21  ;;  %v11969_v40 = vpop.f32.mrf.mxu0  ;;  %v12941_v49 = vld [vmem:[%s17900_s10 + $0x18] sm:$0xff]  }
 0x30c   : > { %v16154_v10 = vpop.f32.mrf.mxu1  ;;  %v11970_v11 = vadd.f32 %v11969_v40, %v11968_v47  ;;  %12405 = vmatpush3.bf16.msra.mxu1 %v12941_v49  ;;  %v12946_v49 = vld [vmem:[%s17900_s10 + $0xa8] sm:$0xff]  }
 0x30d   : > { %v11971_v6 = vpop.f32.mrf.mxu0  ;;  %12406 = vmatprep.subr.bf16.mxu1 %v18040_v34 }
 0x30e   : > { %v16159_v35 = vpop.f32.mrf.mxu1  ;;  %v16162_v56 = vadd.f32 %v11970_v11, %v16104_v63 }
 0x30f   : > { %v11972_v53 = vpop.f32.mrf.mxu0 }
 0x310   : > { %v16164_v5 = vpop.f32.mrf.mxu1  ;;  %v11973_v36 = vadd.f32 %v11972_v53, %v11971_v6 }
 0x311   : > { %v11974_v7 = vpop.f32.mrf.mxu0 }
 0x312   : > { %v16167_v62 = vpop.f32.mrf.mxu1  ;;  %v16170_v1 = vadd.f32 %v11973_v36, %v16107_v12 }
 0x313   : > { %v11975_v32 = vpop.f32.mrf.mxu0 }
 0x314   : > { %v16172_v57 = vpop.f32.mrf.mxu1  ;;  %v11976_v61 = vadd.f32 %v11975_v32, %v11974_v7 }
 0x315   : > { %v11977_v50 = vpop.f32.mrf.mxu0 }
 0x316   : > { %v16174_v63 = vpop.f32.mrf.mxu1  ;;  %v16177_v58 = vadd.f32 %v11976_v61, %v16110_v60 }
 0x317   : > { %v11978_v22 = vpop.f32.mrf.mxu0 }
 0x318   : > { %v16179_v39 = vpop.f32.mrf.mxu1  ;;  %v11979_v51 = vadd.f32 %v11978_v22, %v11977_v50 }
 0x319   : > { %v11980_v37 = vpop.f32.mrf.mxu0 }
 0x31a   : > { %v16181_v4 = vpop.f32.mrf.mxu1  ;;  %v16184_v12 = vadd.f32 %v11979_v51, %v16113_v44 }
 0x31b   : > { %v11981_v55 = vpop.f32.mrf.mxu0 }
 0x31c   : > { %v16186_v48 = vpop.f32.mrf.mxu1  ;;  %v11982_v17 = vadd.f32 %v11981_v55, %v11980_v37 }
 0x31d   : > { %v11983_v20 = vpop.f32.mrf.mxu0 }
 0x31e   : > { %v16188_v21 = vpop.f32.mrf.mxu1  ;;  %v16191_v60 = vadd.f32 %v11982_v17, %v16116_v9 }
 0x31f   : > { %v11984_v54 = vpop.f32.mrf.mxu0 }
 0x320   : > { %v16196_v45 = vpop.f32.mrf.mxu1  ;;  %v11985_v59 = vadd.f32 %v11984_v54, %v11983_v20  ;;  %v12943_v20 = vld [vmem:[%s17900_s10 + $0x10] sm:$0xff]  }
 0x321   : > { %v11986_v44 = vpop.f32.mrf.mxu0  ;;  %12407 = vmatpush3.bf16.msra.mxu1 %v12943_v20  ;;  %v12944_v54 = vld [vmem:[%s17900_s10 + $0xb0] sm:$0xff]  }
 0x322   : > { %v16199_v31 = vpop.f32.mrf.mxu1  ;;  %v16202_v14 = vadd.f32 %v11985_v59, %v16125_v19  ;;  %12408 = vmatprep.subr.bf16.mxu1 %v18040_v34 }
 0x323   : > { %v11987_v23 = vpop.f32.mrf.mxu0 }
 0x324   : > { %v16204_v9 = vpop.f32.mrf.mxu1  ;;  %v11988_v33 = vadd.f32 %v11987_v23, %v11986_v44 }
 0x325   : > { %v11989_v46 = vpop.f32.mrf.mxu0 }
 0x326   : > { %v16206_v27 = vpop.f32.mrf.mxu1  ;;  %v16209_v43 = vadd.f32 %v11988_v33, %v16128_v29 }
 0x327   : > { %v11990_v25 = vpop.f32.mrf.mxu0 }
 0x328   : > { %v16211_v26 = vpop.f32.mrf.mxu1  ;;  %v11991_v15 = vadd.f32 %v11990_v25, %v11989_v46 }
 0x329   : > { %v11992_v41 = vpop.f32.mrf.mxu0 }
 0x32a   : > { %v16213_v24 = vpop.f32.mrf.mxu1  ;;  %v16216_v19 = vadd.f32 %v11991_v15, %v16131_v2 }
 0x32b   : > { %v11993_v47 = vpop.f32.mrf.mxu0 }
 0x32c   : > { %v16221_v40 = vpop.f32.mrf.mxu1  ;;  %v11994_v11 = vadd.f32 %v11993_v47, %v11992_v41  ;;  %v12945_v41 = vld [vmem:[%s17900_s10 + $0x8] sm:$0xff]  }
 0x32d   : > { %v11995_v29 = vpop.f32.mrf.mxu0  ;;  %12409 = vmatpush3.bf16.msra.mxu1 %v12945_v41 }
 0x32e   : > { %v16224_v6 = vpop.f32.mrf.mxu1  ;;  %v5861_v38 = vadd.f32 %v11994_v11, %v16136_v52  ;;  %v12942_v52 = vld [vmem:[%s17900_s10 + $0xb8] sm:$0xff]   ;;  %12410 = vmatprep.subr.bf16.mxu1 %v18040_v34 }
 0x32f   : > { %v11996_v53 = vpop.f32.mrf.mxu0  ;;  %12469 = vmatpush3.bf16.msra.mxu0 %v12942_v52 }
 0x330   : > { %v16227_v36 = vpop.f32.mrf.mxu1  ;;  %v11997_v2 = vadd.f32 %v11996_v53, %v11995_v29  ;;  %12470 = vmatprep.subr.bf16.mxu0 %v18040_v34 }
 0x331   : > { %v11998_v7 = vpop.f32.mrf.mxu0 }
 0x332   : > { %v16229_v32 = vpop.f32.mrf.mxu1  ;;  %v5862_v61 = vadd.f32 %v11997_v2, %v16144_v16 }
 0x333   : > { %v11999_v50 = vpop.f32.mrf.mxu0  ;;  %12471 = vmatpush3.bf16.msra.mxu0 %v12944_v54 }
 0x334   : > { %v16232_v22 = vpop.f32.mrf.mxu1  ;;  %v12000_v51 = vadd.f32 %v11999_v50, %v11998_v7  ;;  %12472 = vmatprep.subr.bf16.mxu0 %v18040_v34 }
 0x335   : > { %v16234_v37 = vpop.f32.mrf.mxu0 }
 0x336   : > { %v12050_v55 = vpop.f32.mrf.mxu1  ;;  %v5863_v17 = vadd.f32 %v12000_v51, %v16152_v30 }
 0x337   : > { %v16243_v13 = vpop.f32.mrf.mxu0  ;;  %12473 = vmatpush3.bf16.msra.mxu0 %v12946_v49 }
 0x338   : > { %v12051_v16 = vpop.f32.mrf.mxu1  ;;  %12474 = vmatprep.subr.bf16.mxu0 %v18040_v34 }
 0x339   : > { %v12052_v59 = vadd.f32 %v12051_v16, %v12050_v55  ;;  %v16248_v44 = vpop.f32.mrf.mxu0 }
 0x33a   : > { %v12053_v30 = vpop.f32.mrf.mxu1 }
 0x33b   : > { %v16252_v23 = vadd.f32 %v12052_v59, %v5861_v38  ;;  %v16254_v33 = vpop.f32.mrf.mxu0 }
 0x33c   : > { %v12054_v46 = vpop.f32.mrf.mxu1 }
 0x33d   : > { %v12055_v25 = vadd.f32 %v12054_v46, %v12053_v30  ;;  %v16256_v15 = vpop.f32.mrf.mxu0  ;;  %v12947_v46 = vld [vmem:[%s17900_s10 + $0xa0] sm:$0xff]  }
 0x33e   : > { %v12056_v47 = vpop.f32.mrf.mxu1  ;;  %12475 = vmatpush3.bf16.msra.mxu0 %v12947_v46 }
 0x33f   : > { %v16265_v11 = vadd.f32 %v12055_v25, %v5862_v61  ;;  %v16267_v29 = vpop.f32.mrf.mxu0  ;;  %v12948_v25 = vld [vmem:[%s17900_s10] sm:$0xff]   ;;  %12476 = vmatprep.subr.bf16.mxu0 %v18040_v34 }
 0x340   : > { %v12057_v38 = vpop.f32.mrf.mxu1  ;;  %12411 = vmatpush3.bf16.msra.mxu1 %v12948_v25 }
 0x341   : > { %v12058_v53 = vadd.f32 %v12057_v38, %v12056_v47  ;;  %v16270_v2 = vpop.f32.mrf.mxu0  ;;  %v12949_v47 = vld [vmem:[%s17900_s10 + $0x98] sm:$0xff]   ;;  %12432 = vmatprep.subr.bf16.mxu1 %v18040_v34 }
 0x342   : > { %v16273_v7 = vpop.f32.mrf.mxu1  ;;  %12477 = vmatpush3.bf16.msra.mxu0 %v12949_v47  ;;  %v13069_v47 = vmov 1983009808  }
 0x343   : > { %v16275_v50 = vadd.f32 %v12058_v53, %v5863_v17  ;;  %v16277_v51 = vpop.f32.mrf.mxu0  ;;  %12478 = vmatprep.subr.bf16.mxu0 %v18040_v34  ;;  %v12950_v34 = vld [vmem:[%s17900_s10 + $0x90] sm:$0xff]  }
 0x344   : > { %v16279_v61 = vpop.f32.mrf.mxu1 }
 0x345   : > { %18340 = vst [vmem:[#allocation17_spill] sm:$0xff] %v16275_v50  ;;  %v16281_v55 = vpop.f32.mrf.mxu0 }
 0x346   : > { %v16283_v52 = vpop.f32.mrf.mxu1  ;;  %12479 = vmatpush3.bf16.msra.mxu0 %v12950_v34  ;;  %v12022_v34 = vadd.f32 %v16164_v5, %v16159_v35  ;;  %v12031_v5 = vadd.f32 %v16186_v48, %v16181_v4  ;;  %v12040_v48 = vadd.f32 %v16211_v26, %v16206_v27 }
 0x347   : > { %v16285_v20 = vpop.f32.mrf.mxu0 }
 0x348   : > { %v16287_v16 = vpop.f32.mrf.mxu1  ;;  %v6127_v26 = vadd.f32 %v12031_v5, %v16170_v1 }
 0x349   : > { %v16289_v54 = vpop.f32.mrf.mxu0 }
 0x34a   : > { %v16291_v59 = vpop.f32.mrf.mxu1 }
 0x34b   : > { %v16293_v30 = vpop.f32.mrf.mxu0 }
 0x34c   : > { %v16295_v17 = vpop.f32.mrf.mxu1  ;;  %v18369_v5 = vld [vmem:[#allocation17_spill] sm:$0xff] }
 0x34d   : > { %v16303_v41 = vpop.f32.mrf.mxu0 }
 0x34e   : > { %18341 = vst [vmem:[#allocation26_spill] sm:$0xff] %v16303_v41  ;;  %v16309_v49 = vpop.f32.mrf.mxu1 }
 0x34f   : > { %18342 = vst [vmem:[#allocation34_spill] sm:$0xff] %v16309_v49  ;;  %v16314_v38 = vpop.f32.mrf.mxu0 }
 0x350   : > { %18343 = vst [vmem:[#allocation23_spill] sm:$0xff] %v16314_v38  ;;  %v16318_v53 = vpop.f32.mrf.mxu1 }
 0x351   : > { %18344 = vst [vmem:[#allocation14_spill] sm:$0xff] %v16318_v53  ;;  %v16320_v18 = vpop.f32.mrf.mxu0 }
 0x352   : > { %18345 = vst [vmem:[#allocation37_spill] sm:$0xff] %v16320_v18  ;;  %v16322_v8 = vpop.f32.mrf.mxu1 }
 0x353   : > { %18346 = vst [vmem:[#allocation39_spill] sm:$0xff] %v16322_v8  ;;  %v16324_v50 = vpop.f32.mrf.mxu0  ;;  %v7035_v8 = vunpack.c.l.s4 %v13069_v47 }
 0x354   : > { %18347 = vst [vmem:[#allocation18_spill] sm:$0xff] %v16324_v50  ;;  %v16327_v46 = vpop.f32.mrf.mxu1 }
 0x355   : > { %18348 = vst [vmem:[#allocation25_spill] sm:$0xff] %v16327_v46  ;;  %v16329_v25 = vpop.f32.mrf.mxu0  ;;  %v7036_v47 = vunpack.c.0.s8 %v7035_v8  ;;  %v12025_v8 = vadd.f32 %v16172_v57, %v16167_v62  ;;  %v12034_v62 = vadd.f32 %v16196_v45, %v16188_v21  ;;  %v12043_v21 = vadd.f32 %v16221_v40, %v16213_v24 }
 0x356   : > { %18349 = vst [vmem:[#allocation28_spill] sm:$0xff] %v16329_v25  ;;  %v16331_v38 = vpop.f32.mrf.mxu1 }
 0x357   : > { %18350 = vst [vmem:[#allocation15_spill] sm:$0xff] %v16331_v38  ;;  %v16333_v41 = vpop.f32.mrf.mxu0  ;;  %v6125_v4 = vadd.f32 %v12025_v8, %v16150_v42  ;;  %v12049_v42 = vadd.f32 %v16232_v22, %v16229_v32  ;;  %v6128_v24 = vadd.f32 %v12034_v62, %v16177_v58  ;;  %v12086_v32 = vadd.f32 %v16277_v51, %v16270_v2 }
 0x358   : > { %18351 = vst [vmem:[#allocation19_spill] sm:$0xff] %v16333_v41  ;;  %v16335_v49 = vpop.f32.mrf.mxu1  ;;  %v6130_v58 = vadd.f32 %v12040_v48, %v16191_v60  ;;  %v6131_v22 = vadd.f32 %v12043_v21, %v16202_v14  ;;  %v12138_v60 = vadd.f32 %v16287_v16, %v16283_v52  ;;  %v12089_v14 = vadd.f32 %v16285_v20, %v16281_v55  ;;  %v18366_v52 = vld [vmem:[#allocation14_spill] sm:$0xff]  ;;  %v18368_v55 = vld [vmem:[#allocation23_spill] sm:$0xff] }
 0x359   : > { %18352 = vst [vmem:[#allocation8_spill] sm:$0xff] %v16335_v49  ;;  %v16337_v53 = vpop.f32.mrf.mxu0  ;;  %v12952_v49 = vld [vmem:[%s17900_s10 + $0x88] sm:$0xff]  }
 0x35a   : > { %18353 = vst [vmem:[#allocation16_spill] sm:$0xff] %v16337_v53  ;;  %v16339_v18 = vpop.f32.mrf.mxu1 }
 0x35b   : > { %18354 = vst [vmem:[#allocation42_spill] sm:$0xff] %v16339_v18  ;;  %v16341_v50 = vpop.f32.mrf.mxu0  ;;  %v18359_v18 = vmov 0.0  }
 0x35c   : > { %18355 = vst [vmem:[#allocation43_spill] sm:$0xff] %v16341_v50  ;;  %v16346_v25 = vpop.f32.mrf.mxu1  ;;  %12480 = vmatprep.subr.bf16.mxu0 %v18359_v18 }
 0x35d   : > { %18356 = vst [vmem:[#allocation45_spill] sm:$0xff] %v16346_v25  ;;  %v16348_v38 = vpop.f32.mrf.mxu0  ;;  %v12019_v25 = vadd.f32 %v16154_v10, %v16147_v0  ;;  %12481 = vmatpush3.bf16.msra.mxu0 %v12952_v49  ;;  %v12028_v0 = vadd.f32 %v16179_v39, %v16174_v63  ;;  %v12037_v63 = vadd.f32 %v16204_v9, %v16199_v31 }
 0x35e   : > { %18357 = vst [vmem:[#allocation44_spill] sm:$0xff] %v16348_v38  ;;  %v16353_v53 = vpop.f32.mrf.mxu1  ;;  %12482 = vmatprep.subr.bf16.mxu0 %v18359_v18  ;;  %v12046_v31 = vadd.f32 %v16227_v36, %v16224_v6  ;;  %v12077_v9 = vadd.f32 %v16243_v13, %v16234_v37  ;;  %v12080_v6 = vadd.f32 %v16254_v33, %v16248_v44 }
 0x35f   : > { %18358 = vst [vmem:[#allocation46_spill] sm:$0xff] %v16353_v53  ;;  %v16356_v41 = vpop.f32.mrf.mxu0  ;;  %v12954_v53 = vld [vmem:[%s17900_s10 + $0x80] sm:$0xff]   ;;  %v12083_v36 = vadd.f32 %v16267_v29, %v16256_v15  ;;  %v16438_v33 = vadd.f32 %v12049_v42, %v16216_v19  ;;  %v12135_v29 = vadd.f32 %v16279_v61, %v16273_v7  ;;  %v12141_v7 = vadd.f32 %v16295_v17, %v16291_v59  ;;  %v18365_v61 = vld [vmem:[#allocation34_spill] sm:$0xff] }
 0x360   : > { %18360 = vst [vmem:[#allocation47_spill] sm:$0xff] %v16356_v41  ;;  %v16358_v50 = vpop.f32.mrf.mxu1  ;;  %v6132_v44 = vadd.f32 %v12046_v31, %v16209_v43  ;;  %v12144_v16 = vadd.f32 %v18366_v52, %v18365_v61  ;;  %v18375_v48 = vld [vmem:[#allocation19_spill] sm:$0xff] }
 0x361   : > { %18361 = vst [vmem:[#allocation48_spill] sm:$0xff] %v16358_v50  ;;  %v12108_v38 = vpop.f32.mrf.mxu0  ;;  %v18363_v50 = vld [vmem:[#allocation10_spill] sm:$0xff]  ;;  %12483 = vmatpush3.bf16.msra.mxu0 %v12954_v53 }
 0x362   : > { %v16370_v46 = vpop.f32.mrf.mxu1  ;;  %v16374_v41 = vsub.s32 %v7036_v47, %v18363_v50  ;;  %v16379_v35 = vadd.s32 16, %v18363_v50  ;;  %v6123_v47 = vadd.f32 %v12019_v25, %v16134_v28  ;;  %12540 = vmatprep.subr.bf16.mxu0 %v18359_v18  ;;  %v6365_v25 = vadd.f32 %v12083_v36, %v6125_v4  ;;  %v18374_v4 = vld [vmem:[#allocation28_spill] sm:$0xff] }
 0x363   : > { %18362 = vst [vmem:[#allocation49_spill] sm:$0xff] %v16370_v46  ;;  %v12109_v10 = vpop.f32.mrf.mxu0  ;;  %v16387_v46 = vstv %s11460_s15  ;;  %v12101_v59 = vadd.f32 %v18375_v48, %v18374_v4 }
 0x364   : > { %18364 = vst [vmem:[#allocation50_spill] sm:$0xff] %v16374_v41  ;;  %v16385_v57 = vpop.f32.mrf.mxu1  ;;  %v12110_v49 = vadd.f32 %v12109_v10, %v12108_v38  ;;  %v6124_v41 = vadd.f32 %v12022_v34, %v16142_v3  ;;  %v16394_v50 = vadd.s32 1, %v16387_v46  ;;  %v6126_v3 = vadd.f32 %v12028_v0, %v16162_v56  ;;  %v18367_v0 = vld [vmem:[#allocation26_spill] sm:$0xff] }
 0x365   : > { %v12111_v39 = vpop.f32.mrf.mxu0  ;;  %v16419_v38 = vadd.s32 2, %v16387_v46  ;;  %v6129_v56 = vadd.f32 %v12037_v63, %v16184_v12  ;;  %v16434_v12 = vadd.s32 3, %v16387_v46  ;;  %v6363_v15 = vadd.f32 %v12077_v9, %v6123_v47  ;;  %v18371_v47 = vld [vmem:[#allocation25_spill] sm:$0xff] }
 0x366   : > { %v16401_v45 = vpop.f32.mrf.mxu1  ;;  %v16404_v28 = vadd.f32 %v12110_v49, %v16252_v23  ;;  %v16447_v53 = vadd.s32 4, %v16387_v46  ;;  %v6364_v43 = vadd.f32 %v12080_v6, %v6124_v41  ;;  %v6366_v19 = vadd.f32 %v12086_v32, %v6126_v3  ;;  %v18370_v49 = vld [vmem:[#allocation39_spill] sm:$0xff]  ;;  %v18377_v6 = vld [vmem:[#allocation8_spill] sm:$0xff]  ;;  %v18378_v32 = vld [vmem:[#allocation42_spill] sm:$0xff] }
 0x367   : > { %v12112_v27 = vpop.f32.mrf.mxu0  ;;  %v12092_v34 = vadd.f32 %v16293_v30, %v16289_v54  ;;  %v12095_v20 = vadd.f32 %v18368_v55, %v18367_v0  ;;  %v6684_v41 = vadd.f32 %v12135_v29, %v6363_v15  ;;  %v12147_v63 = vadd.f32 %v18371_v47, %v18370_v49  ;;  %v18373_v54 = vld [vmem:[#allocation18_spill] sm:$0xff]  ;;  %v18380_v29 = vld [vmem:[#allocation16_spill] sm:$0xff]  ;;  %v18383_v55 = vld [vmem:[#allocation47_spill] sm:$0xff] }
 0x368   : > { %v16416_v40 = vpop.f32.mrf.mxu1  ;;  %v12113_v23 = vadd.f32 %v12112_v27, %v12111_v39  ;;  %v18372_v39 = vld [vmem:[#allocation37_spill] sm:$0xff]  ;;  %v6685_v21 = vadd.f32 %v12138_v60, %v6364_v43  ;;  %v6367_v3 = vadd.f32 %v12089_v14, %v6127_v26  ;;  %v16467_v9 = vadd.s32 5, %v16387_v46  ;;  %v18384_v47 = vld [vmem:[#allocation46_spill] sm:$0xff] }
 0x369   : > { %v12114_v1 = vpop.f32.mrf.mxu0  ;;  %v12098_v30 = vadd.f32 %v18373_v54, %v18372_v39  ;;  %v6368_v27 = vadd.f32 %v12092_v34, %v6128_v24  ;;  %v6686_v52 = vadd.f32 %v12141_v7, %v6365_v25  ;;  %v16475_v0 = vadd.f32 %v12144_v16, %v6366_v19  ;;  %v18382_v34 = vld [vmem:[#allocation44_spill] sm:$0xff]  ;;  %v18386_v16 = vld [vmem:[#allocation10_spill] sm:$0xff] }
 0x36a   : > { %v12163_v37 = vpop.f32.mrf.mxu1  ;;  %v16431_v13 = vadd.f32 %v12113_v23, %v16265_v11  ;;  %v18376_v23 = vld [vmem:[#allocation15_spill] sm:$0xff]  ;;  %v6369_v26 = vadd.f32 %v12095_v20, %v6129_v56  ;;  %v16477_v43 = vadd.f32 %v12147_v63, %v6367_v3  ;;  %v6371_v24 = vadd.f32 %v12101_v59, %v6131_v22  ;;  %v18385_v39 = vld [vmem:[#allocation48_spill] sm:$0xff] }
 0x36b   : > { %v12115_v2 = vpop.f32.mrf.mxu0  ;;  %v12150_v36 = vadd.f32 %v18377_v6, %v18376_v23  ;;  %vm7278_vm6 = vcmp.le.s32.totalorder %v16379_v35, 16  ;;  %vm7282_vm9 = vcmp.ge.s32.totalorder %v16387_v46, 0  ;;  %v12156_v25 = vadd.f32 %v18385_v39, %v18384_v47  ;;  %v18388_v23 = vld [vmem:[#allocation50_spill] sm:$0xff] }
 0x36c   : > { %v12164_v11 = vpop.f32.mrf.mxu1  ;;  %v12116_v51 = vadd.f32 %v12115_v2, %v12114_v1  ;;  %v18379_v1 = vld [vmem:[#allocation45_spill] sm:$0xff]  ;;  %v18381_v2 = vld [vmem:[#allocation43_spill] sm:$0xff]  ;;  %vm7273_vm12 = vcmp.ge.s32.totalorder %v18386_v16, 1  ;;  %vm7324_vm2 = vcmp.lt.s32.totalorder %v16387_v46, 16  ;;  %vm7325_vm3 = vcmp.lt.s32.totalorder %v16394_v50, 16 }
 0x36d   : > { %v12191_v8 = vpop.f32.mrf.mxu0  ;;  %v12153_v15 = vadd.f32 %v18379_v1, %v18378_v32  ;;  %v16486_v20 = vadd.f32 %v12150_v36, %v6368_v27  ;;  %v12165_v4 = vadd.f32 %v12164_v11, %v12163_v37 }
 0x36e   : > { %v12166_v10 = vpop.f32.mrf.mxu1  ;;  %v16458_v62 = vadd.f32 %v12116_v51, %v18369_v5  ;;  %v12104_v51 = vadd.f32 %v18381_v2, %v18380_v29  ;;  %v12107_v5 = vadd.f32 %v18383_v55, %v18382_v34 }
 0x36f   : > { %v12192_v17 = vpop.f32.mrf.mxu0 }
 0x370   : > { %v12167_v31 = vpop.f32.mrf.mxu1  ;;  %v12193_v42 = vadd.f32 %v12192_v17, %v12191_v8  ;;  %v6370_v8 = vadd.f32 %v12098_v30, %v6130_v58  ;;  %v16488_v58 = vadd.f32 %v12153_v15, %v6369_v26  ;;  %v6372_v22 = vadd.f32 %v12104_v51, %v6132_v44 }
 0x371   : > { %v12194_v61 = vpop.f32.mrf.mxu0  ;;  %v12162_v30 = vadd.f32 %v16416_v40, %v16401_v45  ;;  %v6373_v3 = vadd.f32 %v12107_v5, %v16438_v33 }
 0x372   : > { %v12169_v60 = vpop.f32.mrf.mxu1  ;;  %v6963_v14 = vadd.f32 %v12193_v42, %v6684_v41  ;;  %v18387_v41 = vld [vmem:[#allocation49_spill] sm:$0xff]  ;;  %v12168_v42 = vadd.f32 %v12167_v31, %v12166_v10  ;;  %v16497_v36 = vadd.f32 %v12156_v25, %v6370_v8 }
 0x373   : > { %v12195_v49 = vpop.f32.mrf.mxu0  ;;  %v12159_v63 = vadd.f32 %v16385_v57, %v18387_v41  ;;  %v16504_v33 = vadd.f32 %v12165_v4, %v6373_v3 }
 0x374   : > { %v12170_v19 = vpop.f32.mrf.mxu1  ;;  %vm6977_vm11 = vcmp.ge.f32.partialorder %v6963_v14, 0.0  ;;  %v6991_v56 = vmul.f32 0.2, %v6963_v14  ;;  %v12196_v7 = vadd.f32 %v12195_v49, %v12194_v61  ;;  %v16507_v29 = vadd.f32 %v12168_v42, %v16404_v28 }
 0x375   : > { %v12197_v54 = vpop.f32.mrf.mxu0  ;;  %v16499_v1 = vadd.f32 %v12159_v63, %v6371_v24  ;;  %v12171_v45 = vadd.f32 %v12170_v19, %v12169_v60 }
 0x376   : > { %v7005_v48 = vsel %vm6977_vm11, %v6963_v14, %v6991_v56  ;;  %v12172_v59 = vpop.f32.mrf.mxu1  ;;  %v6964_v17 = vadd.f32 %v12196_v7, %v6685_v21  ;;  %v16502_v21 = vadd.f32 %v12162_v30, %v6372_v22  ;;  %vm7283_vm11 = vcmp.ge.s32.totalorder %v16394_v50, 0 }
 0x377   : > { %v7033_v27 = vcombine.high %v7005_v48, %v7005_v48  ;;  %v7040_v6 = vrot.slane %v7005_v48, %v18388_v23  ;;  %v12198_v44 = vpop.f32.mrf.mxu0  ;;  %v16512_v24 = vadd.f32 %v12171_v45, %v16431_v13 }
 0x378   : > { %vm6978_vm10 = vcmp.ge.f32.partialorder %v6964_v17, 0.0  ;;  %v6992_v57 = vmul.f32 0.2, %v6964_v17  ;;  %v12199_v32 = vadd.f32 %v12198_v44, %v12197_v54  ;;  %v12173_v10 = vpop.f32.mrf.mxu1 }
 0x379   : > { %v7047_v40 = vrot.slane %v7033_v27, %v18388_v23  ;;  %v7048_v37 = vcombine.high %v7040_v6, %v7040_v6  ;;  %v12200_v11 = vpop.f32.mrf.mxu0  ;;  %v12174_v55 = vadd.f32 %v12173_v10, %v12172_v59 }
 0x37a   : > { %v7006_v31 = vsel %vm6978_vm10, %v6964_v17, %v6992_v57  ;;  %v6965_v15 = vadd.f32 %v12199_v32, %v6686_v52  ;;  %vm16520_vm10 = vmand %vm7278_vm6, %vm7282_vm9 }
 0x37b   : > { %v7049_v2 = vcombine.high %v7047_v40, %v7047_v40  ;;  %v7396_v51 = vcombine.low %v7040_v6, %v7048_v37  ;;  %v7050_v61 = vcombine.high %v7006_v31, %v7006_v31  ;;  %v12201_v26 = vpop.f32.mrf.mxu0  ;;  %v7057_v60 = vrot.slane %v7006_v31, %v18388_v23  ;;  %vm7344_vm0 = vmand %vm16520_vm10, %vm7324_vm2 }
 0x37c   : > { %vm6979_vm13 = vcmp.ge.f32.partialorder %v6965_v15, 0.0  ;;  %v6993_v14 = vmul.f32 0.2, %v6965_v15  ;;  %v12202_v8 = vadd.f32 %v12201_v26, %v12200_v11  ;;  %v16538_v17 = vadd.f32 %v12174_v55, %v16458_v62  ;;  %vm7343_vm10 = vmand %vm7282_vm9, %vm7324_vm2 }
 0x37d   : > { %v7397_v34 = vcombine.low %v7047_v40, %v7049_v2  ;;  %v7064_v52 = vrot.slane %v7050_v61, %v18388_v23  ;;  %v12203_v28 = vpop.f32.mrf.mxu0  ;;  %v7404_v5 = vrot.slane %v7396_v51, %v18388_v23  ;;  %v7065_v49 = vcombine.high %v7057_v60, %v7057_v60 }
 0x37e   : > { %v7007_v47 = vsel %vm6979_vm13, %v6965_v15, %v6993_v14  ;;  %v6966_v13 = vadd.f32 %v12202_v8, %v16475_v0  ;;  %vm7306_vm13 = vmand %vm7273_vm12, %vm7282_vm9  ;;  %v18393_v14 = vld [vmem:[#allocation20_spill] sm:$0xff]  ;;  %vm7284_vm9 = vcmp.ge.s32.totalorder %v16419_v38, 0 }
 0x37f   : > { %v7411_v25 = vrot.slane %v7397_v34, %v18388_v23  ;;  %v7066_v19 = vcombine.high %v7064_v52, %v7064_v52  ;;  %v7067_v56 = vcombine.high %v7007_v47, %v7007_v47  ;;  %v7074_v7 = vrot.slane %v7007_v47, %v18388_v23  ;;  %v12204_v22 = vpop.f32.mrf.mxu0  ;;  %vm16542_vm1 = vmand %vm7306_vm13, %vm7324_vm2 }
 0x380   : > { %v7413_v41 = vcombine.low %v7057_v60, %v7065_v49  ;;  %vm6980_vm4 = vcmp.ge.f32.partialorder %v6966_v13, 0.0  ;;  %v6994_v63 = vmul.f32 0.2, %v6966_v13  ;;  %v12205_v54 = vadd.f32 %v12204_v22, %v12203_v28 }
 0x381   : > { %v7412_v30 = vcombine.low %v7404_v5, %v7411_v25  ;;  %v7414_v0 = vcombine.low %v7064_v52, %v7066_v19  ;;  %v7081_v4 = vrot.slane %v7067_v56, %v18388_v23  ;;  %v7082_v48 = vcombine.high %v7074_v7, %v7074_v7  ;;  %v12206_v59 = vpop.f32.mrf.mxu0 }
 0x382   : > { %v7436_v42 = vrot.slane %v7074_v7, %v18388_v23  ;;  %v7008_v27 = vsel %vm6980_vm4, %v6966_v13, %v6994_v63  ;;  %v6967_v6 = vadd.f32 %v12205_v54, %v16477_v43  ;;  %v7421_v44 = vrot.slane %v7413_v41, %v18388_v23 }
 0x383   : > { %v7428_v57 = vrot.slane %v7414_v0, %v18388_v23  ;;  %v7437_v32 = vcombine.low %v7082_v48, %v7081_v4  ;;  %v7083_v45 = vcombine.high %v7081_v4, %v7081_v4  ;;  %v12207_v40 = vpop.f32.mrf.mxu0  ;;  %v7084_v37 = vcombine.high %v7008_v27, %v7008_v27 }
 0x384   : > { %v7662_v62 = vsel %vm7344_vm0, %v7436_v42, 0.0  ;;  %v7091_v11 = vrot.slane %v7008_v27, %v18388_v23  ;;  %vm6981_vm13 = vcmp.ge.f32.partialorder %v6967_v6, 0.0  ;;  %v7660_v43 = vsel %vm16542_vm1, %v7412_v30, 0.0  ;;  %vm16566_vm0 = vmand %vm7273_vm12, %vm7283_vm11 }
 0x385   : > { %v7429_v10 = vcombine.low %v7421_v44, %v7428_v57  ;;  %v7679_v31 = vpack.c.bf16 %v7662_v62, %v7662_v62  ;;  %v6995_v15 = vmul.f32 0.2, %v6967_v6  ;;  %v12209_v2 = vpop.f32.mrf.mxu0  ;;  %v7445_v51 = vrot.slane %v7437_v32, %v18388_v23  ;;  %vm16578_vm1 = vmand %vm7278_vm6, %vm7283_vm11 }
 0x386   : > { %v7098_v61 = vrot.slane %v7084_v37, %v18388_v23  ;;  %v7099_v26 = vcombine.high %v7091_v11, %v7091_v11  ;;  %v7438_v60 = vcombine.low %v7083_v45, %v7091_v11  ;;  %v12208_v52 = vadd.f32 %v12207_v40, %v12206_v59  ;;  %vm16590_vm4 = vmand %vm16566_vm0, %vm7325_vm3 }
 0x387   : > { %v7661_v46 = vsel %vm7343_vm10, %v7429_v10, 0.0  ;;  %v16560_v8 = vrot.slane %v7679_v31, %v18393_v14  ;;  %v7009_v55 = vsel %vm6981_vm13, %v6967_v6, %v6995_v15  ;;  %v12210_v28 = vpop.f32.mrf.mxu0  ;;  %vm7347_vm2 = vmand %vm16578_vm1, %vm7325_vm3  ;;  %vm7326_vm10 = vcmp.lt.s32.totalorder %v16419_v38, 16 }
 0x388   : > { %v7678_v5 = vpack.c.bf16 %v7661_v46, %v7660_v43  ;;  %v11461_v49 = vpack.c.bf16 %v7661_v46, %v7661_v46  ;;  %v7452_v47 = vrot.slane %v7438_v60, %v18388_v23  ;;  %v7454_v39 = vcombine.low %v7099_v26, %v7098_v61  ;;  %vm7346_vm13 = vmand %vm7283_vm11, %vm7325_vm3 }
 0x389   : > { %v7764_v13 = vrot.slane %v16560_v8, %v18393_v14  ;;  %v7100_v25 = vcombine.high %v7098_v61, %v7098_v61  ;;  %v7101_v19 = vcombine.high %v7009_v55, %v7009_v55  ;;  %v7108_v56 = vrot.slane %v7009_v55, %v18388_v23  ;;  %v12212_v22 = vpop.f32.mrf.mxu0  ;;  %vm16636_vm1 = vmand %vm7273_vm12, %vm7284_vm9 }
 0x38a   : > { %v7709_v41 = vrot.slane %v7678_v5, %v18393_v14  ;;  %v16584_v63 = vrot.slane %v11461_v49, %v18393_v14  ;;  %v7453_v30 = vcombine.low %v7445_v51, %v7452_v47  ;;  %v7462_v0 = vrot.slane %v7454_v39, %v18388_v23 }
 0x38b   : > { %v7115_v4 = vrot.slane %v7101_v19, %v18388_v23  ;;  %v7116_v48 = vcombine.high %v7108_v56, %v7108_v56  ;;  %v7455_v59 = vcombine.low %v7100_v25, %v7108_v56  ;;  %v6968_v3 = vadd.f32 %v12208_v52, %v16486_v20  ;;  %v12213_v42 = vpop.f32.mrf.mxu0 }
 0x38c   : > { %v7717_v27 = vcombine.high %v7709_v41, %v7709_v41  ;;  %v7718_v6 = vcombine.high %v16584_v63, %v16584_v63  ;;  %v16601_v44 = vrot.slane %v7709_v41, %v18393_v14  ;;  %v16605_v57 = vrot.slane %v16584_v63, %v18393_v14 }
 0x38d   : > { %v7663_v20 = vsel %vm16590_vm4, %v7453_v30, 0.0  ;;  %v7117_v32 = vcombine.high %v7115_v4, %v7115_v4  ;;  %v7469_v45 = vrot.slane %v7455_v59, %v18388_v23  ;;  %v7477_v40 = vrot.slane %v7116_v48, %v18388_v23  ;;  %v12215_v62 = vpop.f32.mrf.mxu0 }
 0x38e   : > { %vm6982_vm0 = vcmp.ge.f32.partialorder %v6968_v3, 0.0  ;;  %v6996_v37 = vmul.f32 0.2, %v6968_v3  ;;  %v12211_v11 = vadd.f32 %v12210_v28, %v12209_v2  ;;  %v12214_v10 = vadd.f32 %v12213_v42, %v12212_v22 }
 0x38f   : > { %v7470_v43 = vcombine.low %v7462_v0, %v7469_v45  ;;  %v7478_v31 = vcombine.low %v7115_v4, %v7117_v32  ;;  %v7665_v15 = vsel %vm7347_vm2, %v7477_v40, 0.0  ;;  %v12216_v51 = vpop.f32.mrf.mxu0  ;;  %v16621_v61 = vrot.slane %v7717_v27, %v18393_v14  ;;  %vm7314_vm2 = vmand %vm7278_vm6, %vm7284_vm9 }
 0x390   : > { %v7681_v26 = vpack.c.bf16 %v7665_v15, %v7665_v15  ;;  %v7010_v60 = vsel %vm6982_vm0, %v6968_v3, %v6996_v37  ;;  %v6969_v46 = vadd.f32 %v12211_v11, %v16488_v58  ;;  %v6970_v34 = vadd.f32 %v12214_v10, %v16497_v36 }
 0x391   : > { %v7486_v50 = vrot.slane %v7478_v31, %v18388_v23  ;;  %v7664_v55 = vsel %vm7346_vm13, %v7470_v43, 0.0  ;;  %v7118_v52 = vcombine.high %v7010_v60, %v7010_v60  ;;  %v7125_v2 = vrot.slane %v7010_v60, %v18388_v23  ;;  %v12218_v28 = vpop.f32.mrf.mxu0  ;;  %vm16669_vm13 = vmand %vm16636_vm1, %vm7326_vm10 }
 0x392   : > { %v7680_v5 = vpack.c.bf16 %v7664_v55, %v7663_v20  ;;  %v11462_v49 = vpack.c.bf16 %v7664_v55, %v7664_v55  ;;  %v7820_v47 = vrot.slane %v7681_v26, %v18393_v14  ;;  %vm6983_vm3 = vcmp.ge.f32.partialorder %v6969_v46, 0.0 }
 0x393   : > { %v7132_v39 = vrot.slane %v7118_v52, %v18388_v23  ;;  %v7133_v25 = vcombine.high %v7125_v2, %v7125_v2  ;;  %v6997_v19 = vmul.f32 0.2, %v6969_v46  ;;  %vm6984_vm11 = vcmp.ge.f32.partialorder %v6970_v34, 0.0  ;;  %v12219_v58 = vpop.f32.mrf.mxu0 }
 0x394   : > { %v7772_v36 = vrot.slane %v7680_v5, %v18393_v14  ;;  %v7779_v56 = vrot.slane %v11462_v49, %v18393_v14  ;;  %v7827_v7 = vrot.slane %v7820_v47, %v18393_v14  ;;  %v6998_v22 = vmul.f32 0.2, %v6970_v34 }
 0x395   : > { %v7134_v41 = vcombine.high %v7132_v39, %v7132_v39  ;;  %v7479_v30 = vcombine.low %v7125_v2, %v7133_v25  ;;  %v7011_v0 = vsel %vm6983_vm3, %v6969_v46, %v6997_v19  ;;  %v12217_v4 = vadd.f32 %v12216_v51, %v12215_v62  ;;  %v16647_v27 = vpop.f32.mrf.mxu0  ;;  %vm7350_vm3 = vmand %vm7314_vm2, %vm7326_vm10 }
 0x396   : > { %v7780_v48 = vcombine.high %v7772_v36, %v7772_v36  ;;  %v7781_v59 = vcombine.high %v7779_v56, %v7779_v56  ;;  %v16641_v3 = vrot.slane %v7772_v36, %v18393_v14  ;;  %v16644_v42 = vrot.slane %v7779_v56, %v18393_v14 }
 0x397   : > { %vm7285_vm4 = vcmp.ge.s32.totalorder %v16434_v12, 0  ;;  %v7493_v20 = vrot.slane %v7479_v30, %v18388_v23  ;;  %v7495_v32 = vcombine.low %v7132_v39, %v7134_v41  ;;  %v7135_v45 = vcombine.high %v7011_v0, %v7011_v0  ;;  %v16682_v2 = vpop.f32.mrf.mxu0 }
 0x398   : > { %v7142_v40 = vrot.slane %v7011_v0, %v18388_v23  ;;  %v16656_v62 = vrot.slane %v7780_v48, %v18393_v14  ;;  %v16659_v37 = vrot.slane %v7781_v59, %v18393_v14  ;;  %v7810_v11 = vcombine.high %v16641_v3, %v16641_v3 }
 0x399   : > { %v7811_v10 = vcombine.high %v16644_v42, %v16644_v42  ;;  %v7494_v31 = vcombine.low %v7486_v50, %v7493_v20  ;;  %v7503_v15 = vrot.slane %v7495_v32, %v18388_v23  ;;  %v7149_v51 = vrot.slane %v7135_v45, %v18388_v23  ;;  %v12224_v41 = vpop.f32.mrf.mxu0 }
 0x39a   : > { %v7150_v26 = vcombine.high %v7142_v40, %v7142_v40  ;;  %vm7327_vm0 = vcmp.lt.s32.totalorder %v16434_v12, 16  ;;  %v7813_v60 = vcombine.high %v16659_v37, %v16659_v37  ;;  %v7012_v46 = vsel %vm6984_vm11, %v6970_v34, %v6998_v22  ;;  %vm7349_vm11 = vmand %vm7284_vm9, %vm7326_vm10 }
 0x39b   : > { %v6971_v55 = vadd.f32 %v12217_v4, %v16499_v1  ;;  %v12220_v52 = vadd.f32 %v12219_v58, %v12218_v28  ;;  %v7666_v50 = vsel %vm16669_vm13, %v7494_v31, 0.0  ;;  %v7518_v49 = vrot.slane %v7149_v51, %v18388_v23  ;;  %vm16707_vm9 = vmand %vm7273_vm12, %vm7285_vm4 }
 0x39c   : > { %v7496_v5 = vcombine.low %v7142_v40, %v7150_v26  ;;  %v7151_v47 = vcombine.high %v7149_v51, %v7149_v51  ;;  %v16687_v39 = vcombine.low %v7813_v60, %v7827_v7  ;;  %v7152_v25 = vcombine.high %v7012_v46, %v7012_v46  ;;  %v12225_v26 = vpop.f32.mrf.mxu0  ;;  %vm16721_vm10 = vmand %vm7278_vm6, %vm7285_vm4 }
 0x39d   : > { %v7159_v19 = vrot.slane %v7012_v46, %v18388_v23  ;;  %vm6985_vm1 = vcmp.ge.f32.partialorder %v6971_v55, 0.0  ;;  %v7668_v36 = vsel %vm7350_vm3, %v7518_v49, 0.0  ;;  %v6999_v1 = vmul.f32 0.2, %v6971_v55 }
 0x39e   : > { %v7510_v34 = vrot.slane %v7496_v5, %v18388_v23  ;;  %v6972_v28 = vadd.f32 %v12220_v52, %v16502_v21  ;;  %v8188_v58 = vrot.slane %v16687_v39, %v18393_v14  ;;  %v7683_v56 = vpack.c.bf16 %v7668_v36, %v7668_v36 }
 0x39f   : > { %v7166_v7 = vrot.slane %v7152_v25, %v18388_v23  ;;  %v7167_v22 = vcombine.high %v7159_v19, %v7159_v19  ;;  %v7519_v30 = vcombine.low %v7151_v47, %v7159_v19  ;;  %v7013_v0 = vsel %vm6985_vm1, %v6971_v55, %v6999_v1  ;;  %vm16733_vm1 = vmand %vm16707_vm9, %vm7327_vm0 }
 0x3a0   : > { %v7511_v54 = vcombine.low %v7503_v15, %v7510_v34  ;;  %vm6986_vm2 = vcmp.ge.f32.partialorder %v6972_v28, 0.0  ;;  %v16700_v4 = vrot.slane %v7683_v56, %v18393_v14  ;;  %v7169_v59 = vcombine.high %v7013_v0, %v7013_v0 }
 0x3a1   : > { %v7520_v21 = vcombine.low %v7167_v22, %v7166_v7  ;;  %v7168_v48 = vcombine.high %v7166_v7, %v7166_v7  ;;  %vm7286_vm13 = vcmp.ge.s32.totalorder %v16447_v53, 0  ;;  %v7527_v32 = vrot.slane %v7519_v30, %v18388_v23  ;;  %v12227_v30 = vpop.f32.mrf.mxu0 }
 0x3a2   : > { %v7667_v20 = vsel %vm7349_vm11, %v7511_v54, 0.0  ;;  %v7176_v45 = vrot.slane %v7013_v0, %v18388_v23  ;;  %v7000_v40 = vmul.f32 0.2, %v6972_v28  ;;  %v7890_v15 = vrot.slane %v16700_v4, %v18393_v14  ;;  %vm7353_vm11 = vmand %vm16721_vm10, %vm7327_vm0 }
 0x3a3   : > { %v7682_v43 = vpack.c.bf16 %v7667_v20, %v7666_v50  ;;  %v11463_v31 = vpack.c.bf16 %v7667_v20, %v7667_v20  ;;  %v7534_v51 = vrot.slane %v7520_v21, %v18388_v23  ;;  %v7183_v60 = vrot.slane %v7169_v59, %v18388_v23 }
 0x3a4   : > { %v7184_v46 = vcombine.high %v7176_v45, %v7176_v45  ;;  %v7536_v52 = vcombine.low %v7168_v48, %v7176_v45  ;;  %v7014_v50 = vsel %vm6986_vm2, %v6972_v28, %v7000_v40  ;;  %vm7328_vm3 = vcmp.lt.s32.totalorder %v16447_v53, 16  ;;  %vm7352_vm2 = vmand %vm7285_vm4, %vm7327_vm0 }
 0x3a5   : > { %v7835_v5 = vrot.slane %v7682_v43, %v18393_v14  ;;  %v7842_v49 = vrot.slane %v11463_v31, %v18393_v14  ;;  %v7535_v25 = vcombine.low %v7527_v32, %v7534_v51  ;;  %v7186_v19 = vcombine.high %v7014_v50, %v7014_v50  ;;  %vm7318_vm4 = vmand %vm7273_vm12, %vm7286_vm13 }
 0x3a6   : > { %v7185_v34 = vcombine.high %v7183_v60, %v7183_v60  ;;  %v7537_v36 = vcombine.low %v7184_v46, %v7183_v60  ;;  %v7544_v1 = vrot.slane %v7536_v52, %v18388_v23  ;;  %v7193_v28 = vrot.slane %v7014_v50, %v18388_v23  ;;  %v12228_v52 = vpop.f32.mrf.mxu0  ;;  %vm16787_vm9 = vmand %vm7318_vm4, %vm7328_vm3 }
 0x3a7   : > { %v7843_v56 = vcombine.high %v7835_v5, %v7835_v5  ;;  %v7844_v7 = vcombine.high %v7842_v49, %v7842_v49  ;;  %v16740_v22 = vrot.slane %v7835_v5, %v18393_v14  ;;  %v16743_v54 = vrot.slane %v7842_v49, %v18393_v14 }
 0x3a8   : > { %v7669_v0 = vsel %vm16733_vm1, %v7535_v25, 0.0  ;;  %v7551_v21 = vrot.slane %v7537_v36, %v18388_v23  ;;  %v7559_v48 = vrot.slane %v7185_v34, %v18388_v23  ;;  %v7200_v59 = vrot.slane %v7186_v19, %v18388_v23 }
 0x3a9   : > { %v16755_v20 = vrot.slane %v7843_v56, %v18393_v14  ;;  %v16758_v38 = vrot.slane %v7844_v7, %v18393_v14  ;;  %v7201_v32 = vcombine.high %v7193_v28, %v7193_v28  ;;  %v12223_v45 = vadd.f32 %v16682_v2, %v16647_v27 }
 0x3aa   : > { %v7552_v40 = vcombine.low %v7544_v1, %v7551_v21  ;;  %v7671_v43 = vsel %vm7353_vm11, %v7559_v48, 0.0  ;;  %v7202_v31 = vcombine.high %v7200_v59, %v7200_v59  ;;  %v12226_v51 = vadd.f32 %v12225_v26, %v12224_v41  ;;  %vm7320_vm11 = vmand %vm7278_vm6, %vm7286_vm13 }
 0x3ab   : > { %v8179_v60 = vcombine.low %v16740_v22, %v16755_v20  ;;  %v11469_v46 = vcombine.high %v16740_v22, %v16755_v20  ;;  %v8181_v55 = vcombine.low %v16743_v54, %v16758_v38  ;;  %v7685_v5 = vpack.c.bf16 %v7671_v43, %v7671_v43 }
 0x3ac   : > { %v7670_v50 = vsel %vm7352_vm2, %v7552_v40, 0.0  ;;  %v7560_v27 = vcombine.low %v7193_v28, %v7201_v32  ;;  %v7561_v2 = vcombine.low %v7200_v59, %v7202_v31  ;;  %v6973_v49 = vadd.f32 %v12223_v45, %v16504_v33 }
 0x3ad   : > { %v7684_v41 = vpack.c.bf16 %v7670_v50, %v7669_v0  ;;  %v11464_v26 = vpack.c.bf16 %v7670_v50, %v7670_v50  ;;  %v6974_v47 = vadd.f32 %v12226_v51, %v16507_v29  ;;  %v7946_v25 = vrot.slane %v7685_v5, %v18393_v14 }
 0x3ae   : > { %v7568_v19 = vrot.slane %v7560_v27, %v18388_v23  ;;  %v7575_v34 = vrot.slane %v7561_v2, %v18388_v23  ;;  %v12229_v36 = vadd.f32 %v12228_v52, %v12227_v30  ;;  %vm6987_vm0 = vcmp.ge.f32.partialorder %v6973_v49, 0.0 }
 0x3af   : > { %v7898_v1 = vrot.slane %v7684_v41, %v18393_v14  ;;  %v7905_v28 = vrot.slane %v11464_v26, %v18393_v14  ;;  %v7001_v56 = vmul.f32 0.2, %v6973_v49  ;;  %v7953_v33 = vrot.slane %v7946_v25, %v18393_v14 }
 0x3b0   : > { %v16792_v29 = vcombine.low %v7568_v19, %v7575_v34  ;;  %vm6988_vm10 = vcmp.ge.f32.partialorder %v6974_v47, 0.0  ;;  %v7002_v0 = vmul.f32 0.2, %v6974_v47  ;;  %vm7287_vm1 = vcmp.ge.s32.totalorder %v16467_v9, 0 }
 0x3b1   : > { %v7906_v30 = vcombine.high %v7898_v1, %v7898_v1  ;;  %v7907_v21 = vcombine.high %v7905_v28, %v7905_v28  ;;  %v16796_v48 = vrot.slane %v7898_v1, %v18393_v14  ;;  %v16799_v59 = vrot.slane %v7905_v28, %v18393_v14 }
 0x3b2   : > { %v7015_v32 = vsel %vm6987_vm0, %v6973_v49, %v7001_v56  ;;  %v7016_v45 = vsel %vm6988_vm10, %v6974_v47, %v7002_v0  ;;  %v7672_v40 = vsel %vm16787_vm9, %v16792_v29, 0.0  ;;  %v6975_v43 = vadd.f32 %v12229_v36, %v16512_v24  ;;  %vm7356_vm0 = vmand %vm7320_vm11, %vm7328_vm3 }
 0x3b3   : > { %v16806_v31 = vrot.slane %v7906_v30, %v18393_v14  ;;  %v16809_v51 = vrot.slane %v7907_v21, %v18393_v14  ;;  %v7936_v52 = vcombine.high %v16796_v48, %v16796_v48  ;;  %vm7329_vm2 = vcmp.lt.s32.totalorder %v16467_v9, 16  ;;  %vm7321_vm10 = vmand %vm7273_vm12, %vm7287_vm1 }
 0x3b4   : > { %v16824_v24 = vcombine.low %v7890_v15, %v16796_v48  ;;  %v7203_v5 = vcombine.high %v7015_v32, %v7015_v32  ;;  %v7210_v27 = vrot.slane %v7015_v32, %v18388_v23  ;;  %v7220_v2 = vcombine.high %v7016_v45, %v7016_v45  ;;  %vm7355_vm11 = vmand %vm7286_vm13, %vm7328_vm3  ;;  %v12955_v48 = vld [vmem:[%s17900_s10 + $0x68] sm:$0xff]  }
 0x3b5   : > { %v7938_v41 = vcombine.high %v16806_v31, %v16806_v31  ;;  %v7939_v26 = vcombine.high %v16809_v51, %v16809_v51  ;;  %v7227_v49 = vrot.slane %v7016_v45, %v18388_v23  ;;  %vm6989_vm4 = vcmp.ge.f32.partialorder %v6975_v43, 0.0  ;;  %vm16878_vm12 = vmand %vm7321_vm10, %vm7329_vm2 }
 0x3b6   : > { %v7217_v47 = vrot.slane %v7203_v5, %v18388_v23  ;;  %v7218_v25 = vcombine.high %v7210_v27, %v7210_v27  ;;  %v7234_v4 = vrot.slane %v7220_v2, %v18388_v23  ;;  %v7003_v15 = vmul.f32 0.2, %v6975_v43  ;;  %v12230_v2 = vpop.f32.mrf.mxu0  ;;  %vm7323_vm3 = vmand %vm7278_vm6, %vm7287_vm1 }
 0x3b7   : > { %v16837_v19 = vcombine.low %v7938_v41, %v16799_v59  ;;  %v16839_v34 = vcombine.low %v7939_v26, %v7953_v33  ;;  %v7235_v36 = vcombine.high %v7227_v49, %v7227_v49  ;;  %v7600_v1 = vrot.slane %v7227_v49, %v18388_v23  ;;  %vm16940_vm9 = vmand %vm7323_vm3, %vm7329_vm2 }
 0x3b8   : > { %v7219_v28 = vcombine.high %v7217_v47, %v7217_v47  ;;  %v7577_v56 = vcombine.low %v7210_v27, %v7218_v25  ;;  %v7017_v0 = vsel %vm6989_vm4, %v6975_v43, %v7003_v15  ;;  %v7236_v30 = vcombine.high %v7234_v4, %v7234_v4  ;;  %vm16962_vm6 = vmand %vm7287_vm1, %vm7329_vm2 }
 0x3b9   : > { %v7601_v21 = vcombine.low %v7235_v36, %v7234_v4  ;;  %v7674_v32 = vsel %vm7356_vm0, %v7600_v1, 0.0  ;;  %v7237_v45 = vcombine.high %v7017_v0, %v7017_v0  ;;  %v7244_v5 = vrot.slane %v7017_v0, %v18388_v23  ;;  %v12231_v36 = vpop.f32.mrf.mxu0 }
 0x3ba   : > { %v7578_v50 = vcombine.low %v7217_v47, %v7219_v28  ;;  %v7585_v12 = vrot.slane %v7577_v56, %v18388_v23  ;;  %v7687_v41 = vpack.c.bf16 %v7674_v32, %v7674_v32  ;;  %v7746_v33 = vrot.slane %v7718_v6, %v18393_v14 }
 0x3bb   : > { %v7609_v26 = vrot.slane %v7601_v21, %v18388_v23  ;;  %v16850_v43 = vrot.slane %v7237_v45, %v18388_v23  ;;  %v7252_v27 = vcombine.high %v7244_v5, %v7244_v5  ;;  %v7602_v49 = vcombine.low %v7236_v30, %v7244_v5 }
 0x3bc   : > { %v7592_v47 = vrot.slane %v7578_v50, %v18388_v23  ;;  %v16858_v25 = vrot.slane %v7687_v41, %v18393_v14  ;;  %v8080_v63 = vcombine.low %v16601_v44, %v16621_v61  ;;  %v11467_v6 = vcombine.high %v16601_v44, %v16621_v61 }
 0x3bd   : > { %v7616_v16 = vrot.slane %v7602_v49, %v18388_v23  ;;  %v16870_v4 = vcombine.low %v7252_v27, %v16850_v43  ;;  %v8082_v50 = vcombine.low %v16605_v57, %v7746_v33  ;;  %v11468_v15 = vcombine.high %v16605_v57, %v7746_v33 }
 0x3be   : > { %v7593_v1 = vcombine.low %v7585_v12, %v7592_v47  ;;  %v8016_v28 = vrot.slane %v16858_v25, %v18393_v14  ;;  %v8090_v53 = vrot.slane %v8080_v63, %v18393_v14  ;;  %v8097_v61 = vrot.slane %v11467_v6, %v18393_v14 }
 0x3bf   : > { %v16884_v56 = vcombine.low %v7609_v26, %v7616_v16  ;;  %v7626_v57 = vrot.slane %v16870_v4, %v18388_v23  ;;  %v8104_v12 = vrot.slane %v8082_v50, %v18393_v14  ;;  %v8111_v0 = vrot.slane %v11468_v15, %v18393_v14 }
 0x3c0   : > { %v7673_v30 = vsel %vm7355_vm11, %v7593_v1, 0.0  ;;  %v8112_v21 = vcombine.low %v8090_v53, %v8097_v61  ;;  %v12232_v32 = vadd.f32 %v12231_v36, %v12230_v2  ;;  %v7253_v45 = vcombine.high %v16850_v43, %v16850_v43 }
 0x3c1   : > { %v7686_v5 = vpack.c.bf16 %v7673_v30, %v7672_v40  ;;  %v11465_v41 = vpack.c.bf16 %v7673_v30, %v7673_v30  ;;  %v7675_v33 = vsel %vm16878_vm12, %v16884_v56, 0.0  ;;  %v8113_v26 = vcombine.low %v8104_v12, %v8111_v0 }
 0x3c2   : > { %v8120_v27 = vrot.slane %v8112_v21, %v18393_v14  ;;  %v6976_v49 = vadd.f32 %v12232_v32, %v16538_v17  ;;  %v7812_v2 = vcombine.high %v16656_v62, %v16656_v62  ;;  %v8129_v7 = vcombine.low %v7764_v13, %v16641_v3 }
 0x3c3   : > { %v7961_v29 = vrot.slane %v7686_v5, %v18393_v14  ;;  %v7968_v40 = vrot.slane %v11465_v41, %v18393_v14  ;;  %v8127_v43 = vrot.slane %v8113_v26, %v18393_v14  ;;  %v8130_v47 = vcombine.low %v16656_v62, %v7810_v11 }
 0x3c4   : > { %vm6990_vm13 = vcmp.ge.f32.partialorder %v6976_v49, 0.0  ;;  %v7004_v17 = vmul.f32 0.2, %v6976_v49  ;;  %v8131_v63 = vcombine.low %v7812_v2, %v16644_v42  ;;  %v8132_v8 = vcombine.low %v16659_v37, %v7811_v10 }
 0x3c5   : > { %v7969_v13 = vcombine.high %v7961_v29, %v7961_v29  ;;  %v7970_v6 = vcombine.high %v7968_v40, %v7968_v40  ;;  %v16920_v16 = vrot.slane %v7961_v29, %v18393_v14  ;;  %v7984_v4 = vrot.slane %v7968_v40, %v18393_v14 }
 0x3c6   : > { %v8128_v50 = vcombine.low %v8120_v27, %v8127_v43  ;;  %v7018_v3 = vsel %vm6990_vm13, %v6976_v49, %v7004_v17  ;;  %v8139_v62 = vrot.slane %v8129_v7, %v18393_v14  ;;  %v8146_v11 = vrot.slane %v8130_v47, %v18393_v14 }
 0x3c7   : > { %v16926_v15 = vrot.slane %v7969_v13, %v18393_v14  ;;  %v7998_v42 = vrot.slane %v7970_v6, %v18393_v14  ;;  %v7260_v37 = vrot.slane %v7018_v3, %v18388_v23  ;;  %v8153_v10 = vrot.slane %v8131_v63, %v18393_v14 }
 0x3c8   : > { %v8415_v36 = vshrl.u32 %v8128_v50, 16  ;;  %v8418_v1 = vshll.u32 %v8128_v50, 16  ;;  %v8160_v53 = vrot.slane %v8132_v8, %v18393_v14  ;;  %v8161_v61 = vcombine.low %v8139_v62, %v8146_v11  ;;  %v12953_v62 = vld [vmem:[%s17900_s10 + $0x70] sm:$0xff]  }
 0x3c9   : > { %v8325_v12 = vcombine.low %v7984_v4, %v7998_v42  ;;  %v11472_v0 = vcombine.high %v7984_v4, %v7998_v42  ;;  %v7261_v30 = vcombine.high %v7260_v37, %v7260_v37  ;;  %v7619_v21 = vcombine.low %v7253_v45, %v7260_v37 }
 0x3ca   : > { %v16936_v32 = vrot.slane %v8415_v36, 7  ;;  %v8162_v35 = vcombine.low %v8153_v10, %v8160_v53  ;;  %v8169_v41 = vrot.slane %v8161_v61, %v18393_v14  ;;  %v8195_v26 = vrot.slane %v8179_v60, %v18393_v14  ;;  %v12951_v60 = vld [vmem:[%s17900_s10 + $0x78] sm:$0xff]  }
 0x3cb   : > { %v16950_v27 = vrot.slane %v8325_v12, %v18393_v14  ;;  %v16953_v45 = vrot.slane %v11472_v0, %v18393_v14  ;;  %v7633_v49 = vrot.slane %v7619_v21, %v18388_v23  ;;  %v7641_v2 = vrot.slane %v7261_v30, %v18388_v23 }
 0x3cc   : > { %v8420_v7 = vor.u32 %v8418_v1, %v16936_v32  ;;  %v8176_v40 = vrot.slane %v8162_v35, %v18393_v14  ;;  %v8202_v43 = vrot.slane %v11469_v46, %v18393_v14  ;;  %v8209_v9 = vrot.slane %v8181_v55, %v18393_v14 }
 0x3cd   : > { %v8357_v47 = vcombine.low %v16950_v27, %v16953_v45  ;;  %v7634_v17 = vcombine.low %v7626_v57, %v7633_v49  ;;  %v7677_v63 = vsel %vm16940_vm9, %v7641_v2, 0.0  ;;  %v8210_v8 = vcombine.low %v8188_v58, %v8195_v26  ;;  %v12962_v27 = vld [vmem:[%s17900_s10 + $0x48] sm:$0xff]  }
 0x3ce   : > { %v16987_v22 = vsel %vm13337_vm8, 0, %v8420_v7  ;;  %v7689_v20 = vpack.c.bf16 %v7677_v63, %v7677_v63  ;;  %v8177_v46 = vcombine.low %v8169_v41, %v8176_v40  ;;  %v8211_v6 = vcombine.low %v8202_v43, %v8209_v9 }
 0x3cf   : > { %12413 = vmatmul.mubr.bf16.vlgmr.msra.gmra.mxu1 %v16987_v22  ;;  %v8649_v55 = vshrl.u32 %v16987_v22, 16  ;;  %v8651_v57 = vshll.u32 %v16987_v22, 16  ;;  %v8839_v4 = vrot.slane %v16987_v22, 1  ;;  %v7676_v50 = vsel %vm16962_vm6, %v7634_v17, 0.0 }
 0x3d0   : > { %v7688_v39 = vpack.c.bf16 %v7676_v50, %v7675_v33  ;;  %v11466_v58 = vpack.c.bf16 %v7676_v50, %v7676_v50  ;;  %v8072_v3 = vrot.slane %v7689_v20, %v18393_v14  ;;  %12433 = vmatpush3.bf16.msra.mxu1 %v12951_v60  ;;  %12416 = vmatprep.mubr.msk.bf16.mxu1 %vm13068_vm5, %v18359_v18  ;;  %v8422_v11 = vshrl.u32 %v8177_v46, 16 }
 0x3d1   : > { %v17005_v42 = vrot.slane %v8651_v57, 1  ;;  %12434 = vmatprep.subr.bf16.mxu1 %v18359_v18  ;;  %v8425_v44 = vshll.u32 %v8177_v46, 16  ;;  %v8218_v56 = vrot.slane %v8210_v8, %v18393_v14  ;;  %v8225_v33 = vrot.slane %v8211_v6, %v18393_v14  ;;  %v12958_v57 = vld [vmem:[%s17900_s10 + $0x138] sm:$0xff]  }
 0x3d2   : > { %v8024_v37 = vrot.slane %v7688_v39, %v18393_v14  ;;  %v8031_v10 = vrot.slane %v11466_v58, %v18393_v14  ;;  %v8079_v36 = vrot.slane %v8072_v3, %v18393_v14  ;;  %v8424_v1 = vrot.slane %v8422_v11, 7 }
 0x3d3   : > { %v8226_v53 = vcombine.low %v8218_v56, %v8225_v33  ;;  %v8229_v61 = vcombine.low %v16806_v31, %v7936_v52  ;;  %v18419_v12 = vcombine.high %v16743_v54, %v16758_v38  ;;  %v8244_v30 = vrot.slane %v16824_v24, %v18393_v14 }
 0x3d4   : > { %v8032_v21 = vcombine.high %v8024_v37, %v8024_v37  ;;  %v8033_v5 = vcombine.high %v8031_v10, %v8031_v10  ;;  %v8040_v35 = vrot.slane %v8024_v37, %v18393_v14  ;;  %v8047_v41 = vrot.slane %v8031_v10, %v18393_v14  ;;  %12435 = vmatpush3.bf16.msra.mxu1 %v12953_v62 }
 0x3d5   : > { %v8237_v0 = vrot.slane %v18419_v12, %v18393_v14  ;;  %v8427_v26 = vor.u32 %v8425_v44, %v8424_v1  ;;  %12436 = vmatprep.subr.bf16.mxu1 %v18359_v18  ;;  %v8430_v31 = vshrl.u32 %v8226_v53, 16  ;;  %v8433_v54 = vshll.u32 %v8226_v53, 16 }
 0x3d6   : > { %v8251_v38 = vrot.slane %v8229_v61, %v18393_v14  ;;  %v8054_v52 = vrot.slane %v8032_v21, %v18393_v14  ;;  %v8061_v24 = vrot.slane %v8033_v5, %v18393_v14  ;;  %v8062_v49 = vcombine.high %v8040_v35, %v8040_v35 }
 0x3d7   : > { %v8063_v2 = vcombine.high %v8047_v41, %v8047_v41  ;;  %v8327_v7 = vcombine.low %v8016_v28, %v8040_v35  ;;  %v17037_v29 = vsel %vm1633_vm7, %v16936_v32, %v8427_v26  ;;  %v17039_v60 = vrot.slane %v8430_v31, 7 }
 0x3d8   : > { %v8258_v40 = vrot.slane %v16837_v19, %v18393_v14  ;;  %v8064_v43 = vcombine.high %v8054_v52, %v8054_v52  ;;  %v8065_v9 = vcombine.high %v8061_v24, %v8061_v24  ;;  %v8328_v17 = vcombine.low %v8054_v52, %v8062_v49  ;;  %12417 = vmatmul.mubr.bf16.gmra.mxu1 %v17037_v29  ;;  %v12956_v19 = vld [vmem:[%s17900_s10 + $0x60] sm:$0xff]  }
 0x3d9   : > { %v17043_v63 = vcombine.low %v8061_v24, %v8063_v2  ;;  %v8349_v8 = vrot.slane %v8327_v7, %v18393_v14  ;;  %v8656_v25 = vshll.u32 %v17037_v29, 16  ;;  %v8840_v28 = vrot.slane %v17037_v29, 1  ;;  %12437 = vmatpush3.bf16.msra.mxu1 %v12955_v48  ;;  %12420 = vmatprep.mubr.msk.bf16.mxu1 %vm13068_vm5, %v18359_v18 }
 0x3da   : > { %v9324_v32 = vrot.slane %v17037_v29, 2  ;;  %v8356_v13 = vrot.slane %v8328_v17, %v18393_v14  ;;  %v17056_v20 = vcombine.low %v8064_v43, %v8047_v41  ;;  %v17058_v46 = vcombine.low %v8065_v9, %v8079_v36  ;;  %12438 = vmatprep.subr.bf16.mxu1 %v18359_v18 }
 0x3db   : > { %v8390_v6 = vrot.slane %v17043_v63, %v18393_v14  ;;  %v17066_v50 = vrot.slane %v8656_v25, 2  ;;  %v8841_v39 = vsel %vm5073_vm15, %v8839_v4, %v8840_v28  ;;  %v8435_v58 = vor.u32 %v8433_v54, %v17039_v60  ;;  %v12957_v4 = vld [vmem:[%s17900_s10 + $0x58] sm:$0xff]   ;;  %v12961_v54 = vld [vmem:[%s17900_s10 + $0x128] sm:$0xff]  }
 0x3dc   : > { %v8259_v3 = vcombine.low %v8237_v0, %v8244_v30  ;;  %v17070_v62 = vcombine.low %v8349_v8, %v8356_v13  ;;  %v8383_v11 = vrot.slane %v17056_v20, %v18393_v14  ;;  %v8397_v44 = vrot.slane %v17058_v46, %v18393_v14  ;;  %12485 = vmatmul.mubr.bf16.vlgmr.msra.gmra.mxu0 %v8841_v39  ;;  %v12959_v0 = vld [vmem:[%s17900_s10 + $0x130] sm:$0xff]  }
 0x3dd   : > { %v8260_v56 = vcombine.low %v8251_v38, %v8258_v40  ;;  %v17077_v33 = vsel %vm1633_vm7, %v8424_v1, %v8435_v58  ;;  %12439 = vmatpush3.bf16.msra.mxu1 %v12956_v19  ;;  %12488 = vmatprep.mubr.msk.bf16.mxu0 %vm13068_vm5, %v18359_v18  ;;  %v18420_v10 = vcombine.high %v16799_v59, %v16799_v59  ;;  %v8658_v53 = vrot.slane %v8656_v25, 1 }
 0x3de   : > { %v8267_v37 = vrot.slane %v8259_v3, %v18393_v14  ;;  %v17090_v61 = vshrl.u32 %v17077_v33, 16  ;;  %v8842_v1 = vrot.slane %v17077_v33, 1  ;;  %12440 = vmatprep.subr.bf16.mxu1 %v18359_v18  ;;  %12541 = vmatpush3.bf16.msra.mxu0 %v12958_v57  ;;  %v8278_v59 = vcombine.low %v16920_v16, %v16926_v15 }
 0x3df   : > { %v8276_v36 = vcombine.low %v16809_v51, %v18420_v10  ;;  %v8274_v12 = vrot.slane %v8260_v56, %v18393_v14  ;;  %12542 = vmatprep.subr.bf16.mxu0 %v18359_v18  ;;  %v11471_v51 = vcombine.high %v16920_v16, %v16926_v15  ;;  %v8293_v21 = vrot.slane %v16839_v34, %v18393_v14  ;;  %v12960_v34 = vld [vmem:[%s17900_s10 + $0x50] sm:$0xff]  }
 0x3e0   : > { %v8654_v5 = vor.u32 %v17005_v42, %v8649_v55  ;;  %12421 = vmatmul.mubr.bf16.gmra.mxu1 %v17077_v33  ;;  %v17113_v35 = vsel %vm5073_vm15, %v8840_v28, %v8842_v1  ;;  %v8300_v26 = vrot.slane %v8278_v59, %v18393_v14  ;;  %v8660_v16 = vshrl.u32 %v17037_v29, 16 }
 0x3e1   : > { %v8286_v30 = vrot.slane %v8276_v36, %v18393_v14  ;;  %v8275_v41 = vcombine.low %v8267_v37, %v8274_v12  ;;  %12441 = vmatpush3.bf16.msra.mxu1 %v12957_v4  ;;  %12424 = vmatprep.mubr.msk.bf16.mxu1 %vm13068_vm5, %v18359_v18  ;;  %v8307_v15 = vrot.slane %v11471_v51, %v18393_v14  ;;  %v17127_v42 = vshll.u32 %v17077_v33, 16 }
 0x3e2   : > { %v17124_v55 = vsel %vm4714_vm14, %v8654_v5, %v8658_v53  ;;  %12442 = vmatprep.subr.bf16.mxu1 %v18359_v18  ;;  %12543 = vmatpush3.bf16.msra.mxu0 %v12959_v0  ;;  %v8662_v38 = vor.u32 %v8660_v16, %v8658_v53  ;;  %v9149_v52 = vrot.slane %v8660_v16, 1  ;;  %v9152_v7 = vrot.slane %v17090_v61, 1  ;;  %v12965_v53 = vld [vmem:[%s17900_s10 + $0x118] sm:$0xff]  }
 0x3e3   : > { %v8308_v22 = vcombine.low %v8286_v30, %v8293_v21  ;;  %v8438_v48 = vshrl.u32 %v8275_v41, 16  ;;  %v8441_v31 = vshll.u32 %v8275_v41, 16  ;;  %12544 = vmatprep.subr.bf16.mxu0 %v18359_v18  ;;  %v8309_v24 = vcombine.low %v8300_v26, %v8307_v15 }
 0x3e4   : > { %v8666_v2 = vrot.slane %v17127_v42, 1  ;;  %12489 = vmatmul.mubr.bf16.gmra.mxu0 %v17113_v35  ;;  %v9151_v43 = vor.u32 %v17066_v50, %v9149_v52  ;;  %v9153_v9 = vrot.slane %v17127_v42, 2  ;;  %v8365_v17 = vrot.slane %v8357_v47, %v18393_v14  ;;  %v12963_v50 = vld [vmem:[%s17900_s10 + $0x120] sm:$0xff]  }
 0x3e5   : > { %v8316_v49 = vrot.slane %v8308_v22, %v18393_v14  ;;  %v8440_v40 = vrot.slane %v8438_v48, 7  ;;  %12443 = vmatpush3.bf16.msra.mxu1 %v12960_v34  ;;  %12492 = vmatprep.mubr.msk.bf16.mxu0 %vm13068_vm5, %v18359_v18  ;;  %v8323_v8 = vrot.slane %v8309_v24, %v18393_v14  ;;  %v9325_v19 = vrot.slane %v17077_v33, 2  ;;  %v12967_v48 = vld [vmem:[%s17900_s10 + $0x110] sm:$0xff]  }
 0x3e6   : > { %v17148_v25 = vsel %vm4714_vm14, %v8662_v38, %v8666_v2  ;;  %v8670_v28 = vor.u32 %v17090_v61, %v8666_v2  ;;  %12545 = vmatpush3.bf16.msra.mxu0 %v12961_v54  ;;  %12444 = vmatprep.subr.bf16.mxu1 %v18359_v18  ;;  %v9154_v45 = vor.u32 %v9153_v9, %v9152_v7  ;;  %vm18421_vm8 = vcmask 1045504  }
 0x3e7   : > { %v8443_v13 = vor.u32 %v8441_v31, %v8440_v40  ;;  %v8372_v47 = vrot.slane %v17070_v62, %v18393_v14  ;;  %12546 = vmatprep.subr.bf16.mxu0 %v18359_v18  ;;  %v8324_v57 = vcombine.low %v8316_v49, %v8323_v8  ;;  %v8398_v39 = vcombine.low %v8383_v11, %v8390_v6  ;;  %vm18423_vm2 = vmmov %vm18421_vm8 }
 0x3e8   : > { %v17171_v58 = vsel %vm18421_vm8, %v9324_v32, %v9325_v19  ;;  %v9810_v3 = vrot.slane %v17077_v33, 3  ;;  %vm18422_vm1 = vsmask.f32 6400  ;;  %v8412_v63 = vrot.slane %v8397_v44, %v18393_v14  ;;  %vm18426_vm10 = vmmov %vm18423_vm2 }
 0x3e9   : > { %v17176_v62 = vsel %vm1633_vm7, %v17039_v60, %v8443_v13  ;;  %v17179_v56 = vsel %vm18422_vm1, %v9151_v43, %v9154_v45  ;;  %v8373_v4 = vcombine.low %v8365_v17, %v8372_v47  ;;  %v8446_v32 = vshrl.u32 %v8324_v57, 16  ;;  %12445 = vmatpush3.bf16.msra.mxu1 %v12962_v27  ;;  %v12964_v60 = vld [vmem:[%s17900_s10 + $0x40] sm:$0xff]   ;;  %vm18425_vm0 = vmmov %vm18422_vm1 }
 0x3ea   : > { %12425 = vmatmul.mubr.bf16.gmra.mxu1 %v17176_v62  ;;  %v8844_v29 = vrot.slane %v17176_v62, 1  ;;  %v8449_v20 = vshll.u32 %v8324_v57, 16  ;;  %v17188_v6 = vshll.u32 %v17176_v62, 16  ;;  %v17196_v46 = vshrl.u32 %v17176_v62, 16  ;;  %12547 = vmatpush3.bf16.msra.mxu0 %v12963_v50  ;;  %vm18428_vm11 = vmmov %vm18423_vm2 }
 0x3eb   : > { %12428 = vmatprep.mubr.msk.bf16.mxu1 %vm13068_vm5, %v18359_v18  ;;  %v8454_v11 = vshrl.u32 %v8373_v4, 16  ;;  %v8457_v44 = vshll.u32 %v8373_v4, 16  ;;  %v9327_v37 = vrot.slane %v17176_v62, 2  ;;  %v8448_v36 = vrot.slane %v8446_v32, 7  ;;  %12446 = vmatprep.subr.bf16.mxu1 %v18359_v18  ;;  %vm18429_vm12 = vmmov %vm18425_vm0 }
 0x3ec   : > { %v17202_v10 = vsel %vm5073_vm15, %v8842_v1, %v8844_v29  ;;  %v8674_v12 = vrot.slane %v17188_v6, 1  ;;  %v9157_v0 = vrot.slane %v17188_v6, 2  ;;  %12548 = vmatprep.subr.bf16.mxu0 %v18359_v18  ;;  %v9156_v33 = vrot.slane %v17196_v46, 1  ;;  %vm17306_vm13 = vmand %vm5073_vm15, %vm18429_vm12 }
 0x3ed   : > { %12493 = vmatmul.mubr.bf16.gmra.mxu0 %v17202_v10  ;;  %v17213_v1 = vrot.slane %v8454_v11, 7  ;;  %v17216_v59 = vsel %vm18423_vm2, %v9325_v19, %v9327_v37  ;;  %v8405_v51 = vrot.slane %v8398_v39, %v18393_v14  ;;  %v8451_v30 = vor.u32 %v8449_v20, %v8448_v36  ;;  %12447 = vmatpush3.bf16.msra.mxu1 %v12964_v60  ;;  %vm18437_vm8 = vmmov %vm18423_vm2 }
 0x3ee   : > { %12496 = vmatprep.mubr.msk.bf16.mxu0 %vm13068_vm5, %v18359_v18  ;;  %v17222_v21 = vsel %vm4714_vm14, %v8670_v28, %v8674_v12  ;;  %v9811_v5 = vrot.slane %v17176_v62, 3  ;;  %v9635_v41 = vrot.slane %v17090_v61, 2  ;;  %v9158_v26 = vor.u32 %v9157_v0, %v9156_v33  ;;  %12549 = vmatpush3.bf16.msra.mxu0 %v12965_v53  ;;  %v12968_v28 = vld [vmem:[%s17900_s10 + $0x108] sm:$0xff]  }
 0x3ef   : > { %v8678_v16 = vor.u32 %v17196_v46, %v8674_v12  ;;  %v8459_v34 = vor.u32 %v8457_v44, %v17213_v1  ;;  %v8413_v15 = vcombine.low %v8405_v51, %v8412_v63  ;;  %v8452_v22 = vsel %vm1633_vm7, %v8440_v40, %v8451_v30  ;;  %12504 = vmatprep.subr.bf16.mxu1 %v18359_v18 }
 0x3f0   : > { %vm18424_vm4 = vcmask 1044480   ;;  %v9636_v61 = vrot.slane %v17127_v42, 3  ;;  %v9638_v54 = vrot.slane %v17196_v46, 2  ;;  %v17238_v38 = vrot.slane %v8452_v22, 1  ;;  %12550 = vmatprep.subr.bf16.mxu0 %v18359_v18  ;;  %v12970_v46 = vld [vmem:[%s17900_s10 + $0x100] sm:$0xff]  }
 0x3f1   : > { %v17234_v31 = vsel %vm18424_vm4, %v9810_v3, %v9811_v5  ;;  %v17242_v52 = vsel %vm18425_vm0, %v9154_v45, %v9158_v26  ;;  %v17244_v24 = vshll.u32 %v8452_v22, 16  ;;  %v17246_v49 = vshrl.u32 %v8452_v22, 16  ;;  %vm18432_vm3 = vmmov %vm18424_vm4 }
 0x3f2   : > { %12429 = vmatmul.mubr.bf16.gmra.mxu1 %v8452_v22  ;;  %v17249_v2 = vsel %vm1633_vm7, %v8448_v36, %v8459_v34  ;;  %v9329_v7 = vrot.slane %v8452_v22, 2  ;;  %v8462_v40 = vshrl.u32 %v8413_v15, 16  ;;  %v9639_v42 = vrot.slane %v17188_v6, 3  ;;  %12551 = vmatpush3.bf16.msra.mxu0 %v12967_v48  ;;  %vm18433_vm9 = vmmov %vm18432_vm3 }
 0x3f3   : > { %v17254_v43 = vsel %vm5073_vm15, %v8844_v29, %v17238_v38  ;;  %12448 = vmatprep.mubr.msk.bf16.mxu1 %vm13068_vm5, %v18359_v18  ;;  %v8682_v9 = vrot.slane %v17244_v24, 1  ;;  %v9160_v17 = vrot.slane %v17246_v49, 1  ;;  %v9161_v8 = vrot.slane %v17244_v24, 2  ;;  %12552 = vmatprep.subr.bf16.mxu0 %v18359_v18  ;;  %v12966_v29 = vld [vmem:[%s17900_s10 + $0xf8] sm:$0xff]   ;;  %vm18438_vm1 = vmmov %vm18432_vm3 }
 0x3f4   : > { %v9165_v19 = vshrl.u32 %v17249_v2, 16  ;;  %v9168_v13 = vshll.u32 %v17249_v2, 16  ;;  %v17267_v27 = vsel %vm18426_vm10, %v9327_v37, %v9329_v7  ;;  %v8999_v45 = vrot.slane %v17249_v2, 1  ;;  %v12992_v37 = vld [vmem:[%s17900_s10 + $0x150] sm:$0xff]  }
 0x3f5   : > { %12497 = vmatmul.mubr.bf16.gmra.mxu0 %v17254_v43  ;;  %v17275_v47 = vsel %vm4714_vm14, %v8678_v16, %v8682_v9  ;;  %v9162_v57 = vor.u32 %v9161_v8, %v9160_v17  ;;  %v17278_v50 = vrot.slane %v17249_v2, 2  ;;  %v8465_v39 = vshll.u32 %v8413_v15, 16  ;;  %vm18427_vm14 = vmmov %vm18425_vm0  ;;  %v12969_v16 = vld [vmem:[%s17900_s10 + $0xf0] sm:$0xff]   ;;  %v12971_v8 = vld [vmem:[%s17900_s10 + $0xe8] sm:$0xff]  }
 0x3f6   : > { %12500 = vmatprep.mubr.msk.bf16.mxu0 %vm13068_vm5, %v18359_v18  ;;  %v9167_v3 = vrot.slane %v9165_v19, 1  ;;  %v9170_v62 = vrot.slane %v9168_v13, 2  ;;  %v17286_v4 = vsel %vm5073_vm15, %v17238_v38, %v8999_v45  ;;  %v8464_v63 = vrot.slane %v8462_v40, 7  ;;  %12553 = vmatpush3.bf16.msra.mxu0 %v12968_v28  ;;  %vm18434_vm15 = vmmov %vm18425_vm0 }
 0x3f7   : > { %v17292_v32 = vsel %vm18427_vm14, %v9158_v26, %v9162_v57  ;;  %v17296_v20 = vsel %vm18428_vm11, %v9329_v7, %v17278_v50  ;;  %v9813_v6 = vrot.slane %v8452_v22, 3  ;;  %v9815_v60 = vrot.slane %v17249_v2, 3  ;;  %12554 = vmatprep.subr.bf16.mxu0 %v18359_v18  ;;  %v13002_v2 = vld [vmem:[%s17900_s10 + $0x200] sm:$0xff]  }
 0x3f8   : > { %v17302_v11 = vor.u32 %v9170_v62, %v9167_v3  ;;  %v8467_v44 = vor.u32 %v8465_v39, %v8464_v63  ;;  %v9637_v36 = vor.u32 %v9636_v61, %v9635_v41  ;;  %v9640_v53 = vor.u32 %v9639_v42, %v9638_v54  ;;  %v12972_v39 = vld [vmem:[%s17900_s10 + $0xe0] sm:$0xff]   ;;  %v12973_v3 = vld [vmem:[%s17900_s10 + $0xd8] sm:$0xff]   ;;  %v12976_v62 = vld [vmem:[%s17900_s10 + $0xd0] sm:$0xff]  }
 0x3f9   : > { %v17312_v12 = vsel %vm18432_vm3, %v9811_v5, %v9813_v6  ;;  %v17315_v0 = vsel %vm18433_vm9, %v9813_v6, %v9815_v60  ;;  %v9642_v33 = vrot.slane %v17246_v49, 2  ;;  %v9643_v51 = vrot.slane %v17244_v24, 3  ;;  %v12978_v63 = vld [vmem:[%s17900_s10 + $0xc8] sm:$0xff]   ;;  %v12986_v24 = vld [vmem:[%s17900_s10 + $0x180] sm:$0xff]  }
 0x3fa   : > { %12449 = vmatmul.mubr.bf16.vlgmr.msra.gmra.mxu1 %v17124_v55  ;;  %v17322_v30 = vsel %vm18434_vm15, %v9162_v57, %v17302_v11  ;;  %v8468_v41 = vsel %vm1633_vm7, %v17213_v1, %v8467_v44  ;;  %vm18435_vm6 = vsmask.f32 5376  ;;  %v9646_v5 = vrot.slane %v9165_v19, 2  ;;  %12555 = vmatpush3.bf16.msra.mxu0 %v12970_v46  ;;  %v12988_v46 = vld [vmem:[%s17900_s10 + $0x160] sm:$0xff]   ;;  %v12993_v44 = vld [vmem:[%s17900_s10 + $0x228] sm:$0xff]  }
 0x3fb   : > { %v17327_v26 = vsel %vm18435_vm6, %v9637_v36, %v9640_v53  ;;  %12505 = vmatpush3.bf16.msra.mxu1 %v12966_v29  ;;  %12452 = vmatprep.mubr.msk.bf16.mxu1 %vm13068_vm5, %v18359_v18  ;;  %v17336_v55 = vsel %vm17306_vm13, %v8468_v41, 0  ;;  %v9644_v34 = vor.u32 %v9643_v51, %v9642_v33  ;;  %v9647_v15 = vrot.slane %v9168_v13, 3  ;;  %vm18436_vm7 = vmmov %vm18435_vm6  ;;  %v12974_v13 = vld [vmem:[%s17900_s10 + $0x1b8] sm:$0xff]   ;;  %v12980_v29 = vld [vmem:[%s17900_s10 + $0xc0] sm:$0xff]  }
 0x3fc   : > { %12506 = vmatprep.subr.bf16.mxu1 %v18359_v18  ;;  %v9485_v1 = vrot.slane %v17336_v55, 2  ;;  %v9817_v22 = vrot.slane %v17336_v55, 3  ;;  %v9651_v48 = vshrl.u32 %v17336_v55, 16  ;;  %v9654_v61 = vshll.u32 %v17336_v55, 16  ;;  %12612 = vmatprep.subr.bf16.mxu0 %v18359_v18  ;;  %vm18439_vm2 = vmmov %vm18435_vm6  ;;  %v12994_v36 = vld [vmem:[%s17900_s10 + $0x148] sm:$0xff]   ;;  %v12996_v33 = vld [vmem:[%s17900_s10 + $0x140] sm:$0xff]  }
 0x3fd   : > { %12501 = vmatmul.mubr.bf16.gmra.mxu0 %v17238_v38  ;;  %v17346_v54 = vsel %vm18436_vm7, %v9640_v53, %v9644_v34  ;;  %v9648_v7 = vor.u32 %v9647_v15, %v9646_v5  ;;  %vm18440_vm4 = vmmov %vm18439_vm2  ;;  %v8686_v6 = vor.u32 %v17246_v49, %v8682_v9  ;;  %v12982_v49 = vld [vmem:[%s17900_s10 + $0x178] sm:$0xff]   ;;  %v12985_v9 = vld [vmem:[%s17900_s10 + $0x170] sm:$0xff]  }
 0x3fe   : > { %12556 = vmatprep.mubr.msk.bf16.mxu0 %vm13068_vm5, %v18359_v18  ;;  %v17354_v40 = vsel %vm18437_vm8, %v17278_v50, %v9485_v1  ;;  %v17359_v42 = vsel %vm18438_vm1, %v9815_v60, %v9817_v22  ;;  %v9653_v38 = vrot.slane %v9651_v48, 2  ;;  %v9656_v17 = vrot.slane %v9654_v61, 3  ;;  %v12990_v60 = vld [vmem:[%s17900_s10 + $0x238] sm:$0xff]   ;;  %v13000_v51 = vld [vmem:[%s17900_s10 + $0x208] sm:$0xff]   ;;  %v13001_v41 = vld [vmem:[%s17900_s10 + $0x1f0] sm:$0xff]  }
 0x3ff   : > { %12507 = vmatpush3.bf16.msra.mxu1 %v12969_v16  ;;  %v17365_v28 = vsel %vm18439_vm2, %v9644_v34, %v9648_v7  ;;  %v12997_v53 = vld [vmem:[%s17900_s10 + $0x218] sm:$0xff]   ;;  %v13004_v16 = vld [vmem:[%s17900_s10 + $0x1e0] sm:$0xff]   ;;  %v17582_v34 = vld [vmem:[%s17902_s12 + $0x70] sm:$0xff]  }
 0x400   : > { %12508 = vmatprep.subr.bf16.mxu1 %v18359_v18  ;;  %v17368_v19 = vor.u32 %v9656_v17, %v9653_v38  ;;  %v17572_v5 = vld [vmem:[%s17902_s12 + $0x38] sm:$0xff]   ;;  %v13010_v48 = vld [vmem:[%s17900_s10 + $0x1d0] sm:$0xff]   ;;  %v13014_v61 = vld [vmem:[%s17902_s12 + $0x60] sm:$0xff]  }
 0x401   : > { %v13006_v15 = vld [vmem:[%s17900_s10 + $0x1d8] sm:$0xff]   ;;  %v13016_v38 = vld [vmem:[%s17900_s10 + $0x1c0] sm:$0xff]   ;;  %v13019_v17 = vld [vmem:[%s17902_s12 + $0x50] sm:$0xff]  }
 0x402   : > { %12453 = vmatmul.mubr.bf16.gmra.mxu1 %v17148_v25  ;;  %v17376_v57 = vsel %vm18440_vm4, %v9648_v7, %v17368_v19  ;;  %v12975_v25 = vld [vmem:[%s17900_s10 + $0x1b0] sm:$0xff]   ;;  %v13013_v7 = vld [vmem:[%s17900_s10 + $0x1c8] sm:$0xff]   ;;  %v18445_v55 = vld [vmem:[#allocation11_spill] sm:$0xff] }
 0x403   : > { %12509 = vmatpush3.bf16.msra.mxu1 %v12971_v8  ;;  %12456 = vmatprep.mubr.msk.bf16.mxu1 %vm13068_vm5, %v18359_v18  ;;  %v13021_v8 = vld [vmem:[%s17902_s12 + $0x48] sm:$0xff]  }
 0x404   : > { %12510 = vmatprep.subr.bf16.mxu1 %v18359_v18 }
 0x405   : > { %12557 = vmatmul.mubr.bf16.vlgmr.msra.gmra.mxu0 %v17179_v56  ;;  %v12977_v56 = vld [vmem:[%s17900_s10 + $0x1a8] sm:$0xff]  }
 0x406   : > { %12560 = vmatprep.mubr.msk.bf16.mxu0 %vm13068_vm5, %v18359_v18  ;;  %12613 = vmatpush3.bf16.msra.mxu0 %v12974_v13  ;;  %v13023_v13 = vld [vmem:[%s17902_s12 + $0x40] sm:$0xff]  }
 0x407   : > { %12511 = vmatpush3.bf16.msra.mxu1 %v12972_v39  ;;  %12614 = vmatprep.subr.bf16.mxu0 %v18359_v18  ;;  %v18441_v39 = vld [vmem:[#allocation29_spill] sm:$0xff] }
 0x408   : > { %12512 = vmatprep.subr.bf16.mxu1 %v18359_v18 }
 0x40a   : > { %12457 = vmatmul.mubr.bf16.gmra.mxu1 %v17222_v21  ;;  %12615 = vmatpush3.bf16.msra.mxu0 %v12975_v25  ;;  %v12979_v21 = vld [vmem:[%s17900_s10 + $0x1a0] sm:$0xff]   ;;  %v18442_v25 = vld [vmem:[#allocation9_spill] sm:$0xff] }
 0x40b   : > { %12513 = vmatpush3.bf16.msra.mxu1 %v12973_v3  ;;  %12460 = vmatprep.mubr.msk.bf16.mxu1 %vm13068_vm5, %v18359_v18  ;;  %v10020_v3 = vcombine.high %v18442_v25, %v18441_v39 }
 0x40c   : > { %12514 = vmatprep.subr.bf16.mxu1 %v18359_v18  ;;  %12616 = vmatprep.subr.bf16.mxu0 %v18359_v18 }
 0x40d   : > { %12561 = vmatmul.mubr.bf16.gmra.mxu0 %v17242_v52  ;;  %v12981_v52 = vld [vmem:[%s17900_s10 + $0x198] sm:$0xff]  }
 0x40e   : > { %12564 = vmatprep.mubr.msk.bf16.mxu0 %vm13068_vm5, %v18359_v18  ;;  %12617 = vmatpush3.bf16.msra.mxu0 %v12977_v56  ;;  %v18443_v56 = vld [vmem:[#allocation27_spill] sm:$0xff] }
 0x40f   : > { %12515 = vmatpush3.bf16.msra.mxu1 %v12976_v62  ;;  %12618 = vmatprep.subr.bf16.mxu0 %v18359_v18  ;;  %v18444_v62 = vld [vmem:[#allocation13_spill] sm:$0xff] }
 0x410   : > { %12516 = vmatprep.subr.bf16.mxu1 %v18359_v18 }
 0x412   : > { %12461 = vmatmul.mubr.bf16.gmra.mxu1 %v17275_v47  ;;  %12619 = vmatpush3.bf16.msra.mxu0 %v12979_v21  ;;  %v12983_v47 = vld [vmem:[%s17900_s10 + $0x190] sm:$0xff]   ;;  %v10022_v21 = vcombine.high %v18444_v62, %v18443_v56 }
 0x413   : > { %12517 = vmatpush3.bf16.msra.mxu1 %v12978_v63  ;;  %12464 = vmatprep.mubr.msk.bf16.mxu1 %vm13068_vm5, %v18359_v18  ;;  %v10036_v63 = vrot.slane %v10020_v3, %v18393_v14 }
 0x414   : > { %12518 = vmatprep.subr.bf16.mxu1 %v18359_v18  ;;  %12620 = vmatprep.subr.bf16.mxu0 %v18359_v18 }
 0x415   : > { %12565 = vmatmul.mubr.bf16.gmra.mxu0 %v17292_v32  ;;  %v12984_v32 = vld [vmem:[%s17900_s10 + $0x188] sm:$0xff]  }
 0x416   : > { %12568 = vmatprep.mubr.msk.bf16.mxu0 %vm13068_vm5, %v18359_v18  ;;  %12621 = vmatpush3.bf16.msra.mxu0 %v12981_v52  ;;  %v10050_v52 = vrot.slane %v10022_v21, %v18393_v14 }
 0x417   : > { %12519 = vmatpush3.bf16.msra.mxu1 %v12980_v29  ;;  %12622 = vmatprep.subr.bf16.mxu0 %v18359_v18  ;;  %v10021_v29 = vcombine.low %v18444_v62, %v18443_v56 }
 0x418   : > { %12576 = vmatprep.subr.bf16.mxu1 %v18359_v18 }
 0x41a   : > { %12465 = vmatmul.mubr.bf16.gmra.mxu1 %v8686_v6  ;;  %12623 = vmatpush3.bf16.msra.mxu0 %v12983_v47  ;;  %v10052_v47 = vcombine.low %v10036_v63, %v10050_v52  ;;  %v10043_v6 = vrot.slane %v10021_v29, %v18393_v14  ;;  %v18457_v29 = vld [vmem:[#allocation33_spill] sm:$0xff] }
 0x41b   : > { %12520 = vmatprep.mubr.msk.bf16.mxu1 %vm13068_vm5, %v18359_v18  ;;  %12624 = vmatprep.subr.bf16.mxu0 %v18359_v18 }
 0x41d   : > { %12569 = vmatmul.mubr.bf16.gmra.mxu0 %v17322_v30  ;;  %v13005_v30 = vld [vmem:[%s17902_s12 + $0x78] sm:$0xff]  }
 0x41e   : > { %12572 = vmatprep.mubr.msk.bf16.mxu0 %vm13068_vm5, %v18359_v18  ;;  %12625 = vmatpush3.bf16.msra.mxu0 %v12984_v32 }
 0x41f   : > { %12626 = vmatprep.subr.bf16.mxu0 %v18359_v18 }
 0x422   : > { %12521 = vmatmul.mubr.bf16.vlgmr.msra.gmra.mxu1 %v17113_v35  ;;  %12627 = vmatpush3.bf16.msra.mxu0 %v12986_v24  ;;  %v12987_v35 = vld [vmem:[%s17900_s10 + $0x168] sm:$0xff]   ;;  %v18447_v24 = vld [vmem:[#allocation41_spill] sm:$0xff] }
 0x423   : > { %12577 = vmatpush3.bf16.msra.mxu1 %v12982_v49  ;;  %12524 = vmatprep.mubr.msk.bf16.mxu1 %vm13068_vm5, %v18359_v18  ;;  %v18448_v49 = vld [vmem:[#allocation7_spill] sm:$0xff] }
 0x424   : > { %12578 = vmatprep.subr.bf16.mxu1 %v18359_v18  ;;  %12684 = vmatprep.subr.bf16.mxu0 %v18359_v18 }
 0x425   : > { %12573 = vmatmul.mubr.bf16.gmra.mxu0 %v17302_v11  ;;  %v12989_v11 = vld [vmem:[%s17900_s10 + $0x158] sm:$0xff]  }
 0x426   : > { %12628 = vmatprep.mubr.msk.bf16.mxu0 %vm13068_vm5, %v18359_v18 }
 0x427   : > { %12579 = vmatpush3.bf16.msra.mxu1 %v12985_v9  ;;  %v10054_v9 = vcombine.high %v18448_v49, %v18447_v24 }
 0x428   : > { %12580 = vmatprep.subr.bf16.mxu1 %v18359_v18 }
 0x42a   : > { %12525 = vmatmul.mubr.bf16.gmra.mxu1 %v17202_v10  ;;  %v12991_v10 = vld [vmem:[%s17900_s10 + $0x230] sm:$0xff]  }
 0x42b   : > { %12581 = vmatpush3.bf16.msra.mxu1 %v12987_v35  ;;  %12528 = vmatprep.mubr.msk.bf16.mxu1 %vm13068_vm5, %v18359_v18  ;;  %v10070_v35 = vrot.slane %v10054_v9, %v18393_v14 }
 0x42c   : > { %12582 = vmatprep.subr.bf16.mxu1 %v18359_v18 }
 0x42d   : > { %12629 = vmatmul.mubr.bf16.vlgmr.msra.gmra.mxu0 %v17216_v59 }
 0x42e   : > { %12632 = vmatprep.mubr.msk.bf16.mxu0 %vm13068_vm5, %v18359_v18  ;;  %12685 = vmatpush3.bf16.msra.mxu0 %v12990_v60 }
 0x42f   : > { %12583 = vmatpush3.bf16.msra.mxu1 %v12988_v46  ;;  %12686 = vmatprep.subr.bf16.mxu0 %v18359_v18 }
 0x430   : > { %12584 = vmatprep.subr.bf16.mxu1 %v18359_v18 }
 0x432   : > { %12529 = vmatmul.mubr.bf16.gmra.mxu1 %v17254_v43  ;;  %12687 = vmatpush3.bf16.msra.mxu0 %v12991_v10  ;;  %v12995_v43 = vld [vmem:[%s17900_s10 + $0x220] sm:$0xff]  }
 0x433   : > { %12585 = vmatpush3.bf16.msra.mxu1 %v12989_v11  ;;  %12532 = vmatprep.mubr.msk.bf16.mxu1 %vm13068_vm5, %v18359_v18  ;;  %v18450_v11 = vld [vmem:[#allocation38_spill] sm:$0xff] }
 0x434   : > { %12586 = vmatprep.subr.bf16.mxu1 %v18359_v18  ;;  %12688 = vmatprep.subr.bf16.mxu0 %v18359_v18 }
 0x435   : > { %12633 = vmatmul.mubr.bf16.gmra.mxu0 %v17267_v27 }
 0x436   : > { %12636 = vmatprep.mubr.msk.bf16.mxu0 %vm13068_vm5, %v18359_v18  ;;  %12689 = vmatpush3.bf16.msra.mxu0 %v12993_v44 }
 0x437   : > { %12587 = vmatpush3.bf16.msra.mxu1 %v12992_v37  ;;  %12690 = vmatprep.subr.bf16.mxu0 %v18359_v18  ;;  %v18451_v37 = vld [vmem:[#allocation36_spill] sm:$0xff] }
 0x438   : > { %12588 = vmatprep.subr.bf16.mxu1 %v18359_v18 }
 0x43a   : > { %12533 = vmatmul.mubr.bf16.gmra.mxu1 %v17286_v4  ;;  %12691 = vmatpush3.bf16.msra.mxu0 %v12995_v43  ;;  %v12999_v4 = vld [vmem:[%s17900_s10 + $0x210] sm:$0xff]  }
 0x43b   : > { %12589 = vmatpush3.bf16.msra.mxu1 %v12994_v36  ;;  %12536 = vmatprep.mubr.msk.bf16.mxu1 %vm13068_vm5, %v18359_v18 }
 0x43c   : > { %12590 = vmatprep.subr.bf16.mxu1 %v18359_v18  ;;  %12692 = vmatprep.subr.bf16.mxu0 %v18359_v18 }
 0x43d   : > { %12637 = vmatmul.mubr.bf16.gmra.mxu0 %v17296_v20 }
 0x43e   : > { %12640 = vmatprep.mubr.msk.bf16.mxu0 %vm13068_vm5, %v18359_v18  ;;  %12693 = vmatpush3.bf16.msra.mxu0 %v12997_v53  ;;  %v10053_v53 = vcombine.low %v18448_v49, %v18447_v24 }
 0x43f   : > { %12591 = vmatpush3.bf16.msra.mxu1 %v12996_v33  ;;  %12694 = vmatprep.subr.bf16.mxu0 %v18359_v18 }
 0x440   : > { %12648 = vmatprep.subr.bf16.mxu1 %v18359_v18 }
 0x442   : > { %12537 = vmatmul.mubr.bf16.gmra.mxu1 %v8999_v45  ;;  %12695 = vmatpush3.bf16.msra.mxu0 %v12999_v4  ;;  %v12998_v45 = vld [vmem:[%s17900_s10 + $0x1f8] sm:$0xff]  }
 0x443   : > { %12592 = vmatprep.mubr.msk.bf16.mxu1 %vm13068_vm5, %v18359_v18  ;;  %12696 = vmatprep.subr.bf16.mxu0 %v18359_v18 }
 0x445   : > { %12641 = vmatmul.mubr.bf16.gmra.mxu0 %v17354_v40  ;;  %v13018_v40 = vld [vmem:[%s17902_s12 + $0x18] sm:$0xff]  }
 0x446   : > { %12644 = vmatprep.mubr.msk.bf16.mxu0 %vm13068_vm5, %v18359_v18  ;;  %12697 = vmatpush3.bf16.msra.mxu0 %v13000_v51 }
 0x447   : > { %12698 = vmatprep.subr.bf16.mxu0 %v18359_v18 }
 0x44a   : > { %12593 = vmatmul.mubr.bf16.vlgmr.msra.gmra.mxu1 %v17171_v58  ;;  %12699 = vmatpush3.bf16.msra.mxu0 %v13002_v2  ;;  %v13003_v58 = vld [vmem:[%s17900_s10 + $0x1e8] sm:$0xff]  }
 0x44b   : > { %12649 = vmatpush3.bf16.msra.mxu1 %v12998_v45  ;;  %12596 = vmatprep.mubr.msk.bf16.mxu1 %vm13068_vm5, %v18359_v18 }
 0x44c   : > { %12650 = vmatprep.subr.bf16.mxu1 %v18359_v18  ;;  %12350 = vmatprep.subr.bf16.mxu0 %v13005_v30 }
 0x44d   : > { %12645 = vmatmul.mubr.bf16.gmra.mxu0 %v9485_v1  ;;  %v13012_v1 = vld [vmem:[%s17902_s12 + $0x28] sm:$0xff]  }
 0x44e   : > { %12700 = vmatprep.mubr.msk.bf16.mxu0 %vm13068_vm5, %v18359_v18 }
 0x44f   : > { %12651 = vmatpush3.bf16.msra.mxu1 %v13001_v41 }
 0x450   : > { %12652 = vmatprep.subr.bf16.mxu1 %v18359_v18 }
 0x452   : > { %12597 = vmatmul.mubr.bf16.gmra.mxu1 %v17216_v59  ;;  %v17592_v59 = vld [vmem:[%s17902_s12 + $0x30] sm:$0xff]  }
 0x453   : > { %12653 = vmatpush3.bf16.msra.mxu1 %v13003_v58  ;;  %12600 = vmatprep.mubr.msk.bf16.mxu1 %vm13068_vm5, %v18359_v18 }
 0x454   : > { %12654 = vmatprep.subr.bf16.mxu1 %v18359_v18 }
 0x455   : > { %12701 = vmatmul.mubr.bf16.vlgmr.msra.gmra.mxu0 %v17234_v31  ;;  %v17602_v31 = vld [vmem:[%s17902_s12 + $0x68] sm:$0xff]  }
 0x456   : > { %12704 = vmatprep.mubr.msk.bf16.mxu0 %vm13068_vm5, %v18359_v18  ;;  %12351 = vmatpush3.bf16.msra.mxu0 %v17572_v5 }
 0x457   : > { %12655 = vmatpush3.bf16.msra.mxu1 %v13004_v16  ;;  %12352 = vmatprep.subr.bf16.mxu0 %v17582_v34 }
 0x458   : > { %12656 = vmatprep.subr.bf16.mxu1 %v18359_v18 }
 0x45a   : > { %12601 = vmatmul.mubr.bf16.gmra.mxu1 %v17267_v27  ;;  %12353 = vmatpush3.bf16.msra.mxu0 %v17592_v59  ;;  %v13015_v27 = vld [vmem:[%s17902_s12 + $0x20] sm:$0xff]  }
 0x45b   : > { %12657 = vmatpush3.bf16.msra.mxu1 %v13006_v15  ;;  %12604 = vmatprep.mubr.msk.bf16.mxu1 %vm13068_vm5, %v18359_v18 }
 0x45c   : > { %12658 = vmatprep.subr.bf16.mxu1 %v18359_v18  ;;  %12354 = vmatprep.subr.bf16.mxu0 %v17602_v31 }
 0x45d   : > { %12705 = vmatmul.mubr.bf16.gmra.mxu0 %v17312_v12  ;;  %v13017_v12 = vld [vmem:[%s17902_s12 + $0x58] sm:$0xff]  }
 0x45e   : > { %12708 = vmatprep.mubr.msk.bf16.mxu0 %vm13068_vm5, %v18359_v18  ;;  %12355 = vmatpush3.bf16.msra.mxu0 %v13012_v1 }
 0x45f   : > { %12659 = vmatpush3.bf16.msra.mxu1 %v13010_v48  ;;  %12356 = vmatprep.subr.bf16.mxu0 %v13014_v61 }
 0x460   : > { %12660 = vmatprep.subr.bf16.mxu1 %v18359_v18 }
 0x462   : > { %12605 = vmatmul.mubr.bf16.gmra.mxu1 %v17296_v20  ;;  %12357 = vmatpush3.bf16.msra.mxu0 %v13015_v27  ;;  %v13020_v20 = vld [vmem:[%s17902_s12 + $0x10] sm:$0xff]  }
 0x463   : > { %12661 = vmatpush3.bf16.msra.mxu1 %v13013_v7  ;;  %12608 = vmatprep.mubr.msk.bf16.mxu1 %vm13068_vm5, %v18359_v18 }
 0x464   : > { %12662 = vmatprep.subr.bf16.mxu1 %v18359_v18  ;;  %12358 = vmatprep.subr.bf16.mxu0 %v13017_v12 }
 0x465   : > { %12709 = vmatmul.mubr.bf16.gmra.mxu0 %v17315_v0  ;;  %v13022_v0 = vld [vmem:[%s17902_s12 + $0x8] sm:$0xff]  }
 0x466   : > { %12712 = vmatprep.mubr.msk.bf16.mxu0 %vm13068_vm5, %v18359_v18  ;;  %12359 = vmatpush3.bf16.msra.mxu0 %v13018_v40 }
 0x467   : > { %12663 = vmatpush3.bf16.msra.mxu1 %v13016_v38  ;;  %12360 = vmatprep.subr.bf16.mxu0 %v13019_v17 }
 0x468   : > { %12720 = vmatprep.subr.bf16.mxu1 %v13005_v30  ;;  %v10063_v30 = vrot.slane %v10053_v53, %v18393_v14  ;;  %v11473_v53 = vld [vmem:[%s17901_s11] ss:$0 sm:$0xff] }
 0x46a   : > { %12609 = vmatmul.mubr.bf16.gmra.mxu1 %v17278_v50  ;;  %12361 = vmatpush3.bf16.msra.mxu0 %v13020_v20  ;;  %v13024_v50 = vld [vmem:[%s17902_s12] sm:$0xff]  }
 0x46b   : > { %12664 = vmatprep.mubr.msk.bf16.mxu1 %vm13068_vm5, %v18359_v18  ;;  %12362 = vmatprep.subr.bf16.mxu0 %v13021_v8 }
 0x46d   : > { %12713 = vmatmul.mubr.bf16.gmra.mxu0 %v17359_v42  ;;  %v10019_v42 = vcombine.low %v18442_v25, %v18441_v39 }
 0x46e   : > { %12716 = vmatprep.mubr.msk.bf16.mxu0 %vm13068_vm5, %v18359_v18  ;;  %12363 = vmatpush3.bf16.msra.mxu0 %v13022_v0 }
 0x46f   : > { %12364 = vmatprep.subr.bf16.mxu0 %v13023_v13 }
 0x472   : > { %12665 = vmatmul.mubr.bf16.vlgmr.msra.gmra.mxu1 %v17327_v26  ;;  %12365 = vmatpush3.bf16.msra.mxu0 %v13024_v50  ;;  %v10029_v26 = vrot.slane %v10019_v42, %v18393_v14 }
 0x473   : > { %12728 = vmatpush3.bf16.msra.mxu1 %v17572_v5  ;;  %12668 = vmatprep.mubr.msk.bf16.mxu1 %vm13068_vm5, %v18359_v18 }
 0x474   : > { %12721 = vmatprep.subr.bf16.mxu1 %v17582_v34  ;;  %v10051_v32 = vcombine.low %v10029_v26, %v10043_v6  ;;  %v18453_v34 = vld [vmem:[#allocation22_spill] sm:$0xff] }
 0x475   : > { %12717 = vmatmul.mubr.bf16.gmra.mxu0 %v9817_v22  ;;  %v18446_v22 = vld [vmem:[#allocation40_spill] sm:$0xff] }
 0x476   : > { %10309 = vmatprep.mubr.bf16.mxu0 %v10052_v47  ;;  %v10055_v46 = vcombine.low %v18446_v22, %v18445_v55  ;;  %v18458_v47 = vld [vmem:[#allocation32_spill] sm:$0xff] }
 0x477   : > { %12729 = vmatpush3.bf16.msra.mxu1 %v17592_v59  ;;  %v18454_v59 = vld [vmem:[#allocation12_spill] sm:$0xff]  ;;  %v10156_v26 = vcombine.high %v18458_v47, %v18457_v29 }
 0x478   : > { %12722 = vmatprep.subr.bf16.mxu1 %v17602_v31  ;;  %v10077_v4 = vrot.slane %v10055_v46, %v18393_v14  ;;  %v10122_v15 = vcombine.high %v18454_v59, %v18453_v34  ;;  %v18455_v31 = vld [vmem:[#allocation35_spill] sm:$0xff] }
 0x47a   : > { %12669 = vmatmul.mubr.bf16.gmra.mxu1 %v17346_v54  ;;  %v10056_v54 = vcombine.high %v18446_v22, %v18445_v55  ;;  %v10085_v41 = vcombine.low %v10063_v30, %v10077_v4  ;;  %v10138_v38 = vrot.slane %v10122_v15, %v18393_v14 }
 0x47b   : > { %12730 = vmatpush3.bf16.msra.mxu1 %v13012_v1  ;;  %12672 = vmatprep.mubr.msk.bf16.mxu1 %vm13068_vm5, %v18359_v18  ;;  %v18456_v1 = vld [vmem:[#allocation30_spill] sm:$0xff] }
 0x47c   : > { %12723 = vmatprep.subr.bf16.mxu1 %v13014_v61  ;;  %v10124_v48 = vcombine.high %v18456_v1, %v18455_v31  ;;  %v10123_v39 = vcombine.low %v18456_v1, %v18455_v31 }
 0x47d   : > { %10310 = vmatmul.mubr.bf16.vlgmr.msra.gmra.mxu0 %v10051_v32 }
 0x47e   : > { %v10145_v63 = vrot.slane %v10123_v39, %v18393_v14 }
 0x47f   : > { %12731 = vmatpush3.bf16.msra.mxu1 %v13015_v27 }
 0x480   : > { %12724 = vmatprep.subr.bf16.mxu1 %v13017_v12 }
 0x482   : > { %12673 = vmatmul.mubr.bf16.gmra.mxu1 %v17365_v28  ;;  %v10084_v28 = vrot.slane %v10056_v54, %v18393_v14  ;;  %v10170_v54 = vrot.slane %v10156_v26, %v18393_v14 }
 0x483   : > { %12732 = vmatpush3.bf16.msra.mxu1 %v13018_v40  ;;  %12676 = vmatprep.mubr.msk.bf16.mxu1 %vm13068_vm5, %v18359_v18 }
 0x484   : > { %12725 = vmatprep.subr.bf16.mxu1 %v13019_v17  ;;  %v10086_v10 = vcombine.low %v10070_v35, %v10084_v28  ;;  %v10152_v17 = vrot.slane %v10124_v48, %v18393_v14  ;;  %v10155_v28 = vcombine.low %v18458_v47, %v18457_v29 }
 0x486   : > { %v10154_v56 = vcombine.low %v10138_v38, %v10152_v17 }
 0x487   : > { %12733 = vmatpush3.bf16.msra.mxu1 %v13020_v20 }
 0x488   : > { %12726 = vmatprep.subr.bf16.mxu1 %v13021_v8 }
 0x48a   : > { %12677 = vmatmul.mubr.bf16.gmra.mxu1 %v17376_v57  ;;  %v18449_v57 = vld [vmem:[#allocation31_spill] sm:$0xff] }
 0x48b   : > { %12734 = vmatpush3.bf16.msra.mxu1 %v13022_v0  ;;  %12680 = vmatprep.mubr.msk.bf16.mxu1 %vm13068_vm5, %v18359_v18  ;;  %v10088_v44 = vcombine.high %v18450_v11, %v18449_v57  ;;  %v18452_v18 = vld [vmem:[#allocation24_spill] sm:$0xff]  ;;  %v10087_v58 = vcombine.low %v18450_v11, %v18449_v57  ;;  %v10163_v11 = vrot.slane %v10155_v28, %v18393_v14 }
 0x48c   : > { %12727 = vmatprep.subr.bf16.mxu1 %v13023_v13  ;;  %v10090_v43 = vcombine.high %v18452_v18, %v18451_v37  ;;  %v10121_v13 = vcombine.low %v18454_v59, %v18453_v34 }
 0x48d   : > { %v10104_v51 = vrot.slane %v10088_v44, %v18393_v14  ;;  %v10097_v27 = vrot.slane %v10087_v58, %v18393_v14 }
 0x48e   : > { %v10118_v2 = vrot.slane %v10090_v43, %v18393_v14 }
 0x48f   : > { %12735 = vmatpush3.bf16.msra.mxu1 %v13024_v50  ;;  %v17705_v60 = vpop.f32.mrf.mxu1  ;;  %v10131_v50 = vrot.slane %v10121_v13, %v18393_v14 }
 0x490   : > { %v10120_v16 = vcombine.low %v10104_v51, %v10118_v2 }
 0x491   : > { %v12414_v36 = vpop.f32.mrf.mxu1  ;;  %v10153_v55 = vcombine.low %v10131_v50, %v10145_v63 }
 0x492   : > { %12681 = vmatmul.mubr.bf16.gmra.mxu1 %v17368_v19  ;;  %v10089_v19 = vcombine.low %v18452_v18, %v18451_v37 }
 0x493   : > { %10317 = vmatprep.mubr.bf16.mxu1 %v10086_v10  ;;  %v17716_v33 = vpop.f32.mrf.mxu1 }
 0x494   : > { %v10111_v7 = vrot.slane %v10089_v19, %v18393_v14 }
 0x495   : > { %v12415_v45 = vpop.f32.mrf.mxu1 }
 0x496   : > { %v10119_v0 = vcombine.low %v10097_v27, %v10111_v7  ;;  %v8622_v45 = vadd.f32 %v11473_v53, %v17705_v60 }
 0x498   : > { %v17726_v5 = vpop.f32.mrf.mxu1 }
 0x49a   : > { %10318 = vmatmul.mubr.bf16.vlgmr.msra.gmra.mxu1 %v10085_v41  ;;  %v12418_v61 = vpop.f32.mrf.mxu1 }
 0x49b   : > { %10325 = vmatprep.mubr.bf16.mxu1 %v10120_v16  ;;  %v8623_v16 = vadd.f32 %v11473_v53, %v17716_v33  ;;  %v8624_v61 = vadd.f32 %v11473_v53, %v17726_v5 }
 0x49c   : > { %v8935_v12 = vpop.f32.mrf.mxu0  ;;  %v17734_v40 = vpop.f32.mrf.mxu1 }
 0x49e   : > { %v12486_v20 = vpop.f32.mrf.mxu0  ;;  %v12419_v8 = vpop.f32.mrf.mxu1 }
 0x49f   : > { %v8625_v8 = vadd.f32 %v11473_v53, %v17734_v40 }
 0x4a0   : > { %v8938_v25 = vpop.f32.mrf.mxu0  ;;  %v17742_v3 = vpop.f32.mrf.mxu1 }
 0x4a2   : > { %10326 = vmatmul.mubr.bf16.gmra.mxu1 %v10119_v0  ;;  %v12487_v62 = vpop.f32.mrf.mxu0  ;;  %v12422_v21 = vpop.f32.mrf.mxu1 }
 0x4a3   : > { %10333 = vmatprep.mubr.bf16.mxu1 %v10154_v56  ;;  %v8626_v62 = vadd.f32 %v11473_v53, %v17742_v3 }
 0x4a4   : > { %v8943_v52 = vpop.f32.mrf.mxu0  ;;  %v8603_v42 = vpop.f32.mrf.mxu1 }
 0x4a5   : > { %v8627_v47 = vadd.f32 %v11473_v53, %v8603_v42 }
 0x4a6   : > { %v12490_v6 = vpop.f32.mrf.mxu0  ;;  %v12423_v32 = vpop.f32.mrf.mxu1 }
 0x4a8   : > { %v8946_v22 = vpop.f32.mrf.mxu0 }
 0x4aa   : > { %v8608_v24 = vpop.f32.mrf.mxu1  ;;  %10334 = vmatmul.mubr.bf16.gmra.mxu1 %v10153_v55  ;;  %v12491_v49 = vpop.f32.mrf.mxu0 }
 0x4ab   : > { %10341 = vmatprep.mubr.bf16.mxu1 %v10170_v54 }
 0x4ac   : > { %v12426_v9 = vpop.f32.mrf.mxu1 }
 0x4ad   : > { %v8951_v35 = vpop.f32.mrf.mxu0 }
 0x4ae   : > { %v8611_v46 = vpop.f32.mrf.mxu1 }
 0x4af   : > { %v12494_v10 = vpop.f32.mrf.mxu0 }
 0x4b0   : > { %v12427_v57 = vpop.f32.mrf.mxu1 }
 0x4b1   : > { %v8954_v44 = vpop.f32.mrf.mxu0 }
 0x4b2   : > { %v17752_v37 = vpop.f32.mrf.mxu1  ;;  %10342 = vmatmul.mubr.bf16.gmra.mxu1 %v10163_v11  ;;  %v8629_v11 = vadd.f32 %v11473_v53, %v8611_v46 }
 0x4b3   : > { %v12495_v18 = vpop.f32.mrf.mxu0 }
 0x4b4   : > { %v12430_v43 = vpop.f32.mrf.mxu1 }
 0x4b5   : > { %v8959_v36 = vpop.f32.mrf.mxu0 }
 0x4b6   : > { %v8619_v4 = vpop.f32.mrf.mxu1 }
 0x4b7   : > { %v12498_v51 = vpop.f32.mrf.mxu0 }
 0x4b8   : > { %v12431_v2 = vpop.f32.mrf.mxu1 }
 0x4b9   : > { %v8962_v30 = vpop.f32.mrf.mxu0 }
 0x4ba   : > { %v8774_v41 = vpop.f32.mrf.mxu1 }
 0x4bb   : > { %v8812_v58 = vadd.f32 %v8774_v41, %v8622_v45  ;;  %v12499_v14 = vpop.f32.mrf.mxu0 }
 0x4bc   : > { %v12450_v19 = vpop.f32.mrf.mxu1 }
 0x4bd   : > { %v8967_v34 = vpop.f32.mrf.mxu0  ;;  %v8973_v59 = vadd.f32 %v8935_v12, %v8812_v58 }
 0x4be   : > { %v8777_v15 = vpop.f32.mrf.mxu1 }
 0x4bf   : > { %v8813_v31 = vadd.f32 %v8777_v15, %v8623_v16  ;;  %v12502_v1 = vpop.f32.mrf.mxu0 }
 0x4c0   : > { %v12451_v48 = vpop.f32.mrf.mxu1 }
 0x4c1   : > { %v8970_v27 = vpop.f32.mrf.mxu0  ;;  %v8974_v7 = vadd.f32 %v8938_v25, %v8813_v31 }
 0x4c2   : > { %v8782_v38 = vpop.f32.mrf.mxu1 }
 0x4c3   : > { %v8814_v17 = vadd.f32 %v8782_v38, %v8624_v61  ;;  %v12503_v60 = vpop.f32.mrf.mxu0 }
 0x4c4   : > { %v12454_v20 = vpop.f32.mrf.mxu1 }
 0x4c5   : > { %v9260_v0 = vpop.f32.mrf.mxu0  ;;  %v8975_v13 = vadd.f32 %v8943_v52, %v8814_v17  ;;  %v8628_v52 = vadd.f32 %v11473_v53, %v8608_v24 }
 0x4c6   : > { %v8785_v39 = vpop.f32.mrf.mxu1 }
 0x4c7   : > { %v8815_v33 = vadd.f32 %v8785_v39, %v8625_v8  ;;  %v12558_v56 = vpop.f32.mrf.mxu0 }
 0x4c8   : > { %v12455_v12 = vpop.f32.mrf.mxu1 }
 0x4c9   : > { %v9263_v21 = vpop.f32.mrf.mxu0  ;;  %v8976_v50 = vadd.f32 %v8946_v22, %v8815_v33 }
 0x4ca   : > { %v8790_v63 = vpop.f32.mrf.mxu1 }
 0x4cb   : > { %v8816_v5 = vadd.f32 %v8790_v63, %v8626_v62  ;;  %v12559_v29 = vpop.f32.mrf.mxu0 }
 0x4cc   : > { %v12458_v25 = vpop.f32.mrf.mxu1 }
 0x4cd   : > { %v9268_v26 = vpop.f32.mrf.mxu0  ;;  %v8977_v6 = vadd.f32 %v8951_v35, %v8816_v5  ;;  %v8630_v35 = vadd.f32 %v11473_v53, %v17752_v37 }
 0x4ce   : > { %v8793_v32 = vpop.f32.mrf.mxu1 }
 0x4cf   : > { %v8817_v55 = vadd.f32 %v8793_v32, %v8627_v47  ;;  %v12562_v40 = vpop.f32.mrf.mxu0 }
 0x4d0   : > { %v12459_v54 = vpop.f32.mrf.mxu1 }
 0x4d1   : > { %v9271_v49 = vpop.f32.mrf.mxu0  ;;  %v8978_v9 = vadd.f32 %v8954_v44, %v8817_v55 }
 0x4d2   : > { %v8798_v28 = vpop.f32.mrf.mxu1 }
 0x4d3   : > { %v8818_v10 = vadd.f32 %v8798_v28, %v8628_v52  ;;  %v12563_v57 = vpop.f32.mrf.mxu0 }
 0x4d4   : > { %v12462_v3 = vpop.f32.mrf.mxu1 }
 0x4d5   : > { %v9276_v22 = vpop.f32.mrf.mxu0  ;;  %v8979_v18 = vadd.f32 %v8959_v36, %v8818_v10 }
 0x4d6   : > { %v8801_v43 = vpop.f32.mrf.mxu1 }
 0x4d7   : > { %v8819_v4 = vadd.f32 %v8801_v43, %v8629_v11  ;;  %v12566_v51 = vpop.f32.mrf.mxu0 }
 0x4d8   : > { %v12463_v42 = vpop.f32.mrf.mxu1 }
 0x4d9   : > { %v9279_v2 = vpop.f32.mrf.mxu0  ;;  %v8980_v45 = vadd.f32 %v8962_v30, %v8819_v4 }
 0x4da   : > { %v8806_v41 = vpop.f32.mrf.mxu1 }
 0x4db   : > { %v8820_v58 = vadd.f32 %v8806_v41, %v8630_v35  ;;  %v12567_v24 = vpop.f32.mrf.mxu0 }
 0x4dc   : > { %v12466_v14 = vpop.f32.mrf.mxu1 }
 0x4dd   : > { %v9284_v44 = vpop.f32.mrf.mxu0  ;;  %v8981_v19 = vadd.f32 %v8967_v34, %v8820_v58 }
 0x4de   : > { %v8809_v16 = vpop.f32.mrf.mxu1 }
 0x4df   : > { %v12570_v15 = vpop.f32.mrf.mxu0 }
 0x4e0   : > { %v12467_v31 = vpop.f32.mrf.mxu1 }
 0x4e1   : > { %v9287_v46 = vpop.f32.mrf.mxu0 }
 0x4e2   : > { %v9085_v1 = vpop.f32.mrf.mxu1 }
 0x4e3   : > { %v9123_v36 = vadd.f32 %v9085_v1, %v8973_v59  ;;  %v12571_v48 = vpop.f32.mrf.mxu0 }
 0x4e4   : > { %v12522_v61 = vpop.f32.mrf.mxu1 }
 0x4e5   : > { %v9292_v27 = vpop.f32.mrf.mxu0  ;;  %v9298_v38 = vadd.f32 %v9260_v0, %v9123_v36 }
 0x4e6   : > { %v9088_v17 = vpop.f32.mrf.mxu1 }
 0x4e7   : > { %v9124_v37 = vadd.f32 %v9088_v17, %v8974_v7  ;;  %v12574_v53 = vpop.f32.mrf.mxu0 }
 0x4e8   : > { %v12523_v30 = vpop.f32.mrf.mxu1 }
 0x4e9   : > { %v9295_v60 = vpop.f32.mrf.mxu0  ;;  %v9299_v20 = vadd.f32 %v9263_v21, %v9124_v37 }
 0x4ea   : > { %v9093_v8 = vpop.f32.mrf.mxu1 }
 0x4eb   : > { %v9125_v39 = vadd.f32 %v9093_v8, %v8975_v13  ;;  %v12575_v33 = vpop.f32.mrf.mxu0 }
 0x4ec   : > { %v12526_v34 = vpop.f32.mrf.mxu1 }
 0x4ed   : > { %v9571_v56 = vpop.f32.mrf.mxu0  ;;  %v9300_v12 = vadd.f32 %v9268_v26, %v9125_v39 }
 0x4ee   : > { %v9096_v62 = vpop.f32.mrf.mxu1 }
 0x4ef   : > { %v9126_v63 = vadd.f32 %v9096_v62, %v8976_v50  ;;  %v12630_v5 = vpop.f32.mrf.mxu0 }
 0x4f0   : > { %v12527_v59 = vpop.f32.mrf.mxu1 }
 0x4f1   : > { %v9574_v29 = vpop.f32.mrf.mxu0  ;;  %v9301_v25 = vadd.f32 %v9271_v49, %v9126_v63 }
 0x4f2   : > { %v9101_v47 = vpop.f32.mrf.mxu1 }
 0x4f3   : > { %v9127_v0 = vadd.f32 %v9101_v47, %v8977_v6  ;;  %v12631_v32 = vpop.f32.mrf.mxu0 }
 0x4f4   : > { %v12530_v7 = vpop.f32.mrf.mxu1 }
 0x4f5   : > { %v9579_v55 = vpop.f32.mrf.mxu0  ;;  %v9302_v40 = vadd.f32 %v9276_v22, %v9127_v0 }
 0x4f6   : > { %v9104_v54 = vpop.f32.mrf.mxu1 }
 0x4f7   : > { %v9128_v21 = vadd.f32 %v9104_v54, %v8978_v9  ;;  %v12634_v52 = vpop.f32.mrf.mxu0 }
 0x4f8   : > { %v12531_v13 = vpop.f32.mrf.mxu1 }
 0x4f9   : > { %v9582_v28 = vpop.f32.mrf.mxu0  ;;  %v9303_v10 = vadd.f32 %v9279_v2, %v9128_v21 }
 0x4fa   : > { %v9109_v57 = vpop.f32.mrf.mxu1 }
 0x4fb   : > { %v9129_v26 = vadd.f32 %v9109_v57, %v8979_v18  ;;  %v12635_v3 = vpop.f32.mrf.mxu0 }
 0x4fc   : > { %v12534_v50 = vpop.f32.mrf.mxu1 }
 0x4fd   : > { %v9587_v11 = vpop.f32.mrf.mxu0  ;;  %v9304_v43 = vadd.f32 %v9284_v44, %v9129_v26 }
 0x4fe   : > { %v9112_v4 = vpop.f32.mrf.mxu1 }
 0x4ff   : > { %v9130_v49 = vadd.f32 %v9112_v4, %v8980_v45  ;;  %v12638_v51 = vpop.f32.mrf.mxu0 }
 0x500   : > { %v12535_v6 = vpop.f32.mrf.mxu1 }
 0x501   : > { %v9590_v42 = vpop.f32.mrf.mxu0  ;;  %v9305_v35 = vadd.f32 %v9287_v46, %v9130_v49 }
 0x502   : > { %v9117_v41 = vpop.f32.mrf.mxu1 }
 0x503   : > { %v9131_v22 = vadd.f32 %v9117_v41, %v8981_v19  ;;  %v12639_v58 = vpop.f32.mrf.mxu0 }
 0x504   : > { %v12538_v9 = vpop.f32.mrf.mxu1 }
 0x505   : > { %v9595_v24 = vpop.f32.mrf.mxu0  ;;  %v9306_v14 = vadd.f32 %v9292_v27, %v9131_v22 }
 0x506   : > { %v9120_v16 = vpop.f32.mrf.mxu1 }
 0x507   : > { %v12642_v2 = vpop.f32.mrf.mxu0 }
 0x508   : > { %v12539_v15 = vpop.f32.mrf.mxu1 }
 0x509   : > { %v9598_v18 = vpop.f32.mrf.mxu0 }
 0x50a   : > { %v9420_v31 = vpop.f32.mrf.mxu1 }
 0x50b   : > { %v9458_v1 = vadd.f32 %v9420_v31, %v9298_v38  ;;  %v12643_v36 = vpop.f32.mrf.mxu0 }
 0x50c   : > { %v12594_v44 = vpop.f32.mrf.mxu1 }
 0x50d   : > { %v9603_v48 = vpop.f32.mrf.mxu0  ;;  %v9609_v45 = vadd.f32 %v9571_v56, %v9458_v1 }
 0x50e   : > { %v9423_v61 = vpop.f32.mrf.mxu1 }
 0x50f   : > { %v9459_v17 = vadd.f32 %v9423_v61, %v9299_v20  ;;  %v12646_v37 = vpop.f32.mrf.mxu0 }
 0x510   : > { %v12595_v46 = vpop.f32.mrf.mxu1 }
 0x511   : > { %v9606_v53 = vpop.f32.mrf.mxu0  ;;  %v9610_v19 = vadd.f32 %v9574_v29, %v9459_v17 }
 0x512   : > { %v9428_v30 = vpop.f32.mrf.mxu1 }
 0x513   : > { %v9460_v60 = vadd.f32 %v9428_v30, %v9300_v12  ;;  %v12647_v8 = vpop.f32.mrf.mxu0 }
 0x514   : > { %v12598_v27 = vpop.f32.mrf.mxu1 }
 0x515   : > { %v9906_v39 = vpop.f32.mrf.mxu0  ;;  %v17763_v33 = vadd.f32 %v9579_v55, %v9460_v60  ;;  %v17794_v27 = vld [vmem:[%s17903_s13] ss:$0 sm:$0xff] }
 0x516   : > { %v9431_v34 = vpop.f32.mrf.mxu1 }
 0x517   : > { %v9461_v62 = vadd.f32 %v9431_v34, %v9301_v25  ;;  %v12702_v38 = vpop.f32.mrf.mxu0 }
 0x518   : > { %v12599_v63 = vpop.f32.mrf.mxu1 }
 0x519   : > { %v9909_v5 = vpop.f32.mrf.mxu0  ;;  %v17765_v59 = vadd.f32 %v9582_v28, %v9461_v62 }
 0x51a   : > { %v9436_v56 = vpop.f32.mrf.mxu1 }
 0x51b   : > { %v9462_v20 = vadd.f32 %v9436_v56, %v9302_v40  ;;  %v12703_v47 = vpop.f32.mrf.mxu0 }
 0x51c   : > { %v12602_v0 = vpop.f32.mrf.mxu1 }
 0x51d   : > { %v17767_v32 = vpop.f32.mrf.mxu0  ;;  %v17769_v29 = vadd.f32 %v9587_v11, %v9462_v20 }
 0x51e   : > { %v9439_v12 = vpop.f32.mrf.mxu1 }
 0x51f   : > { %v9463_v7 = vadd.f32 %v9439_v12, %v9303_v10  ;;  %v12706_v54 = vpop.f32.mrf.mxu0 }
 0x520   : > { %v12603_v55 = vpop.f32.mrf.mxu1 }
 0x521   : > { %v17771_v21 = vpop.f32.mrf.mxu0  ;;  %v17773_v25 = vadd.f32 %v9590_v42, %v9463_v7 }
 0x522   : > { %v9444_v52 = vpop.f32.mrf.mxu1 }
 0x523   : > { %v9464_v13 = vadd.f32 %v9444_v52, %v9304_v43  ;;  %v12707_v28 = vpop.f32.mrf.mxu0 }
 0x524   : > { %v12606_v57 = vpop.f32.mrf.mxu1 }
 0x525   : > { %v17775_v26 = vpop.f32.mrf.mxu0  ;;  %v17777_v40 = vadd.f32 %v9595_v24, %v9464_v13 }
 0x526   : > { %v9447_v3 = vpop.f32.mrf.mxu1 }
 0x527   : > { %v9465_v50 = vadd.f32 %v9447_v3, %v9305_v35  ;;  %v12710_v11 = vpop.f32.mrf.mxu0 }
 0x528   : > { %v12607_v4 = vpop.f32.mrf.mxu1 }
 0x529   : > { %v17779_v49 = vpop.f32.mrf.mxu0  ;;  %v17781_v10 = vadd.f32 %v9598_v18, %v9465_v50 }
 0x52a   : > { %v9452_v51 = vpop.f32.mrf.mxu1 }
 0x52b   : > { %v9466_v6 = vadd.f32 %v9452_v51, %v9306_v14  ;;  %v12711_v42 = vpop.f32.mrf.mxu0 }
 0x52c   : > { %v12610_v41 = vpop.f32.mrf.mxu1 }
 0x52d   : > { %v17783_v22 = vpop.f32.mrf.mxu0  ;;  %v17785_v43 = vadd.f32 %v9603_v48, %v9466_v6 }
 0x52e   : > { %v9455_v58 = vpop.f32.mrf.mxu1 }
 0x52f   : > { %v12714_v9 = vpop.f32.mrf.mxu0 }
 0x530   : > { %v12611_v24 = vpop.f32.mrf.mxu1 }
 0x531   : > { %v17787_v16 = vpop.f32.mrf.mxu0 }
 0x532   : > { %v9746_v35 = vpop.f32.mrf.mxu1 }
 0x533   : > { %v12715_v2 = vpop.f32.mrf.mxu0  ;;  %v9784_v1 = vadd.f32 %v9746_v35, %v9609_v45 }
 0x534   : > { %v12666_v15 = vpop.f32.mrf.mxu1 }
 0x535   : > { %v17789_v31 = vpop.f32.mrf.mxu0  ;;  %v9944_v17 = vadd.f32 %v9906_v39, %v9784_v1 }
 0x536   : > { %v9749_v18 = vpop.f32.mrf.mxu1 }
 0x537   : > { %v12718_v36 = vpop.f32.mrf.mxu0  ;;  %v9785_v37 = vadd.f32 %v9749_v18, %v9610_v19  ;;  %v9962_v60 = vmul.f32 0.2, %v9944_v17  ;;  %vm9953_vm5 = vcmp.ge.f32.partialorder %v9944_v17, 0.0 }
 0x538   : > { %v12667_v14 = vpop.f32.mrf.mxu1 }
 0x539   : > { %v9941_v44 = vpop.f32.mrf.mxu0  ;;  %v9945_v8 = vadd.f32 %v9909_v5, %v9785_v37  ;;  %v9971_v56 = vsel %vm9953_vm5, %v9944_v17, %v9962_v60 }
 0x53a   : > { %v9754_v61 = vpop.f32.mrf.mxu1 }
 0x53b   : > { %v12719_v48 = vpop.f32.mrf.mxu0  ;;  %v9963_v19 = vmul.f32 0.2, %v9945_v8  ;;  %vm9954_vm0 = vcmp.ge.f32.partialorder %v9945_v8, 0.0 }
 0x53c   : > { %v12670_v46 = vpop.f32.mrf.mxu1  ;;  %v9786_v48 = vadd.f32 %v9754_v61, %v17763_v33 }
 0x53d   : > { %v12366_v53 = vpop.f32.mrf.mxu0  ;;  %v9972_v52 = vsel %vm9954_vm0, %v9945_v8, %v9963_v19 }
 0x53e   : > { %v9757_v30 = vpop.f32.mrf.mxu1  ;;  %v9946_v8 = vadd.f32 %v17767_v32, %v9786_v48 }
 0x53f   : > { %v12367_v34 = vpop.f32.mrf.mxu0 }
 0x540   : > { %v12368_v45 = vadd.f32 %v12367_v34, %v12366_v53  ;;  %v12671_v62 = vpop.f32.mrf.mxu1  ;;  %v9787_v34 = vadd.f32 %v9757_v30, %v17765_v59  ;;  %vm9955_vm10 = vcmp.ge.f32.partialorder %v9946_v8, 0.0 }
 0x541   : > { %v12369_v38 = vpop.f32.mrf.mxu0 }
 0x542   : > { %v10312_v63 = vadd.f32 %v12368_v45, %v17794_v27  ;;  %v9762_v39 = vpop.f32.mrf.mxu1  ;;  %v9947_v19 = vadd.f32 %v17771_v21, %v9787_v34 }
 0x543   : > { %v12370_v20 = vpop.f32.mrf.mxu0  ;;  %v9788_v62 = vadd.f32 %v9762_v39, %v17769_v29 }
 0x544   : > { %v10349_v47 = vadd.f32 %v10312_v63, %v9971_v56  ;;  %v12371_v0 = vadd.f32 %v12370_v20, %v12369_v38  ;;  %v12674_v5 = vpop.f32.mrf.mxu1  ;;  %v9964_v63 = vmul.f32 0.2, %v9946_v8  ;;  %vm9956_vm14 = vcmp.ge.f32.partialorder %v9947_v19, 0.0 }
 0x545   : > { %v9948_v33 = vadd.f32 %v17775_v26, %v9788_v62 }
 0x546   : > { %v10367_v12 = vcombine.high %v10349_v47, %v10349_v47  ;;  %v10374_v7 = vrot.slane %v10349_v47, %v18388_v23  ;;  %v10315_v54 = vadd.f32 %v12371_v0, %v17794_v27  ;;  %v9765_v55 = vpop.f32.mrf.mxu1  ;;  %v9965_v0 = vmul.f32 0.2, %v9947_v19 }
 0x547   : > { %v9789_v32 = vadd.f32 %v9765_v55, %v17773_v25  ;;  %v9973_v30 = vsel %vm9955_vm10, %v9946_v8, %v9964_v63  ;;  %v9966_v21 = vmul.f32 0.2, %v9948_v33  ;;  %vm9957_vm11 = vcmp.ge.f32.partialorder %v9948_v33, 0.0 }
 0x548   : > { %v10381_v13 = vrot.slane %v10367_v12, %v18388_v23  ;;  %v10382_v28 = vcombine.high %v10374_v7, %v10374_v7  ;;  %v10350_v57 = vadd.f32 %v10315_v54, %v9972_v52  ;;  %v12675_v3 = vpop.f32.mrf.mxu1  ;;  %v9974_v55 = vsel %vm9956_vm14, %v9947_v19, %v9965_v0 }
 0x549   : > { %v9949_v52 = vadd.f32 %v17779_v49, %v9789_v32 }
 0x54a   : > { %v10383_v50 = vcombine.high %v10381_v13, %v10381_v13  ;;  %v10520_v11 = vcombine.low %v10374_v7, %v10382_v28  ;;  %v10384_v4 = vcombine.high %v10350_v57, %v10350_v57  ;;  %v10391_v51 = vrot.slane %v10350_v57, %v18388_v23  ;;  %v9770_v6 = vpop.f32.mrf.mxu1 }
 0x54b   : > { %v9790_v59 = vadd.f32 %v9770_v6, %v17777_v40  ;;  %vm9958_vm12 = vcmp.ge.f32.partialorder %v9949_v52, 0.0  ;;  %v9967_v49 = vmul.f32 0.2, %v9949_v52 }
 0x54c   : > { %v10521_v42 = vcombine.low %v10381_v13, %v10383_v50  ;;  %v10398_v41 = vrot.slane %v10384_v4, %v18388_v23  ;;  %v10399_v58 = vcombine.high %v10391_v51, %v10391_v51  ;;  %v12678_v9 = vpop.f32.mrf.mxu1  ;;  %v10528_v24 = vrot.slane %v10520_v11, %v18388_v23 }
 0x54d   : > { %v9950_v25 = vadd.f32 %v17783_v22, %v9790_v59  ;;  %v9975_v11 = vsel %vm9957_vm11, %v9948_v33, %v9966_v21 }
 0x54e   : > { %v10535_v35 = vrot.slane %v10521_v42, %v18388_v23  ;;  %v10400_v2 = vcombine.high %v10398_v41, %v10398_v41  ;;  %v10537_v15 = vcombine.low %v10391_v51, %v10399_v58  ;;  %v9773_v18 = vpop.f32.mrf.mxu1 }
 0x54f   : > { %v9791_v40 = vadd.f32 %v9773_v18, %v17781_v10  ;;  %v9968_v22 = vmul.f32 0.2, %v9950_v25  ;;  %vm9959_vm13 = vcmp.ge.f32.partialorder %v9950_v25, 0.0 }
 0x550   : > { %v10536_v1 = vcombine.low %v10528_v24, %v10535_v35  ;;  %v10538_v36 = vcombine.low %v10398_v41, %v10400_v2  ;;  %v12679_v14 = vpop.f32.mrf.mxu1  ;;  %v10545_v44 = vrot.slane %v10537_v15, %v18388_v23 }
 0x551   : > { %v9951_v9 = vadd.f32 %v17787_v16, %v9791_v40  ;;  %v9976_v16 = vsel %vm9958_vm12, %v9949_v52, %v9967_v49 }
 0x552   : > { %10696 = vst [vmem:[%s17808_s19 - $0x1] sm:$0xfe] %v10536_v1  ;;  %v10552_v17 = vrot.slane %v10538_v36, %v18388_v23  ;;  %v9778_v37 = vpop.f32.mrf.mxu1 }
 0x553   : > { %v9792_v15 = vadd.f32 %v9778_v37, %v17785_v43  ;;  %vm9960_vm3 = vcmp.ge.f32.partialorder %v9951_v9, 0.0  ;;  %v9977_v37 = vsel %vm9959_vm13, %v9950_v25, %v9968_v22 }
 0x554   : > { %v10553_v46 = vcombine.low %v10545_v44, %v10552_v17  ;;  %v12682_v53 = vpop.f32.mrf.mxu1 }
 0x556   : > { %10697 = vst [vmem:[%s17808_s19 + $0x7] sm:$0xff] %v10553_v46  ;;  %v9781_v60 = vpop.f32.mrf.mxu1 }
 0x558   : > { %v12683_v45 = vpop.f32.mrf.mxu1 }
 0x55a   : > { %v12372_v38 = vpop.f32.mrf.mxu1 }
 0x55c   : > { %v12373_v56 = vpop.f32.mrf.mxu1 }
 0x55d   : > { %v12374_v20 = vadd.f32 %v12373_v56, %v12372_v38  ;;  %v9969_v56 = vmul.f32 0.2, %v9951_v9 }
 0x55e   : > { %v12375_v61 = vpop.f32.mrf.mxu1 }
 0x55f   : > { %v10320_v47 = vadd.f32 %v12374_v20, %v17794_v27  ;;  %v9952_v20 = vadd.f32 %v17789_v31, %v9792_v15  ;;  %v9978_v52 = vsel %vm9960_vm3, %v9951_v9, %v9969_v56 }
 0x560   : > { %v12376_v5 = vpop.f32.mrf.mxu1 }
 0x561   : > { %v10351_v29 = vadd.f32 %v10320_v47, %v9973_v30  ;;  %v12377_v39 = vadd.f32 %v12376_v5, %v12375_v61  ;;  %vm9961_vm9 = vcmp.ge.f32.partialorder %v9952_v20, 0.0  ;;  %v9970_v40 = vmul.f32 0.2, %v9952_v20 }
 0x562   : > { %v12378_v12 = vpop.f32.mrf.mxu1 }
 0x563   : > { %v10401_v7 = vcombine.high %v10351_v29, %v10351_v29  ;;  %v10408_v26 = vrot.slane %v10351_v29, %v18388_v23  ;;  %v10323_v54 = vadd.f32 %v12377_v39, %v17794_v27 }
 0x564   : > { %v12379_v13 = vpop.f32.mrf.mxu1 }
 0x565   : > { %v10415_v28 = vrot.slane %v10401_v7, %v18388_v23  ;;  %v10416_v57 = vcombine.high %v10408_v26, %v10408_v26  ;;  %11691 = vst.sshfl [vmem:[%s17808_s19 + $0xf] sm:$0x1 pattern:$0x76325410] %v10408_v26  ;;  %v10352_v3 = vadd.f32 %v10323_v54, %v9974_v55  ;;  %v12380_v50 = vadd.f32 %v12379_v13, %v12378_v12 }
 0x566   : > { %v12381_v4 = vpop.f32.mrf.mxu1 }
 0x567   : > { %v10561_v51 = vcombine.low %v10416_v57, %v10415_v28  ;;  %v10417_v6 = vcombine.high %v10415_v28, %v10415_v28  ;;  %v10418_v42 = vcombine.high %v10352_v3, %v10352_v3  ;;  %v10425_v41 = vrot.slane %v10352_v3, %v18388_v23 }
 0x568   : > { %v10328_v10 = vadd.f32 %v12380_v50, %v17794_v27  ;;  %v12382_v58 = vpop.f32.mrf.mxu1 }
 0x569   : > { %v10432_v24 = vrot.slane %v10418_v42, %v18388_v23  ;;  %v10433_v35 = vcombine.high %v10425_v41, %v10425_v41  ;;  %v10562_v2 = vcombine.low %v10417_v6, %v10425_v41  ;;  %v12383_v1 = vadd.f32 %v12382_v58, %v12381_v4 }
 0x56a   : > { %v10353_v18 = vadd.f32 %v10328_v10, %v9975_v11  ;;  %v12384_v36 = vpop.f32.mrf.mxu1  ;;  %v10569_v14 = vrot.slane %v10561_v51, %v18388_v23 }
 0x56b   : > { %v10576_v44 = vrot.slane %v10562_v2, %v18388_v23  ;;  %v10578_v17 = vcombine.low %v10433_v35, %v10432_v24  ;;  %v10434_v48 = vcombine.high %v10432_v24, %v10432_v24  ;;  %v10331_v60 = vadd.f32 %v12383_v1, %v17794_v27 }
 0x56c   : > { %v10435_v46 = vcombine.high %v10353_v18, %v10353_v18  ;;  %v10442_v53 = vrot.slane %v10353_v18, %v18388_v23  ;;  %v12385_v8 = vpop.f32.mrf.mxu1  ;;  %v9979_v24 = vsel %vm9961_vm9, %v9952_v20, %v9970_v40 }
 0x56d   : > { %v10577_v43 = vcombine.low %v10569_v14, %v10576_v44  ;;  %v12386_v34 = vadd.f32 %v12385_v8, %v12384_v36  ;;  %v10354_v63 = vadd.f32 %v10331_v60, %v9976_v16  ;;  %v10586_v33 = vrot.slane %v10578_v17, %v18388_v23 }
 0x56e   : > { %v10449_v45 = vrot.slane %v10435_v46, %v18388_v23  ;;  %v10450_v62 = vcombine.high %v10442_v53, %v10442_v53  ;;  %v10579_v38 = vcombine.low %v10434_v48, %v10442_v53  ;;  %v12387_v19 = vpop.f32.mrf.mxu1 }
 0x56f   : > { %10699 = vst [vmem:[%s17808_s19 + $0xf] sm:$0xfe] %v10577_v43  ;;  %v10336_v61 = vadd.f32 %v12386_v34, %v17794_v27  ;;  %v10452_v32 = vcombine.high %v10354_v63, %v10354_v63  ;;  %v10459_v59 = vrot.slane %v10354_v63, %v18388_v23 }
 0x570   : > { %v10451_v47 = vcombine.high %v10449_v45, %v10449_v45  ;;  %v10593_v0 = vrot.slane %v10579_v38, %v18388_v23  ;;  %11692 = vst.sshfl [vmem:[%s17808_s19 + $0x1f] sm:$0x1 pattern:$0x76325410] %v10450_v62  ;;  %v12388_v30 = vpop.f32.mrf.mxu1 }
 0x571   : > { %v10355_v5 = vadd.f32 %v10336_v61, %v9977_v37  ;;  %v12389_v29 = vadd.f32 %v12388_v30, %v12387_v19  ;;  %v10466_v31 = vrot.slane %v10452_v32, %v18388_v23  ;;  %v10467_v12 = vcombine.high %v10459_v59, %v10459_v59 }
 0x572   : > { %v10594_v39 = vcombine.low %v10586_v33, %v10593_v0  ;;  %v10602_v21 = vcombine.low %v10449_v45, %v10451_v47  ;;  %v12390_v7 = vpop.f32.mrf.mxu1 }
 0x573   : > { %v10469_v26 = vcombine.high %v10355_v5, %v10355_v5  ;;  %v10476_v54 = vrot.slane %v10355_v5, %v18388_v23  ;;  %v10339_v25 = vadd.f32 %v12389_v29, %v17794_v27  ;;  %v10468_v55 = vcombine.high %v10466_v31, %v10466_v31 }
 0x574   : > { %10700 = vst [vmem:[%s17808_s19 + $0x17] sm:$0xff] %v10594_v39  ;;  %v10603_v13 = vcombine.low %v10459_v59, %v10467_v12  ;;  %v12391_v28 = vpop.f32.mrf.mxu1  ;;  %v10610_v4 = vrot.slane %v10602_v21, %v18388_v23 }
 0x575   : > { %v10483_v57 = vrot.slane %v10469_v26, %v18388_v23  ;;  %v10484_v3 = vcombine.high %v10476_v54, %v10476_v54  ;;  %v10356_v50 = vadd.f32 %v10339_v25, %v9978_v52  ;;  %v12392_v11 = vadd.f32 %v12391_v28, %v12390_v7 }
 0x576   : > { %v10617_v51 = vrot.slane %v10603_v13, %v18388_v23  ;;  %v10619_v6 = vcombine.low %v10466_v31, %v10468_v55  ;;  %v12393_v42 = vpop.f32.mrf.mxu1 }
 0x577   : > { %v10620_v41 = vcombine.low %v10476_v54, %v10484_v3  ;;  %11693 = vst.sshfl [vmem:[%s17808_s19 + $0x2f] sm:$0x1 pattern:$0x76325410] %v10483_v57  ;;  %v10485_v49 = vcombine.high %v10483_v57, %v10483_v57  ;;  %v10486_v22 = vcombine.high %v10356_v50, %v10356_v50  ;;  %v10493_v10 = vrot.slane %v10356_v50, %v18388_v23 }
 0x578   : > { %v10618_v58 = vcombine.low %v10610_v4, %v10617_v51  ;;  %v10627_v9 = vrot.slane %v10619_v6, %v18388_v23  ;;  %v10344_v35 = vadd.f32 %v12392_v11, %v17794_v27  ;;  %v12394_v2 = vpop.f32.mrf.mxu1 }
 0x579   : > { %v10634_v15 = vrot.slane %v10620_v41, %v18388_v23  ;;  %v10500_v18 = vrot.slane %v10486_v22, %v18388_v23  ;;  %v10501_v1 = vcombine.high %v10493_v10, %v10493_v10  ;;  %v10643_v36 = vcombine.low %v10485_v49, %v10493_v10 }
 0x57a   : > { %10702 = vst [vmem:[%s17808_s19 + $0x1f] sm:$0xfe] %v10618_v58  ;;  %v10357_v14 = vadd.f32 %v10344_v35, %v9979_v24 }
 0x57b   : > { %v10635_v44 = vcombine.low %v10627_v9, %v10634_v15  ;;  %v10644_v17 = vcombine.low %v10501_v1, %v10500_v18  ;;  %v10502_v48 = vcombine.high %v10500_v18, %v10500_v18  ;;  %v10651_v27 = vrot.slane %v10643_v36, %v18388_v23 }
 0x57c   : > { %v10503_v46 = vcombine.high %v10357_v14, %v10357_v14  ;;  %v10510_v53 = vrot.slane %v10357_v14, %v18388_v23 }
 0x57d   : > { %10703 = vst [vmem:[%s17808_s19 + $0x27] sm:$0xff] %v10635_v44  ;;  %v10658_v16 = vrot.slane %v10644_v17, %v18388_v23 }
 0x57e   : > { %v10517_v60 = vrot.slane %v10503_v46, %v18388_v23  ;;  %v10518_v8 = vcombine.high %v10510_v53, %v10510_v53  ;;  %v10660_v43 = vcombine.low %v10502_v48, %v10510_v53 }
 0x57f   : > { %v10659_v37 = vcombine.low %v10651_v27, %v10658_v16 }
 0x580   : > { %v10519_v34 = vcombine.high %v10517_v60, %v10517_v60  ;;  %v10661_v45 = vcombine.low %v10518_v8, %v10517_v60  ;;  %v10668_v62 = vrot.slane %v10660_v43, %v18388_v23 }
 0x581   : > { %10705 = vst [vmem:[%s17808_s19 + $0x2f] sm:$0xfe] %v10659_v37 }
 0x582   : > { %v10675_v38 = vrot.slane %v10661_v45, %v18388_v23  ;;  %11694 = vst.sshfl [vmem:[%s17808_s19 + $0x3f] sm:$0x1 pattern:$0x76325410] %v10519_v34 }
 0x584   : > { %v10676_v63 = vcombine.low %v10668_v62, %v10675_v38 }
 0x586   : > { %10706 = vst [vmem:[%s17808_s19 + $0x37] sm:$0xff] %v10676_v63 }
 0x587 PF: > { %s18460_s29 = sld [smem:[#allocation4_spill]] }
 0x588   : > { %s18462_s30 = sld [smem:[#allocation3_spill]] }
 0x589   : > { %s18463_s15 = sld [smem:[#allocation5_spill]] }
 0x58a   : > { %s18464_s16 = sld [smem:[#allocation6_spill]] }
 0x58d   : > { %s24_s17 = sadd.s32 1, %s18460_s29   ;;  %s18461_s29 = sld [smem:[#allocation2_spill]] }
 0x58e   : > { %p21_p13 = scmp.ge.s32.totalorder %s24_s17, 10  }
 0x590   :  { %23 = sbr.rel (!%p21_p13) target bundleno = 6 (0x6), region = 137 }

</bundles_post_ra>
